<compile_context>
chip_gen: v7x
topology: tpu7x:2x2x1
jax: 0.10.0
libtpu: 0.0.40
codegen_flags: <defaults>
</compile_context>

<pallas_src>
import functools

import jax
import jax.numpy as jnp
from jax.experimental import pallas as pl
from jax.experimental.pallas import tpu as pltpu

_EPS = 1e-5     # PyTorch BatchNorm2d default eps
_K = 3          # kernel_size (padding=1 => "same" conv for k=3, stride=1)
_LANES = 128    # TPU vreg lane width
_VMEM_BUDGET = 24 * 2**20   # stay well under v7x's 32 MiB scoped default


def _round_up(x, m):
    return (x + m - 1) // m * m


# ---------------------------------------------------------------------------
# in-kernel helpers
# ---------------------------------------------------------------------------
def _im2col_nhwc(a):
    """Batched 3x3 / stride-1 / pad-1 im2col.

    a : (N, H, W, C) bf16 activations (C is a multiple of 128, so every tap
        is lane-aligned in the concat).
    returns (N*H*W, 9*C) bf16 patch matrix.
    """
    N, H, W, C = a.shape
    # 1-pixel zero halo per image, built by concatenation (no padded scratch).
    zrow = jnp.zeros((N, 1, W, C), a.dtype)
    ah = jnp.concatenate([zrow, a, zrow], axis=1)              # (N, H+2, W,   C)
    zcol = jnp.zeros((N, H + 2, 1, C), a.dtype)
    ap = jnp.concatenate([zcol, ah, zcol], axis=2)             # (N, H+2, W+2, C)
    cols = [ap[:, kh:kh + H, kw:kw + W, :]
            for kh in range(_K) for kw in range(_K)]
    patches = jnp.concatenate(cols, axis=-1)                   # (N, H, W, 9C)
    return patches.reshape(N * H * W, _K * _K * C)


def _bn_scale_shift(y, gamma, beta, count):
    """Training-mode BN affine params from the full (M, C) activation.

    Single cross-sublane reduction pass over [y | y*y]; finalized ONCE.
    Returns (scale, shift) with  y_norm = y * scale + shift.
    """
    C = gamma.shape[-1]
    both = jnp.concatenate([y, y * y], axis=-1)                # (M, 2C)
    tot = jnp.sum(both, axis=0, keepdims=True)                 # (1, 2C)
    inv_m = 1.0 / count
    mean = tot[:, :C] * inv_m
    var = jnp.maximum(tot[:, C:] * inv_m - mean * mean, 0.0)   # clamp >= 0
    scale = gamma * jax.lax.rsqrt(var + _EPS)                  # EUP rsqrt
    shift = beta - mean * scale
    return scale, shift


# ---------------------------------------------------------------------------
# fused kernel: conv1 -> bn1 -> relu -> conv2 -> bn2 -> +identity -> relu
# ---------------------------------------------------------------------------
def _fused_block_kernel(x_ref, w1_ref, w2_ref, g1_ref, b1_ref, g2_ref, b2_ref,
                        out_ref, *, count):
    x = x_ref[...]                                             # (N,H,W,Cp) f32
    N, H, W, C = x.shape
    M = N * H * W

    # conv1: bf16 im2col + one MXU matmul (batch folded into M).
    p1 = _im2col_nhwc(x.astype(jnp.bfloat16))                  # (M, 9C) bf16
    y1 = jnp.dot(p1, w1_ref[...], preferred_element_type=jnp.float32)

    # bn1 (global batch stats) + relu, all f32 on the VPU.
    s1, t1 = _bn_scale_shift(y1, g1_ref[...], b1_ref[...], count)
    a = jnp.maximum(y1 * s1 + t1, 0.0)

    # conv2.
    p2 = _im2col_nhwc(a.astype(jnp.bfloat16).reshape(N, H, W, C))
    y2 = jnp.dot(p2, w2_ref[...], preferred_element_type=jnp.float32)

    # bn2 + identity shortcut + relu.
    s2, t2 = _bn_scale_shift(y2, g2_ref[...], b2_ref[...], count)
    out = jnp.maximum(y2 * s2 + t2 + x.reshape(M, C), 0.0)
    out_ref[...] = out.reshape(N, H, W, C)                     # lane-dense store


# ---------------------------------------------------------------------------
# wrapper-side packing helpers (run under jit, outside the kernel)
# ---------------------------------------------------------------------------
def _pad_flatten_weight(w, cin_p, cout_p):
    """HWIO (3,3,Cin,Cout) -> (9*Cin_p, Cout_p) bf16, zero-padded channels."""
    kh, kw, cin, cout = w.shape
    wp = jnp.pad(w, ((0, 0), (0, 0), (0, cin_p - cin), (0, cout_p - cout)))
    return wp.reshape(kh * kw * cin_p, cout_p).astype(jnp.bfloat16)


def _pad_vec(v, cp):
    return jnp.pad(v, (0, cp - v.shape[0])).reshape(1, cp).astype(jnp.float32)


# ---------------------------------------------------------------------------
# public API
# ---------------------------------------------------------------------------
def _basic_block_nhwc(x, params):
    w1, g1, b1, w2, g2, b2 = params
    N, H, W, Cin = x.shape
    Cout = w1.shape[-1]
    Cexp = w2.shape[-1]
    assert Cin == Cexp, (
        "downsample=None requires in_channels == out_channels*expansion")
    Cp = _round_up(max(Cin, Cout, Cexp), _LANES)
    M = N * H * W
    count = float(M)

    # Rough VMEM footprint: x/y1/y2/out f32 slabs + two bf16 patch matrices
    # + the two flattened weights.  The fused path assumes this fits VMEM.
    vmem_est = (4 * M * Cp * 4) + (2 * M * _K * _K * Cp * 2) \
        + (2 * _K * _K * Cp * Cp * 2)
    if vmem_est > _VMEM_BUDGET:
        # TODO(synk): implement the streaming (per-image grid, 3-phase) path.
        raise NotImplementedError(
            f"activation slab ~{vmem_est >> 20} MiB exceeds fused-kernel VMEM "
            "budget; streaming fallback not implemented")

    # Pad channels to the 128-lane width: lane-aligned im2col taps,
    # lane-dense stores, full MXU output columns.  Padded gamma/beta are
    # zero, so padded output channels are exactly 0 and get sliced off.
    xp = jnp.pad(x, ((0, 0), (0, 0), (0, 0), (0, Cp - Cin)))
    w1f = _pad_flatten_weight(w1, Cp, Cp)
    w2f = _pad_flatten_weight(w2, Cp, Cp)
    g1p, b1p = _pad_vec(g1, Cp), _pad_vec(b1, Cp)
    g2p, b2p = _pad_vec(g2, Cp), _pad_vec(b2, Cp)

    kern = functools.partial(_fused_block_kernel, count=count)
    outp = pl.pallas_call(
        kern,
        grid=(1,),
        in_specs=[
            pl.BlockSpec((N, H, W, Cp), lambda i: (0, 0, 0, 0)),
            pl.BlockSpec((_K * _K * Cp, Cp), lambda i: (0, 0)),
            pl.BlockSpec((_K * _K * Cp, Cp), lambda i: (0, 0)),
            pl.BlockSpec((1, Cp), lambda i: (0, 0)),
            pl.BlockSpec((1, Cp), lambda i: (0, 0)),
            pl.BlockSpec((1, Cp), lambda i: (0, 0)),
            pl.BlockSpec((1, Cp), lambda i: (0, 0)),
        ],
        out_specs=pl.BlockSpec((N, H, W, Cp), lambda i: (0, 0, 0, 0)),
        out_shape=jax.ShapeDtypeStruct((N, H, W, Cp), jnp.float32),
        compiler_params=pltpu.CompilerParams(
            dimension_semantics=("arbitrary",)),
    )(xp, w1f, w2f, g1p, b1p, g2p, b2p)
    return outp[..., :Cexp]


@jax.jit
def basic_block(x_nchw, params):
    """NCHW in / NCHW out wrapper matching the PyTorch module."""
    x = jnp.transpose(x_nchw, (0, 2, 3, 1)).astype(jnp.float32)   # NHWC
    out = _basic_block_nhwc(x, params)
    return jnp.transpose(out, (0, 3, 1, 2))                       # back to NCHW


def init_params(key, in_channels, out_channels, kernel_size=3, expansion=1):
    """Deterministic synthetic init (conv: scaled normal; BN: gamma=1, beta=0)."""
    k1, k2 = jax.random.split(key)
    cexp = out_channels * expansion
    fan1 = in_channels * kernel_size * kernel_size
    fan2 = out_channels * kernel_size * kernel_size
    w1 = jax.random.normal(k1, (kernel_size, kernel_size, in_channels, out_channels),
                           jnp.float32) * (2.0 / fan1) ** 0.5
    w2 = jax.random.normal(k2, (kernel_size, kernel_size, out_channels, cexp),
                           jnp.float32) * (2.0 / fan2) ** 0.5
    g1 = jnp.ones((out_channels,), jnp.float32)
    b1 = jnp.zeros((out_channels,), jnp.float32)
    g2 = jnp.ones((cexp,), jnp.float32)
    b2 = jnp.zeros((cexp,), jnp.float32)
    return (w1, g1, b1, w2, g2, b2)


def _reference(x_nchw, params):
    """Pure-JAX reference with the same precision strategy (bf16 conv
    operands, f32 accumulation, f32 training-mode BatchNorm)."""
    w1, g1, b1, w2, g2, b2 = params

    def conv(x, w):
        return jax.lax.conv_general_dilated(
            x.astype(jnp.bfloat16), w.astype(jnp.bfloat16),
            window_strides=(1, 1), padding=((1, 1), (1, 1)),
            dimension_numbers=('NCHW', 'HWIO', 'NCHW'),
            preferred_element_type=jnp.float32)

    def bn(y, g, b):
        mean = jnp.mean(y, axis=(0, 2, 3), keepdims=True)
        var = jnp.mean(y * y, axis=(0, 2, 3), keepdims=True) - mean * mean
        return ((y - mean) * jax.lax.rsqrt(var + _EPS) * g.reshape(1, -1, 1, 1)
                + b.reshape(1, -1, 1, 1))

    o = jax.nn.relu(bn(conv(x_nchw, w1), g1, b1))
    o = bn(conv(o, w2), g2, b2)
    return jax.nn.relu(o + x_nchw)


if __name__ == "__main__":
    key = jax.random.PRNGKey(0)
    kx, kp = jax.random.split(key)

    # layer1-style BasicBlock of AdResNetS: 64 -> 64 channels, identity shortcut.
    N, C, H, W = 2, 64, 16, 16
    x = jax.random.normal(kx, (N, C, H, W), jnp.float32)
    params = init_params(kp, in_channels=C, out_channels=C, kernel_size=_K,
                         expansion=1)

    out = jax.block_until_ready(basic_block(x, params))
    ref = jax.block_until_ready(_reference(x, params))

    assert out.shape == (N, C, H, W)
    err = float(jnp.max(jnp.abs(out - ref)))
    assert err < 1e-2, f"max abs err = {err}"
    print("KERNEL_OK")
</pallas_src>

<mosaic_0001>
module attributes {stable_mosaic.version = 11 : i64} {
  func.func @_fused_block_kernel(%arg0: i32, %arg1: memref<2x16x16x128xf32, #tpu.memory_space<vmem>>, %arg2: memref<1152x128xbf16, #tpu.memory_space<vmem>>, %arg3: memref<1152x128xbf16, #tpu.memory_space<vmem>>, %arg4: memref<1x128xf32, #tpu.memory_space<vmem>>, %arg5: memref<1x128xf32, #tpu.memory_space<vmem>>, %arg6: memref<1x128xf32, #tpu.memory_space<vmem>>, %arg7: memref<1x128xf32, #tpu.memory_space<vmem>>, %arg8: memref<2x16x16x128xf32, #tpu.memory_space<vmem>>) attributes {dimension_semantics = [#tpu.dimension_semantics<arbitrary>], iteration_bounds = array<i64: 1>, scalar_prefetch = 0 : i64, scratch_operands = 0 : i64, tpu.core_type = #tpu.core_type<tc>, window_params = [{pipeline_mode = #tpu.pipeline_mode<synchronous>, transform_indices = @transform_0, window_bounds = array<i64: 2, 16, 16, 128>}, {pipeline_mode = #tpu.pipeline_mode<synchronous>, transform_indices = @transform_1, window_bounds = array<i64: 1152, 128>}, {pipeline_mode = #tpu.pipeline_mode<synchronous>, transform_indices = @transform_2, window_bounds = array<i64: 1152, 128>}, {pipeline_mode = #tpu.pipeline_mode<synchronous>, transform_indices = @transform_3, window_bounds = array<i64: 1, 128>}, {pipeline_mode = #tpu.pipeline_mode<synchronous>, transform_indices = @transform_4, window_bounds = array<i64: 1, 128>}, {pipeline_mode = #tpu.pipeline_mode<synchronous>, transform_indices = @transform_5, window_bounds = array<i64: 1, 128>}, {pipeline_mode = #tpu.pipeline_mode<synchronous>, transform_indices = @transform_6, window_bounds = array<i64: 1, 128>}, {pipeline_mode = #tpu.pipeline_mode<synchronous>, transform_indices = @transform_7, window_bounds = array<i64: 2, 16, 16, 128>}]} {
    %c0 = arith.constant 0 : index
    %c0_0 = arith.constant 0 : index
    %c0_1 = arith.constant 0 : index
    %c0_2 = arith.constant 0 : index
    %0 = vector.load %arg1[%c0, %c0_0, %c0_1, %c0_2] : memref<2x16x16x128xf32, #tpu.memory_space<vmem>>, vector<2x16x16x128xf32>
    %1 = arith.truncf %0 : vector<2x16x16x128xf32> to vector<2x16x16x128xbf16>
    %cst = arith.constant 0.000000e+00 : bf16
    %2 = vector.broadcast %cst : bf16 to vector<2x1x16x128xbf16>
    %3 = tpu.concatenate %2, %1, %2 in 1 : vector<2x1x16x128xbf16>, vector<2x16x16x128xbf16>, vector<2x1x16x128xbf16> -> vector<2x18x16x128xbf16>
    %cst_3 = arith.constant 0.000000e+00 : bf16
    %4 = vector.broadcast %cst_3 : bf16 to vector<2x18x1x128xbf16>
    %5 = tpu.concatenate %4, %3, %4 in 2 : vector<2x18x1x128xbf16>, vector<2x18x16x128xbf16>, vector<2x18x1x128xbf16> -> vector<2x18x18x128xbf16>
    %6 = vector.extract_strided_slice %5 {offsets = [0, 0, 0, 0], sizes = [2, 16, 16, 128], strides = [1, 1, 1, 1]} : vector<2x18x18x128xbf16> to vector<2x16x16x128xbf16>
    %7 = vector.extract_strided_slice %5 {offsets = [0, 0, 1, 0], sizes = [2, 16, 16, 128], strides = [1, 1, 1, 1]} : vector<2x18x18x128xbf16> to vector<2x16x16x128xbf16>
    %8 = vector.extract_strided_slice %5 {offsets = [0, 0, 2, 0], sizes = [2, 16, 16, 128], strides = [1, 1, 1, 1]} : vector<2x18x18x128xbf16> to vector<2x16x16x128xbf16>
    %9 = vector.extract_strided_slice %5 {offsets = [0, 1, 0, 0], sizes = [2, 16, 16, 128], strides = [1, 1, 1, 1]} : vector<2x18x18x128xbf16> to vector<2x16x16x128xbf16>
    %10 = vector.extract_strided_slice %5 {offsets = [0, 1, 1, 0], sizes = [2, 16, 16, 128], strides = [1, 1, 1, 1]} : vector<2x18x18x128xbf16> to vector<2x16x16x128xbf16>
    %11 = vector.extract_strided_slice %5 {offsets = [0, 1, 2, 0], sizes = [2, 16, 16, 128], strides = [1, 1, 1, 1]} : vector<2x18x18x128xbf16> to vector<2x16x16x128xbf16>
    %12 = vector.extract_strided_slice %5 {offsets = [0, 2, 0, 0], sizes = [2, 16, 16, 128], strides = [1, 1, 1, 1]} : vector<2x18x18x128xbf16> to vector<2x16x16x128xbf16>
    %13 = vector.extract_strided_slice %5 {offsets = [0, 2, 1, 0], sizes = [2, 16, 16, 128], strides = [1, 1, 1, 1]} : vector<2x18x18x128xbf16> to vector<2x16x16x128xbf16>
    %14 = vector.extract_strided_slice %5 {offsets = [0, 2, 2, 0], sizes = [2, 16, 16, 128], strides = [1, 1, 1, 1]} : vector<2x18x18x128xbf16> to vector<2x16x16x128xbf16>
    %15 = tpu.concatenate %6, %7, %8, %9, %10, %11, %12, %13, %14 in 3 : vector<2x16x16x128xbf16>, vector<2x16x16x128xbf16>, vector<2x16x16x128xbf16>, vector<2x16x16x128xbf16>, vector<2x16x16x128xbf16>, vector<2x16x16x128xbf16>, vector<2x16x16x128xbf16>, vector<2x16x16x128xbf16>, vector<2x16x16x128xbf16> -> vector<2x16x16x1152xbf16>
    %16 = vector.shape_cast %15 : vector<2x16x16x1152xbf16> to vector<512x1152xbf16>
    %c0_4 = arith.constant 0 : index
    %c0_5 = arith.constant 0 : index
    %17 = vector.load %arg2[%c0_4, %c0_5] : memref<1152x128xbf16, #tpu.memory_space<vmem>>, vector<1152x128xbf16>
    %cst_6 = arith.constant dense<0.000000e+00> : vector<512x128xf32>
    %18 = tpu.matmul %16, %17, %cst_6 {dimension_numbers = #tpu.dot_dimension_numbers<[1], [0], [0], [1], [0, 0, 1, 1], [], []>} : vector<512x1152xbf16>, vector<1152x128xbf16>, vector<512x128xf32> -> vector<512x128xf32>
    %c0_7 = arith.constant 0 : index
    %c0_8 = arith.constant 0 : index
    %19 = vector.load %arg4[%c0_7, %c0_8] : memref<1x128xf32, #tpu.memory_space<vmem>>, vector<1x128xf32>
    %c0_9 = arith.constant 0 : index
    %c0_10 = arith.constant 0 : index
    %20 = vector.load %arg5[%c0_9, %c0_10] : memref<1x128xf32, #tpu.memory_space<vmem>>, vector<1x128xf32>
    %21 = arith.mulf %18, %18 : vector<512x128xf32>
    %22 = tpu.concatenate %18, %21 in 1 : vector<512x128xf32>, vector<512x128xf32> -> vector<512x256xf32>
    %cst_11 = arith.constant dense<0.000000e+00> : vector<256xf32>
    %23 = vector.multi_reduction <add>, %22, %cst_11 [0] : vector<512x256xf32> to vector<256xf32>
    %24 = vector.shape_cast %23 : vector<256xf32> to vector<1x256xf32>
    %25 = vector.extract_strided_slice %24 {offsets = [0, 0], sizes = [1, 128], strides = [1, 1]} : vector<1x256xf32> to vector<1x128xf32>
    %cst_12 = arith.constant 0.001953125 : f32
    %26 = vector.broadcast %cst_12 : f32 to vector<1x128xf32>
    %27 = arith.mulf %25, %26 : vector<1x128xf32>
    %28 = vector.extract_strided_slice %24 {offsets = [0, 128], sizes = [1, 128], strides = [1, 1]} : vector<1x256xf32> to vector<1x128xf32>
    %cst_13 = arith.constant 0.001953125 : f32
    %29 = vector.broadcast %cst_13 : f32 to vector<1x128xf32>
    %30 = arith.mulf %28, %29 : vector<1x128xf32>
    %31 = arith.mulf %27, %27 : vector<1x128xf32>
    %32 = arith.subf %30, %31 : vector<1x128xf32>
    %cst_14 = arith.constant 0.000000e+00 : f32
    %33 = vector.broadcast %cst_14 : f32 to vector<1x128xf32>
    %34 = arith.maximumf %32, %33 : vector<1x128xf32>
    %cst_15 = arith.constant 9.99999974E-6 : f32
    %35 = vector.broadcast %cst_15 : f32 to vector<1x128xf32>
    %36 = arith.addf %34, %35 : vector<1x128xf32>
    %37 = math.rsqrt %36 : vector<1x128xf32>
    %38 = arith.mulf %19, %37 : vector<1x128xf32>
    %39 = arith.mulf %27, %38 : vector<1x128xf32>
    %40 = arith.subf %20, %39 : vector<1x128xf32>
    %41 = vector.broadcast %38 : vector<1x128xf32> to vector<512x128xf32>
    %42 = arith.mulf %18, %41 : vector<512x128xf32>
    %43 = vector.broadcast %40 : vector<1x128xf32> to vector<512x128xf32>
    %44 = arith.addf %42, %43 : vector<512x128xf32>
    %cst_16 = arith.constant 0.000000e+00 : f32
    %45 = vector.broadcast %cst_16 : f32 to vector<512x128xf32>
    %46 = arith.maximumf %44, %45 : vector<512x128xf32>
    %47 = arith.truncf %46 : vector<512x128xf32> to vector<512x128xbf16>
    %48 = vector.shape_cast %47 : vector<512x128xbf16> to vector<2x16x16x128xbf16>
    %cst_17 = arith.constant 0.000000e+00 : bf16
    %49 = vector.broadcast %cst_17 : bf16 to vector<2x1x16x128xbf16>
    %50 = tpu.concatenate %49, %48, %49 in 1 : vector<2x1x16x128xbf16>, vector<2x16x16x128xbf16>, vector<2x1x16x128xbf16> -> vector<2x18x16x128xbf16>
    %cst_18 = arith.constant 0.000000e+00 : bf16
    %51 = vector.broadcast %cst_18 : bf16 to vector<2x18x1x128xbf16>
    %52 = tpu.concatenate %51, %50, %51 in 2 : vector<2x18x1x128xbf16>, vector<2x18x16x128xbf16>, vector<2x18x1x128xbf16> -> vector<2x18x18x128xbf16>
    %53 = vector.extract_strided_slice %52 {offsets = [0, 0, 0, 0], sizes = [2, 16, 16, 128], strides = [1, 1, 1, 1]} : vector<2x18x18x128xbf16> to vector<2x16x16x128xbf16>
    %54 = vector.extract_strided_slice %52 {offsets = [0, 0, 1, 0], sizes = [2, 16, 16, 128], strides = [1, 1, 1, 1]} : vector<2x18x18x128xbf16> to vector<2x16x16x128xbf16>
    %55 = vector.extract_strided_slice %52 {offsets = [0, 0, 2, 0], sizes = [2, 16, 16, 128], strides = [1, 1, 1, 1]} : vector<2x18x18x128xbf16> to vector<2x16x16x128xbf16>
    %56 = vector.extract_strided_slice %52 {offsets = [0, 1, 0, 0], sizes = [2, 16, 16, 128], strides = [1, 1, 1, 1]} : vector<2x18x18x128xbf16> to vector<2x16x16x128xbf16>
    %57 = vector.extract_strided_slice %52 {offsets = [0, 1, 1, 0], sizes = [2, 16, 16, 128], strides = [1, 1, 1, 1]} : vector<2x18x18x128xbf16> to vector<2x16x16x128xbf16>
    %58 = vector.extract_strided_slice %52 {offsets = [0, 1, 2, 0], sizes = [2, 16, 16, 128], strides = [1, 1, 1, 1]} : vector<2x18x18x128xbf16> to vector<2x16x16x128xbf16>
    %59 = vector.extract_strided_slice %52 {offsets = [0, 2, 0, 0], sizes = [2, 16, 16, 128], strides = [1, 1, 1, 1]} : vector<2x18x18x128xbf16> to vector<2x16x16x128xbf16>
    %60 = vector.extract_strided_slice %52 {offsets = [0, 2, 1, 0], sizes = [2, 16, 16, 128], strides = [1, 1, 1, 1]} : vector<2x18x18x128xbf16> to vector<2x16x16x128xbf16>
    %61 = vector.extract_strided_slice %52 {offsets = [0, 2, 2, 0], sizes = [2, 16, 16, 128], strides = [1, 1, 1, 1]} : vector<2x18x18x128xbf16> to vector<2x16x16x128xbf16>
    %62 = tpu.concatenate %53, %54, %55, %56, %57, %58, %59, %60, %61 in 3 : vector<2x16x16x128xbf16>, vector<2x16x16x128xbf16>, vector<2x16x16x128xbf16>, vector<2x16x16x128xbf16>, vector<2x16x16x128xbf16>, vector<2x16x16x128xbf16>, vector<2x16x16x128xbf16>, vector<2x16x16x128xbf16>, vector<2x16x16x128xbf16> -> vector<2x16x16x1152xbf16>
    %63 = vector.shape_cast %62 : vector<2x16x16x1152xbf16> to vector<512x1152xbf16>
    %c0_19 = arith.constant 0 : index
    %c0_20 = arith.constant 0 : index
    %64 = vector.load %arg3[%c0_19, %c0_20] : memref<1152x128xbf16, #tpu.memory_space<vmem>>, vector<1152x128xbf16>
    %cst_21 = arith.constant dense<0.000000e+00> : vector<512x128xf32>
    %65 = tpu.matmul %63, %64, %cst_21 {dimension_numbers = #tpu.dot_dimension_numbers<[1], [0], [0], [1], [0, 0, 1, 1], [], []>} : vector<512x1152xbf16>, vector<1152x128xbf16>, vector<512x128xf32> -> vector<512x128xf32>
    %c0_22 = arith.constant 0 : index
    %c0_23 = arith.constant 0 : index
    %66 = vector.load %arg6[%c0_22, %c0_23] : memref<1x128xf32, #tpu.memory_space<vmem>>, vector<1x128xf32>
    %c0_24 = arith.constant 0 : index
    %c0_25 = arith.constant 0 : index
    %67 = vector.load %arg7[%c0_24, %c0_25] : memref<1x128xf32, #tpu.memory_space<vmem>>, vector<1x128xf32>
    %68 = arith.mulf %65, %65 : vector<512x128xf32>
    %69 = tpu.concatenate %65, %68 in 1 : vector<512x128xf32>, vector<512x128xf32> -> vector<512x256xf32>
    %cst_26 = arith.constant dense<0.000000e+00> : vector<256xf32>
    %70 = vector.multi_reduction <add>, %69, %cst_26 [0] : vector<512x256xf32> to vector<256xf32>
    %71 = vector.shape_cast %70 : vector<256xf32> to vector<1x256xf32>
    %72 = vector.extract_strided_slice %71 {offsets = [0, 0], sizes = [1, 128], strides = [1, 1]} : vector<1x256xf32> to vector<1x128xf32>
    %cst_27 = arith.constant 0.001953125 : f32
    %73 = vector.broadcast %cst_27 : f32 to vector<1x128xf32>
    %74 = arith.mulf %72, %73 : vector<1x128xf32>
    %75 = vector.extract_strided_slice %71 {offsets = [0, 128], sizes = [1, 128], strides = [1, 1]} : vector<1x256xf32> to vector<1x128xf32>
    %cst_28 = arith.constant 0.001953125 : f32
    %76 = vector.broadcast %cst_28 : f32 to vector<1x128xf32>
    %77 = arith.mulf %75, %76 : vector<1x128xf32>
    %78 = arith.mulf %74, %74 : vector<1x128xf32>
    %79 = arith.subf %77, %78 : vector<1x128xf32>
    %cst_29 = arith.constant 0.000000e+00 : f32
    %80 = vector.broadcast %cst_29 : f32 to vector<1x128xf32>
    %81 = arith.maximumf %79, %80 : vector<1x128xf32>
    %cst_30 = arith.constant 9.99999974E-6 : f32
    %82 = vector.broadcast %cst_30 : f32 to vector<1x128xf32>
    %83 = arith.addf %81, %82 : vector<1x128xf32>
    %84 = math.rsqrt %83 : vector<1x128xf32>
    %85 = arith.mulf %66, %84 : vector<1x128xf32>
    %86 = arith.mulf %74, %85 : vector<1x128xf32>
    %87 = arith.subf %67, %86 : vector<1x128xf32>
    %88 = vector.broadcast %85 : vector<1x128xf32> to vector<512x128xf32>
    %89 = arith.mulf %65, %88 : vector<512x128xf32>
    %90 = vector.broadcast %87 : vector<1x128xf32> to vector<512x128xf32>
    %91 = arith.addf %89, %90 : vector<512x128xf32>
    %92 = vector.shape_cast %0 : vector<2x16x16x128xf32> to vector<512x128xf32>
    %93 = arith.addf %91, %92 : vector<512x128xf32>
    %cst_31 = arith.constant 0.000000e+00 : f32
    %94 = vector.broadcast %cst_31 : f32 to vector<512x128xf32>
    %95 = arith.maximumf %93, %94 : vector<512x128xf32>
    %96 = vector.shape_cast %95 : vector<512x128xf32> to vector<2x16x16x128xf32>
    %c0_32 = arith.constant 0 : index
    %c0_33 = arith.constant 0 : index
    %c0_34 = arith.constant 0 : index
    %c0_35 = arith.constant 0 : index
    %97 = vector.load %arg8[%c0_32, %c0_33, %c0_34, %c0_35] : memref<2x16x16x128xf32, #tpu.memory_space<vmem>>, vector<2x16x16x128xf32>
    tpu.vector_store %arg8[%c0_32, %c0_33, %c0_34, %c0_35], %96 {strides = array<i32>} : memref<2x16x16x128xf32, #tpu.memory_space<vmem>>, vector<2x16x16x128xf32>,
    return
  }
  func.func @transform_0(%arg0: i32) -> (i32, i32, i32, i32) {
    %c0_i32 = arith.constant 0 : i32
    %c0_i32_0 = arith.constant 0 : i32
    %c0_i32_1 = arith.constant 0 : i32
    %c0_i32_2 = arith.constant 0 : i32
    %c0_i32_3 = arith.constant 0 : i32
    return %c0_i32, %c0_i32_0, %c0_i32_1, %c0_i32_2 : i32, i32, i32, i32
  }
  func.func @transform_1(%arg0: i32) -> (i32, i32) {
    %c0_i32 = arith.constant 0 : i32
    %c0_i32_0 = arith.constant 0 : i32
    %c0_i32_1 = arith.constant 0 : i32
    return %c0_i32, %c0_i32_0 : i32, i32
  }
  func.func @transform_2(%arg0: i32) -> (i32, i32) {
    %c0_i32 = arith.constant 0 : i32
    %c0_i32_0 = arith.constant 0 : i32
    %c0_i32_1 = arith.constant 0 : i32
    return %c0_i32, %c0_i32_0 : i32, i32
  }
  func.func @transform_3(%arg0: i32) -> (i32, i32) {
    %c0_i32 = arith.constant 0 : i32
    %c0_i32_0 = arith.constant 0 : i32
    %c0_i32_1 = arith.constant 0 : i32
    return %c0_i32, %c0_i32_0 : i32, i32
  }
  func.func @transform_4(%arg0: i32) -> (i32, i32) {
    %c0_i32 = arith.constant 0 : i32
    %c0_i32_0 = arith.constant 0 : i32
    %c0_i32_1 = arith.constant 0 : i32
    return %c0_i32, %c0_i32_0 : i32, i32
  }
  func.func @transform_5(%arg0: i32) -> (i32, i32) {
    %c0_i32 = arith.constant 0 : i32
    %c0_i32_0 = arith.constant 0 : i32
    %c0_i32_1 = arith.constant 0 : i32
    return %c0_i32, %c0_i32_0 : i32, i32
  }
  func.func @transform_6(%arg0: i32) -> (i32, i32) {
    %c0_i32 = arith.constant 0 : i32
    %c0_i32_0 = arith.constant 0 : i32
    %c0_i32_1 = arith.constant 0 : i32
    return %c0_i32, %c0_i32_0 : i32, i32
  }
  func.func @transform_7(%arg0: i32) -> (i32, i32, i32, i32) {
    %c0_i32 = arith.constant 0 : i32
    %c0_i32_0 = arith.constant 0 : i32
    %c0_i32_1 = arith.constant 0 : i32
    %c0_i32_2 = arith.constant 0 : i32
    %c0_i32_3 = arith.constant 0 : i32
    return %c0_i32, %c0_i32_0, %c0_i32_1, %c0_i32_2 : i32, i32, i32, i32
  }
}

</mosaic_0001>

<bundles_post_ra>
// kernel: basic_block.1
= control target key start
LH: loop header
LB: loop body
LE: loop exit
PB: predicated region body
PF: predicated region fallthrough
CT: control target
= control target key end

     0   :  { %v13978_v0 = vmov 0   ;;  %vm421_vm0 = vsmask.f32 256  ;;  %vm420_vm1 = vcmask 1040384   ;;  %v14239_v7 = vmov 0  ;;  %s13970_s1 = inlined_call_operand.vmem [shape: bf16[1152,128], index: 1, kind: input, shape index: {}]   ;;  %s13971_s0 = inlined_call_operand.vmem [shape: f32[2,16,16,128], index: 0, kind: input, shape index: {}]   ;;  %s13972_s2 = inlined_call_operand.vmem [shape: bf16[1152,128], index: 2, kind: input, shape index: {}]   ;;  %s13973_s3 = inlined_call_operand.vmem [shape: f32[1,128], index: 3, kind: input, shape index: {}]   ;;  %s13974_s4 = inlined_call_operand.vmem [shape: f32[1,128], index: 4, kind: input, shape index: {}]   ;;  %s13975_s5 = inlined_call_operand.vmem [shape: f32[1,128], index: 5, kind: input, shape index: {}]   ;;  %s13976_s6 = inlined_call_operand.vmem [shape: f32[1,128], index: 6, kind: input, shape index: {}]   ;;  %s13977_s7 = inlined_call_operand.vmem [shape: f32[2,16,16,128], index: 7, kind: output, shape index: {}]  }
   0x1   :  { %1694 = vmatprep.subr.bf16.mxu0 %v13978_v0  ;;  %v8289_v1 = vld [vmem:[%s13970_s1] sm:$0xff]   ;;  %v8290_v2 = vld [vmem:[%s13970_s1 + $0x8] sm:$0xff]   ;;  %v8291_v3 = vld [vmem:[%s13970_s1 + $0x10] sm:$0xff]   ;;  %v126_v5 = vrot.slane %v13978_v0, 7  ;;  %vm489_vm3 = vsmask.f32 7424 }
   0x2   :  { %1695 = vmatpush1.bf16.msra.mxu0 %v8289_v1  ;;  %v8292_v4 = vld [vmem:[%s13970_s1 + $0x18] sm:$0xff]   ;;  %v8293_v6 = vld [vmem:[%s13970_s1 + $0x20] sm:$0xff]   ;;  %vm8571_vm2 = vmand %vm420_vm1, %vm421_vm0  ;;  %vm955_vm4 = vcmask 1046528  }
   0x3   :  { %1696 = vmatprep.subr.bf16.mxu0 %v13978_v0  ;;  %v14240_v7 = vsel %vm8571_vm2, 4294967295, %v14239_v7  ;;  %v8577_v8 = vsel %vm8571_vm2, 0, %v126_v5  ;;  %v8581_v9 = vsel %vm8571_vm2, %v126_v5, 0  ;;  %v8294_v10 = vld [vmem:[%s13970_s1 + $0x28] sm:$0xff]   ;;  %v8295_v16 = vld [vmem:[%s13970_s1 + $0x30] sm:$0xff]   ;;  %v8296_v19 = vld [vmem:[%s13970_s1 + $0x38] sm:$0xff]  }
   0x4   :  { %14241 = vst [vmem:[#allocation2_spill] sm:$0xff] %v14240_v7  ;;  %14242 = vst [vmem:[#allocation3_spill] sm:$0xff] %v8577_v8  ;;  %v491_v11 = vshrl.u32 %v8577_v8, 16  ;;  %v493_v12 = vshll.u32 %v8577_v8, 16  ;;  %v498_v13 = vshll.u32 %v8581_v9, 16  ;;  %v27_v20 = vld [vmem:[%s13971_s0] sm:$0xff] }
   0x5   :  { %v28_v21 = vld [vmem:[%s13971_s0 + $0x8] sm:$0xff]  ;;  %v8297_v22 = vld [vmem:[%s13970_s1 + $0x40] sm:$0xff]   ;;  %v29_v26 = vld [vmem:[%s13971_s0 + $0x10] sm:$0xff] }
   0x6   :  { %1697 = vmatpush1.bf16.msra.mxu0 %v8290_v2  ;;  %v495_v14 = vrot.slane %v493_v12, 1  ;;  %v500_v15 = vrot.slane %v498_v13, 1  ;;  %v91_v23 = vpack.c.bf16 %v28_v21, %v27_v20  ;;  %v8298_v24 = vld [vmem:[%s13970_s1 + $0x48] sm:$0xff]   ;;  %v30_v27 = vld [vmem:[%s13971_s0 + $0x18] sm:$0xff]  ;;  %v8299_v28 = vld [vmem:[%s13970_s1 + $0x50] sm:$0xff]  }
   0x7   :  { %1698 = vmatprep.subr.bf16.mxu0 %v13978_v0  ;;  %v92_v31 = vpack.c.bf16 %v30_v27, %v29_v26  ;;  %v8300_v32 = vld [vmem:[%s13970_s1 + $0x58] sm:$0xff]   ;;  %v31_v35 = vld [vmem:[%s13971_s0 + $0x20] sm:$0xff]  ;;  %v32_v36 = vld [vmem:[%s13971_s0 + $0x28] sm:$0xff] }
   0x8   :  { %v496_v17 = vor.u32 %v495_v14, %v491_v11  ;;  %v131_v25 = vshrl.u32 %v91_v23, 16  ;;  %v134_v30 = vshll.u32 %v91_v23, 16  ;;  %v8301_v37 = vld [vmem:[%s13970_s1 + $0x60] sm:$0xff]   ;;  %v93_v41 = vpack.c.bf16 %v32_v36, %v31_v35  ;;  %v8302_v42 = vld [vmem:[%s13970_s1 + $0x68] sm:$0xff]   ;;  %v33_v44 = vld [vmem:[%s13971_s0 + $0x30] sm:$0xff] }
   0x9   :  { %v138_v34 = vshrl.u32 %v92_v31, 16  ;;  %v141_v38 = vshll.u32 %v92_v31, 16  ;;  %v34_v45 = vld [vmem:[%s13971_s0 + $0x38] sm:$0xff]  ;;  %v8303_v49 = vld [vmem:[%s13970_s1 + $0x70] sm:$0xff]   ;;  %v8305_v63 = vld [vmem:[%s13970_s1 + $0x80] sm:$0xff]  }
   0xa   :  { %1699 = vmatpush1.bf16.msra.mxu0 %v8291_v3  ;;  %v8595_v18 = vsel %vm489_vm3, %v496_v17, %v500_v15  ;;  %v133_v29 = vrot.slane %v131_v25, 7  ;;  %v145_v48 = vshrl.u32 %v93_v41, 16  ;;  %v94_v50 = vpack.c.bf16 %v34_v45, %v33_v44  ;;  %v8304_v57 = vld [vmem:[%s13970_s1 + $0x78] sm:$0xff]   ;;  %v35_v2 = vld [vmem:[%s13971_s0 + $0x40] sm:$0xff]  ;;  %v36_v3 = vld [vmem:[%s13971_s0 + $0x48] sm:$0xff] }
   0xb   :  { %1700 = vmatprep.subr.bf16.mxu0 %v13978_v0  ;;  %14243 = vst [vmem:[#allocation4_spill] sm:$0xff] %v8595_v18  ;;  %1726 = vmatprep.mubr.bf16.mxu0 %v8595_v18  ;;  %v140_v40 = vrot.slane %v138_v34, 7  ;;  %v148_v56 = vshll.u32 %v93_v41, 16  ;;  %v95_v14 = vpack.c.bf16 %v36_v3, %v35_v2  ;;  %v37_v23 = vld [vmem:[%s13971_s0 + $0x50] sm:$0xff]  ;;  %v8308_v36 = vld [vmem:[%s13970_s1 + $0x98] sm:$0xff]   ;;  %v39_v41 = vld [vmem:[%s13971_s0 + $0x60] sm:$0xff] }
   0xc   :  { %v136_v33 = vor.u32 %v134_v30, %v133_v29  ;;  %v8657_v46 = vsel %vm8571_vm2, %v133_v29, 0  ;;  %v147_v55 = vrot.slane %v145_v48, 7  ;;  %v152_v58 = vshrl.u32 %v94_v50, 16  ;;  %v8307_v27 = vld [vmem:[%s13970_s1 + $0x90] sm:$0xff]   ;;  %v8309_v45 = vld [vmem:[%s13970_s1 + $0xa0] sm:$0xff]  }
   0xd   :  { %v143_v47 = vor.u32 %v141_v38, %v140_v40  ;;  %v510_v53 = vshll.u32 %v8657_v46, 16  ;;  %v8675_v61 = vsel %vm8571_vm2, %v140_v40, 0  ;;  %v155_v12 = vshll.u32 %v94_v50, 16  ;;  %v8363_v7 = vld [vmem:[%s13972_s2 + $0x10] sm:$0xff]  }
   0xe   :  { %1701 = vmatpush1.bf16.msra.mxu0 %v8292_v4  ;;  %v8642_v39 = vsel %vm8571_vm2, 0, %v136_v33  ;;  %v150_v1 = vor.u32 %v148_v56, %v147_v55  ;;  %v522_v4 = vshll.u32 %v8675_v61, 16  ;;  %v154_v5 = vrot.slane %v152_v58, 7  ;;  %v42_v56 = vld [vmem:[%s13971_s0 + $0x78] sm:$0xff] }
   0xf   :  { %1702 = vmatprep.subr.bf16.mxu0 %v13978_v0  ;;  %v505_v43 = vshll.u32 %v8642_v39, 16  ;;  %v503_v51 = vshrl.u32 %v8642_v39, 16  ;;  %v8667_v54 = vsel %vm8571_vm2, 0, %v143_v47  ;;  %v512_v60 = vrot.slane %v510_v53, 1  ;;  %v41_v53 = vld [vmem:[%s13971_s0 + $0x70] sm:$0xff] }
  0x10   :  { %v517_v62 = vshll.u32 %v8667_v54, 16  ;;  %v8695_v13 = vsel %vm8571_vm2, 0, %v150_v1  ;;  %v524_v15 = vrot.slane %v522_v4, 1  ;;  %v157_v21 = vor.u32 %v155_v12, %v154_v5  ;;  %v8311_v4 = vld [vmem:[%s13970_s1 + $0xb0] sm:$0xff]  }
  0x11   :  { %v507_v52 = vrot.slane %v505_v43, 1  ;;  %v529_v20 = vshll.u32 %v8695_v13, 16  ;;  %v527_v25 = vshrl.u32 %v8695_v13, 16  ;;  %v162_v33 = vshll.u32 %v95_v14, 16 }
  0x12   :  { %1703 = vmatpush1.bf16.msra.mxu0 %v8293_v6  ;;  %v519_v11 = vrot.slane %v517_v62, 1  ;;  %v8724_v30 = vsel %vm8571_vm2, 0, %v157_v21  ;;  %v8731_v34 = vsel %vm8571_vm2, %v154_v5, 0  ;;  %v8310_v62 = vld [vmem:[%s13970_s1 + $0xa8] sm:$0xff]   ;;  %v98_v2 = vpack.c.bf16 %v42_v56, %v41_v53  ;;  %v8312_v21 = vld [vmem:[%s13970_s1 + $0xb8] sm:$0xff]  }
  0x13   :  { %1704 = vmatprep.subr.bf16.mxu0 %v13978_v0  ;;  %v508_v59 = vor.u32 %v507_v52, %v503_v51  ;;  %v531_v29 = vrot.slane %v529_v20, 1  ;;  %v541_v35 = vshll.u32 %v8724_v30, 16  ;;  %v546_v44 = vshll.u32 %v8731_v34, 16 }
  0x14   :  { %v539_v47 = vshrl.u32 %v8724_v30, 16 }
  0x15   :  { %v8690_v6 = vsel %vm489_vm3, %v508_v59, %v512_v60  ;;  %v543_v48 = vrot.slane %v541_v35, 1  ;;  %v548_v58 = vrot.slane %v546_v44, 1 }
  0x16   :  { %1705 = vmatpush1.bf16.msra.mxu0 %v8294_v10  ;;  %14244 = vst [vmem:[#allocation5_spill] sm:$0xff] %v8690_v6  ;;  %v515_v10 = vshrl.u32 %v8667_v54, 16 }
  0x17   :  { %1706 = vmatprep.subr.bf16.mxu0 %v13978_v0 }
  0x18   :  { %v520_v17 = vor.u32 %v519_v11, %v515_v10 }
  0x1a   :  { %1707 = vmatpush1.bf16.msra.mxu0 %v8295_v16  ;;  %v8306_v16 = vld [vmem:[%s13970_s1 + $0x88] sm:$0xff]  }
  0x1b   :  { %1708 = vmatprep.subr.bf16.mxu0 %v13978_v0 }
  0x1e   :  { %1709 = vmatpush1.bf16.msra.mxu0 %v8296_v19  ;;  %v8705_v19 = vsel %vm8571_vm2, %v147_v55, 0 }
  0x1f   :  { %1710 = vmatprep.subr.bf16.mxu0 %v13978_v0  ;;  %v534_v26 = vshll.u32 %v8705_v19, 16 }
  0x21   :  { %v536_v38 = vrot.slane %v534_v26, 1 }
  0x22   :  { %1711 = vmatpush1.bf16.msra.mxu0 %v8297_v22  ;;  %v159_v22 = vshrl.u32 %v95_v14, 16 }
  0x23   :  { %1712 = vmatprep.subr.bf16.mxu0 %v13978_v0 }
  0x26   :  { %1713 = vmatpush1.bf16.msra.mxu0 %v8298_v24  ;;  %v38_v24 = vld [vmem:[%s13971_s0 + $0x58] sm:$0xff] }
  0x27   :  { %1714 = vmatprep.subr.bf16.mxu0 %v13978_v0  ;;  %v96_v31 = vpack.c.bf16 %v38_v24, %v37_v23  ;;  %v43_v23 = vld [vmem:[%s13971_s0 + $0x80] sm:$0xff]  ;;  %v44_v24 = vld [vmem:[%s13971_s0 + $0x88] sm:$0xff] }
  0x29   :  { %v166_v40 = vshrl.u32 %v96_v31, 16  ;;  %v169_v52 = vshll.u32 %v96_v31, 16  ;;  %v8313_v31 = vld [vmem:[%s13970_s1 + $0xc0] sm:$0xff]  }
  0x2a   :  { %1715 = vmatpush1.bf16.msra.mxu0 %v8299_v28  ;;  %v8720_v28 = vsel %vm489_vm3, %v520_v17, %v524_v15 }
  0x2b   :  { %1716 = vmatprep.subr.bf16.mxu0 %v13978_v0  ;;  %14245 = vst [vmem:[#allocation6_spill] sm:$0xff] %v8720_v28  ;;  %v168_v51 = vrot.slane %v166_v40, 7 }
  0x2d   :  { %v171_v1 = vor.u32 %v169_v52, %v168_v51  ;;  %v8315_v52 = vld [vmem:[%s13970_s1 + $0xd0] sm:$0xff]  }
  0x2e   :  { %1717 = vmatpush1.bf16.msra.mxu0 %v8300_v32  ;;  %v161_v32 = vrot.slane %v159_v22, 7 }
  0x2f   :  { %1718 = vmatprep.subr.bf16.mxu0 %v13978_v0  ;;  %v8784_v15 = vsel %vm8571_vm2, 0, %v171_v1 }
  0x30   :  { %v164_v43 = vor.u32 %v162_v33, %v161_v32  ;;  %v8767_v59 = vsel %vm8571_vm2, %v161_v32, 0  ;;  %v565_v20 = vshll.u32 %v8784_v15, 16  ;;  %v563_v33 = vshrl.u32 %v8784_v15, 16 }
  0x31   :  { %v558_v3 = vshll.u32 %v8767_v59, 16 }
  0x32   :  { %1719 = vmatpush1.bf16.msra.mxu0 %v8301_v37  ;;  %v532_v37 = vor.u32 %v531_v29, %v527_v25  ;;  %v8758_v55 = vsel %vm8571_vm2, 0, %v164_v43  ;;  %v8802_v25 = vsel %vm8571_vm2, %v168_v51, 0  ;;  %v183_v29 = vshll.u32 %v98_v2, 16  ;;  %v46_v51 = vld [vmem:[%s13971_s0 + $0x98] sm:$0xff] }
  0x33   :  { %1720 = vmatprep.subr.bf16.mxu0 %v13978_v0  ;;  %v551_v12 = vshrl.u32 %v8758_v55, 16  ;;  %v560_v17 = vrot.slane %v558_v3, 1  ;;  %v567_v35 = vrot.slane %v565_v20, 1 }
  0x34   :  { %v8750_v50 = vsel %vm489_vm3, %v532_v37, %v536_v38  ;;  %v99_v38 = vpack.c.bf16 %v44_v24, %v43_v23 }
  0x35   :  { %14246 = vst [vmem:[#allocation7_spill] sm:$0xff] %v8750_v50 }
  0x36   :  { %1721 = vmatpush1.bf16.msra.mxu0 %v8302_v42  ;;  %v40_v42 = vld [vmem:[%s13971_s0 + $0x68] sm:$0xff] }
  0x37   :  { %1722 = vmatprep.subr.bf16.mxu0 %v13978_v0 }
  0x3a   :  { %1723 = vmatpush1.bf16.msra.mxu0 %v8303_v49  ;;  %v97_v49 = vpack.c.bf16 %v40_v42, %v39_v41  ;;  %v8314_v41 = vld [vmem:[%s13970_s1 + $0xc8] sm:$0xff]   ;;  %v568_v42 = vor.u32 %v567_v35, %v563_v33 }
  0x3b   :  { %1724 = vmatprep.subr.bf16.mxu0 %v13978_v0 }
  0x3c   :  { %v173_v60 = vshrl.u32 %v97_v49, 16  ;;  %v176_v11 = vshll.u32 %v97_v49, 16  ;;  %v187_v49 = vshrl.u32 %v99_v38, 16 }
  0x3e   :  { %1725 = vmatpush1.bf16.msra.mxu0 %v8304_v57  ;;  %v544_v57 = vor.u32 %v543_v48, %v539_v47  ;;  %v175_v10 = vrot.slane %v173_v60, 7  ;;  %v45_v47 = vld [vmem:[%s13971_s0 + $0x90] sm:$0xff]  ;;  %v189_v60 = vrot.slane %v187_v49, 7 }
  0x3f   :  { %1983 = vmatprep.subr.bf16.mxu0 %v13978_v0 }
  0x40   :  { %v8779_v5 = vsel %vm489_vm3, %v544_v57, %v548_v58  ;;  %v178_v26 = vor.u32 %v176_v11, %v175_v10  ;;  %v8820_v40 = vsel %vm8571_vm2, %v175_v10, 0  ;;  %v8878_v35 = vsel %vm8571_vm2, %v189_v60, 0 }
  0x41   :  { %1727 = vmatmul.mubr.bf16.vlgmr.msra.gmra.mrb[0].mxu0 %v8577_v8  ;;  %14247 = vst [vmem:[#allocation8_spill] sm:$0xff] %v8779_v5  ;;  %v582_v48 = vshll.u32 %v8820_v40, 16 }
  0x42   :  { %1984 = vmatpush1.bf16.msra.mxu0 %v8305_v63  ;;  %1734 = vmatprep.mubr.bf16.mxu0 %v8690_v6  ;;  %v553_v63 = vshll.u32 %v8758_v55, 16  ;;  %v8815_v37 = vsel %vm8571_vm2, 0, %v178_v26 }
  0x43   :  { %1985 = vmatprep.subr.bf16.mxu0 %v13978_v0  ;;  %v577_v44 = vshll.u32 %v8815_v37, 16  ;;  %v575_v56 = vshrl.u32 %v8815_v37, 16 }
  0x44   :  { %v555_v14 = vrot.slane %v553_v63, 1  ;;  %v100_v63 = vpack.c.bf16 %v46_v51, %v45_v47  ;;  %v606_v47 = vshll.u32 %v8878_v35, 16 }
  0x45   :  { %v579_v57 = vrot.slane %v577_v44, 1 }
  0x46   :  { %1986 = vmatpush1.bf16.msra.mxu0 %v8306_v16  ;;  %v180_v16 = vshrl.u32 %v98_v2, 16  ;;  %v556_v22 = vor.u32 %v555_v14, %v551_v12  ;;  %v584_v2 = vrot.slane %v582_v48, 1  ;;  %v194_v11 = vshrl.u32 %v100_v63, 16  ;;  %v47_v12 = vld [vmem:[%s13971_s0 + $0xa0] sm:$0xff]  ;;  %v48_v14 = vld [vmem:[%s13971_s0 + $0xa8] sm:$0xff] }
  0x47   :  { %1987 = vmatprep.subr.bf16.mxu0 %v13978_v0  ;;  %v580_v1 = vor.u32 %v579_v57, %v575_v56  ;;  %v197_v24 = vshll.u32 %v100_v63, 16  ;;  %v101_v26 = vpack.c.bf16 %v48_v14, %v47_v12  ;;  %v608_v57 = vrot.slane %v606_v47, 1 }
  0x48   :  { %v8808_v32 = vsel %vm489_vm3, %v556_v22, %v560_v17  ;;  %v196_v23 = vrot.slane %v194_v11, 7 }
  0x49   :  { %1735 = vmatmul.mubr.bf16.gmra.mrb[4].mxu0 %v8642_v39  ;;  %14248 = vst [vmem:[#allocation9_spill] sm:$0xff] %v8808_v32  ;;  %v204_v51 = vshll.u32 %v101_v26, 16 }
  0x4a   :  { %1742 = vmatprep.mubr.bf16.mxu0 %v8720_v28  ;;  %1988 = vmatpush1.bf16.msra.mxu0 %v8307_v27  ;;  %v182_v27 = vrot.slane %v180_v16, 7  ;;  %v8862_v16 = vsel %vm489_vm3, %v580_v1, %v584_v2  ;;  %v51_v2 = vld [vmem:[%s13971_s0 + $0xc0] sm:$0xff] }
  0x4b   :  { %1989 = vmatprep.subr.bf16.mxu0 %v13978_v0  ;;  %14251 = vst [vmem:[#allocation12_spill] sm:$0xff] %v8862_v16 }
  0x4e   :  { %1990 = vmatpush1.bf16.msra.mxu0 %v8308_v36  ;;  %v570_v36 = vshll.u32 %v8802_v25, 16 }
  0x4f   :  { %1991 = vmatprep.subr.bf16.mxu0 %v13978_v0 }
  0x50   :  { %v572_v43 = vrot.slane %v570_v36, 1  ;;  %v199_v36 = vor.u32 %v197_v24, %v196_v23  ;;  %v8317_v24 = vld [vmem:[%s13970_s1 + $0xe0] sm:$0xff]  }
  0x51   :  { %1743 = vmatmul.mubr.bf16.gmra.mrb[8].mxu0 %v8667_v54 }
  0x52   :  { %1750 = vmatprep.mubr.bf16.mxu0 %v8750_v50  ;;  %1992 = vmatpush1.bf16.msra.mxu0 %v8309_v45  ;;  %v185_v45 = vor.u32 %v183_v29, %v182_v27  ;;  %v8839_v53 = vsel %vm489_vm3, %v568_v42, %v572_v43  ;;  %v50_v42 = vld [vmem:[%s13971_s0 + $0xb8] sm:$0xff]  ;;  %v8894_v48 = vsel %vm8571_vm2, 0, %v199_v36 }
  0x53   :  { %1993 = vmatprep.subr.bf16.mxu0 %v13978_v0  ;;  %14249 = vst [vmem:[#allocation10_spill] sm:$0xff] %v8839_v53  ;;  %14254 = vst [vmem:[#allocation15_spill] sm:$0xff] %v8894_v48  ;;  %v611_v11 = vshrl.u32 %v8894_v48, 16 }
  0x54   :  { %v8844_v58 = vsel %vm8571_vm2, 0, %v185_v45 }
  0x55   :  { %14250 = vst [vmem:[#allocation11_spill] sm:$0xff] %v8844_v58  ;;  %v589_v3 = vshll.u32 %v8844_v58, 16  ;;  %v587_v17 = vshrl.u32 %v8844_v58, 16 }
  0x56   :  { %1994 = vmatpush1.bf16.msra.mxu0 %v8310_v62  ;;  %v190_v62 = vshll.u32 %v99_v38, 16  ;;  %v201_v38 = vshrl.u32 %v101_v26, 16 }
  0x57   :  { %1995 = vmatprep.subr.bf16.mxu0 %v13978_v0  ;;  %v591_v20 = vrot.slane %v589_v3, 1  ;;  %v52_v3 = vld [vmem:[%s13971_s0 + $0xc8] sm:$0xff] }
  0x58   :  { %v192_v10 = vor.u32 %v190_v62, %v189_v60  ;;  %v203_v49 = vrot.slane %v201_v38, 7  ;;  %v613_v60 = vshll.u32 %v8894_v48, 16  ;;  %v8901_v62 = vsel %vm8571_vm2, %v196_v23, 0  ;;  %v53_v38 = vld [vmem:[%s13971_s0 + $0xd0] sm:$0xff] }
  0x59   :  { %1751 = vmatmul.mubr.bf16.gmra.mrb[12].mxu0 %v8695_v13  ;;  %v592_v29 = vor.u32 %v591_v20, %v587_v17  ;;  %v618_v14 = vshll.u32 %v8901_v62, 16  ;;  %v103_v23 = vpack.c.bf16 %v52_v3, %v51_v2 }
  0x5a   :  { %1758 = vmatprep.mubr.bf16.mxu0 %v8779_v5  ;;  %1996 = vmatpush1.bf16.msra.mxu0 %v8311_v4  ;;  %v8853_v4 = vsel %vm8571_vm2, %v182_v27, 0  ;;  %v8868_v22 = vsel %vm8571_vm2, 0, %v192_v10  ;;  %v8316_v27 = vld [vmem:[%s13970_s1 + $0xd8] sm:$0xff]   ;;  %v206_v63 = vor.u32 %v204_v51, %v203_v49  ;;  %v615_v12 = vrot.slane %v613_v60, 1 }
  0x5b   :  { %1997 = vmatprep.subr.bf16.mxu0 %v13978_v0  ;;  %14252 = vst [vmem:[#allocation13_spill] sm:$0xff] %v8868_v22  ;;  %v601_v33 = vshll.u32 %v8868_v22, 16  ;;  %v599_v44 = vshrl.u32 %v8868_v22, 16  ;;  %v215_v36 = vshrl.u32 %v103_v23, 16 }
  0x5c   :  { %v8916_v17 = vsel %vm8571_vm2, 0, %v206_v63  ;;  %v616_v26 = vor.u32 %v615_v12, %v611_v11  ;;  %v55_v11 = vld [vmem:[%s13971_s0 + $0xe0] sm:$0xff]  ;;  %v56_v12 = vld [vmem:[%s13971_s0 + $0xe8] sm:$0xff] }
  0x5d   :  { %v603_v45 = vrot.slane %v601_v33, 1  ;;  %14256 = vst [vmem:[#allocation17_spill] sm:$0xff] %v8916_v17  ;;  %v217_v51 = vrot.slane %v215_v36, 7 }
  0x5e   :  { %1998 = vmatpush1.bf16.msra.mxu0 %v8312_v21  ;;  %v594_v21 = vshll.u32 %v8853_v4, 16 }
  0x5f   :  { %1999 = vmatprep.subr.bf16.mxu0 %v13978_v0  ;;  %v604_v56 = vor.u32 %v603_v45, %v599_v44  ;;  %v623_v44 = vshrl.u32 %v8916_v17, 16 }
  0x61   :  { %1759 = vmatmul.mubr.bf16.gmra.mrb[16].mxu0 %v8724_v30  ;;  %v8910_v10 = vsel %vm489_vm3, %v604_v56, %v608_v57 }
  0x62   :  { %1766 = vmatprep.mubr.bf16.mxu0 %v8808_v32  ;;  %2000 = vmatpush1.bf16.msra.mxu0 %v8313_v31  ;;  %v596_v31 = vrot.slane %v594_v21, 1  ;;  %14255 = vst [vmem:[#allocation16_spill] sm:$0xff] %v8910_v10 }
  0x63   :  { %2001 = vmatprep.subr.bf16.mxu0 %v13978_v0 }
  0x64   :  { %v8888_v43 = vsel %vm489_vm3, %v592_v29, %v596_v31  ;;  %v625_v29 = vshll.u32 %v8916_v17, 16  ;;  %v8926_v31 = vsel %vm8571_vm2, %v203_v49, 0 }
  0x65   :  { %14253 = vst [vmem:[#allocation14_spill] sm:$0xff] %v8888_v43  ;;  %v630_v47 = vshll.u32 %v8926_v31, 16 }
  0x66   :  { %2002 = vmatpush1.bf16.msra.mxu0 %v8314_v41  ;;  %v49_v41 = vld [vmem:[%s13971_s0 + $0xb0] sm:$0xff]  ;;  %v627_v45 = vrot.slane %v625_v29, 1  ;;  %v105_v29 = vpack.c.bf16 %v56_v12, %v55_v11 }
  0x67   :  { %2003 = vmatprep.subr.bf16.mxu0 %v13978_v0  ;;  %v632_v60 = vrot.slane %v630_v47, 1 }
  0x68   :  { %v628_v57 = vor.u32 %v627_v45, %v623_v44  ;;  %v8974_v44 = vsel %vm8571_vm2, %v217_v51, 0  ;;  %v229_v47 = vshrl.u32 %v105_v29, 16 }
  0x69   :  { %1767 = vmatmul.mubr.bf16.gmra.mrb[20].mxu0 %v8758_v55 }
  0x6a   :  { %1774 = vmatprep.mubr.bf16.mxu0 %v8839_v53  ;;  %2004 = vmatpush1.bf16.msra.mxu0 %v8315_v52  ;;  %v102_v52 = vpack.c.bf16 %v50_v42, %v49_v41  ;;  %v54_v41 = vld [vmem:[%s13971_s0 + $0xd8] sm:$0xff] }
  0x6b   :  { %2005 = vmatprep.subr.bf16.mxu0 %v13978_v0  ;;  %v104_v56 = vpack.c.bf16 %v54_v41, %v53_v38 }
  0x6c   :  { %v208_v1 = vshrl.u32 %v102_v52, 16  ;;  %v211_v21 = vshll.u32 %v102_v52, 16  ;;  %v218_v52 = vshll.u32 %v103_v23, 16 }
  0x6d   :  { %v222_v3 = vshrl.u32 %v104_v56, 16 }
  0x6e   :  { %2006 = vmatpush1.bf16.msra.mxu0 %v8316_v27  ;;  %v210_v20 = vrot.slane %v208_v1, 7  ;;  %v620_v27 = vrot.slane %v618_v14, 1  ;;  %v220_v2 = vor.u32 %v218_v52, %v217_v51  ;;  %v8958_v14 = vsel %vm489_vm3, %v628_v57, %v632_v60 }
  0x6f   :  { %2007 = vmatprep.subr.bf16.mxu0 %v13978_v0  ;;  %14259 = vst [vmem:[#allocation20_spill] sm:$0xff] %v8958_v14  ;;  %v654_v60 = vshll.u32 %v8974_v44, 16 }
  0x70   :  { %v213_v33 = vor.u32 %v211_v21, %v210_v20  ;;  %v8936_v42 = vsel %vm489_vm3, %v616_v26, %v620_v27  ;;  %v8949_v1 = vsel %vm8571_vm2, %v210_v20, 0  ;;  %v8964_v20 = vsel %vm8571_vm2, 0, %v220_v2 }
  0x71   :  { %1775 = vmatmul.mubr.bf16.gmra.mrb[24].mxu0 %v8784_v15  ;;  %14257 = vst [vmem:[#allocation18_spill] sm:$0xff] %v8936_v42  ;;  %14260 = vst [vmem:[#allocation21_spill] sm:$0xff] %v8964_v20  ;;  %v224_v26 = vrot.slane %v222_v3, 7  ;;  %v225_v27 = vshll.u32 %v104_v56, 16  ;;  %v649_v41 = vshll.u32 %v8964_v20, 16  ;;  %v647_v56 = vshrl.u32 %v8964_v20, 16 }
  0x72   :  { %1782 = vmatprep.mubr.bf16.mxu0 %v8862_v16  ;;  %2008 = vmatpush1.bf16.msra.mxu0 %v8317_v24  ;;  %v8942_v49 = vsel %vm8571_vm2, 0, %v213_v33  ;;  %v642_v24 = vshll.u32 %v8949_v1, 16  ;;  %v8318_v33 = vld [vmem:[%s13970_s1 + $0xe8] sm:$0xff]   ;;  %v231_v2 = vrot.slane %v229_v47, 7  ;;  %v232_v3 = vshll.u32 %v105_v29, 16 }
  0x73   :  { %2009 = vmatprep.subr.bf16.mxu0 %v13978_v0  ;;  %14258 = vst [vmem:[#allocation19_spill] sm:$0xff] %v8942_v49  ;;  %v637_v63 = vshll.u32 %v8942_v49, 16  ;;  %v635_v21 = vshrl.u32 %v8942_v49, 16  ;;  %v227_v45 = vor.u32 %v225_v27, %v224_v26  ;;  %v651_v57 = vrot.slane %v649_v41, 1  ;;  %v60_v27 = vld [vmem:[%s13971_s0 + $0x108] sm:$0xff] }
  0x74   :  { %v644_v38 = vrot.slane %v642_v24, 1  ;;  %v656_v11 = vrot.slane %v654_v60, 1  ;;  %v59_v24 = vld [vmem:[%s13971_s0 + $0x100] sm:$0xff]  ;;  %v9016_v60 = vsel %vm8571_vm2, %v231_v2, 0 }
  0x75   :  { %v639_v23 = vrot.slane %v637_v63, 1  ;;  %v8984_v63 = vsel %vm8571_vm2, 0, %v227_v45  ;;  %v652_v51 = vor.u32 %v651_v57, %v647_v56  ;;  %v107_v41 = vpack.c.bf16 %v60_v27, %v59_v24  ;;  %v8319_v45 = vld [vmem:[%s13970_s1 + $0xf0] sm:$0xff]  }
  0x76   :  { %2010 = vmatpush1.bf16.msra.mxu0 %v8318_v33  ;;  %14262 = vst [vmem:[#allocation23_spill] sm:$0xff] %v8984_v63  ;;  %v661_v12 = vshll.u32 %v8984_v63, 16  ;;  %v659_v33 = vshrl.u32 %v8984_v63, 16 }
  0x77   :  { %v640_v36 = vor.u32 %v639_v23, %v635_v21  ;;  %2011 = vmatprep.subr.bf16.mxu0 %v13978_v0  ;;  %v8991_v21 = vsel %vm8571_vm2, %v224_v26, 0  ;;  %v234_v23 = vor.u32 %v232_v3, %v231_v2  ;;  %v9000_v29 = vsel %vm489_vm3, %v652_v51, %v656_v11  ;;  %v61_v51 = vld [vmem:[%s13971_s0 + $0x110] sm:$0xff]  ;;  %v62_v11 = vld [vmem:[%s13971_s0 + $0x118] sm:$0xff] }
  0x78   :  { %14263 = vst [vmem:[#allocation24_spill] sm:$0xff] %v9000_v29  ;;  %v243_v3 = vshrl.u32 %v107_v41, 16  ;;  %v678_v2 = vshll.u32 %v9016_v60, 16 }
  0x79   :  { %1783 = vmatmul.mubr.bf16.gmra.mrb[28].mxu0 %v8815_v37  ;;  %v8978_v52 = vsel %vm489_vm3, %v640_v36, %v644_v38  ;;  %v663_v36 = vrot.slane %v661_v12, 1  ;;  %v666_v38 = vshll.u32 %v8991_v21, 16  ;;  %v9006_v26 = vsel %vm8571_vm2, 0, %v234_v23 }
  0x7a   :  { %1790 = vmatprep.mubr.bf16.mxu0 %v8888_v43  ;;  %14261 = vst [vmem:[#allocation22_spill] sm:$0xff] %v8978_v52  ;;  %14264 = vst [vmem:[#allocation25_spill] sm:$0xff] %v9006_v26  ;;  %v673_v57 = vshll.u32 %v9006_v26, 16  ;;  %2012 = vmatpush1.bf16.msra.mxu0 %v8319_v45  ;;  %v671_v23 = vshrl.u32 %v9006_v26, 16  ;;  %v245_v27 = vrot.slane %v243_v3, 7  ;;  %v680_v45 = vrot.slane %v678_v2, 1 }
  0x7b   :  { %v664_v47 = vor.u32 %v663_v36, %v659_v33  ;;  %v668_v56 = vrot.slane %v666_v38, 1  ;;  %2013 = vmatprep.subr.bf16.mxu0 %v13978_v0  ;;  %v246_v33 = vshll.u32 %v107_v41, 16  ;;  %v108_v36 = vpack.c.bf16 %v62_v11, %v61_v51 }
  0x7c   :  { %v675_v24 = vrot.slane %v673_v57, 1  ;;  %v9053_v2 = vsel %vm8571_vm2, %v245_v27, 0 }
  0x7d   :  { %v9026_v12 = vsel %vm489_vm3, %v664_v47, %v668_v56  ;;  %v248_v0 = vor.u32 %v246_v33, %v245_v27  ;;  %v63_v47 = vld [vmem:[%s13971_s0 + $0x120] sm:$0xff]  ;;  %v64_v56 = vld [vmem:[%s13971_s0 + $0x128] sm:$0xff]  ;;  %v253_v51 = vshll.u32 %v108_v36, 16 }
  0x7e   :  { %14265 = vst [vmem:[#allocation26_spill] sm:$0xff] %v9026_v12  ;;  %v676_v38 = vor.u32 %v675_v24, %v671_v23  ;;  %v109_v11 = vpack.c.bf16 %v64_v56, %v63_v47  ;;  %v8320_v23 = vld [vmem:[%s13970_s1 + $0xf8] sm:$0xff]   ;;  %v690_v56 = vshll.u32 %v9053_v2, 16 }
  0x7f   :  { %v9043_v41 = vsel %vm8571_vm2, 0, %v248_v0  ;;  %2014 = vmatpush1.bf16.msra.mxu0 %v8320_v23 }
  0x80   :  { %v9039_v57 = vsel %vm489_vm3, %v676_v38, %v680_v45  ;;  %v685_v24 = vshll.u32 %v9043_v41, 16  ;;  %v257_v33 = vshrl.u32 %v109_v11, 16  ;;  %v66_v38 = vld [vmem:[%s13971_s0 + $0x138] sm:$0xff]  ;;  %v683_v45 = vshrl.u32 %v9043_v41, 16 }
  0x81   :  { %1791 = vmatmul.mubr.bf16.gmra.mrb[32].mxu0 %v8844_v58  ;;  %14266 = vst [vmem:[#allocation27_spill] sm:$0xff] %v9039_v57  ;;  %v260_v23 = vshll.u32 %v109_v11, 16  ;;  %v68_v11 = vld [vmem:[%s13971_s0 + $0x148] sm:$0xff] }
  0x82   :  { %1798 = vmatprep.mubr.bf16.mxu0 %v8910_v10  ;;  %v687_v47 = vrot.slane %v685_v24, 1 }
  0x89   :  { %1799 = vmatmul.mubr.bf16.gmra.mrb[36].mxu0 %v8868_v22 }
  0x8a   :  { %1806 = vmatprep.mubr.bf16.mxu0 %v8936_v42 }
  0x91   :  { %1807 = vmatmul.mubr.bf16.gmra.mrb[40].mxu0 %v8894_v48 }
  0x92   :  { %1814 = vmatprep.mubr.bf16.mxu0 %v8958_v14 }
  0x99   :  { %1815 = vmatmul.mubr.bf16.gmra.mrb[44].mxu0 %v8916_v17 }
  0x9a   :  { %1822 = vmatprep.mubr.bf16.mxu0 %v8978_v52  ;;  %v692_v52 = vrot.slane %v690_v56, 1 }
  0xa1   :  { %1823 = vmatmul.mubr.bf16.gmra.mrb[48].mxu0 %v8942_v49 }
  0xa2   :  { %1830 = vmatprep.mubr.bf16.mxu0 %v9000_v29  ;;  %v250_v29 = vshrl.u32 %v108_v36, 16  ;;  %v65_v36 = vld [vmem:[%s13971_s0 + $0x130] sm:$0xff] }
  0xa4   :  { %v252_v3 = vrot.slane %v250_v29, 7  ;;  %v14267_v29 = vmov 0  }
  0xa5   :  { %2272 = vmatprep.subr.bf16.mxu0 %v14267_v29 }
  0xa6   :  { %v255_v0 = vor.u32 %v253_v51, %v252_v3  ;;  %v259_v51 = vrot.slane %v257_v33, 7  ;;  %v9073_v24 = vsel %vm8571_vm2, %v252_v3, 0 }
  0xa8   :  { %v9066_v27 = vsel %vm8571_vm2, 0, %v255_v0  ;;  %v262_v42 = vor.u32 %v260_v23, %v259_v51  ;;  %v67_v0 = vld [vmem:[%s13971_s0 + $0x140] sm:$0xff] }
  0xa9   :  { %1831 = vmatmul.mubr.bf16.gmra.mrb[52].mxu0 %v8964_v20  ;;  %14268 = vst [vmem:[#allocation28_spill] sm:$0xff] %v9066_v27  ;;  %v697_v14 = vshll.u32 %v9066_v27, 16  ;;  %v111_v23 = vpack.c.bf16 %v68_v11, %v67_v0 }
  0xaa   :  { %1838 = vmatprep.mubr.bf16.mxu0 %v9026_v12  ;;  %v688_v12 = vor.u32 %v687_v47, %v683_v45  ;;  %v702_v45 = vshll.u32 %v9073_v24, 16  ;;  %v9088_v3 = vsel %vm8571_vm2, 0, %v262_v42  ;;  %v70_v42 = vld [vmem:[%s13971_s0 + $0x158] sm:$0xff] }
  0xab   :  { %14270 = vst [vmem:[#allocation30_spill] sm:$0xff] %v9088_v3  ;;  %v271_v16 = vshrl.u32 %v111_v23, 16  ;;  %v707_v0 = vshrl.u32 %v9088_v3, 16 }
  0xac   :  { %v9082_v33 = vsel %vm489_vm3, %v688_v12, %v692_v52  ;;  %v704_v43 = vrot.slane %v702_v45, 1  ;;  %v709_v52 = vshll.u32 %v9088_v3, 16  ;;  %v274_v45 = vshll.u32 %v111_v23, 16 }
  0xad   :  { %14269 = vst [vmem:[#allocation29_spill] sm:$0xff] %v9082_v33 }
  0xae   :  { %v711_v11 = vrot.slane %v709_v52, 1 }
  0xb1   :  { %1839 = vmatmul.mubr.bf16.gmra.mrb[56].mxu0 %v8984_v63 }
  0xb2   :  { %1846 = vmatprep.mubr.bf16.mxu0 %v9039_v57  ;;  %v110_v57 = vpack.c.bf16 %v66_v38, %v65_v36  ;;  %v695_v36 = vshrl.u32 %v9066_v27, 16  ;;  %v699_v38 = vrot.slane %v697_v14, 1  ;;  %v9095_v14 = vsel %vm8571_vm2, %v259_v51, 0 }
  0xb4   :  { %v264_v10 = vshrl.u32 %v110_v57, 16  ;;  %v267_v56 = vshll.u32 %v110_v57, 16 }
  0xb6   :  { %v266_v47 = vrot.slane %v264_v10, 7  ;;  %v69_v10 = vld [vmem:[%s13971_s0 + $0x150] sm:$0xff] }
  0xb8   :  { %v269_v12 = vor.u32 %v267_v56, %v266_v47  ;;  %v112_v56 = vpack.c.bf16 %v70_v42, %v69_v10  ;;  %v71_v42 = vld [vmem:[%s13971_s0 + $0x160] sm:$0xff] }
  0xb9   :  { %1847 = vmatmul.mubr.bf16.gmra.mrb[60].mxu0 %v9006_v26 }
  0xba   :  { %1854 = vmatprep.mubr.bf16.mxu0 %v8595_v18  ;;  %v700_v18 = vor.u32 %v699_v38, %v695_v36  ;;  %v714_v36 = vshll.u32 %v9095_v14, 16  ;;  %v9110_v51 = vsel %vm8571_vm2, 0, %v269_v12  ;;  %v273_v38 = vrot.slane %v271_v16, 7 }
  0xbb   :  { %14272 = vst [vmem:[#allocation32_spill] sm:$0xff] %v9110_v51  ;;  %v721_v52 = vshll.u32 %v9110_v51, 16  ;;  %v9119_v12 = vsel %vm8571_vm2, %v266_v47, 0  ;;  %v278_v23 = vshrl.u32 %v112_v56, 16  ;;  %v719_v47 = vshrl.u32 %v9110_v51, 16 }
  0xbc   :  { %v9104_v57 = vsel %vm489_vm3, %v700_v18, %v704_v43  ;;  %v963_v18 = vrot.slane %v8675_v61, 1  ;;  %v712_v43 = vor.u32 %v711_v11, %v707_v0  ;;  %v716_v53 = vrot.slane %v714_v36, 1  ;;  %14273 = vst [vmem:[#allocation33_spill] sm:$0xff] %v9119_v12  ;;  %v72_v61 = vld [vmem:[%s13971_s0 + $0x168] sm:$0xff] }
  0xbd   :  { %14271 = vst [vmem:[#allocation31_spill] sm:$0xff] %v9104_v57  ;;  %v276_v16 = vor.u32 %v274_v45, %v273_v38  ;;  %v723_v11 = vrot.slane %v721_v52, 1  ;;  %v726_v36 = vshll.u32 %v9119_v12, 16  ;;  %v280_v45 = vrot.slane %v278_v23, 7 }
  0xbe   :  { %v9132_v0 = vsel %vm489_vm3, %v712_v43, %v716_v53  ;;  %v9145_v43 = vsel %vm8571_vm2, %v273_v38, 0 }
  0xbf   :  { %14274 = vst [vmem:[#allocation34_spill] sm:$0xff] %v9132_v0  ;;  %v724_v32 = vor.u32 %v723_v11, %v719_v47  ;;  %v728_v5 = vrot.slane %v726_v36, 1  ;;  %14276 = vst [vmem:[#allocation36_spill] sm:$0xff] %v9145_v43  ;;  %v738_v47 = vshll.u32 %v9145_v43, 16 }
  0xc1   :  { %1855 = vmatmul.mubr.bf16.gmra.mrb[64].mxu0 %v8577_v8  ;;  %v9154_v23 = vsel %vm489_vm3, %v724_v32, %v728_v5  ;;  %v740_v28 = vrot.slane %v738_v47, 1  ;;  %v9167_v32 = vsel %vm8571_vm2, %v280_v45, 0 }
  0xc2   :  { %1862 = vmatprep.mubr.bf16.mxu0 %v9082_v33  ;;  %v962_v33 = vrot.slane %v8667_v54, 1  ;;  %14277 = vst [vmem:[#allocation37_spill] sm:$0xff] %v9154_v23  ;;  %14279 = vst [vmem:[#allocation39_spill] sm:$0xff] %v9167_v32 }
  0xc4   :  { %v9122_v10 = vsel %vm955_vm4, %v962_v33, %v963_v18  ;;  %v9138_v33 = vsel %vm8571_vm2, 0, %v276_v16  ;;  %v281_v18 = vshll.u32 %v112_v56, 16  ;;  %v73_v16 = vld [vmem:[%s13971_s0 + $0x170] sm:$0xff]  ;;  %v74_v56 = vld [vmem:[%s13971_s0 + $0x178] sm:$0xff] }
  0xc5   :  { %7360 = vmatprep.mubr.bf16.mxu1 %v9122_v10  ;;  %14275 = vst [vmem:[#allocation35_spill] sm:$0xff] %v9138_v33  ;;  %v733_v53 = vshll.u32 %v9138_v33, 16 }
  0xc6   :  { %v283_v52 = vor.u32 %v281_v18, %v280_v45  ;;  %v114_v18 = vpack.c.bf16 %v74_v56, %v73_v16 }
  0xc8   :  { %v9160_v38 = vsel %vm8571_vm2, 0, %v283_v52  ;;  %v292_v6 = vshrl.u32 %v114_v18, 16  ;;  %v295_v47 = vshll.u32 %v114_v18, 16  ;;  %v78_v18 = vld [vmem:[%s13971_s0 + $0x198] sm:$0xff] }
  0xc9   :  { %1863 = vmatmul.mubr.bf16.gmra.mrb[68].mxu0 %v9043_v41  ;;  %14278 = vst [vmem:[#allocation38_spill] sm:$0xff] %v9160_v38  ;;  %v745_v5 = vshll.u32 %v9160_v38, 16  ;;  %v743_v16 = vshrl.u32 %v9160_v38, 16 }
  0xca   :  { %1870 = vmatprep.mubr.bf16.mxu0 %v9104_v57  ;;  %v113_v57 = vpack.c.bf16 %v72_v61, %v71_v42  ;;  %v731_v42 = vshrl.u32 %v9138_v33, 16  ;;  %v735_v61 = vrot.slane %v733_v53, 1 }
  0xcb   :  { %v747_v56 = vrot.slane %v745_v5, 1 }
  0xcc   :  { %v285_v50 = vshrl.u32 %v113_v57, 16  ;;  %v288_v36 = vshll.u32 %v113_v57, 16  ;;  %v76_v57 = vld [vmem:[%s13971_s0 + $0x188] sm:$0xff] }
  0xce   :  { %v287_v11 = vrot.slane %v285_v50, 7  ;;  %v75_v50 = vld [vmem:[%s13971_s0 + $0x180] sm:$0xff] }
  0xd0   :  { %v290_v53 = vor.u32 %v288_v36, %v287_v11  ;;  %v115_v36 = vpack.c.bf16 %v76_v57, %v75_v50 }
  0xd1   :  { %1871 = vmatmul.mubr.bf16.gmra.mrb[72].mxu0 %v9066_v27 }
  0xd2   :  { %1878 = vmatprep.mubr.bf16.mxu0 %v9132_v0  ;;  %v736_v0 = vor.u32 %v735_v61, %v731_v42  ;;  %v750_v42 = vshll.u32 %v9167_v32, 16  ;;  %v9182_v45 = vsel %vm8571_vm2, 0, %v290_v53  ;;  %v294_v61 = vrot.slane %v292_v6, 7  ;;  %v77_v6 = vld [vmem:[%s13971_s0 + $0x190] sm:$0xff] }
  0xd3   :  { %14281 = vst [vmem:[#allocation41_spill] sm:$0xff] %v9182_v45  ;;  %v299_v32 = vshrl.u32 %v115_v36, 16  ;;  %v755_v50 = vshrl.u32 %v9182_v45, 16 }
  0xd4   :  { %v9176_v52 = vsel %vm489_vm3, %v736_v0, %v740_v28  ;;  %v752_v43 = vrot.slane %v750_v42, 1  ;;  %v757_v28 = vshll.u32 %v9182_v45, 16  ;;  %v9189_v0 = vsel %vm8571_vm2, %v287_v11, 0 }
  0xd5   :  { %14280 = vst [vmem:[#allocation40_spill] sm:$0xff] %v9176_v52  ;;  %14282 = vst [vmem:[#allocation42_spill] sm:$0xff] %v9189_v0  ;;  %v297_v5 = vor.u32 %v295_v47, %v294_v61  ;;  %v302_v42 = vshll.u32 %v115_v36, 16  ;;  %v116_v47 = vpack.c.bf16 %v78_v18, %v77_v6  ;;  %v80_v36 = vld [vmem:[%s13971_s0 + $0x1a8] sm:$0xff] }
  0xd6   :  { %v759_v57 = vrot.slane %v757_v28, 1 }
  0xd7   :  { %v9204_v11 = vsel %vm8571_vm2, 0, %v297_v5 }
  0xd8   :  { %14284 = vst [vmem:[#allocation44_spill] sm:$0xff] %v9204_v11  ;;  %v767_v6 = vshrl.u32 %v9204_v11, 16 }
  0xd9   :  { %1879 = vmatmul.mubr.bf16.gmra.mrb[76].mxu0 %v9088_v3 }
  0xda   :  { %1886 = vmatprep.mubr.bf16.mxu0 %v9154_v23  ;;  %v748_v23 = vor.u32 %v747_v56, %v743_v16  ;;  %v762_v16 = vshll.u32 %v9189_v0, 16  ;;  %v301_v56 = vrot.slane %v299_v32, 7  ;;  %v306_v0 = vshrl.u32 %v116_v47, 16  ;;  %v79_v32 = vld [vmem:[%s13971_s0 + $0x1a0] sm:$0xff] }
  0xdc   :  { %v9198_v53 = vsel %vm489_vm3, %v748_v23, %v752_v43  ;;  %v764_v12 = vrot.slane %v762_v16, 1  ;;  %v769_v43 = vshll.u32 %v9204_v11, 16  ;;  %v9211_v23 = vsel %vm8571_vm2, %v294_v61, 0 }
  0xdd   :  { %14283 = vst [vmem:[#allocation43_spill] sm:$0xff] %v9198_v53  ;;  %14285 = vst [vmem:[#allocation45_spill] sm:$0xff] %v9211_v23  ;;  %v304_v28 = vor.u32 %v302_v42, %v301_v56  ;;  %v309_v16 = vshll.u32 %v116_v47, 16  ;;  %v117_v42 = vpack.c.bf16 %v80_v36, %v79_v32  ;;  %v82_v47 = vld [vmem:[%s13971_s0 + $0x1b8] sm:$0xff] }
  0xde   :  { %v771_v18 = vrot.slane %v769_v43, 1 }
  0xdf   :  { %v9226_v61 = vsel %vm8571_vm2, 0, %v304_v28 }
  0xe0   :  { %14287 = vst [vmem:[#allocation47_spill] sm:$0xff] %v9226_v61  ;;  %v779_v32 = vshrl.u32 %v9226_v61, 16 }
  0xe1   :  { %1887 = vmatmul.mubr.bf16.gmra.mrb[80].mxu0 %v9110_v51 }
  0xe2   :  { %1894 = vmatprep.mubr.bf16.mxu0 %v9176_v52  ;;  %v760_v52 = vor.u32 %v759_v57, %v755_v50  ;;  %v774_v50 = vshll.u32 %v9211_v23, 16  ;;  %v308_v57 = vrot.slane %v306_v0, 7  ;;  %v313_v23 = vshrl.u32 %v117_v42, 16  ;;  %v81_v0 = vld [vmem:[%s13971_s0 + $0x1b0] sm:$0xff] }
  0xe4   :  { %v9220_v5 = vsel %vm489_vm3, %v760_v52, %v764_v12  ;;  %v781_v12 = vshll.u32 %v9226_v61, 16  ;;  %v9233_v52 = vsel %vm8571_vm2, %v301_v56, 0  ;;  %v311_v43 = vor.u32 %v309_v16, %v308_v57 }
  0xe5   :  { %14286 = vst [vmem:[#allocation46_spill] sm:$0xff] %v9220_v5  ;;  %14288 = vst [vmem:[#allocation48_spill] sm:$0xff] %v9233_v52  ;;  %v118_v16 = vpack.c.bf16 %v82_v47, %v81_v0 }
  0xe6   :  { %v783_v36 = vrot.slane %v781_v12, 1  ;;  %v9248_v56 = vsel %vm8571_vm2, 0, %v311_v43 }
  0xe7   :  { %14290 = vst [vmem:[#allocation50_spill] sm:$0xff] %v9248_v56  ;;  %v791_v0 = vshrl.u32 %v9248_v56, 16 }
  0xe9   :  { %1895 = vmatmul.mubr.bf16.gmra.mrb[84].mxu0 %v9138_v33  ;;  %v776_v33 = vrot.slane %v774_v50, 1  ;;  %v316_v50 = vshll.u32 %v117_v42, 16  ;;  %v84_v42 = vld [vmem:[%s13971_s0 + $0x1c8] sm:$0xff] }
  0xea   :  { %1902 = vmatprep.mubr.bf16.mxu0 %v9198_v53  ;;  %v772_v53 = vor.u32 %v771_v18, %v767_v6  ;;  %v786_v6 = vshll.u32 %v9233_v52, 16  ;;  %v315_v18 = vrot.slane %v313_v23, 7  ;;  %v320_v52 = vshrl.u32 %v118_v16, 16  ;;  %v83_v23 = vld [vmem:[%s13971_s0 + $0x1c0] sm:$0xff] }
  0xec   :  { %v9242_v28 = vsel %vm489_vm3, %v772_v53, %v776_v33  ;;  %v793_v33 = vshll.u32 %v9248_v56, 16  ;;  %v9255_v53 = vsel %vm8571_vm2, %v308_v57, 0  ;;  %v318_v12 = vor.u32 %v316_v50, %v315_v18 }
  0xed   :  { %14289 = vst [vmem:[#allocation49_spill] sm:$0xff] %v9242_v28  ;;  %14291 = vst [vmem:[#allocation51_spill] sm:$0xff] %v9255_v53  ;;  %v119_v50 = vpack.c.bf16 %v84_v42, %v83_v23 }
  0xee   :  { %v795_v47 = vrot.slane %v793_v33, 1  ;;  %v9270_v57 = vsel %vm8571_vm2, 0, %v318_v12 }
  0xef   :  { %14293 = vst [vmem:[#allocation53_spill] sm:$0xff] %v9270_v57  ;;  %v803_v23 = vshrl.u32 %v9270_v57, 16 }
  0xf1   :  { %1903 = vmatmul.mubr.bf16.gmra.mrb[88].mxu0 %v9160_v38  ;;  %v788_v38 = vrot.slane %v786_v6, 1  ;;  %v323_v6 = vshll.u32 %v118_v16, 16  ;;  %v86_v16 = vld [vmem:[%s13971_s0 + $0x1d8] sm:$0xff] }
  0xf2   :  { %1910 = vmatprep.mubr.bf16.mxu0 %v9220_v5  ;;  %v784_v5 = vor.u32 %v783_v36, %v779_v32  ;;  %v798_v32 = vshll.u32 %v9255_v53, 16  ;;  %v322_v36 = vrot.slane %v320_v52, 7  ;;  %v327_v53 = vshrl.u32 %v119_v50, 16  ;;  %v85_v52 = vld [vmem:[%s13971_s0 + $0x1d0] sm:$0xff] }
  0xf4   :  { %v9264_v43 = vsel %vm489_vm3, %v784_v5, %v788_v38  ;;  %v805_v38 = vshll.u32 %v9270_v57, 16  ;;  %v9277_v5 = vsel %vm8571_vm2, %v315_v18, 0  ;;  %v325_v33 = vor.u32 %v323_v6, %v322_v36 }
  0xf5   :  { %14292 = vst [vmem:[#allocation52_spill] sm:$0xff] %v9264_v43  ;;  %14294 = vst [vmem:[#allocation54_spill] sm:$0xff] %v9277_v5  ;;  %v120_v6 = vpack.c.bf16 %v86_v16, %v85_v52 }
  0xf6   :  { %v807_v42 = vrot.slane %v805_v38, 1  ;;  %v9292_v18 = vsel %vm8571_vm2, 0, %v325_v33 }
  0xf7   :  { %14296 = vst [vmem:[#allocation56_spill] sm:$0xff] %v9292_v18  ;;  %v815_v52 = vshrl.u32 %v9292_v18, 16 }
  0xf9   :  { %1911 = vmatmul.mubr.bf16.gmra.mrb[92].mxu0 %v9182_v45  ;;  %v800_v45 = vrot.slane %v798_v32, 1  ;;  %v330_v32 = vshll.u32 %v119_v50, 16  ;;  %v88_v50 = vld [vmem:[%s13971_s0 + $0x1e8] sm:$0xff] }
  0xfa   :  { %1918 = vmatprep.mubr.bf16.mxu0 %v9242_v28  ;;  %v796_v28 = vor.u32 %v795_v47, %v791_v0  ;;  %v810_v0 = vshll.u32 %v9277_v5, 16  ;;  %v329_v47 = vrot.slane %v327_v53, 7  ;;  %v334_v5 = vshrl.u32 %v120_v6, 16  ;;  %v87_v53 = vld [vmem:[%s13971_s0 + $0x1e0] sm:$0xff] }
  0xfc   :  { %v9286_v12 = vsel %vm489_vm3, %v796_v28, %v800_v45  ;;  %v817_v45 = vshll.u32 %v9292_v18, 16  ;;  %v9299_v28 = vsel %vm8571_vm2, %v322_v36, 0  ;;  %v332_v38 = vor.u32 %v330_v32, %v329_v47 }
  0xfd   :  { %14295 = vst [vmem:[#allocation55_spill] sm:$0xff] %v9286_v12  ;;  %14297 = vst [vmem:[#allocation57_spill] sm:$0xff] %v9299_v28  ;;  %v121_v32 = vpack.c.bf16 %v88_v50, %v87_v53 }
  0xfe   :  { %v819_v16 = vrot.slane %v817_v45, 1  ;;  %v9314_v36 = vsel %vm8571_vm2, 0, %v332_v38 }
  0xff   :  { %14298 = vst [vmem:[#allocation58_spill] sm:$0xff] %v9314_v36 }
 0x101   :  { %1919 = vmatmul.mubr.bf16.gmra.mrb[96].mxu0 %v9204_v11  ;;  %v812_v11 = vrot.slane %v810_v0, 1  ;;  %v337_v0 = vshll.u32 %v120_v6, 16 }
 0x102   :  { %1926 = vmatprep.mubr.bf16.mxu0 %v9264_v43  ;;  %v808_v43 = vor.u32 %v807_v42, %v803_v23  ;;  %v822_v23 = vshll.u32 %v9299_v28, 16  ;;  %v336_v42 = vrot.slane %v334_v5, 7  ;;  %v341_v28 = vshrl.u32 %v121_v32, 16 }
 0x103   :  { %v827_v5 = vshrl.u32 %v9314_v36, 16 }
 0x104   :  { %v9308_v33 = vsel %vm489_vm3, %v808_v43, %v812_v11  ;;  %v829_v11 = vshll.u32 %v9314_v36, 16  ;;  %v9321_v43 = vsel %vm8571_vm2, %v329_v47, 0  ;;  %v339_v45 = vor.u32 %v337_v0, %v336_v42 }
 0x105   :  { %v834_v53 = vshll.u32 %v9321_v43, 16 }
 0x106   :  { %v831_v6 = vrot.slane %v829_v11, 1  ;;  %v9330_v50 = vsel %vm8571_vm2, 0, %v339_v45 }
 0x107   :  { %14300 = vst [vmem:[#allocation60_spill] sm:$0xff] %v9330_v50  ;;  %v839_v45 = vshrl.u32 %v9330_v50, 16 }
 0x108   :  { %v832_v47 = vor.u32 %v831_v6, %v827_v5 }
 0x109   :  { %1927 = vmatmul.mubr.bf16.gmra.mrb[100].mxu0 %v9226_v61  ;;  %v824_v61 = vrot.slane %v822_v23, 1  ;;  %v836_v23 = vrot.slane %v834_v53, 1 }
 0x10a   :  { %1934 = vmatprep.mubr.bf16.mxu0 %v9286_v12  ;;  %v820_v12 = vor.u32 %v819_v16, %v815_v52  ;;  %v343_v52 = vrot.slane %v341_v28, 7  ;;  %v344_v16 = vshll.u32 %v121_v32, 16 }
 0x10b   :  { %v9340_v11 = vsel %vm489_vm3, %v832_v47, %v836_v23 }
 0x10c   :  { %v9324_v38 = vsel %vm489_vm3, %v820_v12, %v824_v61  ;;  %v841_v61 = vshll.u32 %v9330_v50, 16  ;;  %v9337_v12 = vsel %vm8571_vm2, %v336_v42, 0  ;;  %v346_v0 = vor.u32 %v344_v16, %v343_v52 }
 0x10d   :  { %14299 = vst [vmem:[#allocation59_spill] sm:$0xff] %v9324_v38  ;;  %v846_v32 = vshll.u32 %v9337_v12, 16  ;;  %v9353_v53 = vsel %vm8571_vm2, %v343_v52, 0  ;;  %v956_v52 = vrot.slane %v8577_v8, 1  ;;  %v14311_v8 = vld [vmem:[#allocation47_spill] sm:$0xff] }
 0x10e   :  { %v843_v28 = vrot.slane %v841_v61, 1  ;;  %v858_v61 = vshll.u32 %v9353_v53, 16 }
 0x10f   :  { %v848_v42 = vrot.slane %v846_v32, 1  ;;  %v957_v32 = vrot.slane %v8581_v9, 1  ;;  %v8322_v9 = vld [vmem:[%s13970_s1 + $0x108] sm:$0xff]  }
 0x110   :  { %v844_v5 = vor.u32 %v843_v28, %v839_v45  ;;  %v860_v45 = vrot.slane %v858_v61, 1  ;;  %v8323_v61 = vld [vmem:[%s13970_s1 + $0x110] sm:$0xff]  }
 0x111   :  { %1935 = vmatmul.mubr.bf16.gmra.mrb[104].mxu0 %v9248_v56 }
 0x112   :  { %1942 = vmatprep.mubr.bf16.mxu0 %v9308_v33  ;;  %v9356_v16 = vsel %vm489_vm3, %v844_v5, %v848_v42  ;;  %v9372_v5 = vsel %vm955_vm4, %v956_v52, %v957_v32  ;;  %v8321_v42 = vld [vmem:[%s13970_s1 + $0x100] sm:$0xff]   ;;  %v8326_v52 = vld [vmem:[%s13970_s1 + $0x128] sm:$0xff]  }
 0x113   :  { %14302 = vst [vmem:[#allocation62_spill] sm:$0xff] %v9372_v5 }
 0x119   :  { %1943 = vmatmul.mubr.bf16.gmra.mrb[108].mxu0 %v9270_v57 }
 0x11a   :  { %1950 = vmatprep.mubr.bf16.mxu0 %v9324_v38  ;;  %v9346_v38 = vsel %vm8571_vm2, 0, %v346_v0 }
 0x11b   :  { %14301 = vst [vmem:[#allocation61_spill] sm:$0xff] %v9346_v38  ;;  %v853_v6 = vshll.u32 %v9346_v38, 16  ;;  %v851_v47 = vshrl.u32 %v9346_v38, 16 }
 0x11d   :  { %v855_v23 = vrot.slane %v853_v6, 1  ;;  %v959_v6 = vrot.slane %v8642_v39, 1 }
 0x11f   :  { %v856_v0 = vor.u32 %v855_v23, %v851_v47  ;;  %v960_v47 = vrot.slane %v8657_v46, 1  ;;  %v8325_v46 = vld [vmem:[%s13970_s1 + $0x120] sm:$0xff]  }
 0x121   :  { %1951 = vmatmul.mubr.bf16.gmra.mrb[112].mxu0 %v9292_v18  ;;  %v9363_v28 = vsel %vm489_vm3, %v856_v0, %v860_v45  ;;  %v9386_v23 = vsel %vm955_vm4, %v959_v6, %v960_v47  ;;  %v965_v0 = vrot.slane %v8695_v13, 1  ;;  %v966_v45 = vrot.slane %v8705_v19, 1  ;;  %v8328_v47 = vld [vmem:[%s13970_s1 + $0x138] sm:$0xff]  }
 0x122   :  { %1958 = vmatprep.mubr.bf16.mxu0 %v9340_v11  ;;  %v968_v19 = vrot.slane %v8724_v30, 1  ;;  %v969_v6 = vrot.slane %v8731_v34, 1  ;;  %v971_v34 = vrot.slane %v8758_v55, 1 }
 0x123   :  { %v9411_v32 = vsel %vm955_vm4, %v965_v0, %v966_v45  ;;  %v8331_v45 = vld [vmem:[%s13970_s1 + $0x150] sm:$0xff]  }
 0x129   :  { %1959 = vmatmul.mubr.bf16.gmra.mrb[116].mxu0 %v9314_v36 }
 0x12a   :  { %1966 = vmatprep.mubr.bf16.mxu0 %v9356_v16 }
 0x131   :  { %1967 = vmatmul.mubr.bf16.gmra.mrb[120].mxu0 %v9330_v50 }
 0x132   :  { %1974 = vmatprep.mubr.bf16.mxu0 %v9363_v28 }
 0x139   :  { %1975 = vmatmul.mubr.bf16.gmra.mrb[124].mxu0 %v9346_v38 }
 0x13a   :  { %2015 = vmatprep.mubr.bf16.mxu0 %v8642_v39  ;;  %v8324_v39 = vld [vmem:[%s13970_s1 + $0x118] sm:$0xff]  }
 0x141   :  { %2016 = vmatmul.mubr.bf16.vlgmr.msra.gmra.mrb[0].mxu0 %v9372_v5 }
 0x142   :  { %2273 = vmatpush1.bf16.msra.mxu0 %v8321_v42  ;;  %2023 = vmatprep.mubr.bf16.mxu0 %v8667_v54  ;;  %v8327_v42 = vld [vmem:[%s13970_s1 + $0x130] sm:$0xff]  }
 0x143   :  { %2274 = vmatprep.subr.bf16.mxu0 %v14267_v29 }
 0x146   :  { %2275 = vmatpush1.bf16.msra.mxu0 %v8322_v9  ;;  %v9426_v9 = vsel %vm955_vm4, %v968_v19, %v969_v6  ;;  %v8332_v19 = vld [vmem:[%s13970_s1 + $0x158] sm:$0xff]   ;;  %v977_v6 = vrot.slane %v8815_v37, 1 }
 0x147   :  { %2276 = vmatprep.subr.bf16.mxu0 %v14267_v29 }
 0x149   :  { %2024 = vmatmul.mubr.bf16.gmra.mrb[4].mxu0 %v9386_v23 }
 0x14a   :  { %2031 = vmatprep.mubr.bf16.mxu0 %v8695_v13  ;;  %2277 = vmatpush1.bf16.msra.mxu0 %v8323_v61  ;;  %v8329_v61 = vld [vmem:[%s13970_s1 + $0x140] sm:$0xff]  }
 0x14b   :  { %2278 = vmatprep.subr.bf16.mxu0 %v14267_v29 }
 0x14e   :  { %2279 = vmatpush1.bf16.msra.mxu0 %v8324_v39  ;;  %v972_v39 = vrot.slane %v8767_v59, 1  ;;  %v974_v59 = vrot.slane %v8784_v15, 1 }
 0x14f   :  { %2280 = vmatprep.subr.bf16.mxu0 %v14267_v29 }
 0x150   :  { %v9441_v0 = vsel %vm955_vm4, %v971_v34, %v972_v39  ;;  %v981_v34 = vrot.slane %v8853_v4, 1 }
 0x151   :  { %2032 = vmatmul.mubr.bf16.gmra.mrb[8].mxu0 %v9122_v10 }
 0x152   :  { %2039 = vmatprep.mubr.bf16.mxu0 %v8724_v30  ;;  %2281 = vmatpush1.bf16.msra.mxu0 %v8325_v46  ;;  %v8330_v46 = vld [vmem:[%s13970_s1 + $0x148] sm:$0xff]  }
 0x153   :  { %2282 = vmatprep.subr.bf16.mxu0 %v14267_v29 }
 0x156   :  { %2283 = vmatpush1.bf16.msra.mxu0 %v8326_v52  ;;  %v975_v52 = vrot.slane %v8802_v25, 1 }
 0x157   :  { %2284 = vmatprep.subr.bf16.mxu0 %v14267_v29 }
 0x159   :  { %2040 = vmatmul.mubr.bf16.gmra.mrb[12].mxu0 %v9411_v32 }
 0x15a   :  { %2047 = vmatprep.mubr.bf16.mxu0 %v8758_v55  ;;  %2285 = vmatpush1.bf16.msra.mxu0 %v8327_v42  ;;  %v9453_v42 = vsel %vm955_vm4, %v974_v59, %v975_v52  ;;  %v986_v59 = vrot.slane %v8894_v48, 1  ;;  %v987_v52 = vrot.slane %v8901_v62, 1 }
 0x15b   :  { %2286 = vmatprep.subr.bf16.mxu0 %v14267_v29 }
 0x15e   :  { %2287 = vmatpush1.bf16.msra.mxu0 %v8328_v47  ;;  %v978_v47 = vrot.slane %v8820_v40, 1  ;;  %v8333_v40 = vld [vmem:[%s13970_s1 + $0x160] sm:$0xff]  }
 0x15f   :  { %2288 = vmatprep.subr.bf16.mxu0 %v14267_v29 }
 0x160   :  { %v9464_v25 = vsel %vm955_vm4, %v977_v6, %v978_v47  ;;  %v989_v6 = vrot.slane %v8916_v17, 1  ;;  %v990_v47 = vrot.slane %v8926_v31, 1  ;;  %v58_v31 = vld [vmem:[%s13971_s0 + $0xf8] sm:$0xff] }
 0x161   :  { %2048 = vmatmul.mubr.bf16.gmra.mrb[16].mxu0 %v9426_v9 }
 0x162   :  { %2055 = vmatprep.mubr.bf16.mxu0 %v8784_v15  ;;  %2289 = vmatpush1.bf16.msra.mxu0 %v8329_v61  ;;  %v980_v61 = vrot.slane %v8844_v58, 1  ;;  %v9500_v62 = vsel %vm955_vm4, %v989_v6, %v990_v47 }
 0x163   :  { %2290 = vmatprep.subr.bf16.mxu0 %v14267_v29 }
 0x164   :  { %v9471_v39 = vsel %vm955_vm4, %v980_v61, %v981_v34  ;;  %v992_v61 = vrot.slane %v8942_v49, 1  ;;  %v993_v34 = vrot.slane %v8949_v1, 1  ;;  %v995_v1 = vrot.slane %v8964_v20, 1 }
 0x166   :  { %2291 = vmatpush1.bf16.msra.mxu0 %v8330_v46  ;;  %v983_v46 = vrot.slane %v8868_v22, 1 }
 0x167   :  { %2292 = vmatprep.subr.bf16.mxu0 %v14267_v29 }
 0x169   :  { %2056 = vmatmul.mubr.bf16.gmra.mrb[20].mxu0 %v9441_v0 }
 0x16a   :  { %2063 = vmatprep.mubr.bf16.mxu0 %v8815_v37  ;;  %2293 = vmatpush1.bf16.msra.mxu0 %v8331_v45  ;;  %v984_v45 = vrot.slane %v8878_v35, 1  ;;  %v8334_v35 = vld [vmem:[%s13970_s1 + $0x168] sm:$0xff]  }
 0x16b   :  { %2294 = vmatprep.subr.bf16.mxu0 %v14267_v29 }
 0x16c   :  { %v9482_v4 = vsel %vm955_vm4, %v983_v46, %v984_v45  ;;  %v9513_v46 = vsel %vm955_vm4, %v992_v61, %v993_v34  ;;  %v998_v34 = vrot.slane %v8984_v63, 1 }
 0x16e   :  { %2295 = vmatpush1.bf16.msra.mxu0 %v8332_v19  ;;  %v9489_v19 = vsel %vm955_vm4, %v986_v59, %v987_v52  ;;  %v8335_v59 = vld [vmem:[%s13970_s1 + $0x170] sm:$0xff]   ;;  %v996_v52 = vrot.slane %v8974_v44, 1 }
 0x16f   :  { %2296 = vmatprep.subr.bf16.mxu0 %v14267_v29 }
 0x170   :  { %v9524_v6 = vsel %vm955_vm4, %v995_v1, %v996_v52  ;;  %v1001_v1 = vrot.slane %v9006_v26, 1 }
 0x171   :  { %2064 = vmatmul.mubr.bf16.gmra.mrb[24].mxu0 %v9453_v42 }
 0x172   :  { %2071 = vmatprep.mubr.bf16.mxu0 %v8844_v58  ;;  %2297 = vmatpush1.bf16.msra.mxu0 %v8333_v40  ;;  %v57_v40 = vld [vmem:[%s13971_s0 + $0xf0] sm:$0xff]  ;;  %v8358_v58 = vld [vmem:[%s13970_s1 + $0x228] sm:$0xff]  }
 0x173   :  { %2298 = vmatprep.subr.bf16.mxu0 %v14267_v29  ;;  %v106_v45 = vpack.c.bf16 %v58_v31, %v57_v40  ;;  %v999_v40 = vrot.slane %v8991_v21, 1  ;;  %v1002_v21 = vrot.slane %v9016_v60, 1 }
 0x175   :  { %v239_v61 = vshll.u32 %v106_v45, 16  ;;  %v9534_v31 = vsel %vm955_vm4, %v998_v34, %v999_v40  ;;  %v9549_v52 = vsel %vm955_vm4, %v1001_v1, %v1002_v21  ;;  %v1007_v34 = vrot.slane %v9066_v27, 1  ;;  %v14303_v1 = vld [vmem:[#allocation35_spill] sm:$0xff]  ;;  %v14304_v21 = vld [vmem:[#allocation33_spill] sm:$0xff] }
 0x176   :  { %2299 = vmatpush1.bf16.msra.mxu0 %v8334_v35  ;;  %v236_v35 = vshrl.u32 %v106_v45, 16  ;;  %v8336_v45 = vld [vmem:[%s13970_s1 + $0x178] sm:$0xff]   ;;  %v1008_v40 = vrot.slane %v9073_v24, 1  ;;  %v1013_v24 = vrot.slane %v9110_v51, 1 }
 0x177   :  { %2300 = vmatprep.subr.bf16.mxu0 %v14267_v29 }
 0x178   :  { %v9526_v47 = vrot.slane %v236_v35, 7  ;;  %v1004_v35 = vrot.slane %v9043_v41, 1 }
 0x179   :  { %2072 = vmatmul.mubr.bf16.gmra.mrb[28].mxu0 %v9464_v25 }
 0x17a   :  { %2079 = vmatprep.mubr.bf16.mxu0 %v8868_v22  ;;  %2301 = vmatpush1.bf16.msra.mxu0 %v8335_v59  ;;  %v241_v44 = vor.u32 %v239_v61, %v9526_v47  ;;  %v1005_v61 = vrot.slane %v9053_v2, 1  ;;  %v1011_v2 = vrot.slane %v9095_v14, 1  ;;  %v1016_v14 = vrot.slane %v14303_v1, 1  ;;  %v14331_v22 = vld [vmem:[#allocation27_spill] sm:$0xff] }
 0x17b   :  { %2302 = vmatprep.subr.bf16.mxu0 %v14267_v29 }
 0x17c   :  { %v9538_v59 = vsel %vm8571_vm2, 0, %v241_v44  ;;  %v9558_v60 = vsel %vm955_vm4, %v1004_v35, %v1005_v61  ;;  %v9565_v44 = vsel %vm955_vm4, %v1007_v34, %v1008_v40  ;;  %v1014_v35 = vrot.slane %v14304_v21, 1  ;;  %v14305_v34 = vld [vmem:[#allocation38_spill] sm:$0xff]  ;;  %v14306_v40 = vld [vmem:[#allocation36_spill] sm:$0xff] }
 0x17d   :  { %v1019_v21 = vrot.slane %v14305_v34, 1 }
 0x17e   :  { %2303 = vmatpush1.bf16.msra.mxu0 %v8336_v45  ;;  %v9579_v61 = vsel %vm955_vm4, %v1013_v24, %v1014_v35 }
 0x17f   :  { %2561 = vmatprep.subr.bf16.mxu0 %v14267_v29 }
 0x181   :  { %2080 = vmatmul.mubr.bf16.gmra.mrb[32].mxu0 %v9471_v39 }
 0x182   :  { %2087 = vmatprep.mubr.bf16.mxu0 %v8894_v48 }
 0x189   :  { %2088 = vmatmul.mubr.bf16.gmra.mrb[36].mxu0 %v9482_v4 }
 0x18a   :  { %2095 = vmatprep.mubr.bf16.mxu0 %v8916_v17  ;;  %v8355_v17 = vld [vmem:[%s13970_s1 + $0x218] sm:$0xff]  }
 0x191   :  { %2096 = vmatmul.mubr.bf16.gmra.mrb[40].mxu0 %v9489_v19 }
 0x192   :  { %2103 = vmatprep.mubr.bf16.mxu0 %v8942_v49  ;;  %v8352_v49 = vld [vmem:[%s13970_s1 + $0x1f0] sm:$0xff]  }
 0x199   :  { %2104 = vmatmul.mubr.bf16.gmra.mrb[44].mxu0 %v9500_v62 }
 0x19a   :  { %2111 = vmatprep.mubr.bf16.mxu0 %v8964_v20 }
 0x1a1   :  { %2112 = vmatmul.mubr.bf16.gmra.mrb[48].mxu0 %v9513_v46 }
 0x1a2   :  { %2119 = vmatprep.mubr.bf16.mxu0 %v8984_v63 }
 0x1a9   :  { %2120 = vmatmul.mubr.bf16.gmra.mrb[52].mxu0 %v9524_v6 }
 0x1aa   :  { %2127 = vmatprep.mubr.bf16.mxu0 %v9006_v26 }
 0x1b1   :  { %2128 = vmatmul.mubr.bf16.gmra.mrb[56].mxu0 %v9534_v31 }
 0x1b2   :  { %2135 = vmatprep.mubr.bf16.mxu0 %v9538_v59 }
 0x1b9   :  { %2136 = vmatmul.mubr.bf16.gmra.mrb[60].mxu0 %v9549_v52 }
 0x1ba   :  { %2143 = vmatprep.mubr.bf16.mxu0 %v9043_v41  ;;  %v1010_v41 = vrot.slane %v9088_v3, 1 }
 0x1bc   :  { %v9572_v45 = vsel %vm955_vm4, %v1010_v41, %v1011_v2  ;;  %v1017_v41 = vrot.slane %v14306_v40, 1 }
 0x1be   :  { %v9586_v2 = vsel %vm955_vm4, %v1016_v14, %v1017_v41 }
 0x1c1   :  { %2144 = vmatmul.mubr.bf16.gmra.mrb[64].mxu0 %v9372_v5 }
 0x1c2   :  { %2151 = vmatprep.mubr.bf16.mxu0 %v9066_v27  ;;  %v14309_v27 = vld [vmem:[#allocation44_spill] sm:$0xff] }
 0x1c9   :  { %2152 = vmatmul.mubr.bf16.gmra.mrb[68].mxu0 %v9558_v60 }
 0x1ca   :  { %2159 = vmatprep.mubr.bf16.mxu0 %v9088_v3  ;;  %v14307_v3 = vld [vmem:[#allocation41_spill] sm:$0xff] }
 0x1cb   :  { %v1022_v40 = vrot.slane %v14307_v3, 1 }
 0x1d1   :  { %2160 = vmatmul.mubr.bf16.gmra.mrb[72].mxu0 %v9565_v44 }
 0x1d2   :  { %2167 = vmatprep.mubr.bf16.mxu0 %v9110_v51  ;;  %v14308_v51 = vld [vmem:[#allocation39_spill] sm:$0xff] }
 0x1d3   :  { %v1020_v24 = vrot.slane %v14308_v51, 1  ;;  %v1025_v51 = vrot.slane %v14309_v27, 1 }
 0x1d5   :  { %v9593_v35 = vsel %vm955_vm4, %v1019_v21, %v1020_v24 }
 0x1d9   :  { %2168 = vmatmul.mubr.bf16.gmra.mrb[76].mxu0 %v9572_v45 }
 0x1da   :  { %2175 = vmatprep.mubr.bf16.mxu0 %v14303_v1  ;;  %v14310_v1 = vld [vmem:[#allocation42_spill] sm:$0xff] }
 0x1db   :  { %v1023_v14 = vrot.slane %v14310_v1, 1  ;;  %v1028_v1 = vrot.slane %v14311_v8, 1 }
 0x1dd   :  { %v9600_v41 = vsel %vm955_vm4, %v1022_v40, %v1023_v14 }
 0x1e1   :  { %2176 = vmatmul.mubr.bf16.gmra.mrb[80].mxu0 %v9579_v61 }
 0x1e2   :  { %2183 = vmatprep.mubr.bf16.mxu0 %v14305_v34  ;;  %v14312_v34 = vld [vmem:[#allocation45_spill] sm:$0xff] }
 0x1e3   :  { %v1026_v21 = vrot.slane %v14312_v34, 1  ;;  %v1031_v34 = vrot.slane %v9248_v56, 1 }
 0x1e5   :  { %v9607_v24 = vsel %vm955_vm4, %v1025_v51, %v1026_v21 }
 0x1e9   :  { %2184 = vmatmul.mubr.bf16.gmra.mrb[84].mxu0 %v9586_v2 }
 0x1ea   :  { %2191 = vmatprep.mubr.bf16.mxu0 %v14307_v3  ;;  %v14313_v3 = vld [vmem:[#allocation48_spill] sm:$0xff] }
 0x1eb   :  { %v1029_v40 = vrot.slane %v14313_v3, 1  ;;  %v1034_v3 = vrot.slane %v9270_v57, 1 }
 0x1ed   :  { %v9614_v14 = vsel %vm955_vm4, %v1028_v1, %v1029_v40 }
 0x1f1   :  { %2192 = vmatmul.mubr.bf16.gmra.mrb[88].mxu0 %v9593_v35 }
 0x1f2   :  { %2199 = vmatprep.mubr.bf16.mxu0 %v14309_v27  ;;  %v14314_v27 = vld [vmem:[#allocation51_spill] sm:$0xff] }
 0x1f3   :  { %v1032_v51 = vrot.slane %v14314_v27, 1  ;;  %v1037_v27 = vrot.slane %v9292_v18, 1 }
 0x1f5   :  { %v9621_v21 = vsel %vm955_vm4, %v1031_v34, %v1032_v51  ;;  %v89_v51 = vld [vmem:[%s13971_s0 + $0x1f0] sm:$0xff] }
 0x1f9   :  { %2200 = vmatmul.mubr.bf16.gmra.mrb[92].mxu0 %v9600_v41 }
 0x1fa   :  { %2207 = vmatprep.mubr.bf16.mxu0 %v14311_v8  ;;  %v14315_v8 = vld [vmem:[#allocation54_spill] sm:$0xff] }
 0x1fb   :  { %v1035_v1 = vrot.slane %v14315_v8, 1 }
 0x1fd   :  { %v9628_v40 = vsel %vm955_vm4, %v1034_v3, %v1035_v1  ;;  %v1040_v1 = vrot.slane %v9314_v36, 1 }
 0x201   :  { %2208 = vmatmul.mubr.bf16.gmra.mrb[96].mxu0 %v9607_v24 }
 0x202   :  { %2215 = vmatprep.mubr.bf16.mxu0 %v9248_v56  ;;  %v14316_v56 = vld [vmem:[#allocation57_spill] sm:$0xff] }
 0x203   :  { %v1038_v34 = vrot.slane %v14316_v56, 1  ;;  %v1041_v56 = vrot.slane %v9321_v43, 1 }
 0x205   :  { %v9641_v8 = vsel %vm955_vm4, %v1037_v27, %v1038_v34  ;;  %v9648_v26 = vsel %vm955_vm4, %v1040_v1, %v1041_v56  ;;  %v1044_v27 = vrot.slane %v9337_v12, 1  ;;  %v14317_v12 = vld [vmem:[#allocation5_spill] sm:$0xff]  ;;  %v14318_v56 = vld [vmem:[#allocation6_spill] sm:$0xff] }
 0x209   :  { %2216 = vmatmul.mubr.bf16.gmra.mrb[100].mxu0 %v9614_v14 }
 0x20a   :  { %2223 = vmatprep.mubr.bf16.mxu0 %v9270_v57  ;;  %v90_v57 = vld [vmem:[%s13971_s0 + $0x1f8] sm:$0xff] }
 0x20b   :  { %v122_v3 = vpack.c.bf16 %v90_v57, %v89_v51  ;;  %v1043_v57 = vrot.slane %v9330_v50, 1 }
 0x20d   :  { %v351_v20 = vshll.u32 %v122_v3, 16  ;;  %v9658_v51 = vsel %vm955_vm4, %v1043_v57, %v1044_v27  ;;  %v8341_v57 = vld [vmem:[%s13970_s1 + $0x1a0] sm:$0xff]   ;;  %v14319_v27 = vld [vmem:[#allocation7_spill] sm:$0xff] }
 0x211   :  { %2224 = vmatmul.mubr.bf16.gmra.mrb[104].mxu0 %v9621_v21 }
 0x212   :  { %2231 = vmatprep.mubr.bf16.mxu0 %v9292_v18  ;;  %v348_v18 = vshrl.u32 %v122_v3, 16  ;;  %v1047_v3 = vrot.slane %v9353_v53, 1  ;;  %v8338_v53 = vld [vmem:[%s13970_s1 + $0x188] sm:$0xff]  }
 0x214   :  { %v9650_v63 = vrot.slane %v348_v18, 7  ;;  %v1046_v18 = vrot.slane %v9346_v38, 1 }
 0x216   :  { %v353_v34 = vor.u32 %v351_v20, %v9650_v63  ;;  %v9669_v1 = vsel %vm955_vm4, %v1046_v18, %v1047_v3  ;;  %v8337_v20 = vld [vmem:[%s13970_s1 + $0x180] sm:$0xff]   ;;  %v8343_v18 = vld [vmem:[%s13970_s1 + $0x1b0] sm:$0xff]  }
 0x217   :  { %v14320_v3 = vld [vmem:[#allocation8_spill] sm:$0xff] }
 0x218   :  { %v9662_v43 = vsel %vm8571_vm2, 0, %v353_v34  ;;  %v8342_v34 = vld [vmem:[%s13970_s1 + $0x1a8] sm:$0xff]  }
 0x219   :  { %2232 = vmatmul.mubr.bf16.gmra.mrb[108].mxu0 %v9628_v40 }
 0x21a   :  { %2239 = vmatprep.mubr.bf16.mxu0 %v9314_v36  ;;  %v14329_v36 = vld [vmem:[#allocation24_spill] sm:$0xff] }
 0x221   :  { %2240 = vmatmul.mubr.bf16.gmra.mrb[112].mxu0 %v9641_v8 }
 0x222   :  { %2247 = vmatprep.mubr.bf16.mxu0 %v9330_v50  ;;  %v14328_v50 = vld [vmem:[#allocation22_spill] sm:$0xff] }
 0x229   :  { %2248 = vmatmul.mubr.bf16.gmra.mrb[116].mxu0 %v9648_v26 }
 0x22a   :  { %2255 = vmatprep.mubr.bf16.mxu0 %v9346_v38  ;;  %v8350_v38 = vld [vmem:[%s13970_s1 + $0x1e8] sm:$0xff]  }
 0x231   :  { %2256 = vmatmul.mubr.bf16.gmra.mrb[120].mxu0 %v9658_v51 }
 0x232   :  { %2263 = vmatprep.mubr.bf16.mxu0 %v9662_v43 }
 0x239   :  { %2264 = vmatmul.mubr.bf16.gmra.mrb[124].mxu0 %v9669_v1 }
 0x23a   :  { %2304 = vmatprep.mubr.bf16.mxu0 %v9386_v23  ;;  %v8339_v23 = vld [vmem:[%s13970_s1 + $0x190] sm:$0xff]  }
 0x241   :  { %2305 = vmatmul.mubr.bf16.vlgmr.msra.gmra.mrb[0].mxu0 %v14317_v12  ;;  %v8345_v12 = vld [vmem:[%s13970_s1 + $0x1c0] sm:$0xff]  }
 0x242   :  { %2562 = vmatpush1.bf16.msra.mxu0 %v8337_v20  ;;  %2312 = vmatprep.mubr.bf16.mxu0 %v9122_v10  ;;  %v8340_v10 = vld [vmem:[%s13970_s1 + $0x198] sm:$0xff]  }
 0x243   :  { %2563 = vmatprep.subr.bf16.mxu0 %v14267_v29  ;;  %v8344_v20 = vld [vmem:[%s13970_s1 + $0x1b8] sm:$0xff]  }
 0x246   :  { %2564 = vmatpush1.bf16.msra.mxu0 %v8338_v53  ;;  %v14321_v53 = vld [vmem:[#allocation9_spill] sm:$0xff] }
 0x247   :  { %2565 = vmatprep.subr.bf16.mxu0 %v14267_v29 }
 0x249   :  { %2313 = vmatmul.mubr.bf16.gmra.mrb[4].mxu0 %v14318_v56 }
 0x24a   :  { %2320 = vmatprep.mubr.bf16.mxu0 %v9411_v32  ;;  %2566 = vmatpush1.bf16.msra.mxu0 %v8339_v23  ;;  %v8346_v23 = vld [vmem:[%s13970_s1 + $0x1c8] sm:$0xff]  }
 0x24b   :  { %2567 = vmatprep.subr.bf16.mxu0 %v14267_v29 }
 0x24e   :  { %2568 = vmatpush1.bf16.msra.mxu0 %v8340_v10  ;;  %v8347_v10 = vld [vmem:[%s13970_s1 + $0x1d0] sm:$0xff]  }
 0x24f   :  { %2569 = vmatprep.subr.bf16.mxu0 %v14267_v29 }
 0x251   :  { %2321 = vmatmul.mubr.bf16.gmra.mrb[8].mxu0 %v14319_v27 }
 0x252   :  { %2328 = vmatprep.mubr.bf16.mxu0 %v9426_v9  ;;  %2570 = vmatpush1.bf16.msra.mxu0 %v8341_v57  ;;  %v14322_v57 = vld [vmem:[#allocation10_spill] sm:$0xff] }
 0x253   :  { %2571 = vmatprep.subr.bf16.mxu0 %v14267_v29 }
 0x256   :  { %2572 = vmatpush1.bf16.msra.mxu0 %v8342_v34  ;;  %v14323_v34 = vld [vmem:[#allocation12_spill] sm:$0xff] }
 0x257   :  { %2573 = vmatprep.subr.bf16.mxu0 %v14267_v29 }
 0x259   :  { %2329 = vmatmul.mubr.bf16.gmra.mrb[12].mxu0 %v14320_v3 }
 0x25a   :  { %2336 = vmatprep.mubr.bf16.mxu0 %v9441_v0  ;;  %2574 = vmatpush1.bf16.msra.mxu0 %v8343_v18  ;;  %v8348_v18 = vld [vmem:[%s13970_s1 + $0x1d8] sm:$0xff]  }
 0x25b   :  { %2575 = vmatprep.subr.bf16.mxu0 %v14267_v29 }
 0x25e   :  { %2576 = vmatpush1.bf16.msra.mxu0 %v8344_v20  ;;  %v14324_v20 = vld [vmem:[#allocation14_spill] sm:$0xff] }
 0x25f   :  { %2577 = vmatprep.subr.bf16.mxu0 %v14267_v29 }
 0x261   :  { %2337 = vmatmul.mubr.bf16.gmra.mrb[16].mxu0 %v14321_v53 }
 0x262   :  { %2344 = vmatprep.mubr.bf16.mxu0 %v9453_v42  ;;  %2578 = vmatpush1.bf16.msra.mxu0 %v8345_v12  ;;  %v14325_v12 = vld [vmem:[#allocation16_spill] sm:$0xff] }
 0x263   :  { %2579 = vmatprep.subr.bf16.mxu0 %v14267_v29 }
 0x266   :  { %2580 = vmatpush1.bf16.msra.mxu0 %v8346_v23  ;;  %v8349_v23 = vld [vmem:[%s13970_s1 + $0x1e0] sm:$0xff]  }
 0x267   :  { %2581 = vmatprep.subr.bf16.mxu0 %v14267_v29 }
 0x269   :  { %2345 = vmatmul.mubr.bf16.gmra.mrb[20].mxu0 %v14322_v57 }
 0x26a   :  { %2352 = vmatprep.mubr.bf16.mxu0 %v9464_v25  ;;  %2582 = vmatpush1.bf16.msra.mxu0 %v8347_v10  ;;  %v14326_v10 = vld [vmem:[#allocation18_spill] sm:$0xff] }
 0x26b   :  { %2583 = vmatprep.subr.bf16.mxu0 %v14267_v29 }
 0x26e   :  { %2584 = vmatpush1.bf16.msra.mxu0 %v8348_v18  ;;  %v14327_v18 = vld [vmem:[#allocation20_spill] sm:$0xff] }
 0x26f   :  { %2585 = vmatprep.subr.bf16.mxu0 %v14267_v29 }
 0x271   :  { %2353 = vmatmul.mubr.bf16.gmra.mrb[24].mxu0 %v14323_v34 }
 0x272   :  { %2360 = vmatprep.mubr.bf16.mxu0 %v9471_v39  ;;  %2586 = vmatpush1.bf16.msra.mxu0 %v8349_v23  ;;  %v8351_v23 = vld [vmem:[%s13970_s1 + $0x200] sm:$0xff]  }
 0x273   :  { %2587 = vmatprep.subr.bf16.mxu0 %v14267_v29  ;;  %7344 = vmatprep.subr.bf16.mxu1 %v8351_v23 }
 0x274   :  { %7345 = vmatpush3.bf16.msra.mxu1 %v8351_v23  ;;  %v472_v23 = vsel %vm8571_vm2, %v9526_v47, 0 }
 0x275   :  { %v1111_v48 = vrot.slane %v472_v23, 1 }
 0x276   :  { %2588 = vmatpush1.bf16.msra.mxu0 %v8350_v38  ;;  %v8353_v38 = vld [vmem:[%s13970_s1 + $0x208] sm:$0xff]  }
 0x277   :  { %2589 = vmatprep.subr.bf16.mxu0 %v14267_v29  ;;  %7346 = vmatprep.subr.bf16.mxu1 %v8353_v38 }
 0x278   :  { %7347 = vmatpush3.bf16.msra.mxu1 %v8353_v38  ;;  %v8356_v38 = vld [vmem:[%s13970_s1 + $0x220] sm:$0xff]  }
 0x279   :  { %2361 = vmatmul.mubr.bf16.gmra.mrb[28].mxu0 %v14324_v20 }
 0x27a   :  { %2368 = vmatprep.mubr.bf16.mxu0 %v9482_v4  ;;  %2590 = vmatpush1.bf16.msra.mxu0 %v8352_v49  ;;  %v1083_v49 = vshll.u32 %v9538_v59, 16 }
 0x27b   :  { %2591 = vmatprep.subr.bf16.mxu0 %v14267_v29 }
 0x27c   :  { %v1085_v47 = vrot.slane %v1083_v49, 1 }
 0x281   :  { %2369 = vmatmul.mubr.bf16.gmra.mrb[32].mxu0 %v14325_v12  ;;  %v8357_v12 = vld [vmem:[%s13970_s1 + $0x1f8] sm:$0xff]  }
 0x282   :  { %2376 = vmatprep.mubr.bf16.mxu0 %v9489_v19  ;;  %2592 = vmatpush1.bf16.msra.mxu0 %v8357_v12 }
 0x289   :  { %2377 = vmatmul.mubr.bf16.gmra.mrb[36].mxu0 %v14326_v10 }
 0x28a   :  { %2384 = vmatprep.mubr.bf16.mxu0 %v9500_v62 }
 0x291   :  { %2385 = vmatmul.mubr.bf16.gmra.mrb[40].mxu0 %v14327_v18  ;;  %v1110_v18 = vrot.slane %v9538_v59, 1 }
 0x292   :  { %2392 = vmatprep.mubr.bf16.mxu0 %v9513_v46 }
 0x293   :  { %v1112_v10 = vsel %vm955_vm4, %v1110_v18, %v1111_v48  ;;  %v8360_v18 = vld [vmem:[%s13970_s1 + $0x238] sm:$0xff]  }
 0x299   :  { %2393 = vmatmul.mubr.bf16.gmra.mrb[44].mxu0 %v14328_v50  ;;  %v8354_v50 = vld [vmem:[%s13970_s1 + $0x210] sm:$0xff]  }
 0x29a   :  { %2400 = vmatprep.mubr.bf16.mxu0 %v9524_v6  ;;  %7348 = vmatprep.subr.bf16.mxu1 %v8354_v50 }
 0x29b   :  { %7349 = vmatpush3.bf16.msra.mxu1 %v8354_v50  ;;  %v1081_v50 = vshrl.u32 %v9538_v59, 16 }
 0x29c   :  { %7350 = vmatprep.subr.bf16.mxu1 %v8355_v17 }
 0x29f   :  { %7351 = vmatpush3.bf16.msra.mxu1 %v8355_v17  ;;  %v1086_v17 = vor.u32 %v1085_v47, %v1081_v50  ;;  %v14359_v47 = vld [vmem:[#allocation3_spill] sm:$0xff] }
 0x2a0   :  { %7352 = vmatprep.subr.bf16.mxu1 %v8356_v38 }
 0x2a1   :  { %2401 = vmatmul.mubr.bf16.gmra.mrb[48].mxu0 %v14329_v36  ;;  %v14330_v36 = vld [vmem:[#allocation26_spill] sm:$0xff] }
 0x2a2   :  { %2408 = vmatprep.mubr.bf16.mxu0 %v9534_v31 }
 0x2a3   :  { %7353 = vmatpush3.bf16.msra.mxu1 %v8356_v38 }
 0x2a4   :  { %7354 = vmatprep.subr.bf16.mxu1 %v8358_v58 }
 0x2a7   :  { %7355 = vmatpush3.bf16.msra.mxu1 %v8358_v58  ;;  %v14332_v58 = vld [vmem:[#allocation29_spill] sm:$0xff] }
 0x2a9   :  { %2409 = vmatmul.mubr.bf16.gmra.mrb[52].mxu0 %v14330_v36  ;;  %v1088_v36 = vshll.u32 %v472_v23, 16  ;;  %v8359_v23 = vld [vmem:[%s13970_s1 + $0x230] sm:$0xff]  }
 0x2aa   :  { %2416 = vmatprep.mubr.bf16.mxu0 %v9549_v52  ;;  %7356 = vmatprep.subr.bf16.mxu1 %v8359_v23 }
 0x2ab   :  { %v1090_v20 = vrot.slane %v1088_v36, 1  ;;  %7357 = vmatpush3.bf16.msra.mxu1 %v8359_v23  ;;  %v14333_v36 = vld [vmem:[#allocation31_spill] sm:$0xff] }
 0x2ac   :  { %7358 = vmatprep.subr.bf16.mxu1 %v8360_v18 }
 0x2ad   :  { %v9794_v48 = vsel %vm489_vm3, %v1086_v17, %v1090_v20  ;;  %v14360_v17 = vld [vmem:[#allocation28_spill] sm:$0xff] }
 0x2af   :  { %7359 = vmatpush3.bf16.msra.mxu1 %v8360_v18 }
 0x2b0   :  { %5125 = vmatprep.subr.bf16.mxu1 %v14267_v29 }
 0x2b1   :  { %2417 = vmatmul.mubr.bf16.gmra.mrb[56].mxu0 %v14331_v22 }
 0x2b2   :  { %2424 = vmatprep.mubr.bf16.mxu0 %v1112_v10  ;;  %7361 = vmatmul.mubr.bf16.vlgmr.msra.gmra.mrb[0].mxu1 %v9411_v32  ;;  %v14335_v32 = vld [vmem:[#allocation37_spill] sm:$0xff] }
 0x2b3   :  { %7364 = vmatprep.mubr.bf16.mxu1 %v9426_v9  ;;  %v14336_v9 = vld [vmem:[#allocation40_spill] sm:$0xff] }
 0x2b9   :  { %2425 = vmatmul.mubr.bf16.gmra.mrb[60].mxu0 %v9794_v48 }
 0x2ba   :  { %2432 = vmatprep.mubr.bf16.mxu0 %v9558_v60  ;;  %7365 = vmatmul.mubr.bf16.gmra.mrb[4].mxu1 %v9441_v0  ;;  %v14334_v60 = vld [vmem:[#allocation34_spill] sm:$0xff]  ;;  %v14337_v0 = vld [vmem:[#allocation43_spill] sm:$0xff] }
 0x2bb   :  { %7368 = vmatprep.mubr.bf16.mxu1 %v9453_v42  ;;  %v14338_v42 = vld [vmem:[#allocation46_spill] sm:$0xff] }
 0x2c1   :  { %2433 = vmatmul.mubr.bf16.gmra.mrb[64].mxu0 %v14332_v58  ;;  %v14361_v58 = vld [vmem:[#allocation30_spill] sm:$0xff] }
 0x2c2   :  { %2440 = vmatprep.mubr.bf16.mxu0 %v9565_v44  ;;  %7369 = vmatmul.mubr.bf16.gmra.mrb[8].mxu1 %v9464_v25  ;;  %v14339_v25 = vld [vmem:[#allocation49_spill] sm:$0xff] }
 0x2c3   :  { %7372 = vmatprep.mubr.bf16.mxu1 %v9471_v39  ;;  %v14340_v39 = vld [vmem:[#allocation52_spill] sm:$0xff] }
 0x2c9   :  { %2441 = vmatmul.mubr.bf16.gmra.mrb[68].mxu0 %v14333_v36 }
 0x2ca   :  { %2448 = vmatprep.mubr.bf16.mxu0 %v9572_v45  ;;  %7373 = vmatmul.mubr.bf16.gmra.mrb[12].mxu1 %v9482_v4  ;;  %v14341_v4 = vld [vmem:[#allocation55_spill] sm:$0xff] }
 0x2cb   :  { %7376 = vmatprep.mubr.bf16.mxu1 %v9489_v19  ;;  %v14342_v19 = vld [vmem:[#allocation59_spill] sm:$0xff] }
 0x2d1   :  { %2449 = vmatmul.mubr.bf16.gmra.mrb[72].mxu0 %v14334_v60 }
 0x2d2   :  { %2456 = vmatprep.mubr.bf16.mxu0 %v9579_v61  ;;  %7377 = vmatmul.mubr.bf16.gmra.mrb[16].mxu1 %v9500_v62  ;;  %v488_v62 = vsel %vm8571_vm2, %v9650_v63, 0 }
 0x2d3   :  { %7380 = vmatprep.mubr.bf16.mxu1 %v9513_v46  ;;  %v1095_v46 = vshll.u32 %v9662_v43, 16 }
 0x2d9   :  { %2457 = vmatmul.mubr.bf16.gmra.mrb[76].mxu0 %v14335_v32 }
 0x2da   :  { %2464 = vmatprep.mubr.bf16.mxu0 %v9586_v2  ;;  %7381 = vmatmul.mubr.bf16.gmra.mrb[20].mxu1 %v9524_v6  ;;  %v1113_v6 = vrot.slane %v9662_v43, 1 }
 0x2db   :  { %7384 = vmatprep.mubr.bf16.mxu1 %v9534_v31  ;;  %v1114_v31 = vrot.slane %v488_v62, 1 }
 0x2e1   :  { %2465 = vmatmul.mubr.bf16.gmra.mrb[80].mxu0 %v14336_v9 }
 0x2e2   :  { %2472 = vmatprep.mubr.bf16.mxu0 %v9593_v35  ;;  %7385 = vmatmul.mubr.bf16.gmra.mrb[24].mxu1 %v9549_v52  ;;  %v1093_v52 = vshrl.u32 %v9662_v43, 16 }
 0x2e3   :  { %7388 = vmatprep.mubr.bf16.mxu1 %v1112_v10  ;;  %v14358_v10 = vld [vmem:[#allocation25_spill] sm:$0xff] }
 0x2e9   :  { %2473 = vmatmul.mubr.bf16.gmra.mrb[84].mxu0 %v14337_v0 }
 0x2ea   :  { %2480 = vmatprep.mubr.bf16.mxu0 %v9600_v41  ;;  %7389 = vmatmul.mubr.bf16.gmra.mrb[28].mxu1 %v9372_v5 }
 0x2eb   :  { %7392 = vmatprep.mubr.bf16.mxu1 %v9565_v44  ;;  %v1097_v44 = vrot.slane %v1095_v46, 1 }
 0x2ed   :  { %v1098_v63 = vor.u32 %v1097_v44, %v1093_v52  ;;  %v14364_v52 = vld [vmem:[#allocation38_spill] sm:$0xff] }
 0x2f1   :  { %2481 = vmatmul.mubr.bf16.gmra.mrb[88].mxu0 %v14338_v42 }
 0x2f2   :  { %2488 = vmatprep.mubr.bf16.mxu0 %v9607_v24  ;;  %7393 = vmatmul.mubr.bf16.gmra.mrb[32].mxu1 %v9572_v45  ;;  %v1100_v45 = vshll.u32 %v488_v62, 16  ;;  %v14362_v62 = vld [vmem:[#allocation32_spill] sm:$0xff] }
 0x2f3   :  { %7396 = vmatprep.mubr.bf16.mxu1 %v9579_v61 }
 0x2f4   :  { %v1102_v61 = vrot.slane %v1100_v45, 1 }
 0x2f9   :  { %2489 = vmatmul.mubr.bf16.gmra.mrb[92].mxu0 %v14339_v25 }
 0x2fa   :  { %2496 = vmatprep.mubr.bf16.mxu0 %v9614_v14  ;;  %7397 = vmatmul.mubr.bf16.gmra.mrb[36].mxu1 %v9586_v2  ;;  %v9867_v2 = vsel %vm489_vm3, %v1098_v63, %v1102_v61  ;;  %v14366_v63 = vld [vmem:[#allocation44_spill] sm:$0xff] }
 0x2fb   :  { %7400 = vmatprep.mubr.bf16.mxu1 %v9593_v35  ;;  %v14343_v35 = vld [vmem:[#allocation4_spill] sm:$0xff] }
 0x301   :  { %2497 = vmatmul.mubr.bf16.gmra.mrb[96].mxu0 %v14340_v39 }
 0x302   :  { %2504 = vmatprep.mubr.bf16.mxu0 %v9621_v21  ;;  %7401 = vmatmul.mubr.bf16.gmra.mrb[40].mxu1 %v9600_v41  ;;  %v14345_v41 = vld [vmem:[#allocation11_spill] sm:$0xff] }
 0x303   :  { %7404 = vmatprep.mubr.bf16.mxu1 %v9607_v24  ;;  %v14347_v24 = vld [vmem:[#allocation13_spill] sm:$0xff] }
 0x309   :  { %2505 = vmatmul.mubr.bf16.gmra.mrb[100].mxu0 %v14341_v4 }
 0x30a   :  { %2512 = vmatprep.mubr.bf16.mxu0 %v9628_v40  ;;  %7405 = vmatmul.mubr.bf16.gmra.mrb[44].mxu1 %v9614_v14  ;;  %v14349_v14 = vld [vmem:[#allocation15_spill] sm:$0xff] }
 0x30b   :  { %7408 = vmatprep.mubr.bf16.mxu1 %v9621_v21  ;;  %v14351_v21 = vld [vmem:[#allocation17_spill] sm:$0xff] }
 0x311   :  { %2513 = vmatmul.mubr.bf16.gmra.mrb[104].mxu0 %v9308_v33 }
 0x312   :  { %2520 = vmatprep.mubr.bf16.mxu0 %v9641_v8  ;;  %7409 = vmatmul.mubr.bf16.gmra.mrb[48].mxu1 %v9628_v40  ;;  %v14353_v40 = vld [vmem:[#allocation19_spill] sm:$0xff] }
 0x313   :  { %7412 = vmatprep.mubr.bf16.mxu1 %v9641_v8 }
 0x319   :  { %2521 = vmatmul.mubr.bf16.gmra.mrb[108].mxu0 %v14342_v19 }
 0x31a   :  { %2528 = vmatprep.mubr.bf16.mxu0 %v9648_v26  ;;  %7413 = vmatmul.mubr.bf16.gmra.mrb[52].mxu1 %v9648_v26  ;;  %v1115_v26 = vsel %vm955_vm4, %v1113_v6, %v1114_v31  ;;  %v14363_v31 = vld [vmem:[#allocation35_spill] sm:$0xff] }
 0x31b   :  { %7416 = vmatprep.mubr.bf16.mxu1 %v9658_v51 }
 0x321   :  { %2529 = vmatmul.mubr.bf16.gmra.mrb[112].mxu0 %v9340_v11 }
 0x322   :  { %2536 = vmatprep.mubr.bf16.mxu0 %v9658_v51  ;;  %7417 = vmatmul.mubr.bf16.gmra.mrb[56].mxu1 %v9669_v1 }
 0x323   :  { %7420 = vmatprep.mubr.bf16.mxu1 %v1115_v26 }
 0x329   :  { %2537 = vmatmul.mubr.bf16.gmra.mrb[116].mxu0 %v9356_v16 }
 0x32a   :  { %2544 = vmatprep.mubr.bf16.mxu0 %v9669_v1  ;;  %7421 = vmatmul.mubr.bf16.gmra.mrb[60].mxu1 %v9372_v5 }
 0x32b   :  { %5157 = vmatprep.mubr.bf16.mxu1 %v14343_v35 }
 0x331   :  { %2545 = vmatmul.mubr.bf16.gmra.mrb[120].mxu0 %v9363_v28 }
 0x332   :  { %2552 = vmatprep.mubr.bf16.mxu0 %v1115_v26  ;;  %v14365_v26 = vld [vmem:[#allocation41_spill] sm:$0xff] }
 0x339   :  { %2553 = vmatmul.mubr.bf16.gmra.mrb[124].mxu0 %v9867_v2 }
 0x33a   :  { %2593 = vmatprep.mubr.bf16.mxu0 %v14318_v56 }
 0x341   :  { %2594 = vmatmul.mubr.bf16.vlgmr.msra.gmra.mrb[0].mxu0 %v8667_v54  ;;  %v14344_v54 = vld [vmem:[#allocation14_spill] sm:$0xff] }
 0x342   :  { %2601 = vmatprep.mubr.bf16.mxu0 %v14319_v27  ;;  %v14355_v27 = vld [vmem:[#allocation21_spill] sm:$0xff] }
 0x349   :  { %2602 = vmatmul.mubr.bf16.gmra.mrb[4].mxu0 %v8695_v13  ;;  %v14346_v13 = vld [vmem:[#allocation16_spill] sm:$0xff] }
 0x34a   :  { %2609 = vmatprep.mubr.bf16.mxu0 %v14320_v3  ;;  %v14356_v3 = vld [vmem:[#allocation26_spill] sm:$0xff] }
 0x351   :  { %2610 = vmatmul.mubr.bf16.gmra.mrb[8].mxu0 %v8724_v30  ;;  %v14348_v30 = vld [vmem:[#allocation18_spill] sm:$0xff] }
 0x352   :  { %2617 = vmatprep.mubr.bf16.mxu0 %v14321_v53  ;;  %v14357_v53 = vld [vmem:[#allocation23_spill] sm:$0xff] }
 0x359   :  { %2618 = vmatmul.mubr.bf16.gmra.mrb[12].mxu0 %v8758_v55  ;;  %v14350_v55 = vld [vmem:[#allocation20_spill] sm:$0xff] }
 0x35a   :  { %2625 = vmatprep.mubr.bf16.mxu0 %v14322_v57 }
 0x361   :  { %2626 = vmatmul.mubr.bf16.gmra.mrb[16].mxu0 %v8784_v15  ;;  %v14352_v15 = vld [vmem:[#allocation22_spill] sm:$0xff] }
 0x362   :  { %2633 = vmatprep.mubr.bf16.mxu0 %v14323_v34 }
 0x369   :  { %2634 = vmatmul.mubr.bf16.gmra.mrb[20].mxu0 %v8815_v37  ;;  %v14354_v37 = vld [vmem:[#allocation24_spill] sm:$0xff] }
 0x36a   :  { %2641 = vmatprep.mubr.bf16.mxu0 %v14344_v54 }
 0x371   :  { %2642 = vmatmul.mubr.bf16.gmra.mrb[24].mxu0 %v14345_v41  ;;  %v14367_v41 = vld [vmem:[#allocation47_spill] sm:$0xff] }
 0x372   :  { %2649 = vmatprep.mubr.bf16.mxu0 %v14346_v13  ;;  %v14368_v13 = vld [vmem:[#allocation50_spill] sm:$0xff] }
 0x379   :  { %2650 = vmatmul.mubr.bf16.gmra.mrb[28].mxu0 %v14347_v24 }
 0x37a   :  { %2657 = vmatprep.mubr.bf16.mxu0 %v14348_v30 }
 0x381   :  { %2658 = vmatmul.mubr.bf16.gmra.mrb[32].mxu0 %v14349_v14  ;;  %v14369_v14 = vld [vmem:[#allocation53_spill] sm:$0xff] }
 0x382   :  { %2665 = vmatprep.mubr.bf16.mxu0 %v14350_v55  ;;  %v14370_v55 = vld [vmem:[#allocation56_spill] sm:$0xff] }
 0x385   :  { %v9895_v8 = vpop.f32.mrb[0].mxu1 }
 0x386   :  { %v9897_v51 = vpop.f32.mrb[1].mxu1 }
 0x387   :  { %v9899_v1 = vpop.f32.mrb[2].mxu1 }
 0x388   :  { %v9901_v56 = vpop.f32.mrb[3].mxu1 }
 0x389   :  { %2666 = vmatmul.mubr.bf16.gmra.mrb[36].mxu0 %v14351_v21 }
 0x38a   :  { %2673 = vmatprep.mubr.bf16.mxu0 %v14352_v15 }
 0x38d   :  { %v9907_v57 = vpop.f32.mrb[4].mxu1 }
 0x38e   :  { %v9909_v34 = vpop.f32.mrb[5].mxu1 }
 0x38f   :  { %v9911_v20 = vpop.f32.mrb[6].mxu1 }
 0x390   :  { %v9913_v12 = vpop.f32.mrb[7].mxu1 }
 0x391   :  { %2674 = vmatmul.mubr.bf16.gmra.mrb[40].mxu0 %v14353_v40 }
 0x392   :  { %2681 = vmatprep.mubr.bf16.mxu0 %v14354_v37 }
 0x395   :  { %v9919_v49 = vpop.f32.mrb[8].mxu1 }
 0x396   :  { %v9921_v38 = vpop.f32.mrb[9].mxu1 }
 0x399   :  { %2682 = vmatmul.mubr.bf16.gmra.mrb[44].mxu0 %v14355_v27 }
 0x39a   :  { %2689 = vmatprep.mubr.bf16.mxu0 %v14356_v3 }
 0x3a1   :  { %2690 = vmatmul.mubr.bf16.gmra.mrb[48].mxu0 %v14357_v53 }
 0x3a2   :  { %2697 = vmatprep.mubr.bf16.mxu0 %v14331_v22  ;;  %v9923_v22 = vpop.f32.mrb[10].mxu1 }
 0x3a3   :  { %v9925_v50 = vpop.f32.mrb[11].mxu1 }
 0x3a4   :  { %v9931_v23 = vpop.f32.mrb[12].mxu1 }
 0x3a9   :  { %2698 = vmatmul.mubr.bf16.gmra.mrb[52].mxu0 %v14358_v10  ;;  %v14373_v10 = vld [vmem:[#allocation58_spill] sm:$0xff] }
 0x3aa   :  { %2705 = vmatprep.mubr.bf16.mxu0 %v9794_v48 }
 0x3b1   :  { %2706 = vmatmul.mubr.bf16.gmra.mrb[56].mxu0 %v9538_v59  ;;  %v9933_v59 = vpop.f32.mrb[13].mxu1 }
 0x3b2   :  { %2713 = vmatprep.mubr.bf16.mxu0 %v14343_v35  ;;  %v9935_v48 = vpop.f32.mrb[14].mxu1 }
 0x3b3   :  { %v9937_v18 = vpop.f32.mrb[15].mxu1 }
 0x3b9   :  { %2714 = vmatmul.mubr.bf16.gmra.mrb[60].mxu0 %v14359_v47 }
 0x3ba   :  { %2721 = vmatprep.mubr.bf16.mxu0 %v14333_v36  ;;  %v9943_v36 = vpop.f32.mrb[16].mxu1 }
 0x3bb   :  { %v9945_v46 = vpop.f32.mrb[17].mxu1 }
 0x3c1   :  { %2722 = vmatmul.mubr.bf16.gmra.mrb[64].mxu0 %v14360_v17 }
 0x3c2   :  { %2729 = vmatprep.mubr.bf16.mxu0 %v14334_v60  ;;  %v9947_v60 = vpop.f32.mrb[18].mxu1 }
 0x3c3   :  { %v9949_v6 = vpop.f32.mrb[19].mxu1 }
 0x3c9   :  { %2730 = vmatmul.mubr.bf16.gmra.mrb[68].mxu0 %v14361_v58 }
 0x3ca   :  { %2737 = vmatprep.mubr.bf16.mxu0 %v14335_v32  ;;  %v9955_v32 = vpop.f32.mrb[20].mxu1 }
 0x3cb   :  { %v9957_v44 = vpop.f32.mrb[21].mxu1 }
 0x3d1   :  { %2738 = vmatmul.mubr.bf16.gmra.mrb[72].mxu0 %v14362_v62 }
 0x3d2   :  { %2745 = vmatprep.mubr.bf16.mxu0 %v14336_v9  ;;  %v9959_v9 = vpop.f32.mrb[22].mxu1 }
 0x3d3   :  { %v9961_v45 = vpop.f32.mrb[23].mxu1 }
 0x3d9   :  { %2746 = vmatmul.mubr.bf16.gmra.mrb[76].mxu0 %v14363_v31 }
 0x3da   :  { %2753 = vmatprep.mubr.bf16.mxu0 %v14337_v0  ;;  %v9967_v0 = vpop.f32.mrb[24].mxu1 }
 0x3db   :  { %v9969_v61 = vpop.f32.mrb[25].mxu1 }
 0x3e1   :  { %2754 = vmatmul.mubr.bf16.gmra.mrb[80].mxu0 %v14364_v52  ;;  %v14376_v52 = vld [vmem:[#allocation60_spill] sm:$0xff] }
 0x3e2   :  { %2761 = vmatprep.mubr.bf16.mxu0 %v14338_v42  ;;  %v9971_v42 = vpop.f32.mrb[26].mxu1 }
 0x3e3   :  { %v9973_v54 = vpop.f32.mrb[27].mxu1 }
 0x3e9   :  { %2762 = vmatmul.mubr.bf16.gmra.mrb[84].mxu0 %v14365_v26 }
 0x3ea   :  { %2769 = vmatprep.mubr.bf16.mxu0 %v14339_v25  ;;  %v9979_v25 = vpop.f32.mrb[28].mxu1 }
 0x3eb   :  { %v9981_v24 = vpop.f32.mrb[29].mxu1 }
 0x3f1   :  { %2770 = vmatmul.mubr.bf16.gmra.mrb[88].mxu0 %v14366_v63 }
 0x3f2   :  { %2777 = vmatprep.mubr.bf16.mxu0 %v14340_v39  ;;  %v9983_v39 = vpop.f32.mrb[30].mxu1 }
 0x3f3   :  { %v9985_v30 = vpop.f32.mrb[31].mxu1 }
 0x3f9   :  { %2778 = vmatmul.mubr.bf16.gmra.mrb[92].mxu0 %v14367_v41 }
 0x3fa   :  { %2785 = vmatprep.mubr.bf16.mxu0 %v14341_v4  ;;  %v9991_v4 = vpop.f32.mrb[32].mxu1 }
 0x401   :  { %2786 = vmatmul.mubr.bf16.gmra.mrb[96].mxu0 %v14368_v13 }
 0x402   :  { %2793 = vmatprep.mubr.bf16.mxu0 %v9308_v33  ;;  %v9993_v33 = vpop.f32.mrb[33].mxu1 }
 0x403   :  { %v9998_v37 = vpop.f32.mrb[34].mxu1 }
 0x404   :  { %v10000_v3 = vpop.f32.mrb[35].mxu1 }
 0x409   :  { %2794 = vmatmul.mubr.bf16.gmra.mrb[100].mxu0 %v14369_v14 }
 0x40a   :  { %2801 = vmatprep.mubr.bf16.mxu0 %v14342_v19 }
 0x411   :  { %2802 = vmatmul.mubr.bf16.gmra.mrb[104].mxu0 %v14370_v55 }
 0x412   :  { %2809 = vmatprep.mubr.bf16.mxu0 %v9340_v11 }
 0x414   :  { %v2595_v21 = vpop.f32.mrb[0].mxu0 }
 0x415   :  { %v9996_v15 = vadd.f32 %v9897_v51, %v2595_v21  ;;  %v2597_v40 = vpop.f32.mrb[1].mxu0  ;;  %v14379_v21 = vld [vmem:[#allocation61_spill] sm:$0xff] }
 0x416   :  { %v2598_v27 = vpop.f32.mrb[2].mxu0 }
 0x417   :  { %14371 = vst [vmem:[#allocation33_spill] sm:$0xff] %v9996_v15  ;;  %v10003_v19 = vadd.f32 %v9901_v56, %v2598_v27  ;;  %v2600_v53 = vpop.f32.mrb[3].mxu0  ;;  %v10015_v56 = vpop.f32.mrb[36].mxu1 }
 0x418   :  { %v10017_v63 = vpop.f32.mrb[37].mxu1 }
 0x419   :  { %14372 = vst [vmem:[#allocation36_spill] sm:$0xff] %v10003_v19  ;;  %2810 = vmatmul.mubr.bf16.gmra.mrb[108].mxu0 %v14373_v10  ;;  %v10022_v41 = vpop.f32.mrb[38].mxu1 }
 0x41a   :  { %2817 = vmatprep.mubr.bf16.mxu0 %v9356_v16  ;;  %v10024_v14 = vpop.f32.mrb[39].mxu1 }
 0x41c   :  { %v2603_v11 = vpop.f32.mrb[4].mxu0 }
 0x41d   :  { %v10008_v17 = vadd.f32 %v9895_v8, %v2603_v11  ;;  %v2605_v51 = vpop.f32.mrb[5].mxu0 }
 0x41e   :  { %v2606_v58 = vpop.f32.mrb[6].mxu0 }
 0x41f   :  { %14374 = vst [vmem:[#allocation39_spill] sm:$0xff] %v10008_v17  ;;  %v10011_v62 = vadd.f32 %v9899_v1, %v2606_v58  ;;  %v2608_v31 = vpop.f32.mrb[7].mxu0 }
 0x421   :  { %14375 = vst [vmem:[#allocation42_spill] sm:$0xff] %v10011_v62  ;;  %2818 = vmatmul.mubr.bf16.gmra.mrb[112].mxu0 %v14376_v52 }
 0x422   :  { %2825 = vmatprep.mubr.bf16.mxu0 %v9363_v28 }
 0x424   :  { %v2611_v26 = vpop.f32.mrb[8].mxu0 }
 0x425   :  { %v10020_v16 = vadd.f32 %v9909_v34, %v2611_v26  ;;  %v2613_v8 = vpop.f32.mrb[9].mxu0 }
 0x426   :  { %v2614_v13 = vpop.f32.mrb[10].mxu0 }
 0x427   :  { %14377 = vst [vmem:[#allocation45_spill] sm:$0xff] %v10020_v16  ;;  %v10027_v1 = vadd.f32 %v9913_v12, %v2614_v13  ;;  %v2616_v55 = vpop.f32.mrb[11].mxu0  ;;  %v10039_v12 = vpop.f32.mrb[40].mxu1 }
 0x428   :  { %v10041_v51 = vpop.f32.mrb[41].mxu1 }
 0x429   :  { %14378 = vst [vmem:[#allocation48_spill] sm:$0xff] %v10027_v1  ;;  %2826 = vmatmul.mubr.bf16.gmra.mrb[116].mxu0 %v14379_v21  ;;  %v10046_v58 = vpop.f32.mrb[42].mxu1 }
 0x42a   :  { %2833 = vmatprep.mubr.bf16.mxu0 %v9867_v2  ;;  %v10048_v52 = vpop.f32.mrb[43].mxu1 }
 0x42c   :  { %v2619_v28 = vpop.f32.mrb[12].mxu0 }
 0x42d   :  { %v10032_v40 = vadd.f32 %v9907_v57, %v2619_v28  ;;  %v2621_v34 = vpop.f32.mrb[13].mxu0  ;;  %v10060_v28 = vpop.f32.mrb[44].mxu1 }
 0x42e   :  { %v2622_v27 = vpop.f32.mrb[14].mxu0 }
 0x42f   :  { %v10035_v53 = vadd.f32 %v9911_v20, %v2622_v27  ;;  %v2624_v10 = vpop.f32.mrb[15].mxu0  ;;  %v10062_v27 = vpop.f32.mrb[45].mxu1 }
 0x431   :  { %14380 = vst [vmem:[#allocation51_spill] sm:$0xff] %v10035_v53  ;;  %2834 = vmatmul.mubr.bf16.gmra.mrb[120].mxu0 %v9662_v43 }
 0x432   :  { %2841 = vmatprep.mubr.bf16.mxu0 %v14343_v35 }
 0x434   :  { %v2627_v11 = vpop.f32.mrb[16].mxu0 }
 0x435   :  { %v10044_v2 = vadd.f32 %v9921_v38, %v2627_v11  ;;  %v2629_v57 = vpop.f32.mrb[17].mxu0  ;;  %v10067_v11 = vpop.f32.mrb[46].mxu1 }
 0x436   :  { %v2630_v31 = vpop.f32.mrb[18].mxu0 }
 0x437   :  { %14381 = vst [vmem:[#allocation54_spill] sm:$0xff] %v10044_v2  ;;  %v10051_v20 = vadd.f32 %v9925_v50, %v2630_v31  ;;  %v2632_v43 = vpop.f32.mrb[19].mxu0 }
 0x439   :  { %14382 = vst [vmem:[#allocation57_spill] sm:$0xff] %v10051_v20  ;;  %2842 = vmatmul.mubr.bf16.gmra.mrb[124].mxu0 %v14359_v47 }
 0x43c   :  { %v2635_v26 = vpop.f32.mrb[20].mxu0 }
 0x43d   :  { %v10055_v8 = vadd.f32 %v9919_v49, %v2635_v26  ;;  %v2637_v13 = vpop.f32.mrb[21].mxu0  ;;  %v10069_v49 = vpop.f32.mrb[47].mxu1  ;;  %v8361_v26 = vld [vmem:[%s13972_s2] sm:$0xff]  }
 0x43e   :  { %v2638_v55 = vpop.f32.mrb[22].mxu0  ;;  %5126 = vmatpush1.bf16.msra.mxu1 %v8361_v26 }
 0x43f   :  { %14383 = vst [vmem:[#allocation5_spill] sm:$0xff] %v10055_v8  ;;  %v10058_v38 = vadd.f32 %v9923_v22, %v2638_v55  ;;  %v2640_v21 = vpop.f32.mrb[23].mxu0  ;;  %5127 = vmatprep.subr.bf16.mxu1 %v14267_v29 }
 0x441   :  { %14384 = vst [vmem:[#allocation6_spill] sm:$0xff] %v10058_v38 }
 0x444   :  { %v2643_v34 = vpop.f32.mrb[24].mxu0 }
 0x445   :  { %v10065_v50 = vadd.f32 %v9933_v59, %v2643_v34  ;;  %v2645_v10 = vpop.f32.mrb[25].mxu0 }
 0x446   :  { %v2646_v57 = vpop.f32.mrb[26].mxu0  ;;  %v10087_v10 = vpop.f32.mrb[48].mxu1 }
 0x447   :  { %v10072_v31 = vadd.f32 %v9937_v18, %v2646_v57  ;;  %v2648_v22 = vpop.f32.mrb[27].mxu0  ;;  %v8362_v18 = vld [vmem:[%s13972_s2 + $0x8] sm:$0xff]  }
 0x448   :  { %v10089_v22 = vpop.f32.mrb[49].mxu1  ;;  %5128 = vmatpush1.bf16.msra.mxu1 %v8362_v18  ;;  %v3205_v18 = vadd.f32 %v10003_v19, %v9996_v15 }
 0x449   :  { %14385 = vst [vmem:[#allocation7_spill] sm:$0xff] %v10072_v31  ;;  %v10094_v26 = vpop.f32.mrb[50].mxu1  ;;  %5129 = vmatprep.subr.bf16.mxu1 %v14267_v29 }
 0x44a   :  { %14388 = vst [vmem:[#allocation10_spill] sm:$0xff] %v10094_v26  ;;  %v3206_v5 = vadd.f32 %v3205_v18, %v10008_v17 }
 0x44c   :  { %v2651_v43 = vpop.f32.mrb[28].mxu0  ;;  %5130 = vmatpush1.bf16.msra.mxu1 %v8363_v7  ;;  %v8364_v7 = vld [vmem:[%s13972_s2 + $0x18] sm:$0xff]  }
 0x44d   :  { %v10078_v13 = vadd.f32 %v9931_v23, %v2651_v43  ;;  %v2653_v59 = vpop.f32.mrb[29].mxu0  ;;  %5131 = vmatprep.subr.bf16.mxu1 %v14267_v29 }
 0x44e   :  { %v2654_v55 = vpop.f32.mrb[30].mxu0  ;;  %v10096_v59 = vpop.f32.mrb[51].mxu1 }
 0x44f   :  { %v10081_v21 = vadd.f32 %v9935_v48, %v2654_v55  ;;  %v2656_v34 = vpop.f32.mrb[31].mxu0  ;;  %v3142_v55 = vmul.f32 %v10003_v19, %v10003_v19 }
 0x450   :  { %5132 = vmatpush1.bf16.msra.mxu1 %v8364_v7 }
 0x451   :  { %14386 = vst [vmem:[#allocation8_spill] sm:$0xff] %v10081_v21  ;;  %5133 = vmatprep.subr.bf16.mxu1 %v14267_v29 }
 0x454   :  { %v2659_v57 = vpop.f32.mrb[32].mxu0 }
 0x455   :  { %v10092_v23 = vadd.f32 %v9945_v46, %v2659_v57  ;;  %v2661_v43 = vpop.f32.mrb[33].mxu0  ;;  %v3141_v46 = vmul.f32 %v9996_v15, %v9996_v15  ;;  %v3143_v57 = vmul.f32 %v10008_v17, %v10008_v17 }
 0x456   :  { %v2662_v48 = vpop.f32.mrb[34].mxu0 }
 0x457   :  { %14387 = vst [vmem:[#allocation9_spill] sm:$0xff] %v10092_v23  ;;  %v10102_v34 = vadd.f32 %v9949_v6, %v2662_v48  ;;  %v2664_v35 = vpop.f32.mrb[35].mxu0  ;;  %v3274_v43 = vadd.f32 %v3142_v55, %v3141_v46  ;;  %v3207_v55 = vadd.f32 %v3206_v5, %v10011_v62  ;;  %v3145_v46 = vmul.f32 %v10020_v16, %v10020_v16 }
 0x458   :  { %v3144_v35 = vmul.f32 %v10011_v62, %v10011_v62 }
 0x459   :  { %v3275_v6 = vadd.f32 %v3274_v43, %v3143_v57  ;;  %v3208_v17 = vadd.f32 %v3207_v55, %v10020_v16 }
 0x45b   :  { %v3276_v43 = vadd.f32 %v3275_v6, %v3144_v35 }
 0x45c   :  { %v2667_v47 = vpop.f32.mrb[36].mxu0 }
 0x45d   :  { %v10117_v48 = vadd.f32 %v9943_v36, %v2667_v47  ;;  %v2669_v26 = vpop.f32.mrb[37].mxu0  ;;  %v3277_v15 = vadd.f32 %v3276_v43, %v3145_v46  ;;  %v3146_v47 = vmul.f32 %v10027_v1, %v10027_v1  ;;  %v10132_v36 = vpop.f32.mrb[52].mxu1 }
 0x45e   :  { %v2670_v19 = vpop.f32.mrb[38].mxu0  ;;  %v10134_v26 = vpop.f32.mrb[53].mxu1 }
 0x45f   :  { %14389 = vst [vmem:[#allocation12_spill] sm:$0xff] %v10117_v48  ;;  %v10124_v18 = vadd.f32 %v9947_v60, %v2670_v19  ;;  %v2672_v57 = vpop.f32.mrb[39].mxu0  ;;  %v3209_v60 = vadd.f32 %v3208_v17, %v10027_v1  ;;  %v3147_v19 = vmul.f32 %v10032_v40, %v10032_v40  ;;  %v10142_v55 = vpop.f32.mrb[54].mxu1  ;;  %v3278_v43 = vadd.f32 %v3277_v15, %v3146_v47 }
 0x460   :  { %v10144_v57 = vpop.f32.mrb[55].mxu1 }
 0x461   :  { %14390 = vst [vmem:[#allocation27_spill] sm:$0xff] %v10124_v18  ;;  %v3210_v16 = vadd.f32 %v3209_v60, %v10032_v40  ;;  %v3279_v62 = vadd.f32 %v3278_v43, %v3147_v19 }
 0x463   :  { %v3211_v7 = vadd.f32 %v3210_v16, %v10035_v53 }
 0x464   :  { %v2675_v5 = vpop.f32.mrb[40].mxu0 }
 0x465   :  { %v10140_v6 = vadd.f32 %v9957_v44, %v2675_v5  ;;  %v2677_v35 = vpop.f32.mrb[41].mxu0  ;;  %v3148_v44 = vmul.f32 %v10035_v53, %v10035_v53  ;;  %v3149_v5 = vmul.f32 %v10044_v2, %v10044_v2  ;;  %v3212_v60 = vadd.f32 %v3211_v7, %v10044_v2 }
 0x466   :  { %v2678_v46 = vpop.f32.mrb[42].mxu0  ;;  %v8365_v35 = vld [vmem:[%s13972_s2 + $0x20] sm:$0xff]  }
 0x467   :  { %v10149_v17 = vadd.f32 %v9961_v45, %v2678_v46  ;;  %v2680_v1 = vpop.f32.mrb[43].mxu0  ;;  %v3280_v47 = vadd.f32 %v3279_v62, %v3148_v44  ;;  %5134 = vmatpush1.bf16.msra.mxu1 %v8365_v35  ;;  %v3150_v46 = vmul.f32 %v10051_v20, %v10051_v20  ;;  %v3213_v62 = vadd.f32 %v3212_v60, %v10051_v20  ;;  %v8366_v35 = vld [vmem:[%s13972_s2 + $0x28] sm:$0xff]   ;;  %v8367_v20 = vld [vmem:[%s13972_s2 + $0x30] sm:$0xff]  }
 0x468   :  { %5135 = vmatprep.subr.bf16.mxu1 %v14267_v29  ;;  %v3151_v44 = vmul.f32 %v10055_v8, %v10055_v8 }
 0x469   :  { %v3281_v16 = vadd.f32 %v3280_v47, %v3149_v5  ;;  %v3214_v7 = vadd.f32 %v3213_v62, %v10055_v8  ;;  %v10176_v5 = vpop.f32.mrb[56].mxu1 }
 0x46a   :  { %v10178_v47 = vpop.f32.mrb[57].mxu1 }
 0x46b   :  { %5136 = vmatpush1.bf16.msra.mxu1 %v8366_v35  ;;  %v3215_v62 = vadd.f32 %v3214_v7, %v10058_v38 }
 0x46c   :  { %v2683_v15 = vpop.f32.mrb[44].mxu0  ;;  %5137 = vmatprep.subr.bf16.mxu1 %v14267_v29 }
 0x46d   :  { %v10161_v45 = vadd.f32 %v9955_v32, %v2683_v15  ;;  %v2685_v1 = vpop.f32.mrb[45].mxu0  ;;  %v3282_v32 = vadd.f32 %v3281_v16, %v3150_v46 }
 0x46e   :  { %v2686_v19 = vpop.f32.mrb[46].mxu0 }
 0x46f   :  { %v10167_v43 = vadd.f32 %v9959_v9, %v2686_v19  ;;  %v2688_v53 = vpop.f32.mrb[47].mxu0  ;;  %v3283_v9 = vadd.f32 %v3282_v32, %v3151_v44  ;;  %v10185_v19 = vpop.f32.mrb[58].mxu1  ;;  %v3153_v44 = vmul.f32 %v10065_v50, %v10065_v50  ;;  %5138 = vmatpush1.bf16.msra.mxu1 %v8367_v20 }
 0x470   :  { %v3152_v53 = vmul.f32 %v10058_v38, %v10058_v38  ;;  %v10187_v46 = vpop.f32.mrb[59].mxu1  ;;  %v3155_v38 = vmul.f32 %v10078_v13, %v10078_v13  ;;  %5139 = vmatprep.subr.bf16.mxu1 %v14267_v29 }
 0x471   :  { %v10221_v20 = vpop.f32.mrb[60].mxu1 }
 0x474   :  { %v2691_v15 = vpop.f32.mrb[48].mxu0 }
 0x475   :  { %v10183_v60 = vadd.f32 %v9969_v61, %v2691_v15  ;;  %v2693_v1 = vpop.f32.mrb[49].mxu0  ;;  %v3284_v61 = vadd.f32 %v3283_v9, %v3152_v53  ;;  %v3216_v15 = vadd.f32 %v3215_v62, %v10065_v50 }
 0x476   :  { %v2694_v16 = vpop.f32.mrb[50].mxu0  ;;  %v3154_v1 = vmul.f32 %v10072_v31, %v10072_v31 }
 0x477   :  { %v10194_v32 = vadd.f32 %v9973_v54, %v2694_v16  ;;  %v2696_v8 = vpop.f32.mrb[51].mxu0  ;;  %v3285_v35 = vadd.f32 %v3284_v61, %v3153_v44  ;;  %v3217_v7 = vadd.f32 %v3216_v15, %v10072_v31  ;;  %v3156_v15 = vmul.f32 %v10081_v21, %v10081_v21 }
 0x479   :  { %v3286_v53 = vadd.f32 %v3285_v35, %v3154_v1  ;;  %v3218_v16 = vadd.f32 %v3217_v7, %v10078_v13  ;;  %v10223_v1 = vpop.f32.mrb[61].mxu1 }
 0x47b   :  { %v3287_v61 = vadd.f32 %v3286_v53, %v3155_v38  ;;  %v3219_v31 = vadd.f32 %v3218_v16, %v10081_v21  ;;  %v3158_v21 = vmul.f32 %v10102_v34, %v10102_v34 }
 0x47c   :  { %v2699_v2 = vpop.f32.mrb[52].mxu0 }
 0x47d   :  { %v10206_v54 = vadd.f32 %v9967_v0, %v2699_v2  ;;  %v2701_v8 = vpop.f32.mrb[53].mxu0  ;;  %v3157_v0 = vmul.f32 %v10092_v23, %v10092_v23  ;;  %v8368_v2 = vld [vmem:[%s13972_s2 + $0x38] sm:$0xff]   ;;  %v3220_v38 = vadd.f32 %v3219_v31, %v10092_v23  ;;  %v3160_v23 = vmul.f32 %v10124_v18, %v10124_v18 }
 0x47e   :  { %v2702_v9 = vpop.f32.mrb[54].mxu0  ;;  %5140 = vmatpush1.bf16.msra.mxu1 %v8368_v2 }
 0x47f   :  { %v10211_v62 = vadd.f32 %v9971_v42, %v2702_v9  ;;  %v2704_v44 = vpop.f32.mrb[55].mxu0  ;;  %v3288_v42 = vadd.f32 %v3287_v61, %v3156_v15  ;;  %v10229_v9 = vpop.f32.mrb[62].mxu1  ;;  %5141 = vmatprep.subr.bf16.mxu1 %v14267_v29  ;;  %v3159_v15 = vmul.f32 %v10117_v48, %v10117_v48 }
 0x480   :  { %v10231_v16 = vpop.f32.mrb[63].mxu1 }
 0x481   :  { %v3289_v44 = vadd.f32 %v3288_v42, %v3157_v0 }
 0x483   :  { %v3290_v2 = vadd.f32 %v3289_v44, %v3158_v21  ;;  %v3161_v44 = vmul.f32 %v10140_v6, %v10140_v6 }
 0x484   :  { %v2707_v35 = vpop.f32.mrb[56].mxu0 }
 0x485   :  { %v10227_v7 = vadd.f32 %v9981_v24, %v2707_v35  ;;  %v2709_v8 = vpop.f32.mrb[57].mxu0  ;;  %v3221_v24 = vadd.f32 %v3220_v38, %v10102_v34  ;;  %v3291_v42 = vadd.f32 %v3290_v2, %v3159_v15 }
 0x486   :  { %v2710_v53 = vpop.f32.mrb[58].mxu0  ;;  %v8369_v8 = vld [vmem:[%s13972_s2 + $0x40] sm:$0xff]  }
 0x487   :  { %v10237_v61 = vadd.f32 %v9985_v30, %v2710_v53  ;;  %v2712_v31 = vpop.f32.mrb[59].mxu0  ;;  %v3222_v35 = vadd.f32 %v3221_v24, %v10117_v48  ;;  %5142 = vmatpush1.bf16.msra.mxu1 %v8369_v8  ;;  %v3292_v15 = vadd.f32 %v3291_v42, %v3160_v23 }
 0x488   :  { %5143 = vmatprep.subr.bf16.mxu1 %v14267_v29 }
 0x489   :  { %v3223_v21 = vadd.f32 %v3222_v35, %v10124_v18  ;;  %v3293_v48 = vadd.f32 %v3292_v15, %v3161_v44  ;;  %v3163_v35 = vmul.f32 %v10161_v45, %v10161_v45 }
 0x48b   :  { %v3224_v2 = vadd.f32 %v3223_v21, %v10140_v6 }
 0x48c   :  { %v2715_v0 = vpop.f32.mrb[60].mxu0 }
 0x48d   :  { %v10249_v30 = vadd.f32 %v9979_v25, %v2715_v0  ;;  %v2717_v53 = vpop.f32.mrb[61].mxu0  ;;  %v3162_v25 = vmul.f32 %v10149_v17, %v10149_v17  ;;  %v3225_v0 = vadd.f32 %v3224_v2, %v10149_v17  ;;  %v3165_v2 = vmul.f32 %v10183_v60, %v10183_v60 }
 0x48e   :  { %v2718_v38 = vpop.f32.mrb[62].mxu0 }
 0x48f   :  { %v10256_v31 = vadd.f32 %v9983_v39, %v2718_v38  ;;  %v2720_v24 = vpop.f32.mrb[63].mxu0  ;;  %v3294_v38 = vadd.f32 %v3293_v48, %v3162_v25  ;;  %v3226_v23 = vadd.f32 %v3225_v0, %v10161_v45 }
 0x490   :  { %v3164_v24 = vmul.f32 %v10167_v43, %v10167_v43 }
 0x491   :  { %v3295_v44 = vadd.f32 %v3294_v38, %v3163_v35  ;;  %v3227_v15 = vadd.f32 %v3226_v23, %v10167_v43  ;;  %v3166_v35 = vmul.f32 %v10194_v32, %v10194_v32 }
 0x494   :  { %v2723_v8 = vpop.f32.mrb[64].mxu0 }
 0x495   :  { %v10265_v53 = vadd.f32 %v9993_v33, %v2723_v8  ;;  %v2725_v18 = vpop.f32.mrb[65].mxu0  ;;  %v3296_v8 = vadd.f32 %v3295_v44, %v3164_v24 }
 0x496   :  { %v2726_v39 = vpop.f32.mrb[66].mxu0  ;;  %v3228_v18 = vadd.f32 %v3227_v15, %v10183_v60 }
 0x497   :  { %v10269_v42 = vadd.f32 %v10000_v3, %v2726_v39  ;;  %v2728_v21 = vpop.f32.mrb[67].mxu0  ;;  %v3297_v0 = vadd.f32 %v3296_v8, %v3165_v2  ;;  %v3168_v2 = vmul.f32 %v10211_v62, %v10211_v62 }
 0x498   :  { %v3229_v23 = vadd.f32 %v3228_v18, %v10194_v32  ;;  %v3167_v21 = vmul.f32 %v10206_v54, %v10206_v54  ;;  %v3169_v18 = vmul.f32 %v10227_v7, %v10227_v7 }
 0x499   :  { %v3298_v44 = vadd.f32 %v3297_v0, %v3166_v35 }
 0x49a   :  { %v3230_v24 = vadd.f32 %v3229_v23, %v10206_v54 }
 0x49b   :  { %v3299_v15 = vadd.f32 %v3298_v44, %v3167_v21  ;;  %v3170_v21 = vmul.f32 %v10237_v61, %v10237_v61 }
 0x49c   :  { %v2731_v33 = vpop.f32.mrb[68].mxu0 }
 0x49d   :  { %v10278_v48 = vadd.f32 %v9991_v4, %v2731_v33  ;;  %v2733_v25 = vpop.f32.mrb[69].mxu0  ;;  %v3300_v35 = vadd.f32 %v3299_v15, %v3168_v2 }
 0x49e   :  { %v2734_v3 = vpop.f32.mrb[70].mxu0  ;;  %v3231_v25 = vadd.f32 %v3230_v24, %v10211_v62  ;;  %v3171_v24 = vmul.f32 %v10249_v30, %v10249_v30 }
 0x49f   :  { %v10283_v39 = vadd.f32 %v9998_v37, %v2734_v3  ;;  %v2736_v38 = vpop.f32.mrb[71].mxu0  ;;  %v3301_v23 = vadd.f32 %v3300_v35, %v3169_v18 }
 0x4a0   :  { %v3232_v38 = vadd.f32 %v3231_v25, %v10227_v7 }
 0x4a2   :  { %v3233_v44 = vadd.f32 %v3232_v38, %v10237_v61  ;;  %v3173_v38 = vmul.f32 %v10265_v53, %v10265_v53 }
 0x4a4   :  { %v2739_v4 = vpop.f32.mrb[72].mxu0  ;;  %v3234_v15 = vadd.f32 %v3233_v44, %v10249_v30 }
 0x4a5   :  { %v10292_v33 = vadd.f32 %v10017_v63, %v2739_v4  ;;  %v2741_v8 = vpop.f32.mrb[73].mxu0 }
 0x4a6   :  { %v2742_v37 = vpop.f32.mrb[74].mxu0  ;;  %v3235_v35 = vadd.f32 %v3234_v15, %v10256_v31 }
 0x4a7   :  { %v10298_v3 = vadd.f32 %v10024_v14, %v2742_v37  ;;  %v2744_v0 = vpop.f32.mrb[75].mxu0  ;;  %v3302_v37 = vadd.f32 %v3301_v23, %v3170_v21 }
 0x4a8   :  { %v3172_v0 = vmul.f32 %v10256_v31, %v10256_v31 }
 0x4a9   :  { %v3303_v18 = vadd.f32 %v3302_v37, %v3171_v24  ;;  %v3174_v24 = vmul.f32 %v10269_v42, %v10269_v42 }
 0x4ac   :  { %v2747_v63 = vpop.f32.mrb[76].mxu0 }
 0x4ad   :  { %v10307_v4 = vadd.f32 %v10015_v56, %v2747_v63  ;;  %v2749_v8 = vpop.f32.mrb[77].mxu0  ;;  %v3304_v63 = vadd.f32 %v3303_v18, %v3172_v0 }
 0x4ae   :  { %v2750_v14 = vpop.f32.mrb[78].mxu0  ;;  %v3236_v8 = vadd.f32 %v3235_v35, %v10265_v53 }
 0x4af   :  { %v10311_v2 = vadd.f32 %v10022_v41, %v2750_v14  ;;  %v2752_v25 = vpop.f32.mrb[79].mxu0  ;;  %v3305_v44 = vadd.f32 %v3304_v63, %v3173_v38  ;;  %v3176_v38 = vmul.f32 %v10283_v39, %v10283_v39 }
 0x4b0   :  { %v3237_v15 = vadd.f32 %v3236_v8, %v10269_v42  ;;  %v3175_v25 = vmul.f32 %v10278_v48, %v10278_v48  ;;  %v3177_v8 = vmul.f32 %v10292_v33, %v10292_v33 }
 0x4b1   :  { %v3306_v18 = vadd.f32 %v3305_v44, %v3174_v24 }
 0x4b2   :  { %v3238_v0 = vadd.f32 %v3237_v15, %v10278_v48 }
 0x4b3   :  { %v3307_v35 = vadd.f32 %v3306_v18, %v3175_v25  ;;  %v3178_v25 = vmul.f32 %v10298_v3, %v10298_v3 }
 0x4b4   :  { %v2755_v56 = vpop.f32.mrb[80].mxu0 }
 0x4b5   :  { %v10320_v23 = vadd.f32 %v10041_v51, %v2755_v56  ;;  %v2757_v21 = vpop.f32.mrb[81].mxu0  ;;  %v3308_v24 = vadd.f32 %v3307_v35, %v3176_v38 }
 0x4b6   :  { %v2758_v41 = vpop.f32.mrb[82].mxu0  ;;  %v3239_v21 = vadd.f32 %v3238_v0, %v10283_v39  ;;  %v3179_v0 = vmul.f32 %v10307_v4, %v10307_v4 }
 0x4b7   :  { %v10325_v14 = vadd.f32 %v10048_v52, %v2758_v41  ;;  %v2760_v37 = vpop.f32.mrb[83].mxu0  ;;  %v3309_v15 = vadd.f32 %v3308_v24, %v3177_v8 }
 0x4b8   :  { %v3240_v37 = vadd.f32 %v3239_v21, %v10292_v33 }
 0x4ba   :  { %v3241_v18 = vadd.f32 %v3240_v37, %v10298_v3  ;;  %v3181_v37 = vmul.f32 %v10320_v23, %v10320_v23 }
 0x4bc   :  { %v2763_v51 = vpop.f32.mrb[84].mxu0  ;;  %v3242_v35 = vadd.f32 %v3241_v18, %v10307_v4 }
 0x4bd   :  { %v10334_v56 = vadd.f32 %v10039_v12, %v2763_v51  ;;  %v2765_v63 = vpop.f32.mrb[85].mxu0 }
 0x4be   :  { %v2766_v52 = vpop.f32.mrb[86].mxu0  ;;  %v3243_v24 = vadd.f32 %v3242_v35, %v10311_v2 }
 0x4bf   :  { %v10340_v41 = vadd.f32 %v10046_v58, %v2766_v52  ;;  %v2768_v44 = vpop.f32.mrb[87].mxu0  ;;  %v3310_v52 = vadd.f32 %v3309_v15, %v3178_v25 }
 0x4c0   :  { %v3180_v44 = vmul.f32 %v10311_v2, %v10311_v2 }
 0x4c1   :  { %v3311_v8 = vadd.f32 %v3310_v52, %v3179_v0  ;;  %v3182_v0 = vmul.f32 %v10325_v14, %v10325_v14 }
 0x4c4   :  { %v2771_v12 = vpop.f32.mrb[88].mxu0 }
 0x4c5   :  { %v10349_v51 = vadd.f32 %v10062_v27, %v2771_v12  ;;  %v2773_v63 = vpop.f32.mrb[89].mxu0  ;;  %v3312_v12 = vadd.f32 %v3311_v8, %v3180_v44 }
 0x4c6   :  { %v2774_v58 = vpop.f32.mrb[90].mxu0  ;;  %v3244_v63 = vadd.f32 %v3243_v24, %v10320_v23 }
 0x4c7   :  { %v10353_v38 = vadd.f32 %v10069_v49, %v2774_v58  ;;  %v2776_v21 = vpop.f32.mrb[91].mxu0  ;;  %v3313_v18 = vadd.f32 %v3312_v12, %v3181_v37  ;;  %v3184_v37 = vmul.f32 %v10340_v41, %v10340_v41 }
 0x4c8   :  { %v3245_v35 = vadd.f32 %v3244_v63, %v10325_v14  ;;  %v3183_v21 = vmul.f32 %v10334_v56, %v10334_v56  ;;  %v3185_v63 = vmul.f32 %v10349_v51, %v10349_v51 }
 0x4c9   :  { %v3314_v8 = vadd.f32 %v3313_v18, %v3182_v0 }
 0x4ca   :  { %v3246_v44 = vadd.f32 %v3245_v35, %v10334_v56 }
 0x4cb   :  { %v3315_v24 = vadd.f32 %v3314_v8, %v3183_v21  ;;  %v3186_v21 = vmul.f32 %v10353_v38, %v10353_v38 }
 0x4cc   :  { %v2779_v27 = vpop.f32.mrb[92].mxu0 }
 0x4cd   :  { %v10362_v15 = vadd.f32 %v10060_v28, %v2779_v27  ;;  %v2781_v25 = vpop.f32.mrb[93].mxu0  ;;  %v3316_v0 = vadd.f32 %v3315_v24, %v3184_v37  ;;  %v14391_v37 = vld [vmem:[#allocation10_spill] sm:$0xff] }
 0x4ce   :  { %v2782_v49 = vpop.f32.mrb[94].mxu0  ;;  %v3247_v25 = vadd.f32 %v3246_v44, %v10340_v41 }
 0x4cf   :  { %v10367_v58 = vadd.f32 %v10067_v11, %v2782_v49  ;;  %v2784_v52 = vpop.f32.mrb[95].mxu0  ;;  %v3317_v35 = vadd.f32 %v3316_v0, %v3185_v63  ;;  %v3187_v44 = vmul.f32 %v10362_v15, %v10362_v15 }
 0x4d0   :  { %v3248_v52 = vadd.f32 %v3247_v25, %v10349_v51 }
 0x4d1   :  { %v3188_v0 = vmul.f32 %v10367_v58, %v10367_v58 }
 0x4d2   :  { %v3249_v8 = vadd.f32 %v3248_v52, %v10353_v38  ;;  %v8374_v52 = vld [vmem:[%s13972_s2 + $0x200] sm:$0xff]  }
 0x4d3   :  { %7424 = vmatprep.subr.bf16.mxu0 %v8374_v52 }
 0x4d4   :  { %v2787_v28 = vpop.f32.mrb[96].mxu0  ;;  %v3250_v24 = vadd.f32 %v3249_v8, %v10362_v15  ;;  %7425 = vmatpush3.bf16.msra.mxu0 %v8374_v52 }
 0x4d5   :  { %v10376_v27 = vadd.f32 %v10089_v22, %v2787_v28  ;;  %v2789_v12 = vpop.f32.mrb[97].mxu0 }
 0x4d6   :  { %v2790_v11 = vpop.f32.mrb[98].mxu0 }
 0x4d7   :  { %v10382_v49 = vadd.f32 %v10096_v59, %v2790_v11  ;;  %v2792_v18 = vpop.f32.mrb[99].mxu0  ;;  %v3318_v11 = vadd.f32 %v3317_v35, %v3186_v21  ;;  %v3251_v35 = vadd.f32 %v3250_v24, %v10367_v58  ;;  %v3189_v21 = vmul.f32 %v10376_v27, %v10376_v27 }
 0x4d9   :  { %v3319_v18 = vadd.f32 %v3318_v11, %v3187_v44  ;;  %v3252_v44 = vadd.f32 %v3251_v35, %v10376_v27  ;;  %v8375_v11 = vld [vmem:[%s13972_s2 + $0x208] sm:$0xff]   ;;  %v8377_v35 = vld [vmem:[%s13972_s2 + $0x210] sm:$0xff]  }
 0x4da   :  { %7426 = vmatprep.subr.bf16.mxu0 %v8375_v11 }
 0x4db   :  { %v3320_v8 = vadd.f32 %v3319_v18, %v3188_v0  ;;  %v3190_v18 = vmul.f32 %v10382_v49, %v10382_v49  ;;  %7427 = vmatpush3.bf16.msra.mxu0 %v8375_v11  ;;  %v3253_v52 = vadd.f32 %v3252_v44, %v10382_v49 }
 0x4dc   :  { %v2795_v22 = vpop.f32.mrb[100].mxu0  ;;  %7428 = vmatprep.subr.bf16.mxu0 %v8377_v35 }
 0x4dd   :  { %v10391_v28 = vadd.f32 %v10087_v10, %v2795_v22  ;;  %v2797_v12 = vpop.f32.mrb[101].mxu0  ;;  %v8370_v10 = vld [vmem:[%s13972_s2 + $0x48] sm:$0xff]  }
 0x4de   :  { %v2798_v59 = vpop.f32.mrb[102].mxu0  ;;  %5144 = vmatpush1.bf16.msra.mxu1 %v8370_v10 }
 0x4df   :  { %v10395_v25 = vadd.f32 %v14391_v37, %v2798_v59  ;;  %v2800_v63 = vpop.f32.mrb[103].mxu0  ;;  %5145 = vmatprep.subr.bf16.mxu1 %v14267_v29  ;;  %v8371_v37 = vld [vmem:[%s13972_s2 + $0x50] sm:$0xff]   ;;  %v3191_v10 = vmul.f32 %v10391_v28, %v10391_v28  ;;  %7429 = vmatpush3.bf16.msra.mxu0 %v8377_v35 }
 0x4e0   :  { %v3321_v63 = vadd.f32 %v3320_v8, %v3189_v21 }
 0x4e2   :  { %5146 = vmatpush1.bf16.msra.mxu1 %v8371_v37  ;;  %v3322_v21 = vadd.f32 %v3321_v63, %v3190_v18  ;;  %v8378_v37 = vld [vmem:[%s13972_s2 + $0x218] sm:$0xff]   ;;  %v8373_v18 = vld [vmem:[%s13972_s2 + $0x60] sm:$0xff]  }
 0x4e3   :  { %5147 = vmatprep.subr.bf16.mxu1 %v14267_v29  ;;  %7430 = vmatprep.subr.bf16.mxu0 %v8378_v37 }
 0x4e4   :  { %v2803_v22 = vpop.f32.mrb[104].mxu0  ;;  %v3323_v44 = vadd.f32 %v3322_v21, %v3191_v10  ;;  %7431 = vmatpush3.bf16.msra.mxu0 %v8378_v37  ;;  %v8380_v21 = vld [vmem:[%s13972_s2 + $0x220] sm:$0xff]  }
 0x4e5   :  { %v10410_v12 = vadd.f32 %v10134_v26, %v2803_v22  ;;  %v2805_v59 = vpop.f32.mrb[105].mxu0  ;;  %v3254_v22 = vadd.f32 %v3253_v52, %v10391_v28  ;;  %7432 = vmatprep.subr.bf16.mxu0 %v8380_v21 }
 0x4e6   :  { %v2806_v24 = vpop.f32.mrb[106].mxu0  ;;  %v3192_v59 = vmul.f32 %v10395_v25, %v10395_v25 }
 0x4e7   :  { %v10422_v0 = vadd.f32 %v10144_v57, %v2806_v24  ;;  %v2808_v26 = vpop.f32.mrb[107].mxu0  ;;  %v8372_v57 = vld [vmem:[%s13972_s2 + $0x58] sm:$0xff]   ;;  %v3193_v52 = vmul.f32 %v10410_v12, %v10410_v12 }
 0x4e8   :  { %5148 = vmatpush1.bf16.msra.mxu1 %v8372_v57  ;;  %v3255_v26 = vadd.f32 %v3254_v22, %v10395_v25  ;;  %v3324_v35 = vadd.f32 %v3323_v44, %v3192_v59  ;;  %v8376_v22 = vld [vmem:[%s13972_s2 + $0x68] sm:$0xff]   ;;  %7433 = vmatpush3.bf16.msra.mxu0 %v8380_v21 }
 0x4e9   :  { %5149 = vmatprep.subr.bf16.mxu1 %v14267_v29 }
 0x4ea   :  { %v3256_v57 = vadd.f32 %v3255_v26, %v10410_v12 }
 0x4ec   :  { %v2811_v8 = vpop.f32.mrb[108].mxu0  ;;  %5150 = vmatpush1.bf16.msra.mxu1 %v8373_v18  ;;  %v3257_v44 = vadd.f32 %v3256_v57, %v10422_v0  ;;  %v8381_v18 = vld [vmem:[%s13972_s2 + $0x228] sm:$0xff]  }
 0x4ed   :  { %v10438_v11 = vadd.f32 %v10132_v36, %v2811_v8  ;;  %v2813_v24 = vpop.f32.mrb[109].mxu0  ;;  %5151 = vmatprep.subr.bf16.mxu1 %v14267_v29  ;;  %v3325_v8 = vadd.f32 %v3324_v35, %v3193_v52  ;;  %v8379_v52 = vld [vmem:[%s13972_s2 + $0x70] sm:$0xff]   ;;  %7434 = vmatprep.subr.bf16.mxu0 %v8381_v18 }
 0x4ee   :  { %v2814_v63 = vpop.f32.mrb[110].mxu0  ;;  %7435 = vmatpush3.bf16.msra.mxu0 %v8381_v18 }
 0x4ef   :  { %14392 = vst [vmem:[#allocation29_spill] sm:$0xff] %v10438_v11  ;;  %v10451_v36 = vadd.f32 %v10142_v55, %v2814_v63  ;;  %v2816_v10 = vpop.f32.mrb[111].mxu0  ;;  %v3194_v55 = vmul.f32 %v10422_v0, %v10422_v0  ;;  %v3195_v59 = vmul.f32 %v10438_v11, %v10438_v11  ;;  %v3258_v35 = vadd.f32 %v3257_v44, %v10438_v11  ;;  %v14396_v11 = vld [vmem:[#allocation3_spill] sm:$0xff] }
 0x4f0   :  { %5152 = vmatpush1.bf16.msra.mxu1 %v8376_v22 }
 0x4f1   :  { %14393 = vst [vmem:[#allocation31_spill] sm:$0xff] %v10451_v36  ;;  %5153 = vmatprep.subr.bf16.mxu1 %v14267_v29  ;;  %v3326_v10 = vadd.f32 %v3325_v8, %v3194_v55  ;;  %v3196_v22 = vmul.f32 %v10451_v36, %v10451_v36  ;;  %v8383_v8 = vld [vmem:[%s13972_s2 + $0x230] sm:$0xff]   ;;  %v3259_v55 = vadd.f32 %v3258_v35, %v10451_v36 }
 0x4f2   :  { %7436 = vmatprep.subr.bf16.mxu0 %v8383_v8 }
 0x4f3   :  { %v3327_v21 = vadd.f32 %v3326_v10, %v3195_v59  ;;  %7437 = vmatpush3.bf16.msra.mxu0 %v8383_v8 }
 0x4f4   :  { %v2819_v24 = vpop.f32.mrb[112].mxu0  ;;  %5154 = vmatpush1.bf16.msra.mxu1 %v8379_v52 }
 0x4f5   :  { %v10467_v37 = vadd.f32 %v10178_v47, %v2819_v24  ;;  %v2821_v63 = vpop.f32.mrb[113].mxu0  ;;  %5155 = vmatprep.subr.bf16.mxu1 %v14267_v29  ;;  %v8382_v24 = vld [vmem:[%s13972_s2 + $0x78] sm:$0xff]   ;;  %v3328_v18 = vadd.f32 %v3327_v21, %v3196_v22 }
 0x4f6   :  { %v2822_v26 = vpop.f32.mrb[114].mxu0  ;;  %v8385_v63 = vld [vmem:[%s13972_s2 + $0x80] sm:$0xff]  }
 0x4f7   :  { %v10478_v57 = vadd.f32 %v10187_v46, %v2822_v26  ;;  %v2824_v47 = vpop.f32.mrb[115].mxu0  ;;  %v8384_v46 = vld [vmem:[%s13972_s2 + $0x238] sm:$0xff]   ;;  %v3197_v44 = vmul.f32 %v10467_v37, %v10467_v37  ;;  %v3260_v26 = vadd.f32 %v3259_v55, %v10467_v37 }
 0x4f8   :  { %5156 = vmatpush1.bf16.msra.mxu1 %v8382_v24  ;;  %7438 = vmatprep.subr.bf16.mxu0 %v8384_v46 }
 0x4f9   :  { %5414 = vmatprep.subr.bf16.mxu1 %v14267_v29  ;;  %v3329_v47 = vadd.f32 %v3328_v18, %v3197_v44  ;;  %v3198_v24 = vmul.f32 %v10478_v57, %v10478_v57  ;;  %7439 = vmatpush3.bf16.msra.mxu0 %v8384_v46 }
 0x4fb   :  { %5158 = vmatmul.mubr.bf16.vlgmr.msra.gmra.mrb[64].mxu1 %v14396_v11  ;;  %v3330_v22 = vadd.f32 %v3329_v47, %v3198_v24 }
 0x4fc   :  { %v2827_v59 = vpop.f32.mrb[116].mxu0  ;;  %5415 = vmatpush1.bf16.msra.mxu1 %v8385_v63 }
 0x4fd   :  { %v10500_v52 = vadd.f32 %v10176_v5, %v2827_v59  ;;  %v2829_v10 = vpop.f32.mrb[117].mxu0  ;;  %v3261_v5 = vadd.f32 %v3260_v26, %v10478_v57  ;;  %5416 = vmatprep.subr.bf16.mxu1 %v14267_v29 }
 0x4fe   :  { %v2830_v35 = vpop.f32.mrb[118].mxu0 }
 0x4ff   :  { %14394 = vst [vmem:[#allocation34_spill] sm:$0xff] %v10500_v52  ;;  %v10506_v8 = vadd.f32 %v10185_v19, %v2830_v35  ;;  %v2832_v36 = vpop.f32.mrb[119].mxu0  ;;  %v3199_v21 = vmul.f32 %v10500_v52, %v10500_v52  ;;  %v3262_v55 = vadd.f32 %v3261_v5, %v10500_v52 }
 0x501   :  { %14395 = vst [vmem:[#allocation37_spill] sm:$0xff] %v10506_v8  ;;  %v3331_v59 = vadd.f32 %v3330_v22, %v3199_v21  ;;  %v3200_v19 = vmul.f32 %v10506_v8, %v10506_v8  ;;  %v3263_v18 = vadd.f32 %v3262_v55, %v10506_v8 }
 0x503   :  { %v3332_v47 = vadd.f32 %v3331_v59, %v3200_v19 }
 0x504   :  { %v2835_v44 = vpop.f32.mrb[120].mxu0 }
 0x505   :  { %v10517_v36 = vadd.f32 %v10223_v1, %v2835_v44  ;;  %v2837_v63 = vpop.f32.mrb[121].mxu0 }
 0x506   :  { %v2838_v46 = vpop.f32.mrb[122].mxu0 }
 0x507   :  { %v3201_v26 = vmul.f32 %v10517_v36, %v10517_v36  ;;  %v10523_v10 = vadd.f32 %v10231_v16, %v2838_v46  ;;  %v2840_v35 = vpop.f32.mrb[123].mxu0  ;;  %v3264_v24 = vadd.f32 %v3263_v18, %v10517_v36 }
 0x509   :  { %14397 = vst [vmem:[#allocation40_spill] sm:$0xff] %v10523_v10  ;;  %v3333_v5 = vadd.f32 %v3332_v47, %v3201_v26  ;;  %v3202_v21 = vmul.f32 %v10523_v10, %v10523_v10  ;;  %v3265_v22 = vadd.f32 %v3264_v24, %v10523_v10  ;;  %v8386_v26 = vld [vmem:[%s13972_s2 + $0x88] sm:$0xff]  }
 0x50a   :  { %5417 = vmatpush1.bf16.msra.mxu1 %v8386_v26 }
 0x50b   :  { %v3334_v11 = vadd.f32 %v3333_v5, %v3202_v21  ;;  %5418 = vmatprep.subr.bf16.mxu1 %v14267_v29 }
 0x50c   :  { %v2843_v1 = vpop.f32.mrb[124].mxu0 }
 0x50d   :  { %v3133_v44 = vadd.f32 %v10221_v20, %v2843_v1  ;;  %v2845_v55 = vpop.f32.mrb[125].mxu0 }
 0x50e   :  { %v2846_v63 = vpop.f32.mrb[126].mxu0 }
 0x50f   :  { %v3203_v8 = vmul.f32 %v3133_v44, %v3133_v44  ;;  %v3266_v52 = vadd.f32 %v3265_v22, %v3133_v44  ;;  %v3136_v16 = vadd.f32 %v10229_v9, %v2846_v63  ;;  %v2848_v46 = vpop.f32.mrb[127].mxu0 }
 0x511   :  { %v3335_v59 = vadd.f32 %v3334_v11, %v3203_v8  ;;  %v3204_v19 = vmul.f32 %v3136_v16, %v3136_v16  ;;  %v3267_v18 = vadd.f32 %v3266_v52, %v3136_v16 }
 0x513   :  { %v3268_v35 = vrot.slane %v3267_v18, 4  ;;  %v3336_v47 = vadd.f32 %v3335_v59, %v3204_v19  ;;  %v8387_v59 = vld [vmem:[%s13972_s2 + $0x90] sm:$0xff]  }
 0x514   :  { %5419 = vmatpush1.bf16.msra.mxu1 %v8387_v59  ;;  %v14400_v59 = vld [vmem:[#allocation36_spill] sm:$0xff] }
 0x515   :  { %v3269_v24 = vadd.f32 %v3268_v35, %v3267_v18  ;;  %v3337_v20 = vrot.slane %v3336_v47, 4  ;;  %5420 = vmatprep.subr.bf16.mxu1 %v14267_v29  ;;  %v3354_v35 = vlaneseq }
 0x517   :  { %v3270_v5 = vrot.slane %v3269_v24, 2  ;;  %v3338_v21 = vadd.f32 %v3337_v20, %v3336_v47  ;;  %v3355_v47 = vshrl.u32 %v3354_v35, 7 }
 0x519   :  { %v3271_v1 = vadd.f32 %v3270_v5, %v3269_v24  ;;  %v3339_v22 = vrot.slane %v3338_v21, 2  ;;  %v3139_v24 = vld [vmem:[%s13973_s3] sm:$0x1]  ;;  %v10542_v20 = vsub.s32 0, %v3355_v47  ;;  %v8388_v5 = vld [vmem:[%s13972_s2 + $0x98] sm:$0xff]  }
 0x51a   :  { %5421 = vmatpush1.bf16.msra.mxu1 %v8388_v5  ;;  %v14403_v47 = vld [vmem:[#allocation45_spill] sm:$0xff] }
 0x51b   :  { %v3272_v9 = vrot.slane %v3271_v1, 1  ;;  %v3340_v55 = vadd.f32 %v3339_v22, %v3338_v21  ;;  %14398 = vst [vmem:[#allocation43_spill] sm:$0xff] %v10542_v20  ;;  %5422 = vmatprep.subr.bf16.mxu1 %v14267_v29 }
 0x51d   :  { %v3273_v11 = vadd.f32 %v3272_v9, %v3271_v1  ;;  %v3341_v8 = vrot.slane %v3340_v55, 1  ;;  %v3140_v1 = vld [vmem:[%s13974_s4] sm:$0x1] }
 0x51f   :  { %v3342_v52 = vadd.f32 %v3341_v8, %v3340_v55  ;;  %v3343_v63 = vmul.f32 0.001953125, %v3273_v11 }
 0x521   :  { %v3344_v46 = vmul.f32 0.001953125, %v3342_v52  ;;  %v3345_v10 = vmul.f32 %v3343_v63, %v3343_v63  ;;  %v14399_v52 = vld [vmem:[#allocation33_spill] sm:$0xff] }
 0x523   :  { %v3346_v19 = vsub.f32 %v3344_v46, %v3345_v10 }
 0x525   :  { %v3347_v18 = vmax.f32 %v3346_v19, 0.0 }
 0x527   :  { %v3348_v26 = vadd.f32 1e-05, %v3347_v18  ;;  %v14401_v18 = vld [vmem:[#allocation39_spill] sm:$0xff] }
 0x529   :  { %8433 = vrsqrt.f32 %v3348_v26 }
 0x533   :  { %v8434_v21 = vpop.eup %8433 }
 0x534   :  { %v3350_v10 = vmul.f32 %v8434_v21, %v3139_v24  ;;  %v14404_v24 = vld [vmem:[#allocation48_spill] sm:$0xff] }
 0x536   :  { %v3351_v22 = vmul.f32 %v3350_v10, %v3343_v63  ;;  %v10552_v9 = vrot.slane %v3350_v10, %v10542_v20  ;;  %v14402_v63 = vld [vmem:[#allocation42_spill] sm:$0xff]  ;;  %v14405_v10 = vld [vmem:[#allocation51_spill] sm:$0xff] }
 0x538   :  { %v3352_v55 = vsub.f32 %v3140_v1, %v3351_v22  ;;  %v3421_v11 = vmul.f32 %v10552_v9, %v3133_v44  ;;  %v3422_v8 = vmul.f32 %v10552_v9, %v3136_v16  ;;  %v10558_v46 = vmul.f32 %v10552_v9, %v14399_v52  ;;  %v14406_v22 = vld [vmem:[#allocation54_spill] sm:$0xff] }
 0x539   :  { %v10562_v19 = vmul.f32 %v10552_v9, %v14400_v59  ;;  %v10566_v26 = vmul.f32 %v10552_v9, %v14401_v18  ;;  %v10570_v35 = vmul.f32 %v10552_v9, %v14402_v63  ;;  %v10574_v44 = vmul.f32 %v10552_v9, %v14403_v47  ;;  %v14407_v59 = vld [vmem:[#allocation57_spill] sm:$0xff]  ;;  %v14410_v47 = vld [vmem:[#allocation6_spill] sm:$0xff] }
 0x53a   :  { %v10577_v16 = vrot.slane %v3352_v55, %v10542_v20  ;;  %v10581_v5 = vmul.f32 %v10552_v9, %v14404_v24  ;;  %v10585_v21 = vmul.f32 %v10552_v9, %v10032_v40  ;;  %v10589_v1 = vmul.f32 %v10552_v9, %v14405_v10  ;;  %v14408_v18 = vld [vmem:[#allocation5_spill] sm:$0xff]  ;;  %v14413_v20 = vld [vmem:[#allocation7_spill] sm:$0xff] }
 0x53b   :  { %v10593_v52 = vmul.f32 %v10552_v9, %v14406_v22  ;;  %v10597_v55 = vmul.f32 %v10552_v9, %v14407_v59  ;;  %v10601_v63 = vmul.f32 %v10552_v9, %v14408_v18  ;;  %v10605_v40 = vmul.f32 %v10552_v9, %v14410_v47 }
 0x53c   :  { %v3491_v24 = vadd.f32 %v10577_v16, %v3421_v11  ;;  %v3492_v10 = vadd.f32 %v10577_v16, %v3422_v8  ;;  %v10611_v22 = vmul.f32 %v10552_v9, %v10065_v50  ;;  %v10615_v59 = vmul.f32 %v10552_v9, %v14413_v20  ;;  %v14418_v20 = vld [vmem:[#allocation12_spill] sm:$0xff] }
 0x53d   :  { %14409 = vst [vmem:[#allocation46_spill] sm:$0xff] %v10601_v63  ;;  %14411 = vst [vmem:[#allocation49_spill] sm:$0xff] %v10605_v40  ;;  %v10619_v18 = vmul.f32 %v10552_v9, %v10078_v13  ;;  %v14416_v63 = vld [vmem:[#allocation8_spill] sm:$0xff]  ;;  %v14417_v40 = vld [vmem:[#allocation9_spill] sm:$0xff]  ;;  %v10631_v50 = vmul.f32 %v10552_v9, %v10102_v34  ;;  %v10651_v34 = vmul.f32 %v10552_v9, %v10161_v45 }
 0x53e   :  { %14412 = vst [vmem:[#allocation52_spill] sm:$0xff] %v10611_v22  ;;  %14414 = vst [vmem:[#allocation55_spill] sm:$0xff] %v10615_v59  ;;  %v10623_v47 = vmul.f32 %v10552_v9, %v14416_v63  ;;  %v10627_v11 = vmul.f32 %v10552_v9, %v14417_v40  ;;  %v3555_v8 = vmax.f32 %v3491_v24, 0.0  ;;  %v3556_v22 = vmax.f32 %v3492_v10, 0.0  ;;  %v14419_v13 = vld [vmem:[#allocation27_spill] sm:$0xff] }
 0x53f   :  { %14415 = vst [vmem:[#allocation59_spill] sm:$0xff] %v10619_v18  ;;  %v10635_v59 = vmul.f32 %v10552_v9, %v14418_v20  ;;  %v10639_v18 = vmul.f32 %v10552_v9, %v14419_v13  ;;  %v10643_v63 = vmul.f32 %v10552_v9, %v10140_v6  ;;  %v10647_v40 = vmul.f32 %v10552_v9, %v10149_v17  ;;  %v14422_v13 = vld [vmem:[#allocation31_spill] sm:$0xff] }
 0x540   :  { %v10655_v24 = vmul.f32 %v10552_v9, %v10167_v43  ;;  %v10657_v10 = vpack.c.bf16 %v3556_v22, %v3555_v8  ;;  %v10661_v20 = vmul.f32 %v10552_v9, %v10183_v60  ;;  %v10665_v6 = vmul.f32 %v10552_v9, %v10194_v32  ;;  %v14421_v8 = vld [vmem:[#allocation29_spill] sm:$0xff] }
 0x541   :  { %v10669_v17 = vmul.f32 %v10552_v9, %v10206_v54  ;;  %v10673_v45 = vmul.f32 %v10552_v9, %v10211_v62  ;;  %v10677_v43 = vmul.f32 %v10552_v9, %v10227_v7  ;;  %v10681_v60 = vmul.f32 %v10552_v9, %v10237_v61 }
 0x542   :  { %14420 = vst [vmem:[#allocation14_spill] sm:$0xff] %v10657_v10  ;;  %v10685_v32 = vmul.f32 %v10552_v9, %v10249_v30  ;;  %v10689_v54 = vmul.f32 %v10552_v9, %v10256_v31  ;;  %v10693_v62 = vmul.f32 %v10552_v9, %v10265_v53  ;;  %v10697_v7 = vmul.f32 %v10552_v9, %v10269_v42  ;;  %v8389_v30 = vld [vmem:[%s13972_s2 + $0xa0] sm:$0xff]   ;;  %v14425_v10 = vld [vmem:[#allocation37_spill] sm:$0xff] }
 0x543   :  { %v10701_v61 = vmul.f32 %v10552_v9, %v10278_v48  ;;  %v10708_v31 = vmul.f32 %v10552_v9, %v10283_v39  ;;  %v10712_v53 = vmul.f32 %v10552_v9, %v10292_v33  ;;  %v10716_v42 = vmul.f32 %v10552_v9, %v10298_v3  ;;  %5423 = vmatpush1.bf16.msra.mxu1 %v8389_v30  ;;  %v14424_v30 = vld [vmem:[#allocation34_spill] sm:$0xff] }
 0x544   :  { %v10720_v48 = vmul.f32 %v10552_v9, %v10307_v4  ;;  %v10724_v22 = vmul.f32 %v10552_v9, %v10311_v2  ;;  %v10728_v39 = vmul.f32 %v10552_v9, %v10320_v23  ;;  %v10732_v33 = vmul.f32 %v10552_v9, %v10325_v14  ;;  %5424 = vmatprep.subr.bf16.mxu1 %v14267_v29 }
 0x545   :  { %v10736_v3 = vmul.f32 %v10552_v9, %v10334_v56  ;;  %v10740_v4 = vmul.f32 %v10552_v9, %v10340_v41  ;;  %v10744_v2 = vmul.f32 %v10552_v9, %v10349_v51  ;;  %v10748_v23 = vmul.f32 %v10552_v9, %v10353_v38 }
 0x546   :  { %v10752_v14 = vmul.f32 %v10552_v9, %v10362_v15  ;;  %v10757_v56 = vmul.f32 %v10552_v9, %v10367_v58  ;;  %v10761_v41 = vmul.f32 %v10552_v9, %v10376_v27  ;;  %v10765_v51 = vmul.f32 %v10552_v9, %v10382_v49 }
 0x547   :  { %v10769_v38 = vmul.f32 %v10552_v9, %v10391_v28  ;;  %v10773_v15 = vmul.f32 %v10552_v9, %v10395_v25  ;;  %v10777_v58 = vmul.f32 %v10552_v9, %v10410_v12  ;;  %v10781_v27 = vmul.f32 %v10552_v9, %v10422_v0 }
 0x548   :  { %v10785_v49 = vmul.f32 %v10552_v9, %v14421_v8  ;;  %v10789_v28 = vmul.f32 %v10552_v9, %v14422_v13  ;;  %v10793_v25 = vmul.f32 %v10552_v9, %v10467_v37  ;;  %v10797_v12 = vmul.f32 %v10552_v9, %v10478_v57 }
 0x549   :  { %v10801_v0 = vmul.f32 %v10552_v9, %v14424_v30  ;;  %v10805_v8 = vmul.f32 %v10552_v9, %v14425_v10  ;;  %v10809_v13 = vmul.f32 %v10552_v9, %v10517_v36  ;;  %v10817_v57 = vadd.f32 %v10577_v16, %v10558_v46 }
 0x54a   :  { %14423 = vst [vmem:[#allocation11_spill] sm:$0xff] %v10789_v28  ;;  %v14426_v28 = vld [vmem:[#allocation40_spill] sm:$0xff]  ;;  %v10821_v30 = vadd.f32 %v10577_v16, %v10562_v19  ;;  %v10825_v10 = vadd.f32 %v10577_v16, %v10566_v26  ;;  %v10829_v36 = vadd.f32 %v10577_v16, %v10570_v35  ;;  %v10837_v46 = vadd.f32 %v10577_v16, %v10581_v5 }
 0x54b   :  { %v10813_v37 = vmul.f32 %v10552_v9, %v14426_v28  ;;  %14427 = vst [vmem:[#allocation16_spill] sm:$0xff] %v10817_v57  ;;  %v10833_v9 = vadd.f32 %v10577_v16, %v10574_v44  ;;  %v10841_v19 = vadd.f32 %v10577_v16, %v10585_v21  ;;  %v10845_v26 = vadd.f32 %v10577_v16, %v10589_v1  ;;  %v14436_v28 = vld [vmem:[#allocation46_spill] sm:$0xff] }
 0x54c   :  { %14428 = vst [vmem:[#allocation13_spill] sm:$0xff] %v10821_v30  ;;  %14429 = vst [vmem:[#allocation18_spill] sm:$0xff] %v10825_v10  ;;  %v10849_v35 = vadd.f32 %v10577_v16, %v10593_v52  ;;  %v10853_v44 = vadd.f32 %v10577_v16, %v10597_v55  ;;  %v10857_v5 = vadd.f32 %v10577_v16, %v14436_v28 }
 0x54d   :  { %14430 = vst [vmem:[#allocation15_spill] sm:$0xff] %v10829_v36  ;;  %14431 = vst [vmem:[#allocation20_spill] sm:$0xff] %v10833_v9  ;;  %v10877_v28 = vadd.f32 %v10577_v16, %v10623_v47  ;;  %v10897_v47 = vadd.f32 %v10577_v16, %v10643_v63  ;;  %v10917_v63 = vadd.f32 %v10577_v16, %v10665_v6 }
 0x54e   :  { %14432 = vst [vmem:[#allocation17_spill] sm:$0xff] %v10837_v46  ;;  %14433 = vst [vmem:[#allocation22_spill] sm:$0xff] %v10841_v19  ;;  %v14437_v46 = vld [vmem:[#allocation49_spill] sm:$0xff]  ;;  %v14438_v19 = vld [vmem:[#allocation52_spill] sm:$0xff]  ;;  %v10937_v6 = vadd.f32 %v10577_v16, %v10685_v32  ;;  %v10957_v32 = vadd.f32 %v10577_v16, %v10708_v31  ;;  %v10976_v31 = vadd.f32 %v10577_v16, %v10724_v22 }
 0x54f   :  { %14434 = vst [vmem:[#allocation19_spill] sm:$0xff] %v10845_v26  ;;  %14435 = vst [vmem:[#allocation24_spill] sm:$0xff] %v10849_v35  ;;  %v10861_v21 = vadd.f32 %v10577_v16, %v14437_v46  ;;  %v10865_v1 = vadd.f32 %v10577_v16, %v14438_v19  ;;  %v14439_v26 = vld [vmem:[#allocation55_spill] sm:$0xff]  ;;  %v10881_v46 = vadd.f32 %v10577_v16, %v10627_v11 }
 0x550   :  { %v10869_v52 = vadd.f32 %v10577_v16, %v14439_v26  ;;  %v14440_v35 = vld [vmem:[#allocation59_spill] sm:$0xff]  ;;  %v10885_v19 = vadd.f32 %v10577_v16, %v10631_v50  ;;  %v10889_v26 = vadd.f32 %v10577_v16, %v10635_v59  ;;  %v10901_v11 = vadd.f32 %v10577_v16, %v10647_v40 }
 0x551   :  { %v10873_v55 = vadd.f32 %v10577_v16, %v14440_v35  ;;  %v10893_v35 = vadd.f32 %v10577_v16, %v10639_v18  ;;  %v10905_v50 = vadd.f32 %v10577_v16, %v10651_v34  ;;  %v10909_v59 = vadd.f32 %v10577_v16, %v10655_v24 }
 0x552   :  { %v10913_v18 = vadd.f32 %v10577_v16, %v10661_v20  ;;  %v10921_v40 = vadd.f32 %v10577_v16, %v10669_v17  ;;  %v10925_v34 = vadd.f32 %v10577_v16, %v10673_v45  ;;  %v10929_v24 = vadd.f32 %v10577_v16, %v10677_v43 }
 0x553   :  { %v10933_v20 = vadd.f32 %v10577_v16, %v10681_v60  ;;  %v10941_v17 = vadd.f32 %v10577_v16, %v10689_v54  ;;  %v10945_v45 = vadd.f32 %v10577_v16, %v10693_v62  ;;  %v10949_v43 = vadd.f32 %v10577_v16, %v10697_v7  ;;  %v8390_v62 = vld [vmem:[%s13972_s2 + $0xa8] sm:$0xff]  }
 0x554   :  { %v10953_v60 = vadd.f32 %v10577_v16, %v10701_v61  ;;  %v10961_v54 = vadd.f32 %v10577_v16, %v10712_v53  ;;  %v10968_v7 = vadd.f32 %v10577_v16, %v10716_v42  ;;  %v10972_v61 = vadd.f32 %v10577_v16, %v10720_v48  ;;  %5425 = vmatpush1.bf16.msra.mxu1 %v8390_v62  ;;  %v14445_v62 = vld [vmem:[#allocation11_spill] sm:$0xff] }
 0x555   :  { %v10980_v53 = vadd.f32 %v10577_v16, %v10728_v39  ;;  %v10988_v42 = vadd.f32 %v10577_v16, %v10736_v3  ;;  %v10992_v48 = vadd.f32 %v10577_v16, %v10740_v4  ;;  %v10996_v22 = vadd.f32 %v10577_v16, %v10744_v2  ;;  %5426 = vmatprep.subr.bf16.mxu1 %v14267_v29 }
 0x556   :  { %14441 = vst [vmem:[#allocation21_spill] sm:$0xff] %v10961_v54  ;;  %v10984_v54 = vadd.f32 %v10577_v16, %v10732_v33  ;;  %v11000_v39 = vadd.f32 %v10577_v16, %v10748_v23  ;;  %v11004_v33 = vadd.f32 %v10577_v16, %v10752_v14  ;;  %v11008_v3 = vadd.f32 %v10577_v16, %v10757_v56 }
 0x557   :  { %v11012_v4 = vadd.f32 %v10577_v16, %v10761_v41  ;;  %v11017_v2 = vadd.f32 %v10577_v16, %v10765_v51  ;;  %v11021_v23 = vadd.f32 %v10577_v16, %v10769_v38  ;;  %v11025_v14 = vadd.f32 %v10577_v16, %v10773_v15 }
 0x558   :  { %v11029_v56 = vadd.f32 %v10577_v16, %v10777_v58  ;;  %v11033_v41 = vadd.f32 %v10577_v16, %v10781_v27  ;;  %v11037_v51 = vadd.f32 %v10577_v16, %v10785_v49  ;;  %v11041_v38 = vadd.f32 %v10577_v16, %v14445_v62 }
 0x559   :  { %v11045_v15 = vadd.f32 %v10577_v16, %v10793_v25  ;;  %v11049_v58 = vadd.f32 %v10577_v16, %v10797_v12  ;;  %v11053_v27 = vadd.f32 %v10577_v16, %v10801_v0  ;;  %v11057_v49 = vadd.f32 %v10577_v16, %v10805_v8  ;;  %v14453_v8 = vld [vmem:[#allocation17_spill] sm:$0xff] }
 0x55a   :  { %14442 = vst [vmem:[#allocation26_spill] sm:$0xff] %v11029_v56  ;;  %14443 = vst [vmem:[#allocation23_spill] sm:$0xff] %v11033_v41  ;;  %v11061_v62 = vadd.f32 %v10577_v16, %v10809_v13  ;;  %v11065_v25 = vadd.f32 %v10577_v16, %v10813_v37  ;;  %v14455_v13 = vld [vmem:[#allocation19_spill] sm:$0xff]  ;;  %v14456_v41 = vld [vmem:[#allocation24_spill] sm:$0xff]  ;;  %v3502_v16 = vmax.f32 %v10853_v44, 0.0  ;;  %v3503_v37 = vmax.f32 %v10857_v5, 0.0 }
 0x55b   :  { %14444 = vst [vmem:[#allocation25_spill] sm:$0xff] %v11037_v51  ;;  %14446 = vst [vmem:[#allocation28_spill] sm:$0xff] %v11041_v38  ;;  %v14454_v38 = vld [vmem:[#allocation22_spill] sm:$0xff]  ;;  %v3501_v56 = vmax.f32 %v14456_v41, 0.0  ;;  %v3504_v12 = vmax.f32 %v10861_v21, 0.0  ;;  %v3506_v0 = vmax.f32 %v10869_v52, 0.0 }
 0x55c   :  { %14447 = vst [vmem:[#allocation30_spill] sm:$0xff] %v11045_v15  ;;  %14448 = vst [vmem:[#allocation32_spill] sm:$0xff] %v11049_v58  ;;  %v3499_v51 = vmax.f32 %v14454_v38, 0.0  ;;  %v3505_v58 = vmax.f32 %v10865_v1, 0.0  ;;  %v3509_v38 = vmax.f32 %v10881_v46, 0.0  ;;  %v3511_v41 = vmax.f32 %v10889_v26, 0.0 }
 0x55d   :  { %14449 = vst [vmem:[#allocation35_spill] sm:$0xff] %v11053_v27  ;;  %14450 = vst [vmem:[#allocation38_spill] sm:$0xff] %v11057_v49  ;;  %v3498_v49 = vmax.f32 %v14453_v8, 0.0  ;;  %v3507_v27 = vmax.f32 %v10873_v55, 0.0  ;;  %v3508_v8 = vmax.f32 %v10877_v28, 0.0  ;;  %v3512_v44 = vmax.f32 %v10893_v35, 0.0 }
 0x55e   :  { %14451 = vst [vmem:[#allocation41_spill] sm:$0xff] %v11061_v62  ;;  %14452 = vst [vmem:[#allocation44_spill] sm:$0xff] %v11065_v25  ;;  %v3500_v62 = vmax.f32 %v14455_v13, 0.0  ;;  %v3510_v13 = vmax.f32 %v10885_v19, 0.0  ;;  %v3513_v5 = vmax.f32 %v10897_v47, 0.0  ;;  %v3514_v21 = vmax.f32 %v10901_v11, 0.0 }
 0x55f   :  { %v3515_v1 = vmax.f32 %v10905_v50, 0.0  ;;  %v3516_v52 = vmax.f32 %v10909_v59, 0.0  ;;  %v3517_v55 = vmax.f32 %v10913_v18, 0.0  ;;  %v3518_v28 = vmax.f32 %v10917_v63, 0.0  ;;  %v14457_v15 = vld [vmem:[#allocation21_spill] sm:$0xff] }
 0x560   :  { %v3519_v46 = vmax.f32 %v10921_v40, 0.0  ;;  %v3520_v19 = vmax.f32 %v10925_v34, 0.0  ;;  %v3521_v26 = vmax.f32 %v10929_v24, 0.0  ;;  %v3522_v35 = vmax.f32 %v10933_v20, 0.0  ;;  %v8391_v20 = vld [vmem:[%s13972_s2 + $0xb0] sm:$0xff]  }
 0x561   :  { %v3523_v47 = vmax.f32 %v10937_v6, 0.0  ;;  %v3524_v11 = vmax.f32 %v10941_v17, 0.0  ;;  %v3525_v50 = vmax.f32 %v10945_v45, 0.0  ;;  %v3526_v59 = vmax.f32 %v10949_v43, 0.0  ;;  %5427 = vmatpush1.bf16.msra.mxu1 %v8391_v20 }
 0x562   :  { %v3527_v18 = vmax.f32 %v10953_v60, 0.0  ;;  %v3528_v63 = vmax.f32 %v10957_v32, 0.0  ;;  %v3529_v40 = vmax.f32 %v14457_v15, 0.0  ;;  %v3530_v34 = vmax.f32 %v10968_v7, 0.0  ;;  %5428 = vmatprep.subr.bf16.mxu1 %v14267_v29 }
 0x563   :  { %v3531_v24 = vmax.f32 %v10972_v61, 0.0  ;;  %v3532_v6 = vmax.f32 %v10976_v31, 0.0  ;;  %v3533_v17 = vmax.f32 %v10980_v53, 0.0  ;;  %v3534_v45 = vmax.f32 %v10984_v54, 0.0  ;;  %v14462_v30 = vld [vmem:[#allocation30_spill] sm:$0xff]  ;;  %v14463_v57 = vld [vmem:[#allocation32_spill] sm:$0xff] }
 0x564   :  { %v3535_v43 = vmax.f32 %v10988_v42, 0.0  ;;  %v3536_v60 = vmax.f32 %v10992_v48, 0.0  ;;  %v3537_v32 = vmax.f32 %v10996_v22, 0.0  ;;  %v3538_v7 = vmax.f32 %v11000_v39, 0.0  ;;  %v14458_v42 = vld [vmem:[#allocation26_spill] sm:$0xff]  ;;  %v14459_v22 = vld [vmem:[#allocation23_spill] sm:$0xff] }
 0x565   :  { %v3539_v61 = vmax.f32 %v11004_v33, 0.0  ;;  %v3540_v15 = vmax.f32 %v11008_v3, 0.0  ;;  %v3541_v9 = vmax.f32 %v11012_v4, 0.0  ;;  %v3542_v31 = vmax.f32 %v11017_v2, 0.0  ;;  %v14460_v39 = vld [vmem:[#allocation25_spill] sm:$0xff]  ;;  %v14461_v33 = vld [vmem:[#allocation28_spill] sm:$0xff] }
 0x566   :  { %v3543_v53 = vmax.f32 %v11021_v23, 0.0  ;;  %v3544_v54 = vmax.f32 %v11025_v14, 0.0  ;;  %v3545_v48 = vmax.f32 %v14458_v42, 0.0  ;;  %v3546_v36 = vmax.f32 %v14459_v22, 0.0  ;;  %v14464_v25 = vld [vmem:[#allocation35_spill] sm:$0xff]  ;;  %v14465_v23 = vld [vmem:[#allocation38_spill] sm:$0xff] }
 0x567   :  { %v3547_v10 = vmax.f32 %v14460_v39, 0.0  ;;  %v3548_v20 = vmax.f32 %v14461_v33, 0.0  ;;  %v3549_v3 = vmax.f32 %v14462_v30, 0.0  ;;  %v3550_v4 = vmax.f32 %v14463_v57, 0.0  ;;  %v14466_v14 = vld [vmem:[#allocation41_spill] sm:$0xff]  ;;  %v14467_v22 = vld [vmem:[#allocation44_spill] sm:$0xff] }
 0x568   :  { %v3551_v2 = vmax.f32 %v14464_v25, 0.0  ;;  %v3552_v29 = vmax.f32 %v14465_v23, 0.0  ;;  %v3553_v42 = vmax.f32 %v14466_v14, 0.0  ;;  %v3554_v39 = vmax.f32 %v14467_v22, 0.0  ;;  %v14468_v33 = vld [vmem:[#allocation16_spill] sm:$0xff]  ;;  %v14470_v57 = vld [vmem:[#allocation13_spill] sm:$0xff] }
 0x569   :  { %v14469_v30 = vmax.f32 %v14468_v33, 0.0  ;;  %v14471_v25 = vmax.f32 %v14470_v57, 0.0  ;;  %v14472_v14 = vld [vmem:[#allocation18_spill] sm:$0xff]  ;;  %v14474_v33 = vld [vmem:[#allocation15_spill] sm:$0xff] }
 0x56a   :  { %v14473_v22 = vmax.f32 %v14472_v14, 0.0  ;;  %v14475_v57 = vmax.f32 %v14474_v33, 0.0 }
 0x56b   :  { %v3557_v23 = vpack.c.bf16 %v14471_v25, %v14469_v30  ;;  %v14476_v30 = vld [vmem:[#allocation20_spill] sm:$0xff] }
 0x56c   :  { %v3558_v25 = vpack.c.bf16 %v14475_v57, %v14473_v22  ;;  %v14477_v14 = vmax.f32 %v14476_v30, 0.0  ;;  %v3560_v22 = vpack.c.bf16 %v3500_v62, %v3499_v51  ;;  %v11143_v57 = vpack.c.bf16 %v3502_v16, %v3501_v56 }
 0x56d   :  { %v11145_v30 = vpack.c.bf16 %v3504_v12, %v3503_v37  ;;  %v11151_v51 = vpack.c.bf16 %v3510_v13, %v3509_v38  ;;  %v11153_v62 = vpack.c.bf16 %v3512_v44, %v3511_v41  ;;  %v11155_v16 = vpack.c.bf16 %v3514_v21, %v3513_v5 }
 0x56e   :  { %v3559_v33 = vpack.c.bf16 %v3498_v49, %v14477_v14  ;;  %14478 = vst [vmem:[#allocation47_spill] sm:$0xff] %v11143_v57  ;;  %v11147_v14 = vpack.c.bf16 %v3506_v0, %v3505_v58  ;;  %v11149_v49 = vpack.c.bf16 %v3508_v8, %v3507_v27  ;;  %v11157_v56 = vpack.c.bf16 %v3516_v52, %v3515_v1 }
 0x56f   :  { %14479 = vst [vmem:[#allocation50_spill] sm:$0xff] %v11145_v30  ;;  %v11159_v57 = vpack.c.bf16 %v3518_v28, %v3517_v55  ;;  %v11161_v12 = vpack.c.bf16 %v3520_v19, %v3519_v46  ;;  %v11163_v37 = vpack.c.bf16 %v3522_v35, %v3521_v26  ;;  %v11165_v30 = vpack.c.bf16 %v3524_v11, %v3523_v47  ;;  %v8392_v26 = vld [vmem:[%s13972_s2 + $0xb8] sm:$0xff]  }
 0x570   :  { %v11167_v58 = vpack.c.bf16 %v3526_v59, %v3525_v50  ;;  %v11169_v27 = vpack.c.bf16 %v3528_v63, %v3527_v18  ;;  %v11171_v0 = vpack.c.bf16 %v3530_v34, %v3529_v40  ;;  %v11173_v8 = vpack.c.bf16 %v3532_v6, %v3531_v24  ;;  %5429 = vmatpush1.bf16.msra.mxu1 %v8392_v26 }
 0x571   :  { %v11175_v38 = vpack.c.bf16 %v3534_v45, %v3533_v17  ;;  %v11177_v13 = vpack.c.bf16 %v3536_v60, %v3535_v43  ;;  %v11179_v41 = vpack.c.bf16 %v3538_v7, %v3537_v32  ;;  %v11181_v44 = vpack.c.bf16 %v3540_v15, %v3539_v61 }
 0x572   :  { %v11183_v5 = vpack.c.bf16 %v3542_v31, %v3541_v9  ;;  %v11185_v21 = vpack.c.bf16 %v3544_v54, %v3543_v53  ;;  %v11187_v1 = vpack.c.bf16 %v3546_v36, %v3545_v48  ;;  %v11189_v52 = vpack.c.bf16 %v3548_v20, %v3547_v10 }
 0x573   :  { %v11191_v55 = vpack.c.bf16 %v3550_v4, %v3549_v3  ;;  %v11193_v28 = vpack.c.bf16 %v3552_v29, %v3551_v2  ;;  %v11195_v46 = vpack.c.bf16 %v3554_v39, %v3553_v42  ;;  %v3604_v19 = vshrl.u32 %v3559_v33, 16 }
 0x574   :  { %v3607_v9 = vshll.u32 %v3559_v33, 16  ;;  %v14480_v11 = vmov 0   ;;  %v3597_v50 = vshrl.u32 %v3558_v25, 16  ;;  %v3611_v29 = vshrl.u32 %v3560_v22, 16 }
 0x575   :  { %v3606_v35 = vrot.slane %v3604_v19, 7  ;;  %5430 = vmatprep.subr.bf16.mxu1 %v14480_v11  ;;  %v3600_v59 = vshll.u32 %v3558_v25, 16  ;;  %v3590_v63 = vshrl.u32 %v3557_v23, 16  ;;  %v14482_v40 = vld [vmem:[#allocation47_spill] sm:$0xff]  ;;  %v3614_v24 = vshll.u32 %v3560_v22, 16 }
 0x576   :  { %v3618_v34 = vshrl.u32 %v14482_v40, 16  ;;  %v3599_v6 = vrot.slane %v3597_v50, 7  ;;  %v3613_v45 = vrot.slane %v3611_v29, 7  ;;  %v3593_v43 = vshll.u32 %v3557_v23, 16  ;;  %v14483_v32 = vld [vmem:[#allocation50_spill] sm:$0xff] }
 0x577   :  { %v3609_v47 = vor.u32 %v3607_v9, %v3606_v35  ;;  %v11207_v18 = vsel %vm8571_vm2, %v3606_v35, 0  ;;  %v3621_v60 = vshll.u32 %v14482_v40, 16  ;;  %v3628_v7 = vshll.u32 %v14483_v32, 16  ;;  %v8393_v40 = vld [vmem:[%s13972_s2 + $0xc0] sm:$0xff]  }
 0x578   :  { %v3592_v61 = vrot.slane %v3590_v63, 7  ;;  %v3602_v15 = vor.u32 %v3600_v59, %v3599_v6  ;;  %v3910_v31 = vsel %vm8571_vm2, %v3599_v6, 0  ;;  %v4398_v53 = vrot.slane %v11207_v18, 1  ;;  %5431 = vmatpush1.bf16.msra.mxu1 %v8393_v40 }
 0x579   :  { %v11203_v10 = vsel %vm8571_vm2, 0, %v3609_v47  ;;  %v3616_v54 = vor.u32 %v3614_v24, %v3613_v45  ;;  %v11218_v48 = vsel %vm8571_vm2, %v3613_v45, 0  ;;  %v3620_v4 = vrot.slane %v3618_v34, 7  ;;  %5432 = vmatprep.subr.bf16.mxu1 %v14480_v11 }
 0x57a   :  { %v4397_v17 = vrot.slane %v11203_v10, 1  ;;  %v3595_v20 = vor.u32 %v3593_v43, %v3592_v61  ;;  %v11222_v3 = vsel %vm8571_vm2, %v3592_v61, 0  ;;  %v11226_v2 = vsel %vm8571_vm2, 0, %v3602_v15 }
 0x57b   :  { %v11233_v39 = vsel %vm8571_vm2, 0, %v3616_v54  ;;  %v3625_v23 = vshrl.u32 %v14483_v32, 16  ;;  %v4394_v25 = vrot.slane %v11226_v2, 1  ;;  %v4395_v33 = vrot.slane %v3910_v31, 1 }
 0x57c   :  { %v11229_v42 = vsel %vm955_vm4, %v4397_v17, %v4398_v53  ;;  %v4400_v22 = vrot.slane %v11233_v39, 1  ;;  %v11240_v19 = vsel %vm8571_vm2, 0, %v3595_v20  ;;  %v4401_v26 = vrot.slane %v11218_v48, 1 }
 0x57d   :  { %v3944_v35 = vshll.u32 %v11240_v19, 16  ;;  %v3949_v9 = vshll.u32 %v11222_v3, 16  ;;  %v3956_v47 = vshll.u32 %v11226_v2, 16  ;;  %v11247_v50 = vsel %vm955_vm4, %v4394_v25, %v4395_v33 }
 0x57e   :  { %v3954_v29 = vshrl.u32 %v11226_v2, 16  ;;  %v3961_v59 = vshll.u32 %v3910_v31, 16  ;;  %v3623_v63 = vor.u32 %v3621_v60, %v3620_v4  ;;  %7440 = vmatprep.mubr.bf16.mxu0 %v11247_v50  ;;  %v3942_v34 = vshrl.u32 %v11240_v19, 16 }
 0x57f   :  { %v3946_v24 = vrot.slane %v3944_v35, 1  ;;  %v3958_v6 = vrot.slane %v3956_v47, 1  ;;  %v3627_v17 = vrot.slane %v3625_v23, 7  ;;  %7441 = vmatmul.mubr.bf16.vlgmr.msra.gmra.mrb[128].mxu0 %v11229_v42  ;;  %v11257_v45 = vsel %vm955_vm4, %v4400_v22, %v4401_v26 }
 0x580   :  { %v11261_v43 = vsel %vm8571_vm2, 0, %v3623_v63  ;;  %v3968_v60 = vshll.u32 %v11203_v10, 16  ;;  %7444 = vmatprep.mubr.bf16.mxu0 %v11257_v45  ;;  %v3951_v61 = vrot.slane %v3949_v9, 1  ;;  %v3963_v53 = vrot.slane %v3961_v59, 1 }
 0x581   :  { %v3947_v32 = vor.u32 %v3946_v24, %v3942_v34  ;;  %v3959_v15 = vor.u32 %v3958_v6, %v3954_v29  ;;  %v3630_v31 = vor.u32 %v3628_v7, %v3627_v17  ;;  %v11268_v54 = vsel %vm8571_vm2, %v3620_v4, 0 }
 0x582   :  { %v3632_v20 = vshrl.u32 %v11147_v14, 16  ;;  %v4403_v25 = vrot.slane %v11261_v43, 1  ;;  %v11281_v7 = vsel %vm8571_vm2, %v3627_v17, 0  ;;  %v3635_v22 = vshll.u32 %v11147_v14, 16 }
 0x583   :  { %v11272_v23 = vsel %vm489_vm3, %v3947_v32, %v3951_v61  ;;  %v11277_v33 = vsel %vm8571_vm2, 0, %v3630_v31  ;;  %v11288_v35 = vsel %vm489_vm3, %v3959_v15, %v3963_v53  ;;  %v4404_v9 = vrot.slane %v11268_v54, 1 }
 0x584   :  { %14484 = vst [vmem:[#allocation53_spill] sm:$0xff] %v11272_v23  ;;  %5165 = vmatprep.mubr.bf16.mxu1 %v11272_v23  ;;  %v4406_v4 = vrot.slane %v11277_v33, 1  ;;  %v3634_v26 = vrot.slane %v3632_v20, 7  ;;  %14485 = vst [vmem:[#allocation56_spill] sm:$0xff] %v11288_v35  ;;  %v3970_v47 = vrot.slane %v3968_v60, 1  ;;  %v3639_v29 = vshrl.u32 %v11149_v49, 16 }
 0x585   :  { %5166 = vmatmul.mubr.bf16.gmra.mrb[68].mxu1 %v11240_v19  ;;  %v3642_v59 = vshll.u32 %v11149_v49, 16  ;;  %v4407_v14 = vrot.slane %v11281_v7, 1  ;;  %v3646_v40 = vshrl.u32 %v11151_v51, 16  ;;  %v11297_v34 = vsel %vm955_vm4, %v4403_v25, %v4404_v9 }
 0x586   :  { %5173 = vmatprep.mubr.bf16.mxu1 %v11288_v35  ;;  %v3637_v63 = vor.u32 %v3635_v22, %v3634_v26  ;;  %v3966_v24 = vshrl.u32 %v11203_v10, 16  ;;  %v3973_v6 = vshll.u32 %v11207_v18, 16  ;;  %v3641_v17 = vrot.slane %v3639_v29, 7 }
 0x587   :  { %7445 = vmatmul.mubr.bf16.gmra.mrb[132].mxu0 %v11297_v34  ;;  %v11303_v60 = vsel %vm955_vm4, %v4406_v4, %v4407_v14  ;;  %v3648_v32 = vrot.slane %v3646_v40, 7  ;;  %v3653_v61 = vshrl.u32 %v11153_v62, 16  ;;  %v3980_v53 = vshll.u32 %v11233_v39, 16 }
 0x588   :  { %v11307_v49 = vsel %vm8571_vm2, 0, %v3637_v63  ;;  %7448 = vmatprep.mubr.bf16.mxu0 %v11303_v60  ;;  %v3971_v15 = vor.u32 %v3970_v47, %v3966_v24  ;;  %v3644_v31 = vor.u32 %v3642_v59, %v3641_v17  ;;  %v3649_v18 = vshll.u32 %v11151_v51, 16 }
 0x589   :  { %v3656_v20 = vshll.u32 %v11153_v62, 16  ;;  %v11316_v25 = vsel %vm8571_vm2, %v3634_v26, 0  ;;  %v3655_v22 = vrot.slane %v3653_v61, 7  ;;  %v3975_v4 = vrot.slane %v3973_v6, 1 }
 0x58a   :  { %v4409_v9 = vrot.slane %v11307_v49, 1  ;;  %v11321_v29 = vsel %vm8571_vm2, 0, %v3644_v31  ;;  %v11325_v47 = vsel %vm8571_vm2, %v3641_v17, 0  ;;  %v3651_v59 = vor.u32 %v3649_v18, %v3648_v32  ;;  %v8394_v17 = vld [vmem:[%s13972_s2 + $0xc8] sm:$0xff]  }
 0x58b   :  { %14486 = vst [vmem:[#allocation58_spill] sm:$0xff] %v11321_v29  ;;  %v4412_v51 = vrot.slane %v11321_v29, 1  ;;  %v11330_v62 = vsel %vm489_vm3, %v3971_v15, %v3975_v4  ;;  %v4410_v26 = vrot.slane %v11316_v25, 1  ;;  %v3982_v14 = vrot.slane %v3980_v53, 1  ;;  %5433 = vmatpush1.bf16.msra.mxu1 %v8394_v17 }
 0x58c   :  { %14487 = vst [vmem:[#allocation60_spill] sm:$0xff] %v11330_v62  ;;  %v3658_v63 = vor.u32 %v3656_v20, %v3655_v22  ;;  %v4413_v40 = vrot.slane %v11325_v47, 1  ;;  %v3660_v24 = vshrl.u32 %v11155_v16, 16  ;;  %v3667_v6 = vshrl.u32 %v11157_v56, 16  ;;  %5434 = vmatprep.subr.bf16.mxu1 %v14480_v11 }
 0x58d   :  { %5174 = vmatmul.mubr.bf16.gmra.mrb[72].mxu1 %v11226_v2  ;;  %v11341_v61 = vsel %vm955_vm4, %v4409_v9, %v4410_v26  ;;  %v3978_v15 = vshrl.u32 %v11233_v39, 16  ;;  %v3985_v31 = vshll.u32 %v11218_v48, 16  ;;  %v11351_v18 = vsel %vm8571_vm2, 0, %v3651_v59 }
 0x58e   :  { %5181 = vmatprep.mubr.bf16.mxu1 %v11330_v62  ;;  %14488 = vst [vmem:[#allocation61_spill] sm:$0xff] %v11341_v61  ;;  %v11347_v53 = vsel %vm955_vm4, %v4412_v51, %v4413_v40  ;;  %14490 = vst [vmem:[#allocation33_spill] sm:$0xff] %v11351_v18  ;;  %v3992_v20 = vshll.u32 %v11261_v43, 16  ;;  %v3662_v4 = vrot.slane %v3660_v24, 7  ;;  %v11357_v26 = vsel %vm8571_vm2, 0, %v3658_v63 }
 0x58f   :  { %7449 = vmatmul.mubr.bf16.gmra.mrb[136].mxu0 %v11341_v61  ;;  %14489 = vst [vmem:[#allocation10_spill] sm:$0xff] %v11347_v53  ;;  %v3983_v9 = vor.u32 %v3982_v14, %v3978_v15  ;;  %14491 = vst [vmem:[#allocation36_spill] sm:$0xff] %v11357_v26  ;;  %v3669_v48 = vrot.slane %v3667_v6, 7  ;;  %v3663_v51 = vshll.u32 %v11155_v16, 16  ;;  %v11363_v59 = vsel %vm8571_vm2, %v3648_v32, 0 }
 0x590   :  { %7452 = vmatprep.mubr.bf16.mxu0 %v11347_v53  ;;  %v3670_v40 = vshll.u32 %v11157_v56, 16  ;;  %v3987_v24 = vrot.slane %v3985_v31, 1  ;;  %v4415_v17 = vrot.slane %v11351_v18, 1  ;;  %v11369_v14 = vsel %vm8571_vm2, %v3655_v22, 0 }
 0x591   :  { %v4418_v63 = vrot.slane %v11357_v26, 1  ;;  %v3994_v6 = vrot.slane %v3992_v20, 1  ;;  %v3665_v15 = vor.u32 %v3663_v51, %v3662_v4  ;;  %v3674_v62 = vshrl.u32 %v11159_v57, 16 }
 0x592   :  { %v11375_v16 = vsel %vm489_vm3, %v3983_v9, %v3987_v24  ;;  %v4416_v56 = vrot.slane %v11363_v59, 1  ;;  %v3672_v32 = vor.u32 %v3670_v40, %v3669_v48  ;;  %v3681_v31 = vshrl.u32 %v11161_v12, 16 }
 0x593   :  { %14492 = vst [vmem:[#allocation39_spill] sm:$0xff] %v11375_v16  ;;  %v4419_v22 = vrot.slane %v11369_v14, 1  ;;  %v3990_v35 = vshrl.u32 %v11261_v43, 16  ;;  %v3997_v20 = vshll.u32 %v11268_v54, 16  ;;  %v11392_v40 = vsel %vm8571_vm2, 0, %v3665_v15 }
 0x594   :  { %v11384_v51 = vsel %vm955_vm4, %v4415_v17, %v4416_v56  ;;  %14495 = vst [vmem:[#allocation48_spill] sm:$0xff] %v11392_v40  ;;  %v11397_v23 = vsel %vm8571_vm2, 0, %v3672_v32  ;;  %v4004_v54 = vshll.u32 %v11277_v33, 16  ;;  %v3683_v17 = vrot.slane %v3681_v31, 7 }
 0x595   :  { %5182 = vmatmul.mubr.bf16.gmra.mrb[76].mxu1 %v11203_v10  ;;  %14493 = vst [vmem:[#allocation42_spill] sm:$0xff] %v11384_v51  ;;  %v11388_v9 = vsel %vm955_vm4, %v4418_v63, %v4419_v22  ;;  %v3995_v24 = vor.u32 %v3994_v6, %v3990_v35  ;;  %14496 = vst [vmem:[#allocation51_spill] sm:$0xff] %v11397_v23  ;;  %v3677_v56 = vshll.u32 %v11159_v57, 16  ;;  %v11403_v35 = vsel %vm8571_vm2, %v3662_v4, 0 }
 0x596   :  { %5189 = vmatprep.mubr.bf16.mxu1 %v11375_v16  ;;  %14494 = vst [vmem:[#allocation45_spill] sm:$0xff] %v11388_v9  ;;  %v3676_v16 = vrot.slane %v3674_v62, 7  ;;  %v3684_v63 = vshll.u32 %v11161_v12, 16  ;;  %v4421_v62 = vrot.slane %v11392_v40, 1  ;;  %v11409_v6 = vsel %vm8571_vm2, %v3669_v48, 0 }
 0x597   :  { %7453 = vmatmul.mubr.bf16.gmra.mrb[140].mxu0 %v11384_v51  ;;  %v3999_v51 = vrot.slane %v3997_v20, 1  ;;  %v4424_v32 = vrot.slane %v11397_v23, 1  ;;  %v3688_v57 = vshrl.u32 %v11163_v37, 16  ;;  %v4422_v4 = vrot.slane %v11403_v35, 1 }
 0x598   :  { %7456 = vmatprep.mubr.bf16.mxu0 %v11388_v9  ;;  %v3679_v31 = vor.u32 %v3677_v56, %v3676_v16  ;;  %v4006_v22 = vrot.slane %v4004_v54, 1  ;;  %v3686_v12 = vor.u32 %v3684_v63, %v3683_v17  ;;  %v3695_v20 = vshrl.u32 %v11165_v30, 16 }
 0x599   :  { %v11412_v15 = vsel %vm489_vm3, %v3995_v24, %v3999_v51  ;;  %v4425_v48 = vrot.slane %v11409_v6, 1  ;;  %v8395_v51 = vld [vmem:[%s13972_s2 + $0xd0] sm:$0xff]   ;;  %v11425_v24 = vsel %vm955_vm4, %v4421_v62, %v4422_v4  ;;  %v4002_v56 = vshrl.u32 %v11277_v33, 16 }
 0x59a   :  { %14497 = vst [vmem:[#allocation54_spill] sm:$0xff] %v11412_v15  ;;  %14498 = vst [vmem:[#allocation57_spill] sm:$0xff] %v11425_v24  ;;  %v4009_v9 = vshll.u32 %v11281_v7, 16  ;;  %v11435_v63 = vsel %vm8571_vm2, 0, %v3679_v31  ;;  %v3690_v53 = vrot.slane %v3688_v57, 7  ;;  %5435 = vmatpush1.bf16.msra.mxu1 %v8395_v51  ;;  %v11441_v4 = vsel %vm8571_vm2, 0, %v3686_v12 }
 0x59b   :  { %v11431_v54 = vsel %vm955_vm4, %v4424_v32, %v4425_v48  ;;  %14500 = vst [vmem:[#allocation6_spill] sm:$0xff] %v11435_v63  ;;  %v4007_v62 = vor.u32 %v4006_v22, %v4002_v56  ;;  %14501 = vst [vmem:[#allocation7_spill] sm:$0xff] %v11441_v4  ;;  %v3697_v7 = vrot.slane %v3695_v20, 7  ;;  %5436 = vmatprep.subr.bf16.mxu1 %v14480_v11  ;;  %v3691_v32 = vshll.u32 %v11163_v37, 16 }
 0x59c   :  { %14499 = vst [vmem:[#allocation5_spill] sm:$0xff] %v11431_v54  ;;  %v11447_v31 = vsel %vm8571_vm2, %v3676_v16, 0  ;;  %v3698_v48 = vshll.u32 %v11165_v30, 16  ;;  %v4011_v57 = vrot.slane %v4009_v9, 1  ;;  %v4427_v51 = vrot.slane %v11435_v63, 1 }
 0x59d   :  { %5190 = vmatmul.mubr.bf16.gmra.mrb[80].mxu1 %v11233_v39  ;;  %v11453_v22 = vsel %vm8571_vm2, %v3683_v17, 0  ;;  %v4430_v12 = vrot.slane %v11441_v4, 1  ;;  %v3693_v56 = vor.u32 %v3691_v32, %v3690_v53  ;;  %v4428_v16 = vrot.slane %v11447_v31, 1 }
 0x59e   :  { %5197 = vmatprep.mubr.bf16.mxu1 %v11412_v15  ;;  %v4016_v15 = vshll.u32 %v11307_v49, 16  ;;  %v11458_v37 = vsel %vm489_vm3, %v4007_v62, %v4011_v57  ;;  %v3709_v30 = vshrl.u32 %v11169_v27, 16  ;;  %v4431_v9 = vrot.slane %v11453_v22, 1 }
 0x59f   :  { %7457 = vmatmul.mubr.bf16.gmra.mrb[144].mxu0 %v11425_v24  ;;  %14502 = vst [vmem:[#allocation8_spill] sm:$0xff] %v11458_v37  ;;  %v4014_v17 = vshrl.u32 %v11307_v49, 16  ;;  %v4021_v24 = vshll.u32 %v11316_v25, 16  ;;  %v4028_v25 = vshll.u32 %v11321_v29, 16 }
 0x5a0   :  { %7460 = vmatprep.mubr.bf16.mxu0 %v11431_v54  ;;  %v4018_v20 = vrot.slane %v4016_v15, 1  ;;  %v3700_v54 = vor.u32 %v3698_v48, %v3697_v7  ;;  %v11467_v15 = vsel %vm955_vm4, %v4427_v51, %v4428_v16  ;;  %v11471_v62 = vsel %vm955_vm4, %v4430_v12, %v4431_v9 }
 0x5a1   :  { %14503 = vst [vmem:[#allocation9_spill] sm:$0xff] %v11467_v15  ;;  %14504 = vst [vmem:[#allocation12_spill] sm:$0xff] %v11471_v62  ;;  %v11475_v48 = vsel %vm8571_vm2, 0, %v3693_v56  ;;  %v3711_v51 = vrot.slane %v3709_v30, 7  ;;  %v4023_v16 = vrot.slane %v4021_v24, 1  ;;  %v3712_v12 = vshll.u32 %v11169_v27, 16 }
 0x5a2   :  { %v4019_v32 = vor.u32 %v4018_v20, %v4014_v17  ;;  %14505 = vst [vmem:[#allocation27_spill] sm:$0xff] %v11475_v48  ;;  %v11480_v57 = vsel %vm8571_vm2, 0, %v3700_v54  ;;  %v4433_v20 = vrot.slane %v11475_v48, 1  ;;  %v11491_v56 = vsel %vm8571_vm2, %v3697_v7, 0 }
 0x5a3   :  { %14506 = vst [vmem:[#allocation29_spill] sm:$0xff] %v11480_v57  ;;  %14507 = vst [vmem:[#allocation31_spill] sm:$0xff] %v11491_v56  ;;  %v4541_v54 = vrot.slane %v11480_v57, 1  ;;  %v3716_v30 = vshrl.u32 %v11171_v0, 16  ;;  %v4030_v24 = vrot.slane %v4028_v25, 1  ;;  %v3714_v17 = vor.u32 %v3712_v12, %v3711_v51 }
 0x5a4   :  { %v11494_v9 = vsel %vm489_vm3, %v4019_v32, %v4023_v16  ;;  %v3723_v27 = vshrl.u32 %v11173_v8, 16  ;;  %v4542_v7 = vrot.slane %v11491_v56, 1  ;;  %v8396_v32 = vld [vmem:[%s13972_s2 + $0xd8] sm:$0xff]   ;;  %v4026_v57 = vshrl.u32 %v11321_v29, 16 }
 0x5a5   :  { %5198 = vmatmul.mubr.bf16.gmra.mrb[84].mxu1 %v11261_v43  ;;  %14508 = vst [vmem:[#allocation34_spill] sm:$0xff] %v11494_v9  ;;  %v3718_v12 = vrot.slane %v3716_v30, 7  ;;  %v11526_v30 = vsel %vm8571_vm2, %v3711_v51, 0  ;;  %v4045_v51 = vshll.u32 %v11363_v59, 16 }
 0x5a6   :  { %5205 = vmatprep.mubr.bf16.mxu1 %v11458_v37  ;;  %v11485_v37 = vsel %vm8571_vm2, %v3690_v53, 0  ;;  %v11513_v25 = vsel %vm955_vm4, %v4541_v54, %v4542_v7  ;;  %5437 = vmatpush1.bf16.msra.mxu1 %v8396_v32  ;;  %v4031_v56 = vor.u32 %v4030_v24, %v4026_v57 }
 0x5a7   :  { %7461 = vmatmul.mubr.bf16.gmra.mrb[148].mxu0 %v11467_v15  ;;  %v4434_v53 = vrot.slane %v11485_v37, 1  ;;  %14510 = vst [vmem:[#allocation40_spill] sm:$0xff] %v11513_v25  ;;  %5438 = vmatprep.subr.bf16.mxu1 %v14480_v11  ;;  %v4047_v15 = vrot.slane %v4045_v51, 1  ;;  %v3751_v51 = vshrl.u32 %v11181_v44, 16 }
 0x5a8   :  { %7464 = vmatprep.mubr.bf16.mxu0 %v11471_v62  ;;  %v4033_v62 = vshll.u32 %v11325_v47, 16  ;;  %v3719_v47 = vshll.u32 %v11171_v0, 16  ;;  %v3737_v0 = vshrl.u32 %v11177_v13, 16 }
 0x5a9   :  { %v11507_v16 = vsel %vm955_vm4, %v4433_v20, %v4434_v53  ;;  %v4040_v20 = vshll.u32 %v11351_v18, 16  ;;  %v3725_v53 = vrot.slane %v3723_v27, 7 }
 0x5aa   :  { %14509 = vst [vmem:[#allocation37_spill] sm:$0xff] %v11507_v16  ;;  %v4035_v54 = vrot.slane %v4033_v62, 1  ;;  %v3721_v24 = vor.u32 %v3719_v47, %v3718_v12  ;;  %v4038_v62 = vshrl.u32 %v11351_v18, 16  ;;  %v14513_v47 = vld [vmem:[#allocation62_spill] sm:$0xff] }
 0x5ab   :  { %v4042_v7 = vrot.slane %v4040_v20, 1 }
 0x5ac   :  { %v11532_v27 = vsel %vm489_vm3, %v4031_v56, %v4035_v54  ;;  %v11545_v56 = vsel %vm8571_vm2, 0, %v3721_v24  ;;  %v3740_v24 = vshll.u32 %v11177_v13, 16 }
 0x5ad   :  { %5206 = vmatmul.mubr.bf16.gmra.mrb[88].mxu1 %v11277_v33  ;;  %14512 = vst [vmem:[#allocation49_spill] sm:$0xff] %v11532_v27  ;;  %14515 = vst [vmem:[#allocation55_spill] sm:$0xff] %v11545_v56  ;;  %v4043_v54 = vor.u32 %v4042_v7, %v4038_v62  ;;  %v4442_v61 = vrot.slane %v11545_v56, 1 }
 0x5ae   :  { %5213 = vmatprep.mubr.bf16.mxu1 %v11494_v9  ;;  %v11518_v9 = vsel %vm8571_vm2, 0, %v3714_v17  ;;  %v3730_v17 = vshrl.u32 %v11175_v38, 16 }
 0x5af   :  { %7465 = vmatmul.mubr.bf16.gmra.mrb[152].mxu0 %v11507_v16  ;;  %14511 = vst [vmem:[#allocation46_spill] sm:$0xff] %v11518_v9  ;;  %v3726_v16 = vshll.u32 %v11173_v8, 16  ;;  %v4439_v57 = vrot.slane %v11518_v9, 1  ;;  %v4440_v8 = vrot.slane %v11526_v30, 1 }
 0x5b0   :  { %7468 = vmatprep.mubr.bf16.mxu0 %v11513_v25  ;;  %v3732_v20 = vrot.slane %v3730_v17, 7  ;;  %v11562_v17 = vsel %vm8571_vm2, %v3725_v53, 0 }
 0x5b1   :  { %v3728_v32 = vor.u32 %v3726_v16, %v3725_v53  ;;  %v11541_v25 = vsel %vm955_vm4, %v4439_v57, %v4440_v8  ;;  %v4052_v16 = vshll.u32 %v11357_v26, 16  ;;  %v3739_v57 = vrot.slane %v3737_v0, 7 }
 0x5b2   :  { %14514 = vst [vmem:[#allocation52_spill] sm:$0xff] %v11541_v25  ;;  %v3733_v8 = vshll.u32 %v11175_v38, 16  ;;  %v11569_v38 = vsel %vm489_vm3, %v4043_v54, %v4047_v15  ;;  %v4446_v53 = vrot.slane %v11562_v17, 1  ;;  %v4057_v15 = vshll.u32 %v11369_v14, 16 }
 0x5b3   :  { %v11555_v59 = vsel %vm8571_vm2, 0, %v3728_v32  ;;  %v3744_v32 = vshrl.u32 %v11179_v41, 16  ;;  %14517 = vst [vmem:[#allocation11_spill] sm:$0xff] %v11569_v38  ;;  %v4054_v13 = vrot.slane %v4052_v16, 1  ;;  %v3742_v0 = vor.u32 %v3740_v24, %v3739_v57 }
 0x5b4   :  { %14516 = vst [vmem:[#allocation59_spill] sm:$0xff] %v11555_v59  ;;  %v3735_v62 = vor.u32 %v3733_v8, %v3732_v20  ;;  %v4064_v24 = vshll.u32 %v11392_v40, 16  ;;  %v3753_v14 = vrot.slane %v3751_v51, 7 }
 0x5b5   :  { %5214 = vmatmul.mubr.bf16.gmra.mrb[92].mxu1 %v11307_v49 }
 0x5b6   :  { %5221 = vmatprep.mubr.bf16.mxu1 %v11532_v27  ;;  %v11551_v27 = vsel %vm8571_vm2, %v3718_v12, 0  ;;  %v4445_v12 = vrot.slane %v11555_v59, 1  ;;  %v11588_v54 = vsel %vm8571_vm2, 0, %v3735_v62  ;;  %v11600_v62 = vsel %vm8571_vm2, %v3732_v20, 0 }
 0x5b7   :  { %7469 = vmatmul.mubr.bf16.gmra.mrb[156].mxu0 %v14513_v47  ;;  %v4443_v7 = vrot.slane %v11551_v27, 1  ;;  %14520 = vst [vmem:[#allocation19_spill] sm:$0xff] %v11588_v54 }
 0x5b8   :  { %7472 = vmatprep.mubr.bf16.mxu0 %v11541_v25  ;;  %v8397_v25 = vld [vmem:[%s13972_s2 + $0xe0] sm:$0xff]   ;;  %v11584_v16 = vsel %vm955_vm4, %v4445_v12, %v4446_v53  ;;  %v3747_v12 = vshll.u32 %v11179_v41, 16  ;;  %v3754_v53 = vshll.u32 %v11181_v44, 16  ;;  %v4449_v44 = vrot.slane %v11600_v62, 1 }
 0x5b9   :  { %v11578_v8 = vsel %vm955_vm4, %v4442_v61, %v4443_v7  ;;  %14519 = vst [vmem:[#allocation22_spill] sm:$0xff] %v11584_v16  ;;  %5439 = vmatpush1.bf16.msra.mxu1 %v8397_v25  ;;  %v11594_v7 = vsel %vm8571_vm2, 0, %v3742_v0  ;;  %v4448_v25 = vrot.slane %v11588_v54, 1  ;;  %v4066_v0 = vrot.slane %v4064_v24, 1 }
 0x5ba   :  { %14518 = vst [vmem:[#allocation17_spill] sm:$0xff] %v11578_v8  ;;  %14521 = vst [vmem:[#allocation24_spill] sm:$0xff] %v11594_v7  ;;  %5440 = vmatprep.subr.bf16.mxu1 %v14480_v11  ;;  %v3756_v20 = vor.u32 %v3754_v53, %v3753_v14  ;;  %v4069_v24 = vshll.u32 %v11403_v35, 16  ;;  %v4076_v35 = vshll.u32 %v11397_v23, 16 }
 0x5bd   :  { %5222 = vmatmul.mubr.bf16.gmra.mrb[96].mxu1 %v11321_v29  ;;  %v4050_v29 = vshrl.u32 %v11357_v26, 16 }
 0x5be   :  { %5229 = vmatprep.mubr.bf16.mxu1 %v11569_v38  ;;  %v3746_v38 = vrot.slane %v3744_v32, 7  ;;  %v4059_v32 = vrot.slane %v4057_v15, 1  ;;  %v3765_v15 = vshrl.u32 %v11185_v21, 16 }
 0x5bf   :  { %7473 = vmatmul.mubr.bf16.gmra.mrb[160].mxu0 %v11578_v8  ;;  %v4055_v61 = vor.u32 %v4054_v13, %v4050_v29  ;;  %v11606_v29 = vsel %vm8571_vm2, %v3739_v57, 0  ;;  %v4451_v13 = vrot.slane %v11594_v7, 1  ;;  %v4062_v8 = vshrl.u32 %v11392_v40, 16 }
 0x5c0   :  { %7476 = vmatprep.mubr.bf16.mxu0 %v11584_v16  ;;  %v3749_v51 = vor.u32 %v3747_v12, %v3746_v38  ;;  %v3758_v16 = vshrl.u32 %v11183_v5, 16  ;;  %v4452_v57 = vrot.slane %v11606_v29, 1  ;;  %v11621_v12 = vsel %vm955_vm4, %v4448_v25, %v4449_v44 }
 0x5c1   :  { %v11612_v41 = vsel %vm489_vm3, %v4055_v61, %v4059_v32  ;;  %14523 = vst [vmem:[#allocation26_spill] sm:$0xff] %v11621_v12  ;;  %v4067_v32 = vor.u32 %v4066_v0, %v4062_v8  ;;  %v3767_v25 = vrot.slane %v3765_v15, 7  ;;  %v3761_v44 = vshll.u32 %v11183_v5, 16 }
 0x5c2   :  { %14522 = vst [vmem:[#allocation21_spill] sm:$0xff] %v11612_v41  ;;  %v11625_v61 = vsel %vm955_vm4, %v4451_v13, %v4452_v57  ;;  %v11629_v53 = vsel %vm8571_vm2, 0, %v3749_v51  ;;  %v11640_v8 = vsel %vm8571_vm2, %v3746_v38, 0  ;;  %v3768_v13 = vshll.u32 %v11185_v21, 16 }
 0x5c3   :  { %14524 = vst [vmem:[#allocation23_spill] sm:$0xff] %v11625_v61  ;;  %14525 = vst [vmem:[#allocation25_spill] sm:$0xff] %v11629_v53  ;;  %v11646_v0 = vsel %vm8571_vm2, %v3753_v14, 0  ;;  %v3772_v5 = vshrl.u32 %v11187_v1, 16  ;;  %v4455_v38 = vrot.slane %v11640_v8, 1  ;;  %v4078_v57 = vrot.slane %v4076_v35, 1 }
 0x5c4   :  { %v3770_v21 = vor.u32 %v3768_v13, %v3767_v25  ;;  %v4458_v14 = vrot.slane %v11646_v0, 1 }
 0x5c5   :  { %5230 = vmatmul.mubr.bf16.gmra.mrb[100].mxu1 %v11351_v18  ;;  %v11634_v18 = vsel %vm8571_vm2, 0, %v3756_v20 }
 0x5c6   :  { %5237 = vmatprep.mubr.bf16.mxu1 %v11612_v41  ;;  %v3760_v41 = vrot.slane %v3758_v16, 7  ;;  %14526 = vst [vmem:[#allocation28_spill] sm:$0xff] %v11634_v18  ;;  %v4454_v16 = vrot.slane %v11629_v53, 1  ;;  %v4457_v20 = vrot.slane %v11634_v18, 1 }
 0x5c7   :  { %7477 = vmatmul.mubr.bf16.gmra.mrb[164].mxu0 %v11621_v12  ;;  %v4071_v12 = vrot.slane %v4069_v24, 1  ;;  %v3779_v24 = vshrl.u32 %v11189_v52, 16 }
 0x5c8   :  { %7480 = vmatprep.mubr.bf16.mxu0 %v11625_v61  ;;  %v3763_v15 = vor.u32 %v3761_v44, %v3760_v41  ;;  %v4074_v44 = vshrl.u32 %v11397_v23, 16  ;;  %v4081_v61 = vshll.u32 %v11409_v6, 16  ;;  %v11668_v35 = vsel %vm955_vm4, %v4457_v20, %v4458_v14 }
 0x5c9   :  { %v11649_v51 = vsel %vm489_vm3, %v4067_v32, %v4071_v12  ;;  %v8398_v12 = vld [vmem:[%s13972_s2 + $0xe8] sm:$0xff]   ;;  %v11662_v32 = vsel %vm955_vm4, %v4454_v16, %v4455_v38  ;;  %14529 = vst [vmem:[#allocation35_spill] sm:$0xff] %v11668_v35  ;;  %v11677_v16 = vsel %vm8571_vm2, 0, %v3770_v21  ;;  %v4088_v6 = vshll.u32 %v11435_v63, 16 }
 0x5ca   :  { %14527 = vst [vmem:[#allocation30_spill] sm:$0xff] %v11649_v51  ;;  %14528 = vst [vmem:[#allocation32_spill] sm:$0xff] %v11662_v32  ;;  %v11672_v13 = vsel %vm8571_vm2, 0, %v3763_v15  ;;  %5441 = vmatpush1.bf16.msra.mxu1 %v8398_v12  ;;  %v3781_v38 = vrot.slane %v3779_v24, 7  ;;  %v3775_v20 = vshll.u32 %v11187_v1, 16  ;;  %v11684_v15 = vsel %vm8571_vm2, %v3760_v41, 0 }
 0x5cb   :  { %14530 = vst [vmem:[#allocation38_spill] sm:$0xff] %v11672_v13  ;;  %14531 = vst [vmem:[#allocation41_spill] sm:$0xff] %v11677_v16  ;;  %5442 = vmatprep.subr.bf16.mxu1 %v14480_v11  ;;  %v4083_v14 = vrot.slane %v4081_v61, 1  ;;  %v11690_v21 = vsel %vm8571_vm2, %v3767_v25, 0  ;;  %v4463_v12 = vrot.slane %v11677_v16, 1  ;;  %v4461_v41 = vrot.slane %v11684_v15, 1 }
 0x5cd   :  { %5238 = vmatmul.mubr.bf16.gmra.mrb[104].mxu1 %v11357_v26  ;;  %v4079_v26 = vor.u32 %v4078_v57, %v4074_v44  ;;  %v4460_v57 = vrot.slane %v11672_v13, 1  ;;  %v3786_v44 = vshrl.u32 %v11191_v55, 16 }
 0x5ce   :  { %5245 = vmatprep.mubr.bf16.mxu1 %v11649_v51  ;;  %v3774_v51 = vrot.slane %v3772_v5, 7  ;;  %v3782_v5 = vshll.u32 %v11189_v52, 16  ;;  %v4090_v52 = vrot.slane %v4088_v6, 1 }
 0x5cf   :  { %7481 = vmatmul.mubr.bf16.gmra.mrb[168].mxu0 %v11662_v32  ;;  %v11696_v1 = vsel %vm489_vm3, %v4079_v26, %v4083_v14  ;;  %v11702_v25 = vsel %vm955_vm4, %v4460_v57, %v4461_v41  ;;  %v4093_v32 = vshll.u32 %v11447_v31, 16  ;;  %v4100_v41 = vshll.u32 %v11441_v4, 16 }
 0x5d0   :  { %7484 = vmatprep.mubr.bf16.mxu0 %v11668_v35  ;;  %v3777_v24 = vor.u32 %v3775_v20, %v3774_v51  ;;  %14532 = vst [vmem:[#allocation44_spill] sm:$0xff] %v11696_v1  ;;  %v3784_v61 = vor.u32 %v3782_v5, %v3781_v38  ;;  %v4464_v35 = vrot.slane %v11690_v21, 1  ;;  %v4086_v20 = vshrl.u32 %v11435_v63, 16 }
 0x5d1   :  { %v3788_v5 = vrot.slane %v3786_v44, 7  ;;  %v3789_v31 = vshll.u32 %v11191_v55, 16  ;;  %v11728_v44 = vsel %vm8571_vm2, %v3781_v38, 0 }
 0x5d2   :  { %v11708_v26 = vsel %vm955_vm4, %v4463_v12, %v4464_v35  ;;  %v11712_v6 = vsel %vm8571_vm2, 0, %v3777_v24  ;;  %v4091_v14 = vor.u32 %v4090_v52, %v4086_v20  ;;  %v11717_v57 = vsel %vm8571_vm2, 0, %v3784_v61 }
 0x5d3   :  { %14533 = vst [vmem:[#allocation16_spill] sm:$0xff] %v11708_v26  ;;  %14534 = vst [vmem:[#allocation13_spill] sm:$0xff] %v11712_v6  ;;  %v11723_v35 = vsel %vm8571_vm2, %v3774_v51, 0  ;;  %v4095_v12 = vrot.slane %v4093_v32, 1  ;;  %v4466_v24 = vrot.slane %v11712_v6, 1  ;;  %v4469_v52 = vrot.slane %v11717_v57, 1 }
 0x5d4   :  { %14535 = vst [vmem:[#allocation18_spill] sm:$0xff] %v11717_v57  ;;  %v3791_v20 = vor.u32 %v3789_v31, %v3788_v5  ;;  %v4467_v55 = vrot.slane %v11723_v35, 1  ;;  %v4470_v51 = vrot.slane %v11728_v44, 1  ;;  %v8399_v32 = vld [vmem:[%s13972_s2 + $0xf0] sm:$0xff]   ;;  %v4098_v31 = vshrl.u32 %v11441_v4, 16 }
 0x5d5   :  { %5246 = vmatmul.mubr.bf16.gmra.mrb[108].mxu1 %v11392_v40  ;;  %v11733_v61 = vsel %vm489_vm3, %v4091_v14, %v4095_v12 }
 0x5d6   :  { %5253 = vmatprep.mubr.bf16.mxu1 %v11696_v1  ;;  %14536 = vst [vmem:[#allocation15_spill] sm:$0xff] %v11733_v61  ;;  %v4102_v1 = vrot.slane %v4100_v41, 1  ;;  %v11742_v38 = vsel %vm955_vm4, %v4466_v24, %v4467_v55  ;;  %v11748_v14 = vsel %vm955_vm4, %v4469_v52, %v4470_v51  ;;  %v11752_v41 = vsel %vm8571_vm2, 0, %v3791_v20  ;;  %5443 = vmatpush1.bf16.msra.mxu1 %v8399_v32 }
 0x5d7   :  { %7485 = vmatmul.mubr.bf16.gmra.mrb[172].mxu0 %v11702_v25  ;;  %14537 = vst [vmem:[#allocation20_spill] sm:$0xff] %v11742_v38  ;;  %14538 = vst [vmem:[#allocation2_spill] sm:$0xff] %v11748_v14  ;;  %v4112_v24 = vshll.u32 %v11475_v48, 16  ;;  %5444 = vmatprep.subr.bf16.mxu1 %v14480_v11  ;;  %v3702_v55 = vshrl.u32 %v11167_v58, 16  ;;  %v4472_v51 = vrot.slane %v11752_v41, 1 }
 0x5d8   :  { %7488 = vmatprep.mubr.bf16.mxu0 %v11708_v26  ;;  %v4105_v26 = vshll.u32 %v11453_v22, 16  ;;  %14539 = vst [vmem:[#allocation47_spill] sm:$0xff] %v11752_v41  ;;  %v4103_v12 = vor.u32 %v4102_v1, %v4098_v31  ;;  %v11759_v22 = vsel %vm8571_vm2, %v3788_v5, 0  ;;  %v4110_v5 = vshrl.u32 %v11475_v48, 16 }
 0x5d9   :  { %v4473_v1 = vrot.slane %v11759_v22, 1  ;;  %v4114_v32 = vrot.slane %v4112_v24, 1  ;;  %v3704_v31 = vrot.slane %v3702_v55, 7 }
 0x5da   :  { %v4107_v52 = vrot.slane %v4105_v26, 1  ;;  %v4117_v26 = vshll.u32 %v11485_v37, 16 }
 0x5dc   :  { %v11765_v20 = vsel %vm489_vm3, %v4103_v12, %v4107_v52  ;;  %v4119_v52 = vrot.slane %v4117_v26, 1  ;;  %v4136_v26 = vshll.u32 %v11518_v9, 16 }
 0x5dd   :  { %5254 = vmatmul.mubr.bf16.gmra.mrb[112].mxu1 %v11397_v23  ;;  %14540 = vst [vmem:[#allocation50_spill] sm:$0xff] %v11765_v20 }
 0x5de   :  { %5261 = vmatprep.mubr.bf16.mxu1 %v11733_v61  ;;  %v11770_v61 = vsel %vm955_vm4, %v4472_v51, %v4473_v1  ;;  %v14543_v51 = vld [vmem:[#allocation4_spill] sm:$0xff] }
 0x5df   :  { %7489 = vmatmul.mubr.bf16.gmra.mrb[176].mxu0 %v11742_v38  ;;  %14541 = vst [vmem:[#allocation63_spill] sm:$0xff] %v11770_v61  ;;  %v4115_v38 = vor.u32 %v4114_v32, %v4110_v5 }
 0x5e0   :  { %7492 = vmatprep.mubr.bf16.mxu0 %v11748_v14  ;;  %v3705_v14 = vshll.u32 %v11167_v58, 16  ;;  %v8400_v58 = vld [vmem:[%s13972_s2 + $0xf8] sm:$0xff]  }
 0x5e1   :  { %v11778_v24 = vsel %vm489_vm3, %v4115_v38, %v4119_v52  ;;  %5445 = vmatpush1.bf16.msra.mxu1 %v8400_v58  ;;  %v14544_v52 = vld [vmem:[#allocation3_spill] sm:$0xff] }
 0x5e2   :  { %v3707_v12 = vor.u32 %v3705_v14, %v3704_v31  ;;  %14542 = vst [vmem:[#allocation64_spill] sm:$0xff] %v11778_v24  ;;  %5703 = vmatprep.subr.bf16.mxu1 %v14480_v11  ;;  %v11792_v14 = vsel %vm8571_vm2, %v3704_v31, 0  ;;  %v4138_v31 = vrot.slane %v4136_v26, 1 }
 0x5e3   :  { %v4129_v32 = vshll.u32 %v11792_v14, 16 }
 0x5e4   :  { %v11783_v55 = vsel %vm8571_vm2, 0, %v3707_v12 }
 0x5e5   :  { %5262 = vmatmul.mubr.bf16.gmra.mrb[116].mxu1 %v11435_v63  ;;  %v4124_v37 = vshll.u32 %v11783_v55, 16  ;;  %v4122_v1 = vshrl.u32 %v11783_v55, 16  ;;  %v4131_v12 = vrot.slane %v4129_v32, 1  ;;  %v4146_v32 = vshrl.u32 %v11545_v56, 16 }
 0x5e6   :  { %5269 = vmatprep.mubr.bf16.mxu1 %v11765_v20  ;;  %v4148_v20 = vshll.u32 %v11545_v56, 16 }
 0x5e7   :  { %7493 = vmatmul.mubr.bf16.gmra.mrb[180].mxu0 %v11770_v61  ;;  %v4126_v38 = vrot.slane %v4124_v37, 1  ;;  %v4134_v37 = vshrl.u32 %v11518_v9, 16 }
 0x5e9   :  { %v4127_v5 = vor.u32 %v4126_v38, %v4122_v1  ;;  %v4150_v1 = vrot.slane %v4148_v20, 1  ;;  %v4165_v20 = vshll.u32 %v11562_v17, 16 }
 0x5eb   :  { %v11801_v58 = vsel %vm489_vm3, %v4127_v5, %v4131_v12  ;;  %v4153_v5 = vshll.u32 %v11551_v27, 16  ;;  %v4151_v26 = vor.u32 %v4150_v1, %v4146_v32  ;;  %v4160_v12 = vshll.u32 %v11555_v59, 16 }
 0x5ec   :  { %v4167_v27 = vrot.slane %v4165_v20, 1  ;;  %v4182_v20 = vshrl.u32 %v11594_v7, 16 }
 0x5ed   :  { %5270 = vmatmul.mubr.bf16.gmra.mrb[120].mxu1 %v11441_v4 }
 0x5ee   :  { %5277 = vmatprep.mubr.bf16.mxu1 %v11778_v24  ;;  %v4139_v24 = vor.u32 %v4138_v31, %v4134_v37  ;;  %v4162_v31 = vrot.slane %v4160_v12, 1  ;;  %v4172_v37 = vshll.u32 %v11588_v54, 16 }
 0x5f0   :  { %v4174_v32 = vrot.slane %v4172_v37, 1 }
 0x5f5   :  { %5278 = vmatmul.mubr.bf16.gmra.mrb[124].mxu1 %v11475_v48 }
 0x5f6   :  { %5285 = vmatprep.mubr.bf16.mxu1 %v14543_v51  ;;  %v4141_v51 = vshll.u32 %v11526_v30, 16  ;;  %v4155_v30 = vrot.slane %v4153_v5, 1  ;;  %v4170_v5 = vshrl.u32 %v11588_v54, 16 }
 0x5f8   :  { %v4143_v61 = vrot.slane %v4141_v51, 1  ;;  %v11817_v51 = vsel %vm489_vm3, %v4151_v26, %v4155_v30  ;;  %v4177_v26 = vshll.u32 %v11600_v62, 16  ;;  %v4175_v12 = vor.u32 %v4174_v32, %v4170_v5 }
 0x5f9   :  { %v4184_v30 = vshll.u32 %v11594_v7, 16 }
 0x5fa   :  { %v11809_v38 = vsel %vm489_vm3, %v4139_v24, %v4143_v61  ;;  %v4158_v61 = vshrl.u32 %v11555_v59, 16  ;;  %v4179_v17 = vrot.slane %v4177_v26, 1  ;;  %v4194_v26 = vshrl.u32 %v11629_v53, 16 }
 0x5fc   :  { %v4163_v24 = vor.u32 %v4162_v31, %v4158_v61  ;;  %v11833_v31 = vsel %vm489_vm3, %v4175_v12, %v4179_v17  ;;  %v4186_v61 = vrot.slane %v4184_v30, 1  ;;  %v4201_v12 = vshll.u32 %v11640_v8, 16 }
 0x5fd   :  { %5286 = vmatmul.mubr.bf16.gmra.mrb[128].mxu1 %v14544_v52  ;;  %v4208_v17 = vshll.u32 %v11634_v18, 16 }
 0x5fe   :  { %5293 = vmatprep.mubr.bf16.mxu1 %v11801_v58  ;;  %v11825_v1 = vsel %vm489_vm3, %v4163_v24, %v4167_v27  ;;  %v4189_v24 = vshll.u32 %v11606_v29, 16  ;;  %v4187_v37 = vor.u32 %v4186_v61, %v4182_v20  ;;  %v4196_v27 = vshll.u32 %v11629_v53, 16 }
 0x5ff   :  { %v4203_v29 = vrot.slane %v4201_v12, 1  ;;  %v4210_v20 = vrot.slane %v4208_v17, 1  ;;  %v4218_v12 = vshrl.u32 %v11672_v13, 16 }
 0x600   :  { %v4191_v62 = vrot.slane %v4189_v24, 1  ;;  %v4198_v5 = vrot.slane %v4196_v27, 1  ;;  %v4206_v24 = vshrl.u32 %v11634_v18, 16 }
 0x602   :  { %v11841_v32 = vsel %vm489_vm3, %v4187_v37, %v4191_v62  ;;  %v4199_v30 = vor.u32 %v4198_v5, %v4194_v26  ;;  %v4213_v37 = vshll.u32 %v11646_v0, 16  ;;  %v4211_v27 = vor.u32 %v4210_v20, %v4206_v24 }
 0x603   :  { %v4220_v62 = vshll.u32 %v11672_v13, 16 }
 0x604   :  { %v11849_v61 = vsel %vm489_vm3, %v4199_v30, %v4203_v29  ;;  %v4215_v8 = vrot.slane %v4213_v37, 1  ;;  %v4225_v30 = vshll.u32 %v11684_v15, 16  ;;  %v4232_v29 = vshll.u32 %v11677_v16, 16 }
 0x605   :  { %5294 = vmatmul.mubr.bf16.gmra.mrb[132].mxu1 %v11783_v55  ;;  %v4222_v26 = vrot.slane %v4220_v62, 1  ;;  %v4230_v37 = vshrl.u32 %v11677_v16, 16 }
 0x606   :  { %5301 = vmatprep.mubr.bf16.mxu1 %v11809_v38  ;;  %v11857_v5 = vsel %vm489_vm3, %v4211_v27, %v4215_v8  ;;  %v4227_v0 = vrot.slane %v4225_v30, 1  ;;  %v4234_v24 = vrot.slane %v4232_v29, 1  ;;  %v4237_v27 = vshll.u32 %v11690_v21, 16 }
 0x607   :  { %v4223_v17 = vor.u32 %v4222_v26, %v4218_v12  ;;  %v4244_v8 = vshll.u32 %v11712_v6, 16  ;;  %v4242_v30 = vshrl.u32 %v11712_v6, 16  ;;  %v3793_v21 = vshrl.u32 %v11193_v28, 16 }
 0x608   :  { %v4235_v62 = vor.u32 %v4234_v24, %v4230_v37  ;;  %v4239_v15 = vrot.slane %v4237_v27, 1 }
 0x609   :  { %v11865_v20 = vsel %vm489_vm3, %v4223_v17, %v4227_v0  ;;  %v4246_v12 = vrot.slane %v4244_v8, 1  ;;  %v4249_v17 = vshll.u32 %v11723_v35, 16  ;;  %v4256_v0 = vshll.u32 %v11717_v57, 16 }
 0x60a   :  { %v11873_v26 = vsel %vm489_vm3, %v4235_v62, %v4239_v15  ;;  %v3795_v62 = vrot.slane %v3793_v21, 7  ;;  %v4254_v8 = vshrl.u32 %v11717_v57, 16  ;;  %v4261_v15 = vshll.u32 %v11728_v44, 16 }
 0x60b   :  { %14545 = vst [vmem:[#allocation65_spill] sm:$0xff] %v11873_v26  ;;  %v4247_v29 = vor.u32 %v4246_v12, %v4242_v30  ;;  %v4251_v24 = vrot.slane %v4249_v17, 1  ;;  %v4258_v27 = vrot.slane %v4256_v0, 1  ;;  %v3796_v35 = vshll.u32 %v11193_v28, 16 }
 0x60c   :  { %v4268_v30 = vshll.u32 %v11752_v41, 16  ;;  %v3800_v17 = vshrl.u32 %v11195_v46, 16 }
 0x60d   :  { %5302 = vmatmul.mubr.bf16.gmra.mrb[136].mxu1 %v11518_v9  ;;  %v11882_v37 = vsel %vm489_vm3, %v4247_v29, %v4251_v24  ;;  %v4259_v12 = vor.u32 %v4258_v27, %v4254_v8  ;;  %v3798_v52 = vor.u32 %v3796_v35, %v3795_v62  ;;  %v4263_v29 = vrot.slane %v4261_v15, 1 }
 0x60e   :  { %5309 = vmatprep.mubr.bf16.mxu1 %v11817_v51  ;;  %v4270_v44 = vrot.slane %v4268_v30, 1  ;;  %v3802_v8 = vrot.slane %v3800_v17, 7  ;;  %v4266_v15 = vshrl.u32 %v11752_v41, 16  ;;  %v4273_v35 = vshll.u32 %v11759_v22, 16 }
 0x60f   :  { %v11896_v0 = vsel %vm489_vm3, %v4259_v12, %v4263_v29  ;;  %v11905_v27 = vsel %vm8571_vm2, 0, %v3798_v52  ;;  %v11917_v52 = vsel %vm8571_vm2, %v3795_v62, 0 }
 0x610   :  { %14548 = vst [vmem:[#allocation68_spill] sm:$0xff] %v11896_v0  ;;  %14551 = vst [vmem:[#allocation71_spill] sm:$0xff] %v11905_v27  ;;  %v4271_v12 = vor.u32 %v4270_v44, %v4266_v15  ;;  %v4280_v29 = vshll.u32 %v11905_v27, 16  ;;  %v4278_v15 = vshrl.u32 %v11905_v27, 16  ;;  %v4285_v62 = vshll.u32 %v11917_v52, 16 }
 0x615   :  { %5310 = vmatmul.mubr.bf16.gmra.mrb[140].mxu1 %v11545_v56 }
 0x616   :  { %5317 = vmatprep.mubr.bf16.mxu1 %v11825_v1 }
 0x61d   :  { %5318 = vmatmul.mubr.bf16.gmra.mrb[144].mxu1 %v11555_v59 }
 0x61e   :  { %5325 = vmatprep.mubr.bf16.mxu1 %v11833_v31 }
 0x625   :  { %5326 = vmatmul.mubr.bf16.gmra.mrb[148].mxu1 %v11588_v54 }
 0x626   :  { %5333 = vmatprep.mubr.bf16.mxu1 %v11841_v32 }
 0x62d   :  { %5334 = vmatmul.mubr.bf16.gmra.mrb[152].mxu1 %v11594_v7 }
 0x62e   :  { %5341 = vmatprep.mubr.bf16.mxu1 %v11849_v61 }
 0x635   :  { %5342 = vmatmul.mubr.bf16.gmra.mrb[156].mxu1 %v11629_v53 }
 0x636   :  { %5349 = vmatprep.mubr.bf16.mxu1 %v11857_v5 }
 0x63d   :  { %5350 = vmatmul.mubr.bf16.gmra.mrb[160].mxu1 %v11634_v18 }
 0x63e   :  { %5357 = vmatprep.mubr.bf16.mxu1 %v11865_v20 }
 0x645   :  { %5358 = vmatmul.mubr.bf16.gmra.mrb[164].mxu1 %v11672_v13 }
 0x646   :  { %5365 = vmatprep.mubr.bf16.mxu1 %v11873_v26 }
 0x64d   :  { %5366 = vmatmul.mubr.bf16.gmra.mrb[168].mxu1 %v11677_v16 }
 0x64e   :  { %5373 = vmatprep.mubr.bf16.mxu1 %v11882_v37 }
 0x652   :  { %v11890_v26 = vpop.f32.mrb[128].mxu0 }
 0x653   :  { %14546 = vst [vmem:[#allocation66_spill] sm:$0xff] %v11890_v26  ;;  %v11892_v24 = vpop.f32.mrb[129].mxu0  ;;  %v3803_v26 = vshll.u32 %v11195_v46, 16  ;;  %v4282_v46 = vrot.slane %v4280_v29, 1  ;;  %v11941_v29 = vsel %vm8571_vm2, %v3802_v8, 0 }
 0x654   :  { %14547 = vst [vmem:[#allocation67_spill] sm:$0xff] %v11892_v24  ;;  %v11898_v21 = vpop.f32.mrb[130].mxu0  ;;  %v4275_v24 = vrot.slane %v4273_v35, 1 }
 0x655   :  { %5374 = vmatmul.mubr.bf16.gmra.mrb[172].mxu1 %v11712_v6  ;;  %14549 = vst [vmem:[#allocation69_spill] sm:$0xff] %v11898_v21  ;;  %v11901_v28 = vpop.f32.mrb[131].mxu0  ;;  %v3805_v21 = vor.u32 %v3803_v26, %v3802_v8  ;;  %v4283_v35 = vor.u32 %v4282_v46, %v4278_v15 }
 0x656   :  { %5381 = vmatprep.mubr.bf16.mxu1 %v11896_v0  ;;  %14550 = vst [vmem:[#allocation70_spill] sm:$0xff] %v11901_v28  ;;  %v11921_v17 = vsel %vm489_vm3, %v4271_v12, %v4275_v24  ;;  %v4287_v12 = vrot.slane %v4285_v62, 1  ;;  %v4297_v62 = vshll.u32 %v11941_v29, 16 }
 0x657   :  { %v11930_v44 = vsel %vm8571_vm2, 0, %v3805_v21 }
 0x658   :  { %v11945_v21 = vsel %vm489_vm3, %v4283_v35, %v4287_v12  ;;  %v4290_v15 = vshrl.u32 %v11930_v44, 16  ;;  %v4299_v8 = vrot.slane %v4297_v62, 1 }
 0x65a   :  { %v11911_v30 = vpop.f32.mrb[132].mxu0 }
 0x65b   :  { %14552 = vst [vmem:[#allocation72_spill] sm:$0xff] %v11911_v30  ;;  %v11913_v0 = vpop.f32.mrb[133].mxu0  ;;  %v4292_v30 = vshll.u32 %v11930_v44, 16 }
 0x65c   :  { %14553 = vst [vmem:[#allocation73_spill] sm:$0xff] %v11913_v0  ;;  %v11923_v22 = vpop.f32.mrb[134].mxu0 }
 0x65d   :  { %5382 = vmatmul.mubr.bf16.gmra.mrb[176].mxu1 %v11717_v57  ;;  %14554 = vst [vmem:[#allocation74_spill] sm:$0xff] %v11923_v22  ;;  %v11926_v26 = vpop.f32.mrb[135].mxu0  ;;  %v4294_v0 = vrot.slane %v4292_v30, 1 }
 0x65e   :  { %5389 = vmatprep.mubr.bf16.mxu1 %v11921_v17  ;;  %14555 = vst [vmem:[#allocation75_spill] sm:$0xff] %v11926_v26 }
 0x662   :  { %v11935_v24 = vpop.f32.mrb[136].mxu0 }
 0x663   :  { %14556 = vst [vmem:[#allocation76_spill] sm:$0xff] %v11935_v24  ;;  %v11937_v22 = vpop.f32.mrb[137].mxu0  ;;  %v4295_v24 = vor.u32 %v4294_v0, %v4290_v15 }
 0x664   :  { %14557 = vst [vmem:[#allocation77_spill] sm:$0xff] %v11937_v22  ;;  %v11947_v26 = vpop.f32.mrb[138].mxu0 }
 0x665   :  { %5390 = vmatmul.mubr.bf16.gmra.mrb[180].mxu1 %v11752_v41  ;;  %14558 = vst [vmem:[#allocation78_spill] sm:$0xff] %v11947_v26  ;;  %v11950_v46 = vpop.f32.mrb[139].mxu0  ;;  %v11960_v35 = vsel %vm489_vm3, %v4295_v24, %v4299_v8  ;;  %v8401_v24 = vld [vmem:[%s13972_s2 + $0x100] sm:$0xff]  }
 0x666   :  { %5397 = vmatprep.mubr.bf16.mxu1 %v11945_v21  ;;  %14559 = vst [vmem:[#allocation79_spill] sm:$0xff] %v11950_v46 }
 0x66a   :  { %v11954_v22 = vpop.f32.mrb[140].mxu0 }
 0x66b   :  { %14560 = vst [vmem:[#allocation80_spill] sm:$0xff] %v11954_v22  ;;  %v11956_v28 = vpop.f32.mrb[141].mxu0 }
 0x66c   :  { %14561 = vst [vmem:[#allocation81_spill] sm:$0xff] %v11956_v28  ;;  %v11962_v30 = vpop.f32.mrb[142].mxu0  ;;  %v14607_v28 = vld [vmem:[#allocation36_spill] sm:$0xff] }
 0x66d   :  { %5398 = vmatmul.mubr.bf16.gmra.mrb[184].mxu1 %v11905_v27  ;;  %14562 = vst [vmem:[#allocation82_spill] sm:$0xff] %v11962_v30  ;;  %v11965_v12 = vpop.f32.mrb[143].mxu0 }
 0x66e   :  { %5405 = vmatprep.mubr.bf16.mxu1 %v11960_v35  ;;  %14563 = vst [vmem:[#allocation83_spill] sm:$0xff] %v11965_v12  ;;  %v14605_v12 = vld [vmem:[#allocation10_spill] sm:$0xff] }
 0x672   :  { %v11967_v26 = vpop.f32.mrb[144].mxu0 }
 0x673   :  { %14564 = vst [vmem:[#allocation84_spill] sm:$0xff] %v11967_v26  ;;  %v11969_v46 = vpop.f32.mrb[145].mxu0 }
 0x674   :  { %14565 = vst [vmem:[#allocation85_spill] sm:$0xff] %v11969_v46  ;;  %v11972_v0 = vpop.f32.mrb[146].mxu0  ;;  %v4391_v46 = vrot.slane %v11240_v19, 1 }
 0x675   :  { %5406 = vmatmul.mubr.bf16.gmra.mrb[188].mxu1 %v11930_v44  ;;  %14566 = vst [vmem:[#allocation86_spill] sm:$0xff] %v11972_v0  ;;  %v11975_v15 = vpop.f32.mrb[147].mxu0 }
 0x676   :  { %5446 = vmatprep.mubr.bf16.mxu1 %v11240_v19  ;;  %14567 = vst [vmem:[#allocation87_spill] sm:$0xff] %v11975_v15  ;;  %v8402_v15 = vld [vmem:[%s13972_s2 + $0x108] sm:$0xff]   ;;  %v8404_v19 = vld [vmem:[%s13972_s2 + $0x118] sm:$0xff]  }
 0x67a   :  { %v11980_v62 = vpop.f32.mrb[148].mxu0 }
 0x67b   :  { %14568 = vst [vmem:[#allocation88_spill] sm:$0xff] %v11980_v62  ;;  %v11982_v8 = vpop.f32.mrb[149].mxu0  ;;  %v4392_v62 = vrot.slane %v11222_v3, 1 }
 0x67c   :  { %14569 = vst [vmem:[#allocation89_spill] sm:$0xff] %v11982_v8  ;;  %v11985_v26 = vpop.f32.mrb[150].mxu0 }
 0x67d   :  { %5447 = vmatmul.mubr.bf16.vlgmr.msra.gmra.mrb[64].mxu1 %v14513_v47  ;;  %14570 = vst [vmem:[#allocation90_spill] sm:$0xff] %v11985_v26  ;;  %v11988_v0 = vpop.f32.mrb[151].mxu0  ;;  %v8403_v26 = vld [vmem:[%s13972_s2 + $0x110] sm:$0xff]  }
 0x67e   :  { %5454 = vmatprep.mubr.bf16.mxu1 %v11226_v2  ;;  %5704 = vmatpush1.bf16.msra.mxu1 %v8401_v24  ;;  %14571 = vst [vmem:[#allocation91_spill] sm:$0xff] %v11988_v0  ;;  %v12003_v24 = vsel %vm955_vm4, %v4391_v46, %v4392_v62  ;;  %v8405_v46 = vld [vmem:[%s13972_s2 + $0x120] sm:$0xff]  }
 0x67f   :  { %5705 = vmatprep.subr.bf16.mxu1 %v14480_v11 }
 0x682   :  { %5706 = vmatpush1.bf16.msra.mxu1 %v8402_v15  ;;  %v11999_v8 = vpop.f32.mrb[152].mxu0 }
 0x683   :  { %14572 = vst [vmem:[#allocation92_spill] sm:$0xff] %v11999_v8  ;;  %5707 = vmatprep.subr.bf16.mxu1 %v14480_v11  ;;  %v12005_v0 = vpop.f32.mrb[153].mxu0 }
 0x684   :  { %14573 = vst [vmem:[#allocation93_spill] sm:$0xff] %v12005_v0  ;;  %v12008_v30 = vpop.f32.mrb[154].mxu0 }
 0x685   :  { %5455 = vmatmul.mubr.bf16.gmra.mrb[68].mxu1 %v12003_v24  ;;  %14574 = vst [vmem:[#allocation94_spill] sm:$0xff] %v12008_v30  ;;  %v12011_v3 = vpop.f32.mrb[155].mxu0 }
 0x686   :  { %5462 = vmatprep.mubr.bf16.mxu1 %v11203_v10  ;;  %14575 = vst [vmem:[#allocation95_spill] sm:$0xff] %v12011_v3  ;;  %5708 = vmatpush1.bf16.msra.mxu1 %v8403_v26 }
 0x687   :  { %5709 = vmatprep.subr.bf16.mxu1 %v14480_v11 }
 0x68a   :  { %5710 = vmatpush1.bf16.msra.mxu1 %v8404_v19  ;;  %v12020_v15 = vpop.f32.mrb[156].mxu0  ;;  %v8406_v19 = vld [vmem:[%s13972_s2 + $0x128] sm:$0xff]  }
 0x68b   :  { %14576 = vst [vmem:[#allocation96_spill] sm:$0xff] %v12020_v15  ;;  %5711 = vmatprep.subr.bf16.mxu1 %v14480_v11  ;;  %v12023_v62 = vpop.f32.mrb[157].mxu0  ;;  %v8407_v15 = vld [vmem:[%s13972_s2 + $0x130] sm:$0xff]  }
 0x68c   :  { %14577 = vst [vmem:[#allocation97_spill] sm:$0xff] %v12023_v62  ;;  %v12026_v26 = vpop.f32.mrb[158].mxu0 }
 0x68d   :  { %5463 = vmatmul.mubr.bf16.gmra.mrb[72].mxu1 %v11247_v50  ;;  %14578 = vst [vmem:[#allocation98_spill] sm:$0xff] %v12026_v26  ;;  %v12029_v30 = vpop.f32.mrb[159].mxu0 }
 0x68e   :  { %5470 = vmatprep.mubr.bf16.mxu1 %v11233_v39  ;;  %14579 = vst [vmem:[#allocation99_spill] sm:$0xff] %v12029_v30  ;;  %5712 = vmatpush1.bf16.msra.mxu1 %v8405_v46 }
 0x68f   :  { %5713 = vmatprep.subr.bf16.mxu1 %v14480_v11 }
 0x692   :  { %5714 = vmatpush1.bf16.msra.mxu1 %v8406_v19  ;;  %v12038_v62 = vpop.f32.mrb[160].mxu0  ;;  %v8408_v19 = vld [vmem:[%s13972_s2 + $0x138] sm:$0xff]  }
 0x693   :  { %14580 = vst [vmem:[#allocation100_spill] sm:$0xff] %v12038_v62  ;;  %5715 = vmatprep.subr.bf16.mxu1 %v14480_v11  ;;  %v12041_v26 = vpop.f32.mrb[161].mxu0  ;;  %v8409_v62 = vld [vmem:[%s13972_s2 + $0x140] sm:$0xff]  }
 0x694   :  { %14581 = vst [vmem:[#allocation101_spill] sm:$0xff] %v12041_v26  ;;  %v12044_v46 = vpop.f32.mrb[162].mxu0 }
 0x695   :  { %5471 = vmatmul.mubr.bf16.gmra.mrb[76].mxu1 %v11229_v42  ;;  %14582 = vst [vmem:[#allocation102_spill] sm:$0xff] %v12044_v46  ;;  %v12047_v30 = vpop.f32.mrb[163].mxu0 }
 0x696   :  { %5478 = vmatprep.mubr.bf16.mxu1 %v11261_v43  ;;  %14583 = vst [vmem:[#allocation103_spill] sm:$0xff] %v12047_v30  ;;  %5716 = vmatpush1.bf16.msra.mxu1 %v8407_v15 }
 0x697   :  { %5717 = vmatprep.subr.bf16.mxu1 %v14480_v11 }
 0x69a   :  { %5718 = vmatpush1.bf16.msra.mxu1 %v8408_v19  ;;  %v12056_v26 = vpop.f32.mrb[164].mxu0  ;;  %v8410_v19 = vld [vmem:[%s13972_s2 + $0x148] sm:$0xff]  }
 0x69b   :  { %14584 = vst [vmem:[#allocation104_spill] sm:$0xff] %v12056_v26  ;;  %5719 = vmatprep.subr.bf16.mxu1 %v14480_v11  ;;  %v12059_v46 = vpop.f32.mrb[165].mxu0  ;;  %v8411_v26 = vld [vmem:[%s13972_s2 + $0x150] sm:$0xff]  }
 0x69c   :  { %14585 = vst [vmem:[#allocation105_spill] sm:$0xff] %v12059_v46  ;;  %v12062_v15 = vpop.f32.mrb[166].mxu0 }
 0x69d   :  { %5479 = vmatmul.mubr.bf16.gmra.mrb[80].mxu1 %v11257_v45  ;;  %14586 = vst [vmem:[#allocation106_spill] sm:$0xff] %v12062_v15  ;;  %v12065_v30 = vpop.f32.mrb[167].mxu0 }
 0x69e   :  { %5486 = vmatprep.mubr.bf16.mxu1 %v11277_v33  ;;  %14587 = vst [vmem:[#allocation107_spill] sm:$0xff] %v12065_v30  ;;  %5720 = vmatpush1.bf16.msra.mxu1 %v8409_v62 }
 0x69f   :  { %5721 = vmatprep.subr.bf16.mxu1 %v14480_v11 }
 0x6a2   :  { %5722 = vmatpush1.bf16.msra.mxu1 %v8410_v19  ;;  %v12074_v46 = vpop.f32.mrb[168].mxu0 }
 0x6a3   :  { %14588 = vst [vmem:[#allocation108_spill] sm:$0xff] %v12074_v46  ;;  %5723 = vmatprep.subr.bf16.mxu1 %v14480_v11  ;;  %v12077_v15 = vpop.f32.mrb[169].mxu0 }
 0x6a4   :  { %14589 = vst [vmem:[#allocation109_spill] sm:$0xff] %v12077_v15  ;;  %v12080_v62 = vpop.f32.mrb[170].mxu0  ;;  %v14595_v15 = vld [vmem:[#allocation58_spill] sm:$0xff] }
 0x6a5   :  { %5487 = vmatmul.mubr.bf16.gmra.mrb[84].mxu1 %v11297_v34  ;;  %14590 = vst [vmem:[#allocation110_spill] sm:$0xff] %v12080_v62  ;;  %v12083_v30 = vpop.f32.mrb[171].mxu0  ;;  %v8412_v62 = vld [vmem:[%s13972_s2 + $0x158] sm:$0xff]  }
 0x6a6   :  { %5494 = vmatprep.mubr.bf16.mxu1 %v11307_v49  ;;  %14591 = vst [vmem:[#allocation111_spill] sm:$0xff] %v12083_v30  ;;  %5724 = vmatpush1.bf16.msra.mxu1 %v8411_v26 }
 0x6a7   :  { %5725 = vmatprep.subr.bf16.mxu1 %v14480_v11 }
 0x6aa   :  { %v12086_v19 = vpop.f32.mrb[172].mxu0  ;;  %5726 = vmatpush1.bf16.msra.mxu1 %v8412_v62 }
 0x6ab   :  { %14592 = vst [vmem:[#allocation112_spill] sm:$0xff] %v12086_v19  ;;  %v12088_v8 = vpop.f32.mrb[173].mxu0  ;;  %5727 = vmatprep.subr.bf16.mxu1 %v14480_v11 }
 0x6ac   :  { %14593 = vst [vmem:[#allocation113_spill] sm:$0xff] %v12088_v8  ;;  %v12091_v46 = vpop.f32.mrb[174].mxu0  ;;  %v14599_v8 = vld [vmem:[#allocation61_spill] sm:$0xff] }
 0x6ad   :  { %5495 = vmatmul.mubr.bf16.gmra.mrb[88].mxu1 %v11303_v60  ;;  %14594 = vst [vmem:[#allocation114_spill] sm:$0xff] %v12091_v46  ;;  %v12094_v3 = vpop.f32.mrb[175].mxu0  ;;  %v14601_v46 = vld [vmem:[#allocation33_spill] sm:$0xff] }
 0x6ae   :  { %5502 = vmatprep.mubr.bf16.mxu1 %v14595_v15  ;;  %14596 = vst [vmem:[#allocation58_spill] sm:$0xff] %v12094_v3 }
 0x6b2   :  { %v12100_v26 = vpop.f32.mrb[176].mxu0 }
 0x6b3   :  { %14597 = vst [vmem:[#allocation115_spill] sm:$0xff] %v12100_v26  ;;  %v12102_v19 = vpop.f32.mrb[177].mxu0 }
 0x6b4   :  { %14598 = vst [vmem:[#allocation116_spill] sm:$0xff] %v12102_v19  ;;  %v12105_v30 = vpop.f32.mrb[178].mxu0  ;;  %v14613_v19 = vld [vmem:[#allocation9_spill] sm:$0xff] }
 0x6b5   :  { %5503 = vmatmul.mubr.bf16.gmra.mrb[92].mxu1 %v14599_v8  ;;  %14600 = vst [vmem:[#allocation61_spill] sm:$0xff] %v12105_v30  ;;  %v12108_v0 = vpop.f32.mrb[179].mxu0  ;;  %v8413_v30 = vld [vmem:[%s13972_s2 + $0x160] sm:$0xff]  }
 0x6b6   :  { %5510 = vmatprep.mubr.bf16.mxu1 %v14601_v46  ;;  %14602 = vst [vmem:[#allocation117_spill] sm:$0xff] %v12108_v0  ;;  %5728 = vmatpush1.bf16.msra.mxu1 %v8413_v30  ;;  %v14609_v0 = vld [vmem:[#allocation42_spill] sm:$0xff]  ;;  %v14612_v30 = vld [vmem:[#allocation5_spill] sm:$0xff] }
 0x6b7   :  { %5729 = vmatprep.subr.bf16.mxu1 %v14480_v11 }
 0x6ba   :  { %v12110_v3 = vpop.f32.mrb[180].mxu0 }
 0x6bb   :  { %14603 = vst [vmem:[#allocation118_spill] sm:$0xff] %v12110_v3  ;;  %v12112_v22 = vpop.f32.mrb[181].mxu0  ;;  %v14610_v3 = vld [vmem:[#allocation45_spill] sm:$0xff] }
 0x6bc   :  { %14604 = vst [vmem:[#allocation119_spill] sm:$0xff] %v12112_v22  ;;  %v12115_v62 = vpop.f32.mrb[182].mxu0  ;;  %v8415_v22 = vld [vmem:[%s13972_s2 + $0x170] sm:$0xff]  }
 0x6bd   :  { %5511 = vmatmul.mubr.bf16.gmra.mrb[96].mxu1 %v14605_v12  ;;  %14606 = vst [vmem:[#allocation10_spill] sm:$0xff] %v12115_v62  ;;  %v12118_v26 = vpop.f32.mrb[183].mxu0  ;;  %v8414_v62 = vld [vmem:[%s13972_s2 + $0x168] sm:$0xff]  }
 0x6be   :  { %5518 = vmatprep.mubr.bf16.mxu1 %v14607_v28  ;;  %14608 = vst [vmem:[#allocation120_spill] sm:$0xff] %v12118_v26  ;;  %5730 = vmatpush1.bf16.msra.mxu1 %v8414_v62  ;;  %v14611_v26 = vld [vmem:[#allocation57_spill] sm:$0xff]  ;;  %v14614_v62 = vld [vmem:[#allocation12_spill] sm:$0xff] }
 0x6bf   :  { %5731 = vmatprep.subr.bf16.mxu1 %v14480_v11  ;;  %v14618_v28 = vld [vmem:[#allocation17_spill] sm:$0xff] }
 0x6c2   :  { %5732 = vmatpush1.bf16.msra.mxu1 %v8415_v22  ;;  %v4436_v22 = vrot.slane %v11783_v55, 1 }
 0x6c3   :  { %5733 = vmatprep.subr.bf16.mxu1 %v14480_v11 }
 0x6c5   :  { %5519 = vmatmul.mubr.bf16.gmra.mrb[100].mxu1 %v14609_v0 }
 0x6c6   :  { %5526 = vmatprep.mubr.bf16.mxu1 %v11392_v40 }
 0x6cd   :  { %5527 = vmatmul.mubr.bf16.gmra.mrb[104].mxu1 %v14610_v3 }
 0x6ce   :  { %5534 = vmatprep.mubr.bf16.mxu1 %v11397_v23  ;;  %v14615_v23 = vld [vmem:[#allocation29_spill] sm:$0xff] }
 0x6d5   :  { %5535 = vmatmul.mubr.bf16.gmra.mrb[108].mxu1 %v14611_v26 }
 0x6d6   :  { %5542 = vmatprep.mubr.bf16.mxu1 %v11435_v63  ;;  %v8416_v63 = vld [vmem:[%s13972_s2 + $0x178] sm:$0xff]  }
 0x6d7   :  { %5734 = vmatpush1.bf16.msra.mxu1 %v8416_v63  ;;  %v14617_v63 = vld [vmem:[#allocation52_spill] sm:$0xff] }
 0x6d8   :  { %5992 = vmatprep.subr.bf16.mxu1 %v14480_v11 }
 0x6dd   :  { %5543 = vmatmul.mubr.bf16.gmra.mrb[112].mxu1 %v14612_v30 }
 0x6de   :  { %5550 = vmatprep.mubr.bf16.mxu1 %v11441_v4  ;;  %v14616_v4 = vld [vmem:[#allocation37_spill] sm:$0xff] }
 0x6e5   :  { %5551 = vmatmul.mubr.bf16.gmra.mrb[116].mxu1 %v14613_v19 }
 0x6e6   :  { %5558 = vmatprep.mubr.bf16.mxu1 %v11475_v48  ;;  %v4437_v48 = vrot.slane %v11792_v14, 1  ;;  %v14622_v14 = vld [vmem:[#allocation32_spill] sm:$0xff] }
 0x6e8   :  { %v12155_v40 = vsel %vm955_vm4, %v4436_v22, %v4437_v48  ;;  %v14621_v48 = vld [vmem:[#allocation23_spill] sm:$0xff] }
 0x6e9   :  { %v14623_v22 = vld [vmem:[#allocation35_spill] sm:$0xff] }
 0x6ed   :  { %5559 = vmatmul.mubr.bf16.gmra.mrb[120].mxu1 %v14614_v62 }
 0x6ee   :  { %5566 = vmatprep.mubr.bf16.mxu1 %v14615_v23 }
 0x6f5   :  { %5567 = vmatmul.mubr.bf16.gmra.mrb[124].mxu1 %v14616_v4 }
 0x6f6   :  { %5574 = vmatprep.mubr.bf16.mxu1 %v11783_v55  ;;  %v14620_v55 = vld [vmem:[#allocation26_spill] sm:$0xff] }
 0x6fd   :  { %5575 = vmatmul.mubr.bf16.gmra.mrb[128].mxu1 %v14513_v47  ;;  %v14619_v47 = vld [vmem:[#allocation22_spill] sm:$0xff] }
 0x6fe   :  { %5582 = vmatprep.mubr.bf16.mxu1 %v11518_v9 }
 0x705   :  { %5583 = vmatmul.mubr.bf16.gmra.mrb[132].mxu1 %v12155_v40 }
 0x706   :  { %5590 = vmatprep.mubr.bf16.mxu1 %v11545_v56 }
 0x70d   :  { %5591 = vmatmul.mubr.bf16.gmra.mrb[136].mxu1 %v14617_v63 }
 0x70e   :  { %5598 = vmatprep.mubr.bf16.mxu1 %v11555_v59  ;;  %v14628_v59 = vld [vmem:[#allocation63_spill] sm:$0xff] }
 0x715   :  { %5599 = vmatmul.mubr.bf16.gmra.mrb[140].mxu1 %v14618_v28 }
 0x716   :  { %5606 = vmatprep.mubr.bf16.mxu1 %v11588_v54 }
 0x71d   :  { %5607 = vmatmul.mubr.bf16.gmra.mrb[144].mxu1 %v14619_v47 }
 0x71e   :  { %5614 = vmatprep.mubr.bf16.mxu1 %v11594_v7  ;;  %v14624_v7 = vld [vmem:[#allocation16_spill] sm:$0xff] }
 0x725   :  { %5615 = vmatmul.mubr.bf16.gmra.mrb[148].mxu1 %v14620_v55 }
 0x726   :  { %5622 = vmatprep.mubr.bf16.mxu1 %v11629_v53  ;;  %v14625_v53 = vld [vmem:[#allocation20_spill] sm:$0xff] }
 0x72d   :  { %5623 = vmatmul.mubr.bf16.gmra.mrb[152].mxu1 %v14621_v48 }
 0x72e   :  { %5630 = vmatprep.mubr.bf16.mxu1 %v11634_v18  ;;  %v14626_v18 = vld [vmem:[#allocation2_spill] sm:$0xff] }
 0x735   :  { %5631 = vmatmul.mubr.bf16.gmra.mrb[156].mxu1 %v14622_v14 }
 0x736   :  { %5638 = vmatprep.mubr.bf16.mxu1 %v11672_v13  ;;  %v14627_v13 = vld [vmem:[#allocation14_spill] sm:$0xff] }
 0x737   :  { %v3807_v54 = vshrl.u32 %v14627_v13, 16 }
 0x73d   :  { %5639 = vmatmul.mubr.bf16.gmra.mrb[160].mxu1 %v14623_v22 }
 0x73e   :  { %5646 = vmatprep.mubr.bf16.mxu1 %v11677_v16  ;;  %v12183_v16 = vrot.slane %v3807_v54, 7  ;;  %v4478_v54 = vrot.slane %v11930_v44, 1 }
 0x745   :  { %5647 = vmatmul.mubr.bf16.gmra.mrb[164].mxu1 %v11702_v25 }
 0x746   :  { %5654 = vmatprep.mubr.bf16.mxu1 %v11712_v6  ;;  %v3810_v6 = vshll.u32 %v14627_v13, 16  ;;  %v4479_v13 = vrot.slane %v11941_v29, 1  ;;  %v8421_v29 = vld [vmem:[%s13972_s2 + $0x1a0] sm:$0xff]  }
 0x748   :  { %v3812_v56 = vor.u32 %v3810_v6, %v12183_v16  ;;  %v8417_v6 = vld [vmem:[%s13972_s2 + $0x180] sm:$0xff]  }
 0x74a   :  { %v12196_v46 = vsel %vm8571_vm2, 0, %v3812_v56  ;;  %v8418_v56 = vld [vmem:[%s13972_s2 + $0x188] sm:$0xff]  }
 0x74d   :  { %5655 = vmatmul.mubr.bf16.gmra.mrb[168].mxu1 %v14624_v7 }
 0x74e   :  { %5662 = vmatprep.mubr.bf16.mxu1 %v11717_v57  ;;  %v4475_v57 = vrot.slane %v11905_v27, 1 }
 0x755   :  { %5663 = vmatmul.mubr.bf16.gmra.mrb[172].mxu1 %v14625_v53 }
 0x756   :  { %5670 = vmatprep.mubr.bf16.mxu1 %v11752_v41  ;;  %v4476_v41 = vrot.slane %v11917_v52, 1  ;;  %v14630_v52 = vld [vmem:[#allocation56_spill] sm:$0xff] }
 0x758   :  { %v12191_v9 = vsel %vm955_vm4, %v4475_v57, %v4476_v41  ;;  %v14629_v57 = vld [vmem:[#allocation53_spill] sm:$0xff]  ;;  %v8419_v41 = vld [vmem:[%s13972_s2 + $0x190] sm:$0xff]  }
 0x75d   :  { %5671 = vmatmul.mubr.bf16.gmra.mrb[176].mxu1 %v14626_v18 }
 0x75e   :  { %5678 = vmatprep.mubr.bf16.mxu1 %v11905_v27  ;;  %v12202_v27 = vsel %vm955_vm4, %v4478_v54, %v4479_v13  ;;  %v8423_v54 = vld [vmem:[%s13972_s2 + $0x1b0] sm:$0xff]   ;;  %v14632_v13 = vld [vmem:[#allocation39_spill] sm:$0xff] }
 0x765   :  { %5679 = vmatmul.mubr.bf16.gmra.mrb[180].mxu1 %v14628_v59 }
 0x766   :  { %5686 = vmatprep.mubr.bf16.mxu1 %v11930_v44 }
 0x76d   :  { %5687 = vmatmul.mubr.bf16.gmra.mrb[184].mxu1 %v12191_v9 }
 0x76e   :  { %5694 = vmatprep.mubr.bf16.mxu1 %v12196_v46 }
 0x775   :  { %5695 = vmatmul.mubr.bf16.gmra.mrb[188].mxu1 %v12202_v27 }
 0x776   :  { %5735 = vmatprep.mubr.bf16.mxu1 %v12003_v24  ;;  %v14631_v24 = vld [vmem:[#allocation60_spill] sm:$0xff] }
 0x77d   :  { %5736 = vmatmul.mubr.bf16.vlgmr.msra.gmra.mrb[64].mxu1 %v14629_v57  ;;  %v14633_v57 = vld [vmem:[#allocation54_spill] sm:$0xff] }
 0x77e   :  { %5743 = vmatprep.mubr.bf16.mxu1 %v11247_v50  ;;  %5993 = vmatpush1.bf16.msra.mxu1 %v8417_v6  ;;  %v8420_v50 = vld [vmem:[%s13972_s2 + $0x198] sm:$0xff]   ;;  %v8425_v6 = vld [vmem:[%s13972_s2 + $0x1c0] sm:$0xff]  }
 0x77f   :  { %5994 = vmatprep.subr.bf16.mxu1 %v14480_v11 }
 0x782   :  { %5995 = vmatpush1.bf16.msra.mxu1 %v8418_v56  ;;  %v8427_v56 = vld [vmem:[%s13972_s2 + $0x1d0] sm:$0xff]  }
 0x783   :  { %5996 = vmatprep.subr.bf16.mxu1 %v14480_v11 }
 0x785   :  { %5744 = vmatmul.mubr.bf16.gmra.mrb[68].mxu1 %v14630_v52 }
 0x786   :  { %5751 = vmatprep.mubr.bf16.mxu1 %v11229_v42  ;;  %5997 = vmatpush1.bf16.msra.mxu1 %v8419_v41  ;;  %v8422_v42 = vld [vmem:[%s13972_s2 + $0x1a8] sm:$0xff]   ;;  %v14634_v41 = vld [vmem:[#allocation8_spill] sm:$0xff] }
 0x787   :  { %5998 = vmatprep.subr.bf16.mxu1 %v14480_v11 }
 0x78a   :  { %5999 = vmatpush1.bf16.msra.mxu1 %v8420_v50  ;;  %v8428_v50 = vld [vmem:[%s13972_s2 + $0x1d8] sm:$0xff]  }
 0x78b   :  { %6000 = vmatprep.subr.bf16.mxu1 %v14480_v11 }
 0x78d   :  { %5752 = vmatmul.mubr.bf16.gmra.mrb[72].mxu1 %v14631_v24 }
 0x78e   :  { %5759 = vmatprep.mubr.bf16.mxu1 %v11257_v45  ;;  %6001 = vmatpush1.bf16.msra.mxu1 %v8421_v29  ;;  %v8424_v45 = vld [vmem:[%s13972_s2 + $0x1b8] sm:$0xff]  }
 0x78f   :  { %6002 = vmatprep.subr.bf16.mxu1 %v14480_v11  ;;  %v14636_v29 = vld [vmem:[#allocation49_spill] sm:$0xff] }
 0x792   :  { %6003 = vmatpush1.bf16.msra.mxu1 %v8422_v42  ;;  %v14637_v42 = vld [vmem:[#allocation11_spill] sm:$0xff] }
 0x793   :  { %6004 = vmatprep.subr.bf16.mxu1 %v14480_v11 }
 0x795   :  { %5760 = vmatmul.mubr.bf16.gmra.mrb[76].mxu1 %v14632_v13 }
 0x796   :  { %5767 = vmatprep.mubr.bf16.mxu1 %v11297_v34  ;;  %6005 = vmatpush1.bf16.msra.mxu1 %v8423_v54  ;;  %v8426_v34 = vld [vmem:[%s13972_s2 + $0x1c8] sm:$0xff]   ;;  %v14639_v54 = vld [vmem:[#allocation30_spill] sm:$0xff] }
 0x797   :  { %6006 = vmatprep.subr.bf16.mxu1 %v14480_v11 }
 0x79a   :  { %6007 = vmatpush1.bf16.msra.mxu1 %v8424_v45  ;;  %v14641_v45 = vld [vmem:[#allocation15_spill] sm:$0xff] }
 0x79b   :  { %6008 = vmatprep.subr.bf16.mxu1 %v14480_v11 }
 0x79d   :  { %5768 = vmatmul.mubr.bf16.gmra.mrb[80].mxu1 %v14633_v57 }
 0x79e   :  { %5775 = vmatprep.mubr.bf16.mxu1 %v11303_v60  ;;  %6009 = vmatpush1.bf16.msra.mxu1 %v8425_v6  ;;  %v14635_v60 = vld [vmem:[#allocation34_spill] sm:$0xff]  ;;  %v4514_v6 = vshll.u32 %v14615_v23, 16 }
 0x79f   :  { %6010 = vmatprep.subr.bf16.mxu1 %v14480_v11 }
 0x7a2   :  { %6011 = vmatpush1.bf16.msra.mxu1 %v8426_v34  ;;  %v4516_v34 = vrot.slane %v4514_v6, 1 }
 0x7a3   :  { %6012 = vmatprep.subr.bf16.mxu1 %v14480_v11 }
 0x7a5   :  { %5776 = vmatmul.mubr.bf16.gmra.mrb[84].mxu1 %v14634_v41 }
 0x7a6   :  { %5783 = vmatprep.mubr.bf16.mxu1 %v14599_v8  ;;  %6013 = vmatpush1.bf16.msra.mxu1 %v8427_v56  ;;  %v8429_v8 = vld [vmem:[%s13972_s2 + $0x1e0] sm:$0xff]   ;;  %v14643_v56 = vld [vmem:[#allocation64_spill] sm:$0xff] }
 0x7a7   :  { %6014 = vmatprep.subr.bf16.mxu1 %v14480_v11 }
 0x7aa   :  { %6015 = vmatpush1.bf16.msra.mxu1 %v8428_v50  ;;  %v14645_v50 = vld [vmem:[#allocation31_spill] sm:$0xff] }
 0x7ab   :  { %6016 = vmatprep.subr.bf16.mxu1 %v14480_v11 }
 0x7ad   :  { %5784 = vmatmul.mubr.bf16.gmra.mrb[88].mxu1 %v14635_v60 }
 0x7ae   :  { %5791 = vmatprep.mubr.bf16.mxu1 %v14605_v12  ;;  %6017 = vmatpush1.bf16.msra.mxu1 %v8429_v8  ;;  %v14638_v12 = vld [vmem:[#allocation21_spill] sm:$0xff]  ;;  %v4519_v8 = vshll.u32 %v14645_v50, 16  ;;  %v14671_v50 = vld [vmem:[#allocation66_spill] sm:$0xff] }
 0x7af   :  { %6018 = vmatprep.subr.bf16.mxu1 %v14480_v11 }
 0x7b5   :  { %5792 = vmatmul.mubr.bf16.gmra.mrb[92].mxu1 %v14636_v29 }
 0x7b6   :  { %5799 = vmatprep.mubr.bf16.mxu1 %v14609_v0  ;;  %v8430_v0 = vld [vmem:[%s13972_s2 + $0x1e8] sm:$0xff]  }
 0x7b7   :  { %6019 = vmatpush1.bf16.msra.mxu1 %v8430_v0  ;;  %v8432_v0 = vld [vmem:[%s13972_s2 + $0x1f8] sm:$0xff]  }
 0x7b8   :  { %6020 = vmatprep.subr.bf16.mxu1 %v14480_v11 }
 0x7bd   :  { %5800 = vmatmul.mubr.bf16.gmra.mrb[96].mxu1 %v14637_v42 }
 0x7be   :  { %5807 = vmatprep.mubr.bf16.mxu1 %v14610_v3  ;;  %v14640_v3 = vld [vmem:[#allocation44_spill] sm:$0xff] }
 0x7c5   :  { %5808 = vmatmul.mubr.bf16.gmra.mrb[100].mxu1 %v14638_v12 }
 0x7c6   :  { %5815 = vmatprep.mubr.bf16.mxu1 %v14611_v26  ;;  %v8431_v26 = vld [vmem:[%s13972_s2 + $0x1f0] sm:$0xff]  }
 0x7c7   :  { %6021 = vmatpush1.bf16.msra.mxu1 %v8431_v26  ;;  %v4521_v26 = vrot.slane %v4519_v8, 1 }
 0x7c8   :  { %6022 = vmatprep.subr.bf16.mxu1 %v14480_v11 }
 0x7cb   :  { %6023 = vmatpush1.bf16.msra.mxu1 %v8432_v0 }
 0x7cd   :  { %5816 = vmatmul.mubr.bf16.gmra.mrb[104].mxu1 %v14639_v54 }
 0x7ce   :  { %5823 = vmatprep.mubr.bf16.mxu1 %v14612_v30  ;;  %v14642_v30 = vld [vmem:[#allocation50_spill] sm:$0xff] }
 0x7d5   :  { %5824 = vmatmul.mubr.bf16.gmra.mrb[108].mxu1 %v14640_v3 }
 0x7d6   :  { %5831 = vmatprep.mubr.bf16.mxu1 %v14613_v19  ;;  %v14644_v19 = vld [vmem:[#allocation40_spill] sm:$0xff] }
 0x7dd   :  { %5832 = vmatmul.mubr.bf16.gmra.mrb[112].mxu1 %v14641_v45 }
 0x7de   :  { %5839 = vmatprep.mubr.bf16.mxu1 %v14614_v62  ;;  %v4512_v62 = vshrl.u32 %v14615_v23, 16 }
 0x7e0   :  { %v4517_v11 = vor.u32 %v4516_v34, %v4512_v62  ;;  %v14669_v34 = vld [vmem:[#allocation70_spill] sm:$0xff]  ;;  %v14670_v62 = vld [vmem:[#allocation47_spill] sm:$0xff] }
 0x7e2   :  { %v12306_v6 = vsel %vm489_vm3, %v4517_v11, %v4521_v26  ;;  %v14672_v11 = vld [vmem:[#allocation69_spill] sm:$0xff] }
 0x7e5   :  { %5840 = vmatmul.mubr.bf16.gmra.mrb[116].mxu1 %v14642_v30 }
 0x7e6   :  { %5847 = vmatprep.mubr.bf16.mxu1 %v14616_v4  ;;  %v8437_v4 = vld [vmem:[%s13972_s2 + $0x200] sm:$0xff]  }
 0x7e7   :  { %7504 = vmatprep.subr.bf16.mxu1 %v8437_v4 }
 0x7ed   :  { %5848 = vmatmul.mubr.bf16.gmra.mrb[120].mxu1 %v14643_v56 }
 0x7ee   :  { %5855 = vmatprep.mubr.bf16.mxu1 %v14644_v19 }
 0x7f5   :  { %5856 = vmatmul.mubr.bf16.gmra.mrb[124].mxu1 %v12306_v6 }
 0x7f6   :  { %5863 = vmatprep.mubr.bf16.mxu1 %v12155_v40  ;;  %v14646_v40 = vld [vmem:[#allocation65_spill] sm:$0xff] }
 0x7fd   :  { %5864 = vmatmul.mubr.bf16.gmra.mrb[128].mxu1 %v11801_v58 }
 0x7fe   :  { %5871 = vmatprep.mubr.bf16.mxu1 %v14617_v63 }
 0x805   :  { %5872 = vmatmul.mubr.bf16.gmra.mrb[132].mxu1 %v11809_v38 }
 0x806   :  { %5879 = vmatprep.mubr.bf16.mxu1 %v14618_v28  ;;  %v4524_v28 = vshrl.u32 %v12196_v46, 16 }
 0x80d   :  { %5880 = vmatmul.mubr.bf16.gmra.mrb[136].mxu1 %v11817_v51 }
 0x80e   :  { %5887 = vmatprep.mubr.bf16.mxu1 %v14619_v47  ;;  %v14647_v47 = vld [vmem:[#allocation68_spill] sm:$0xff] }
 0x815   :  { %5888 = vmatmul.mubr.bf16.gmra.mrb[140].mxu1 %v11825_v1 }
 0x816   :  { %5895 = vmatprep.mubr.bf16.mxu1 %v14620_v55 }
 0x81d   :  { %5896 = vmatmul.mubr.bf16.gmra.mrb[144].mxu1 %v11833_v31 }
 0x81e   :  { %5903 = vmatprep.mubr.bf16.mxu1 %v14621_v48 }
 0x825   :  { %5904 = vmatmul.mubr.bf16.gmra.mrb[148].mxu1 %v11841_v32 }
 0x826   :  { %5911 = vmatprep.mubr.bf16.mxu1 %v14622_v14  ;;  %v8439_v14 = vld [vmem:[%s13972_s2 + $0x210] sm:$0xff]  }
 0x82d   :  { %5912 = vmatmul.mubr.bf16.gmra.mrb[152].mxu1 %v11849_v61 }
 0x82e   :  { %5919 = vmatprep.mubr.bf16.mxu1 %v14623_v22  ;;  %v8441_v22 = vld [vmem:[%s13972_s2 + $0x220] sm:$0xff]  }
 0x835   :  { %5920 = vmatmul.mubr.bf16.gmra.mrb[156].mxu1 %v11857_v5 }
 0x836   :  { %5927 = vmatprep.mubr.bf16.mxu1 %v11702_v25 }
 0x83d   :  { %5928 = vmatmul.mubr.bf16.gmra.mrb[160].mxu1 %v11865_v20 }
 0x83e   :  { %5935 = vmatprep.mubr.bf16.mxu1 %v14624_v7  ;;  %v3940_v7 = vsel %vm8571_vm2, %v12183_v16, 0  ;;  %v8438_v16 = vld [vmem:[%s13972_s2 + $0x208] sm:$0xff]  }
 0x83f   :  { %v4545_v25 = vrot.slane %v3940_v7, 1  ;;  %v4531_v63 = vshll.u32 %v3940_v7, 16 }
 0x841   :  { %v4533_v48 = vrot.slane %v4531_v63, 1  ;;  %v14676_v63 = vld [vmem:[#allocation72_spill] sm:$0xff] }
 0x845   :  { %5936 = vmatmul.mubr.bf16.gmra.mrb[164].mxu1 %v14646_v40 }
 0x846   :  { %5943 = vmatprep.mubr.bf16.mxu1 %v14625_v53  ;;  %v4526_v53 = vshll.u32 %v12196_v46, 16 }
 0x848   :  { %v4528_v58 = vrot.slane %v4526_v53, 1 }
 0x84a   :  { %v4529_v55 = vor.u32 %v4528_v58, %v4524_v28 }
 0x84c   :  { %v12350_v36 = vsel %vm489_vm3, %v4529_v55, %v4533_v48 }
 0x84d   :  { %5944 = vmatmul.mubr.bf16.gmra.mrb[168].mxu1 %v11882_v37 }
 0x84e   :  { %5951 = vmatprep.mubr.bf16.mxu1 %v14626_v18  ;;  %v4544_v18 = vrot.slane %v12196_v46, 1 }
 0x855   :  { %5952 = vmatmul.mubr.bf16.gmra.mrb[172].mxu1 %v14647_v47 }
 0x856   :  { %5959 = vmatprep.mubr.bf16.mxu1 %v14628_v59  ;;  %v12345_v59 = vsel %vm955_vm4, %v4544_v18, %v4545_v25  ;;  %v14675_v18 = vld [vmem:[#allocation75_spill] sm:$0xff] }
 0x85d   :  { %5960 = vmatmul.mubr.bf16.gmra.mrb[176].mxu1 %v11921_v17 }
 0x85e   :  { %5967 = vmatprep.mubr.bf16.mxu1 %v12191_v9 }
 0x865   :  { %5968 = vmatmul.mubr.bf16.gmra.mrb[180].mxu1 %v11945_v21 }
 0x866   :  { %5975 = vmatprep.mubr.bf16.mxu1 %v12202_v27 }
 0x86d   :  { %5976 = vmatmul.mubr.bf16.gmra.mrb[184].mxu1 %v11960_v35 }
 0x86e   :  { %5983 = vmatprep.mubr.bf16.mxu1 %v12345_v59 }
 0x875   :  { %5984 = vmatmul.mubr.bf16.gmra.mrb[188].mxu1 %v12350_v36 }
 0x876   :  { %6024 = vmatprep.mubr.bf16.mxu1 %v14630_v52  ;;  %v8443_v52 = vld [vmem:[%s13972_s2 + $0x230] sm:$0xff]  }
 0x87d   :  { %6025 = vmatmul.mubr.bf16.vlgmr.msra.gmra.mrb[64].mxu1 %v11226_v2  ;;  %v8440_v2 = vld [vmem:[%s13972_s2 + $0x218] sm:$0xff]  }
 0x87e   :  { %6032 = vmatprep.mubr.bf16.mxu1 %v14631_v24  ;;  %7512 = vmatpush3.bf16.msra.mxu1 %v8437_v4  ;;  %v14649_v24 = vld [vmem:[#allocation36_spill] sm:$0xff] }
 0x87f   :  { %7505 = vmatprep.subr.bf16.mxu1 %v8438_v16 }
 0x882   :  { %7513 = vmatpush3.bf16.msra.mxu1 %v8438_v16  ;;  %v14677_v16 = vld [vmem:[#allocation74_spill] sm:$0xff] }
 0x883   :  { %7506 = vmatprep.subr.bf16.mxu1 %v8439_v14 }
 0x885   :  { %6033 = vmatmul.mubr.bf16.gmra.mrb[68].mxu1 %v11203_v10  ;;  %v8442_v10 = vld [vmem:[%s13972_s2 + $0x228] sm:$0xff]  }
 0x886   :  { %6040 = vmatprep.mubr.bf16.mxu1 %v14632_v13  ;;  %7514 = vmatpush3.bf16.msra.mxu1 %v8439_v14  ;;  %v14650_v13 = vld [vmem:[#allocation48_spill] sm:$0xff] }
 0x887   :  { %7507 = vmatprep.subr.bf16.mxu1 %v8440_v2 }
 0x88a   :  { %7515 = vmatpush3.bf16.msra.mxu1 %v8440_v2 }
 0x88b   :  { %7508 = vmatprep.subr.bf16.mxu1 %v8441_v22 }
 0x88d   :  { %6041 = vmatmul.mubr.bf16.gmra.mrb[72].mxu1 %v11233_v39  ;;  %v8444_v39 = vld [vmem:[%s13972_s2 + $0x238] sm:$0xff]  }
 0x88e   :  { %6048 = vmatprep.mubr.bf16.mxu1 %v14633_v57  ;;  %7516 = vmatpush3.bf16.msra.mxu1 %v8441_v22  ;;  %v14654_v57 = vld [vmem:[#allocation27_spill] sm:$0xff] }
 0x88f   :  { %7509 = vmatprep.subr.bf16.mxu1 %v8442_v10 }
 0x892   :  { %7517 = vmatpush3.bf16.msra.mxu1 %v8442_v10  ;;  %v14678_v10 = vld [vmem:[#allocation77_spill] sm:$0xff] }
 0x893   :  { %7510 = vmatprep.subr.bf16.mxu1 %v8443_v52 }
 0x895   :  { %6049 = vmatmul.mubr.bf16.gmra.mrb[76].mxu1 %v11261_v43  ;;  %v14648_v43 = vld [vmem:[#allocation33_spill] sm:$0xff] }
 0x896   :  { %6056 = vmatprep.mubr.bf16.mxu1 %v14634_v41  ;;  %7518 = vmatpush3.bf16.msra.mxu1 %v8443_v52  ;;  %v14655_v41 = vld [vmem:[#allocation4_spill] sm:$0xff] }
 0x897   :  { %7511 = vmatprep.subr.bf16.mxu1 %v8444_v39 }
 0x89a   :  { %7519 = vmatpush3.bf16.msra.mxu1 %v8444_v39  ;;  %v14679_v39 = vld [vmem:[#allocation79_spill] sm:$0xff] }
 0x89d   :  { %6057 = vmatmul.mubr.bf16.gmra.mrb[80].mxu1 %v11277_v33  ;;  %v14651_v33 = vld [vmem:[#allocation51_spill] sm:$0xff] }
 0x89e   :  { %6064 = vmatprep.mubr.bf16.mxu1 %v14635_v60  ;;  %v14656_v60 = vld [vmem:[#allocation3_spill] sm:$0xff] }
 0x8a5   :  { %6065 = vmatmul.mubr.bf16.gmra.mrb[84].mxu1 %v11307_v49  ;;  %v14652_v49 = vld [vmem:[#allocation6_spill] sm:$0xff] }
 0x8a6   :  { %6072 = vmatprep.mubr.bf16.mxu1 %v14636_v29  ;;  %v14657_v29 = vld [vmem:[#allocation46_spill] sm:$0xff] }
 0x8ad   :  { %6073 = vmatmul.mubr.bf16.gmra.mrb[88].mxu1 %v14595_v15  ;;  %v14653_v15 = vld [vmem:[#allocation7_spill] sm:$0xff] }
 0x8ae   :  { %6080 = vmatprep.mubr.bf16.mxu1 %v14637_v42  ;;  %v14658_v42 = vld [vmem:[#allocation55_spill] sm:$0xff] }
 0x8b5   :  { %6081 = vmatmul.mubr.bf16.gmra.mrb[92].mxu1 %v14648_v43 }
 0x8b6   :  { %6088 = vmatprep.mubr.bf16.mxu1 %v14638_v12  ;;  %v14659_v12 = vld [vmem:[#allocation59_spill] sm:$0xff] }
 0x8bd   :  { %6089 = vmatmul.mubr.bf16.gmra.mrb[96].mxu1 %v14649_v24 }
 0x8be   :  { %6096 = vmatprep.mubr.bf16.mxu1 %v14639_v54  ;;  %v14660_v54 = vld [vmem:[#allocation19_spill] sm:$0xff] }
 0x8c5   :  { %6097 = vmatmul.mubr.bf16.gmra.mrb[100].mxu1 %v14650_v13 }
 0x8c6   :  { %6104 = vmatprep.mubr.bf16.mxu1 %v14640_v3  ;;  %v14668_v3 = vld [vmem:[#allocation67_spill] sm:$0xff] }
 0x8cd   :  { %6105 = vmatmul.mubr.bf16.gmra.mrb[104].mxu1 %v14651_v33  ;;  %v14680_v33 = vld [vmem:[#allocation76_spill] sm:$0xff] }
 0x8ce   :  { %6112 = vmatprep.mubr.bf16.mxu1 %v14641_v45 }
 0x8d5   :  { %6113 = vmatmul.mubr.bf16.gmra.mrb[108].mxu1 %v14652_v49 }
 0x8d6   :  { %6120 = vmatprep.mubr.bf16.mxu1 %v14642_v30 }
 0x8dd   :  { %6121 = vmatmul.mubr.bf16.gmra.mrb[112].mxu1 %v14653_v15 }
 0x8de   :  { %6128 = vmatprep.mubr.bf16.mxu1 %v14643_v56 }
 0x8e5   :  { %6129 = vmatmul.mubr.bf16.gmra.mrb[116].mxu1 %v14654_v57  ;;  %v14681_v57 = vld [vmem:[#allocation78_spill] sm:$0xff] }
 0x8e6   :  { %6136 = vmatprep.mubr.bf16.mxu1 %v12306_v6  ;;  %v14673_v6 = vld [vmem:[#allocation71_spill] sm:$0xff] }
 0x8ed   :  { %6137 = vmatmul.mubr.bf16.gmra.mrb[120].mxu1 %v14615_v23  ;;  %v14661_v23 = vld [vmem:[#allocation24_spill] sm:$0xff] }
 0x8ee   :  { %6144 = vmatprep.mubr.bf16.mxu1 %v14655_v41 }
 0x8f5   :  { %6145 = vmatmul.mubr.bf16.gmra.mrb[124].mxu1 %v14656_v60 }
 0x8f6   :  { %6152 = vmatprep.mubr.bf16.mxu1 %v11809_v38  ;;  %v14662_v38 = vld [vmem:[#allocation25_spill] sm:$0xff] }
 0x8fd   :  { %6153 = vmatmul.mubr.bf16.gmra.mrb[128].mxu1 %v14657_v29 }
 0x8fe   :  { %6160 = vmatprep.mubr.bf16.mxu1 %v11817_v51  ;;  %v14663_v51 = vld [vmem:[#allocation28_spill] sm:$0xff] }
 0x905   :  { %6161 = vmatmul.mubr.bf16.gmra.mrb[132].mxu1 %v14658_v42 }
 0x906   :  { %6168 = vmatprep.mubr.bf16.mxu1 %v11825_v1  ;;  %v14664_v1 = vld [vmem:[#allocation38_spill] sm:$0xff] }
 0x90d   :  { %6169 = vmatmul.mubr.bf16.gmra.mrb[136].mxu1 %v14659_v12  ;;  %v14682_v12 = vld [vmem:[#allocation81_spill] sm:$0xff] }
 0x90e   :  { %6176 = vmatprep.mubr.bf16.mxu1 %v11833_v31  ;;  %v14665_v31 = vld [vmem:[#allocation41_spill] sm:$0xff] }
 0x915   :  { %6177 = vmatmul.mubr.bf16.gmra.mrb[140].mxu1 %v14660_v54 }
 0x916   :  { %6184 = vmatprep.mubr.bf16.mxu1 %v11841_v32  ;;  %v14666_v32 = vld [vmem:[#allocation13_spill] sm:$0xff] }
 0x91d   :  { %6185 = vmatmul.mubr.bf16.gmra.mrb[144].mxu1 %v14661_v23  ;;  %v14683_v23 = vld [vmem:[#allocation83_spill] sm:$0xff] }
 0x91e   :  { %6192 = vmatprep.mubr.bf16.mxu1 %v11849_v61  ;;  %v14667_v61 = vld [vmem:[#allocation18_spill] sm:$0xff] }
 0x925   :  { %6193 = vmatmul.mubr.bf16.gmra.mrb[148].mxu1 %v14662_v38 }
 0x926   :  { %6200 = vmatprep.mubr.bf16.mxu1 %v11857_v5 }
 0x92d   :  { %6201 = vmatmul.mubr.bf16.gmra.mrb[152].mxu1 %v14663_v51 }
 0x92e   :  { %6208 = vmatprep.mubr.bf16.mxu1 %v11865_v20 }
 0x935   :  { %6209 = vmatmul.mubr.bf16.gmra.mrb[156].mxu1 %v14664_v1  ;;  %v14684_v1 = vld [vmem:[#allocation62_spill] sm:$0xff] }
 0x936   :  { %6216 = vmatprep.mubr.bf16.mxu1 %v14646_v40 }
 0x93d   :  { %6217 = vmatmul.mubr.bf16.gmra.mrb[160].mxu1 %v14665_v31 }
 0x93e   :  { %6224 = vmatprep.mubr.bf16.mxu1 %v11882_v37 }
 0x945   :  { %6225 = vmatmul.mubr.bf16.gmra.mrb[164].mxu1 %v14666_v32  ;;  %v14685_v32 = vld [vmem:[#allocation80_spill] sm:$0xff] }
 0x946   :  { %6232 = vmatprep.mubr.bf16.mxu1 %v14647_v47  ;;  %v14674_v47 = vld [vmem:[#allocation73_spill] sm:$0xff] }
 0x94d   :  { %6233 = vmatmul.mubr.bf16.gmra.mrb[168].mxu1 %v14667_v61 }
 0x94e   :  { %6240 = vmatprep.mubr.bf16.mxu1 %v11921_v17 }
 0x950   :  { %v6026_v5 = vpop.f32.mrb[64].mxu1 }
 0x951   :  { %v12430_v45 = vadd.f32 %v14668_v3, %v6026_v5  ;;  %v6028_v20 = vpop.f32.mrb[65].mxu1  ;;  %v14686_v3 = vld [vmem:[#allocation82_spill] sm:$0xff] }
 0x952   :  { %v6029_v30 = vpop.f32.mrb[66].mxu1 }
 0x953   :  { %v12433_v56 = vadd.f32 %v14669_v34, %v6029_v30  ;;  %v6031_v19 = vpop.f32.mrb[67].mxu1  ;;  %v14687_v34 = vld [vmem:[#allocation85_spill] sm:$0xff] }
 0x955   :  { %6241 = vmatmul.mubr.bf16.gmra.mrb[172].mxu1 %v14670_v62 }
 0x956   :  { %6248 = vmatprep.mubr.bf16.mxu1 %v11945_v21 }
 0x958   :  { %v6034_v37 = vpop.f32.mrb[68].mxu1 }
 0x959   :  { %v12438_v8 = vadd.f32 %v14671_v50, %v6034_v37  ;;  %v6036_v0 = vpop.f32.mrb[69].mxu1  ;;  %v14688_v50 = vld [vmem:[#allocation87_spill] sm:$0xff] }
 0x95a   :  { %v6037_v17 = vpop.f32.mrb[70].mxu1 }
 0x95b   :  { %v12441_v4 = vadd.f32 %v14672_v11, %v6037_v17  ;;  %v6039_v26 = vpop.f32.mrb[71].mxu1 }
 0x95c   :  { %v14689_v26 = vld [vmem:[#allocation84_spill] sm:$0xff] }
 0x95d   :  { %6249 = vmatmul.mubr.bf16.gmra.mrb[176].mxu1 %v14673_v6 }
 0x95e   :  { %6256 = vmatprep.mubr.bf16.mxu1 %v11960_v35 }
 0x960   :  { %v6042_v40 = vpop.f32.mrb[72].mxu1 }
 0x961   :  { %v12446_v7 = vadd.f32 %v14674_v47, %v6042_v40  ;;  %v6044_v53 = vpop.f32.mrb[73].mxu1 }
 0x962   :  { %v6045_v21 = vpop.f32.mrb[74].mxu1  ;;  %v14690_v53 = vld [vmem:[#allocation86_spill] sm:$0xff] }
 0x963   :  { %v12449_v25 = vadd.f32 %v14675_v18, %v6045_v21  ;;  %v6047_v58 = vpop.f32.mrb[75].mxu1 }
 0x965   :  { %6257 = vmatmul.mubr.bf16.gmra.mrb[180].mxu1 %v11930_v44 }
 0x966   :  { %6264 = vmatprep.mubr.bf16.mxu1 %v12350_v36 }
 0x968   :  { %v6050_v28 = vpop.f32.mrb[76].mxu1 }
 0x969   :  { %v12454_v55 = vadd.f32 %v14676_v63, %v6050_v28  ;;  %v6052_v48 = vpop.f32.mrb[77].mxu1  ;;  %v14691_v28 = vld [vmem:[#allocation89_spill] sm:$0xff] }
 0x96a   :  { %v6053_v35 = vpop.f32.mrb[78].mxu1 }
 0x96b   :  { %v12457_v14 = vadd.f32 %v14677_v16, %v6053_v35  ;;  %v6055_v2 = vpop.f32.mrb[79].mxu1  ;;  %v14692_v16 = vld [vmem:[#allocation91_spill] sm:$0xff] }
 0x96d   :  { %6265 = vmatmul.mubr.bf16.gmra.mrb[184].mxu1 %v12196_v46 }
 0x96e   :  { %6272 = vmatprep.mubr.bf16.mxu1 %v14655_v41 }
 0x970   :  { %v6058_v22 = vpop.f32.mrb[80].mxu1 }
 0x971   :  { %v12462_v52 = vadd.f32 %v14678_v10, %v6058_v22  ;;  %v6060_v44 = vpop.f32.mrb[81].mxu1 }
 0x972   :  { %v6061_v36 = vpop.f32.mrb[82].mxu1  ;;  %v14693_v44 = vld [vmem:[#allocation88_spill] sm:$0xff] }
 0x973   :  { %v12465_v43 = vadd.f32 %v14679_v39, %v6061_v36  ;;  %v6063_v24 = vpop.f32.mrb[83].mxu1 }
 0x975   :  { %6273 = vmatmul.mubr.bf16.gmra.mrb[188].mxu1 %v14656_v60 }
 0x976   :  { %7496 = vmatprep.mubr.bf16.mxu1 %v12191_v9 }
 0x978   :  { %v6066_v13 = vpop.f32.mrb[84].mxu1 }
 0x979   :  { %v12470_v49 = vadd.f32 %v14680_v33, %v6066_v13  ;;  %v6068_v46 = vpop.f32.mrb[85].mxu1  ;;  %v14694_v13 = vld [vmem:[#allocation90_spill] sm:$0xff] }
 0x97a   :  { %v6069_v15 = vpop.f32.mrb[86].mxu1 }
 0x97b   :  { %v12473_v41 = vadd.f32 %v14681_v57, %v6069_v15  ;;  %v6071_v29 = vpop.f32.mrb[87].mxu1  ;;  %v6573_v15 = vmul.f32 %v12433_v56, %v12433_v56  ;;  %v6572_v57 = vmul.f32 %v12430_v45, %v12430_v45 }
 0x97c   :  { %v6636_v29 = vadd.f32 %v12433_v56, %v12430_v45 }
 0x97d   :  { %7497 = vmatmul.mubr.bf16.vlgmr.msra.gmra.mrb[192].mxu1 %v12202_v27 }
 0x97e   :  { %7500 = vmatprep.mubr.bf16.mxu1 %v12345_v59 }
 0x980   :  { %v6074_v42 = vpop.f32.mrb[88].mxu1 }
 0x981   :  { %v12478_v54 = vadd.f32 %v14682_v12, %v6074_v42  ;;  %v6076_v60 = vpop.f32.mrb[89].mxu1  ;;  %v6574_v42 = vmul.f32 %v12438_v8, %v12438_v8 }
 0x982   :  { %v6077_v9 = vpop.f32.mrb[90].mxu1  ;;  %v14695_v60 = vld [vmem:[#allocation93_spill] sm:$0xff] }
 0x983   :  { %v12481_v38 = vadd.f32 %v14683_v23, %v6077_v9  ;;  %v6079_v51 = vpop.f32.mrb[91].mxu1 }
 0x984   :  { %v6705_v51 = vadd.f32 %v6573_v15, %v6572_v57  ;;  %v6580_v57 = vmul.f32 %v12462_v52, %v12462_v52 }
 0x985   :  { %7501 = vmatmul.mubr.bf16.gmra.mrb[196].mxu1 %v14684_v1  ;;  %v6637_v1 = vadd.f32 %v6636_v29, %v12438_v8 }
 0x988   :  { %v6082_v31 = vpop.f32.mrb[92].mxu1 }
 0x989   :  { %v12485_v61 = vadd.f32 %v14685_v32, %v6082_v31  ;;  %v6084_v5 = vpop.f32.mrb[93].mxu1  ;;  %v14696_v32 = vld [vmem:[#allocation95_spill] sm:$0xff] }
 0x98a   :  { %v6085_v27 = vpop.f32.mrb[94].mxu1 }
 0x98b   :  { %v12488_v59 = vadd.f32 %v14686_v3, %v6085_v27  ;;  %v6087_v20 = vpop.f32.mrb[95].mxu1  ;;  %v6706_v3 = vadd.f32 %v6705_v51, %v6574_v42  ;;  %v14700_v42 = vld [vmem:[#allocation99_spill] sm:$0xff] }
 0x98c   :  { %v6575_v20 = vmul.f32 %v12441_v4, %v12441_v4 }
 0x990   :  { %v6090_v30 = vpop.f32.mrb[96].mxu1 }
 0x991   :  { %v12491_v19 = vadd.f32 %v14687_v34, %v6090_v30  ;;  %v6092_v62 = vpop.f32.mrb[97].mxu1  ;;  %v6638_v30 = vadd.f32 %v6637_v1, %v12441_v4  ;;  %v6576_v34 = vmul.f32 %v12446_v7, %v12446_v7 }
 0x992   :  { %v6093_v37 = vpop.f32.mrb[98].mxu1  ;;  %v6707_v62 = vadd.f32 %v6706_v3, %v6575_v20  ;;  %v14701_v20 = vld [vmem:[#allocation96_spill] sm:$0xff] }
 0x993   :  { %v12494_v0 = vadd.f32 %v14688_v50, %v6093_v37  ;;  %v6095_v17 = vpop.f32.mrb[99].mxu1  ;;  %v6639_v37 = vadd.f32 %v6638_v30, %v12446_v7 }
 0x994   :  { %v14697_v17 = vld [vmem:[#allocation92_spill] sm:$0xff] }
 0x998   :  { %v6098_v11 = vpop.f32.mrb[100].mxu1 }
 0x999   :  { %v12497_v6 = vadd.f32 %v14689_v26, %v6098_v11  ;;  %v6100_v40 = vpop.f32.mrb[101].mxu1 }
 0x99a   :  { %v6101_v47 = vpop.f32.mrb[102].mxu1  ;;  %v6708_v40 = vadd.f32 %v6707_v62, %v6576_v34 }
 0x99b   :  { %v12500_v21 = vadd.f32 %v14690_v53, %v6101_v47  ;;  %v6103_v18 = vpop.f32.mrb[103].mxu1  ;;  %v6577_v47 = vmul.f32 %v12449_v25, %v12449_v25 }
 0x99c   :  { %v14698_v18 = vld [vmem:[#allocation94_spill] sm:$0xff] }
 0x9a0   :  { %v6106_v58 = vpop.f32.mrb[104].mxu1 }
 0x9a1   :  { %v12503_v63 = vadd.f32 %v14691_v28, %v6106_v58  ;;  %v6108_v48 = vpop.f32.mrb[105].mxu1 }
 0x9a2   :  { %v6109_v35 = vpop.f32.mrb[106].mxu1  ;;  %v6640_v48 = vadd.f32 %v6639_v37, %v12449_v25 }
 0x9a3   :  { %v12506_v2 = vadd.f32 %v14692_v16, %v6109_v35  ;;  %v6111_v22 = vpop.f32.mrb[107].mxu1  ;;  %v6578_v35 = vmul.f32 %v12454_v55, %v12454_v55  ;;  %v6709_v16 = vadd.f32 %v6708_v40, %v6577_v47 }
 0x9a4   :  { %v6641_v22 = vadd.f32 %v6640_v48, %v12454_v55 }
 0x9a6   :  { %v6642_v15 = vadd.f32 %v6641_v22, %v12457_v14  ;;  %v14704_v22 = vld [vmem:[#allocation101_spill] sm:$0xff] }
 0x9a8   :  { %v6114_v10 = vpop.f32.mrb[108].mxu1  ;;  %v6643_v51 = vadd.f32 %v6642_v15, %v12462_v52  ;;  %v14705_v15 = vld [vmem:[#allocation103_spill] sm:$0xff] }
 0x9a9   :  { %v12509_v36 = vadd.f32 %v14693_v44, %v6114_v10  ;;  %v6116_v39 = vpop.f32.mrb[109].mxu1  ;;  %v6710_v10 = vadd.f32 %v6709_v16, %v6578_v35  ;;  %v6579_v44 = vmul.f32 %v12457_v14, %v12457_v14 }
 0x9aa   :  { %v6117_v24 = vpop.f32.mrb[110].mxu1 }
 0x9ab   :  { %v12512_v33 = vadd.f32 %v14694_v13, %v6117_v24  ;;  %v6119_v46 = vpop.f32.mrb[111].mxu1  ;;  %v14699_v24 = vld [vmem:[#allocation97_spill] sm:$0xff] }
 0x9b0   :  { %v6122_v12 = vpop.f32.mrb[112].mxu1 }
 0x9b1   :  { %v12523_v9 = vadd.f32 %v14695_v60, %v6122_v12  ;;  %v6124_v23 = vpop.f32.mrb[113].mxu1 }
 0x9b2   :  { %v6125_v31 = vpop.f32.mrb[114].mxu1  ;;  %v6711_v23 = vadd.f32 %v6710_v10, %v6579_v44 }
 0x9b3   :  { %v12527_v5 = vadd.f32 %v14696_v32, %v6125_v31  ;;  %v6127_v27 = vpop.f32.mrb[115].mxu1  ;;  %v6581_v31 = vmul.f32 %v12465_v43, %v12465_v43  ;;  %v6644_v32 = vadd.f32 %v6643_v51, %v12465_v43 }
 0x9b4   :  { %v6712_v1 = vadd.f32 %v6711_v23, %v6580_v57  ;;  %v6582_v27 = vmul.f32 %v12470_v49, %v12470_v49 }
 0x9b5   :  { %v6645_v37 = vadd.f32 %v6644_v32, %v12470_v49 }
 0x9b6   :  { %v6713_v62 = vadd.f32 %v6712_v1, %v6581_v31  ;;  %v6587_v31 = vmul.f32 %v12488_v59, %v12488_v59 }
 0x9b8   :  { %v6130_v50 = vpop.f32.mrb[116].mxu1  ;;  %v6714_v47 = vadd.f32 %v6713_v62, %v6582_v27  ;;  %v14707_v27 = vld [vmem:[#allocation100_spill] sm:$0xff]  ;;  %v6588_v62 = vmul.f32 %v12491_v19, %v12491_v19 }
 0x9b9   :  { %v12536_v11 = vadd.f32 %v14697_v17, %v6130_v50  ;;  %v6132_v26 = vpop.f32.mrb[117].mxu1  ;;  %v14702_v17 = vld [vmem:[#allocation98_spill] sm:$0xff] }
 0x9ba   :  { %v6133_v53 = vpop.f32.mrb[118].mxu1 }
 0x9bb   :  { %v12541_v58 = vadd.f32 %v14698_v18, %v6133_v53  ;;  %v6135_v28 = vpop.f32.mrb[119].mxu1  ;;  %v6583_v53 = vmul.f32 %v12473_v41, %v12473_v41  ;;  %v6646_v18 = vadd.f32 %v6645_v37, %v12473_v41 }
 0x9bc   :  { %v6584_v28 = vmul.f32 %v12478_v54, %v12478_v54 }
 0x9bd   :  { %v6715_v48 = vadd.f32 %v6714_v47, %v6583_v53  ;;  %v6647_v35 = vadd.f32 %v6646_v18, %v12478_v54 }
 0x9c0   :  { %v6138_v39 = vpop.f32.mrb[120].mxu1 }
 0x9c1   :  { %v12550_v13 = vadd.f32 %v14699_v24, %v6138_v39  ;;  %v6140_v46 = vpop.f32.mrb[121].mxu1  ;;  %v6716_v39 = vadd.f32 %v6715_v48, %v6584_v28  ;;  %v6585_v24 = vmul.f32 %v12481_v38, %v12481_v38  ;;  %v6589_v28 = vmul.f32 %v12494_v0, %v12494_v0 }
 0x9c2   :  { %v6141_v29 = vpop.f32.mrb[122].mxu1 }
 0x9c3   :  { %v12556_v12 = vadd.f32 %v14700_v42, %v6141_v29  ;;  %v6143_v60 = vpop.f32.mrb[123].mxu1  ;;  %v6648_v42 = vadd.f32 %v6647_v35, %v12481_v38  ;;  %v6717_v23 = vadd.f32 %v6716_v39, %v6585_v24  ;;  %v6590_v35 = vmul.f32 %v12497_v6, %v12497_v6 }
 0x9c4   :  { %v6586_v60 = vmul.f32 %v12485_v61, %v12485_v61 }
 0x9c5   :  { %v6649_v51 = vadd.f32 %v6648_v42, %v12485_v61 }
 0x9c6   :  { %v6718_v1 = vadd.f32 %v6717_v23, %v6586_v60 }
 0x9c8   :  { %v6146_v3 = vpop.f32.mrb[124].mxu1  ;;  %v6719_v47 = vadd.f32 %v6718_v1, %v6587_v31  ;;  %v6592_v31 = vmul.f32 %v12503_v63, %v12503_v63 }
 0x9c9   :  { %v12565_v30 = vadd.f32 %v14701_v20, %v6146_v3  ;;  %v6148_v34 = vpop.f32.mrb[125].mxu1 }
 0x9ca   :  { %v6149_v50 = vpop.f32.mrb[126].mxu1  ;;  %v6650_v34 = vadd.f32 %v6649_v51, %v12488_v59  ;;  %v6720_v18 = vadd.f32 %v6719_v47, %v6588_v62  ;;  %v6591_v51 = vmul.f32 %v12500_v21, %v12500_v21 }
 0x9cb   :  { %v12569_v26 = vadd.f32 %v14702_v17, %v6149_v50  ;;  %v6151_v40 = vpop.f32.mrb[127].mxu1  ;;  %v14708_v50 = vld [vmem:[#allocation102_spill] sm:$0xff] }
 0x9cc   :  { %v6651_v53 = vadd.f32 %v6650_v34, %v12491_v19  ;;  %v6721_v24 = vadd.f32 %v6720_v18, %v6589_v28  ;;  %v14714_v34 = vld [vmem:[#allocation104_spill] sm:$0xff] }
 0x9cd   :  { %14703 = vst [vmem:[#allocation42_spill] sm:$0xff] %v12569_v26 }
 0x9ce   :  { %v6652_v48 = vadd.f32 %v6651_v53, %v12494_v0  ;;  %v6722_v23 = vadd.f32 %v6721_v24, %v6590_v35  ;;  %v14716_v53 = vld [vmem:[#allocation106_spill] sm:$0xff]  ;;  %v6594_v35 = vmul.f32 %v12509_v36, %v12509_v36  ;;  %v6595_v24 = vmul.f32 %v12512_v33, %v12512_v33 }
 0x9d0   :  { %v6154_v16 = vpop.f32.mrb[128].mxu1 }
 0x9d1   :  { %v12578_v10 = vadd.f32 %v14704_v22, %v6154_v16  ;;  %v6156_v44 = vpop.f32.mrb[129].mxu1  ;;  %v14710_v22 = vld [vmem:[#allocation105_spill] sm:$0xff] }
 0x9d2   :  { %v6157_v46 = vpop.f32.mrb[130].mxu1 }
 0x9d3   :  { %v12583_v57 = vadd.f32 %v14705_v15, %v6157_v46  ;;  %v6159_v29 = vpop.f32.mrb[131].mxu1  ;;  %v6653_v46 = vadd.f32 %v6652_v48, %v12497_v6 }
 0x9d4   :  { %v14712_v29 = vld [vmem:[#allocation107_spill] sm:$0xff] }
 0x9d5   :  { %14706 = vst [vmem:[#allocation45_spill] sm:$0xff] %v12583_v57  ;;  %v6654_v1 = vadd.f32 %v6653_v46, %v12500_v21 }
 0x9d8   :  { %v6162_v32 = vpop.f32.mrb[132].mxu1 }
 0x9d9   :  { %v12592_v3 = vadd.f32 %v14707_v27, %v6162_v32  ;;  %v6164_v20 = vpop.f32.mrb[133].mxu1  ;;  %v6723_v32 = vadd.f32 %v6722_v23, %v6591_v51  ;;  %v6655_v27 = vadd.f32 %v6654_v1, %v12503_v63  ;;  %v6596_v51 = vmul.f32 %v12523_v9, %v12523_v9 }
 0x9da   :  { %v6165_v37 = vpop.f32.mrb[134].mxu1 }
 0x9db   :  { %v12598_v17 = vadd.f32 %v14708_v50, %v6165_v37  ;;  %v6167_v40 = vpop.f32.mrb[135].mxu1  ;;  %v6724_v50 = vadd.f32 %v6723_v32, %v6592_v31  ;;  %v6656_v48 = vadd.f32 %v6655_v27, %v12506_v2  ;;  %v14719_v31 = vld [vmem:[#allocation111_spill] sm:$0xff] }
 0x9dc   :  { %v6593_v40 = vmul.f32 %v12506_v2, %v12506_v2 }
 0x9dd   :  { %14709 = vst [vmem:[#allocation57_spill] sm:$0xff] %v12598_v17 }
 0x9e0   :  { %v6170_v16 = vpop.f32.mrb[136].mxu1 }
 0x9e1   :  { %v12607_v44 = vadd.f32 %v14710_v22, %v6170_v16  ;;  %v6172_v39 = vpop.f32.mrb[137].mxu1  ;;  %v6725_v16 = vadd.f32 %v6724_v50, %v6593_v40  ;;  %v6657_v22 = vadd.f32 %v6656_v48, %v12509_v36  ;;  %v6597_v50 = vmul.f32 %v12527_v5, %v12527_v5 }
 0x9e2   :  { %v6173_v15 = vpop.f32.mrb[138].mxu1 }
 0x9e3   :  { %14711 = vst [vmem:[#allocation5_spill] sm:$0xff] %v12607_v44  ;;  %v12611_v42 = vadd.f32 %v14712_v29, %v6173_v15  ;;  %v6175_v60 = vpop.f32.mrb[139].mxu1  ;;  %v6726_v39 = vadd.f32 %v6725_v16, %v6594_v35  ;;  %v14718_v15 = vld [vmem:[#allocation109_spill] sm:$0xff]  ;;  %v6658_v23 = vadd.f32 %v6657_v22, %v12512_v33 }
 0x9e5   :  { %14713 = vst [vmem:[#allocation9_spill] sm:$0xff] %v12611_v42 }
 0x9e8   :  { %v6178_v20 = vpop.f32.mrb[140].mxu1 }
 0x9e9   :  { %v12620_v62 = vadd.f32 %v14714_v34, %v6178_v20  ;;  %v6180_v37 = vpop.f32.mrb[141].mxu1  ;;  %v6727_v20 = vadd.f32 %v6726_v39, %v6595_v24  ;;  %v6659_v34 = vadd.f32 %v6658_v23, %v12523_v9  ;;  %v14722_v24 = vld [vmem:[#allocation110_spill] sm:$0xff]  ;;  %v6599_v23 = vmul.f32 %v12541_v58, %v12541_v58 }
 0x9ea   :  { %v6181_v47 = vpop.f32.mrb[142].mxu1 }
 0x9eb   :  { %14715 = vst [vmem:[#allocation12_spill] sm:$0xff] %v12620_v62  ;;  %v12625_v18 = vadd.f32 %v14716_v53, %v6181_v47  ;;  %v6183_v28 = vpop.f32.mrb[143].mxu1  ;;  %v6728_v37 = vadd.f32 %v6727_v20, %v6596_v51  ;;  %v6660_v40 = vadd.f32 %v6659_v34, %v12527_v5  ;;  %v6598_v47 = vmul.f32 %v12536_v11, %v12536_v11  ;;  %v14724_v34 = vld [vmem:[#allocation113_spill] sm:$0xff] }
 0x9ec   :  { %v14721_v28 = vld [vmem:[#allocation108_spill] sm:$0xff] }
 0x9ed   :  { %14717 = vst [vmem:[#allocation29_spill] sm:$0xff] %v12625_v18  ;;  %v6729_v16 = vadd.f32 %v6728_v37, %v6597_v50  ;;  %v6661_v22 = vadd.f32 %v6660_v40, %v12536_v11 }
 0x9ef   :  { %v6662_v51 = vadd.f32 %v6661_v22, %v12541_v58 }
 0x9f0   :  { %v6186_v46 = vpop.f32.mrb[144].mxu1 }
 0x9f1   :  { %v12634_v29 = vadd.f32 %v14718_v15, %v6186_v46  ;;  %v6188_v60 = vpop.f32.mrb[145].mxu1 }
 0x9f2   :  { %v6189_v1 = vpop.f32.mrb[146].mxu1  ;;  %v6730_v60 = vadd.f32 %v6729_v16, %v6598_v47  ;;  %v6601_v47 = vmul.f32 %v12556_v12, %v12556_v12 }
 0x9f3   :  { %v12640_v32 = vadd.f32 %v14719_v31, %v6189_v1  ;;  %v6191_v27 = vpop.f32.mrb[147].mxu1  ;;  %v6600_v1 = vmul.f32 %v12550_v13, %v12550_v13 }
 0x9f4   :  { %v6731_v31 = vadd.f32 %v6730_v60, %v6599_v23  ;;  %v6663_v27 = vadd.f32 %v6662_v51, %v12550_v13  ;;  %v6603_v23 = vmul.f32 %v12569_v26, %v12569_v26 }
 0x9f5   :  { %14720 = vst [vmem:[#allocation37_spill] sm:$0xff] %v12640_v32 }
 0x9f6   :  { %v6732_v40 = vadd.f32 %v6731_v31, %v6600_v1  ;;  %v6664_v22 = vadd.f32 %v6663_v27, %v12556_v12  ;;  %v14728_v1 = vld [vmem:[#allocation112_spill] sm:$0xff]  ;;  %v6604_v27 = vmul.f32 %v12578_v10, %v12578_v10 }
 0x9f8   :  { %v6194_v53 = vpop.f32.mrb[148].mxu1 }
 0x9f9   :  { %v12649_v48 = vadd.f32 %v14721_v28, %v6194_v53  ;;  %v6196_v35 = vpop.f32.mrb[149].mxu1  ;;  %v14726_v28 = vld [vmem:[#allocation58_spill] sm:$0xff] }
 0x9fa   :  { %v6197_v39 = vpop.f32.mrb[150].mxu1 }
 0x9fb   :  { %v12653_v46 = vadd.f32 %v14722_v24, %v6197_v39  ;;  %v6199_v15 = vpop.f32.mrb[151].mxu1  ;;  %v6602_v39 = vmul.f32 %v12565_v30, %v12565_v30  ;;  %v6733_v24 = vadd.f32 %v6732_v40, %v6601_v47 }
 0x9fc   :  { %v6665_v15 = vadd.f32 %v6664_v22, %v12565_v30 }
 0x9fd   :  { %14723 = vst [vmem:[#allocation52_spill] sm:$0xff] %v12653_v46  ;;  %v6734_v60 = vadd.f32 %v6733_v24, %v6602_v39  ;;  %v6605_v39 = vmul.f32 %v12583_v57, %v12583_v57 }
 0x9ff   :  { %v6735_v47 = vadd.f32 %v6734_v60, %v6603_v23  ;;  %v14733_v23 = vld [vmem:[#allocation117_spill] sm:$0xff] }
 0xa00   :  { %v6202_v20 = vpop.f32.mrb[152].mxu1 }
 0xa01   :  { %v12662_v37 = vadd.f32 %v14724_v34, %v6202_v20  ;;  %v6204_v50 = vpop.f32.mrb[153].mxu1  ;;  %v6666_v34 = vadd.f32 %v6665_v15, %v12569_v26  ;;  %v6736_v22 = vadd.f32 %v6735_v47, %v6604_v27  ;;  %v6606_v15 = vmul.f32 %v12592_v3, %v12592_v3 }
 0xa02   :  { %v6205_v53 = vpop.f32.mrb[154].mxu1  ;;  %v6607_v47 = vmul.f32 %v12598_v17, %v12598_v17 }
 0xa03   :  { %14725 = vst [vmem:[#allocation17_spill] sm:$0xff] %v12662_v37  ;;  %v12667_v35 = vadd.f32 %v14726_v28, %v6205_v53  ;;  %v6207_v16 = vpop.f32.mrb[155].mxu1  ;;  %v14730_v53 = vld [vmem:[#allocation114_spill] sm:$0xff] }
 0xa04   :  { %v6667_v16 = vadd.f32 %v6666_v34, %v12578_v10 }
 0xa05   :  { %14727 = vst [vmem:[#allocation22_spill] sm:$0xff] %v12667_v35 }
 0xa06   :  { %v6668_v24 = vadd.f32 %v6667_v16, %v12583_v57  ;;  %v6608_v57 = vmul.f32 %v12607_v44, %v12607_v44 }
 0xa08   :  { %v6210_v51 = vpop.f32.mrb[156].mxu1 }
 0xa09   :  { %v12676_v31 = vadd.f32 %v14728_v1, %v6210_v51  ;;  %v6212_v20 = vpop.f32.mrb[157].mxu1  ;;  %v14732_v1 = vld [vmem:[#allocation116_spill] sm:$0xff] }
 0xa0a   :  { %v6213_v50 = vpop.f32.mrb[158].mxu1 }
 0xa0b   :  { %14729 = vst [vmem:[#allocation26_spill] sm:$0xff] %v12676_v31  ;;  %v12682_v28 = vadd.f32 %v14730_v53, %v6213_v50  ;;  %v6215_v40 = vpop.f32.mrb[159].mxu1  ;;  %v6737_v50 = vadd.f32 %v6736_v22, %v6605_v39  ;;  %v6669_v53 = vadd.f32 %v6668_v24, %v12592_v3  ;;  %v14735_v39 = vld [vmem:[#allocation115_spill] sm:$0xff] }
 0xa0d   :  { %14731 = vst [vmem:[#allocation23_spill] sm:$0xff] %v12682_v28  ;;  %v6738_v40 = vadd.f32 %v6737_v50, %v6606_v15  ;;  %v6670_v16 = vadd.f32 %v6669_v53, %v12598_v17  ;;  %v6609_v15 = vmul.f32 %v12611_v42, %v12611_v42 }
 0xa10   :  { %v6218_v51 = vpop.f32.mrb[160].mxu1 }
 0xa11   :  { %v12691_v20 = vadd.f32 %v14732_v1, %v6218_v51  ;;  %v6220_v26 = vpop.f32.mrb[161].mxu1  ;;  %v6739_v51 = vadd.f32 %v6738_v40, %v6607_v47  ;;  %v6610_v40 = vmul.f32 %v12620_v62, %v12620_v62 }
 0xa12   :  { %v6221_v60 = vpop.f32.mrb[162].mxu1  ;;  %v6671_v26 = vadd.f32 %v6670_v16, %v12607_v44 }
 0xa13   :  { %v12695_v34 = vadd.f32 %v14733_v23, %v6221_v60  ;;  %v6223_v27 = vpop.f32.mrb[163].mxu1  ;;  %v6740_v60 = vadd.f32 %v6739_v51, %v6608_v57  ;;  %v14736_v23 = vld [vmem:[#allocation61_spill] sm:$0xff]  ;;  %v6611_v57 = vmul.f32 %v12625_v18, %v12625_v18 }
 0xa14   :  { %v6672_v17 = vadd.f32 %v6671_v26, %v12611_v42  ;;  %v6612_v26 = vmul.f32 %v12634_v29, %v12634_v29 }
 0xa15   :  { %14734 = vst [vmem:[#allocation32_spill] sm:$0xff] %v12695_v34  ;;  %v6741_v47 = vadd.f32 %v6740_v60, %v6609_v15 }
 0xa16   :  { %v6673_v16 = vadd.f32 %v6672_v17, %v12620_v62 }
 0xa18   :  { %v6226_v22 = vpop.f32.mrb[164].mxu1 }
 0xa19   :  { %v12704_v24 = vadd.f32 %v14735_v39, %v6226_v22  ;;  %v6228_v1 = vpop.f32.mrb[165].mxu1  ;;  %v6742_v22 = vadd.f32 %v6741_v47, %v6610_v40  ;;  %v14738_v39 = vld [vmem:[#allocation119_spill] sm:$0xff]  ;;  %v6613_v47 = vmul.f32 %v12640_v32, %v12640_v32 }
 0xa1a   :  { %v6229_v50 = vpop.f32.mrb[166].mxu1 }
 0xa1b   :  { %v12709_v27 = vadd.f32 %v14736_v23, %v6229_v50  ;;  %v6231_v53 = vpop.f32.mrb[167].mxu1  ;;  %v6674_v50 = vadd.f32 %v6673_v16, %v12625_v18  ;;  %v6743_v17 = vadd.f32 %v6742_v22, %v6611_v57  ;;  %v14744_v57 = vld [vmem:[#allocation10_spill] sm:$0xff] }
 0xa1c   :  { %v14740_v53 = vld [vmem:[#allocation120_spill] sm:$0xff] }
 0xa1d   :  { %14737 = vst [vmem:[#allocation35_spill] sm:$0xff] %v12709_v27  ;;  %v6675_v15 = vadd.f32 %v6674_v50, %v12634_v29  ;;  %v6744_v40 = vadd.f32 %v6743_v17, %v6612_v26  ;;  %v6615_v17 = vmul.f32 %v12653_v46, %v12653_v46 }
 0xa20   :  { %v6234_v51 = vpop.f32.mrb[168].mxu1 }
 0xa21   :  { %v12718_v1 = vadd.f32 %v14738_v39, %v6234_v51  ;;  %v6236_v44 = vpop.f32.mrb[169].mxu1  ;;  %v6676_v51 = vadd.f32 %v6675_v15, %v12640_v32  ;;  %v14742_v39 = vld [vmem:[#allocation118_spill] sm:$0xff]  ;;  %v6616_v32 = vmul.f32 %v12662_v37, %v12662_v37 }
 0xa22   :  { %v6237_v23 = vpop.f32.mrb[170].mxu1  ;;  %v6614_v44 = vmul.f32 %v12649_v48, %v12649_v48 }
 0xa23   :  { %14739 = vst [vmem:[#allocation16_spill] sm:$0xff] %v12718_v1  ;;  %v12724_v42 = vadd.f32 %v14740_v53, %v6237_v23  ;;  %v6239_v60 = vpop.f32.mrb[171].mxu1  ;;  %v6745_v23 = vadd.f32 %v6744_v40, %v6613_v47  ;;  %v6677_v53 = vadd.f32 %v6676_v51, %v12649_v48 }
 0xa25   :  { %14741 = vst [vmem:[#allocation20_spill] sm:$0xff] %v12724_v42  ;;  %v6746_v60 = vadd.f32 %v6745_v23, %v6614_v44  ;;  %v6678_v15 = vadd.f32 %v6677_v53, %v12653_v46  ;;  %v6618_v23 = vmul.f32 %v12676_v31, %v12676_v31 }
 0xa28   :  { %v6242_v16 = vpop.f32.mrb[172].mxu1 }
 0xa29   :  { %v12733_v18 = vadd.f32 %v14742_v39, %v6242_v16  ;;  %v6244_v62 = vpop.f32.mrb[173].mxu1  ;;  %v6747_v16 = vadd.f32 %v6746_v60, %v6615_v17  ;;  %v6617_v39 = vmul.f32 %v12667_v35, %v12667_v35  ;;  %v6619_v60 = vmul.f32 %v12682_v28, %v12682_v28 }
 0xa2a   :  { %v6245_v22 = vpop.f32.mrb[174].mxu1  ;;  %v6679_v62 = vadd.f32 %v6678_v15, %v12662_v37 }
 0xa2b   :  { %14743 = vst [vmem:[#allocation2_spill] sm:$0xff] %v12733_v18  ;;  %v12737_v50 = vadd.f32 %v14744_v57, %v6245_v22  ;;  %v6247_v26 = vpop.f32.mrb[175].mxu1  ;;  %v6748_v51 = vadd.f32 %v6747_v16, %v6616_v32  ;;  %v6620_v16 = vmul.f32 %v12691_v20, %v12691_v20 }
 0xa2c   :  { %v6680_v44 = vadd.f32 %v6679_v62, %v12667_v35 }
 0xa2d   :  { %14745 = vst [vmem:[#allocation14_spill] sm:$0xff] %v12737_v50  ;;  %v6749_v53 = vadd.f32 %v6748_v51, %v6617_v39  ;;  %v6621_v51 = vmul.f32 %v12695_v34, %v12695_v34 }
 0xa2e   :  { %v6681_v26 = vadd.f32 %v6680_v44, %v12676_v31  ;;  %v6622_v44 = vmul.f32 %v12704_v24, %v12704_v24 }
 0xa2f   :  { %v6750_v46 = vadd.f32 %v6749_v53, %v6618_v23 }
 0xa30   :  { %v6250_v40 = vpop.f32.mrb[176].mxu1  ;;  %v6682_v32 = vadd.f32 %v6681_v26, %v12682_v28 }
 0xa31   :  { %v6252_v47 = vpop.f32.mrb[177].mxu1  ;;  %v6751_v62 = vadd.f32 %v6750_v46, %v6619_v60  ;;  %v6623_v46 = vmul.f32 %v12709_v27, %v12709_v27 }
 0xa32   :  { %v6253_v22 = vpop.f32.mrb[178].mxu1  ;;  %v6683_v35 = vadd.f32 %v6682_v32, %v12691_v20  ;;  %v6624_v32 = vmul.f32 %v12718_v1, %v12718_v1 }
 0xa33   :  { %v6255_v57 = vpop.f32.mrb[179].mxu1  ;;  %v6752_v37 = vadd.f32 %v6751_v62, %v6620_v16 }
 0xa34   :  { %v6684_v39 = vadd.f32 %v6683_v35, %v12695_v34 }
 0xa35   :  { %v6753_v26 = vadd.f32 %v6752_v37, %v6621_v51  ;;  %v6625_v37 = vmul.f32 %v12724_v42, %v12724_v42 }
 0xa38   :  { %v6258_v17 = vpop.f32.mrb[180].mxu1 }
 0xa39   :  { %v6260_v15 = vpop.f32.mrb[181].mxu1 }
 0xa3a   :  { %v6261_v47 = vpop.f32.mrb[182].mxu1  ;;  %v6685_v15 = vadd.f32 %v6684_v39, %v12704_v24 }
 0xa3b   :  { %v6263_v57 = vpop.f32.mrb[183].mxu1 }
 0xa3c   :  { %v6754_v57 = vadd.f32 %v6753_v26, %v6622_v44  ;;  %v6686_v60 = vadd.f32 %v6685_v15, %v12709_v27  ;;  %v6626_v44 = vmul.f32 %v12733_v18, %v12733_v18 }
 0xa3e   :  { %v6755_v35 = vadd.f32 %v6754_v57, %v6623_v46  ;;  %v6687_v16 = vadd.f32 %v6686_v60, %v12718_v1  ;;  %v6627_v57 = vmul.f32 %v12737_v50, %v12737_v50 }
 0xa40   :  { %v6266_v23 = vpop.f32.mrb[184].mxu1  ;;  %v6688_v39 = vadd.f32 %v6687_v16, %v12724_v42 }
 0xa41   :  { %v6268_v53 = vpop.f32.mrb[185].mxu1 }
 0xa42   :  { %v6269_v28 = vpop.f32.mrb[186].mxu1  ;;  %v6756_v53 = vadd.f32 %v6755_v35, %v6624_v32  ;;  %v6689_v15 = vadd.f32 %v6688_v39, %v12733_v18 }
 0xa43   :  { %v6271_v31 = vpop.f32.mrb[187].mxu1 }
 0xa44   :  { %v6757_v26 = vadd.f32 %v6756_v53, %v6625_v37  ;;  %v6690_v32 = vadd.f32 %v6689_v15, %v12737_v50 }
 0xa46   :  { %v6758_v27 = vadd.f32 %v6757_v26, %v6626_v44 }
 0xa48   :  { %v6274_v62 = vpop.f32.mrb[188].mxu1  ;;  %v6759_v1 = vadd.f32 %v6758_v27, %v6627_v57 }
 0xa49   :  { %v6276_v34 = vpop.f32.mrb[189].mxu1 }
 0xa4a   :  { %v6277_v51 = vpop.f32.mrb[190].mxu1 }
 0xa4b   :  { %v6279_v31 = vpop.f32.mrb[191].mxu1 }
 0xa50   :  { %v7498_v46 = vpop.f32.mrb[192].mxu1 }
 0xa51   :  { %v12777_v34 = vadd.f32 %v7498_v46, %v6258_v17  ;;  %v6539_v60 = vpop.f32.mrb[193].mxu1 }
 0xa52   :  { %v12780_v35 = vadd.f32 %v6539_v60, %v6250_v40  ;;  %v7499_v31 = vpop.f32.mrb[194].mxu1 }
 0xa53   :  { %14746 = vst [vmem:[#allocation63_spill] sm:$0xff] %v12777_v34  ;;  %v12782_v16 = vadd.f32 %v7499_v31, %v6261_v47  ;;  %v6542_v42 = vpop.f32.mrb[195].mxu1  ;;  %v6630_v40 = vmul.f32 %v12777_v34, %v12777_v34 }
 0xa54   :  { %14747 = vst [vmem:[#allocation53_spill] sm:$0xff] %v12780_v35  ;;  %v6628_v53 = vmul.f32 %v12780_v35, %v12780_v35  ;;  %v6691_v37 = vadd.f32 %v6690_v32, %v12780_v35  ;;  %v12787_v39 = vadd.f32 %v6542_v42, %v6253_v22 }
 0xa55   :  { %v6631_v42 = vmul.f32 %v12782_v16, %v12782_v16 }
 0xa56   :  { %14748 = vst [vmem:[#allocation56_spill] sm:$0xff] %v12787_v39  ;;  %v6760_v44 = vadd.f32 %v6759_v1, %v6628_v53  ;;  %v6629_v17 = vmul.f32 %v12787_v39, %v12787_v39  ;;  %v6692_v26 = vadd.f32 %v6691_v37, %v12787_v39 }
 0xa58   :  { %v6693_v47 = vadd.f32 %v6692_v26, %v12777_v34  ;;  %v6761_v15 = vadd.f32 %v6760_v44, %v6629_v17  ;;  %v7502_v27 = vpop.f32.mrb[196].mxu1 }
 0xa59   :  { %v12795_v57 = vadd.f32 %v7502_v27, %v6274_v62  ;;  %v6555_v46 = vpop.f32.mrb[197].mxu1 }
 0xa5a   :  { %v6762_v22 = vadd.f32 %v6761_v15, %v6630_v40  ;;  %v12799_v1 = vadd.f32 %v6555_v46, %v6266_v23  ;;  %v6694_v60 = vadd.f32 %v6693_v47, %v12782_v16  ;;  %v7503_v32 = vpop.f32.mrb[198].mxu1 }
 0xa5b   :  { %14749 = vst [vmem:[#allocation60_spill] sm:$0xff] %v12795_v57  ;;  %v12802_v31 = vadd.f32 %v7503_v32, %v6277_v51  ;;  %v6558_v53 = vpop.f32.mrb[199].mxu1  ;;  %v6634_v47 = vmul.f32 %v12795_v57, %v12795_v57 }
 0xa5c   :  { %v6632_v37 = vmul.f32 %v12799_v1, %v12799_v1  ;;  %v6695_v44 = vadd.f32 %v6694_v60, %v12799_v1  ;;  %v6763_v62 = vadd.f32 %v6762_v22, %v6631_v42  ;;  %v12807_v17 = vadd.f32 %v6558_v53, %v6269_v28 }
 0xa5d   :  { %v6635_v27 = vmul.f32 %v12802_v31, %v12802_v31 }
 0xa5e   :  { %14750 = vst [vmem:[#allocation39_spill] sm:$0xff] %v12807_v17  ;;  %v6764_v26 = vadd.f32 %v6763_v62, %v6632_v37  ;;  %v6633_v40 = vmul.f32 %v12807_v17, %v12807_v17  ;;  %v6696_v23 = vadd.f32 %v6695_v44, %v12807_v17 }
 0xa60   :  { %v6697_v51 = vadd.f32 %v6696_v23, %v12795_v57  ;;  %v6765_v15 = vadd.f32 %v6764_v26, %v6633_v40 }
 0xa62   :  { %v6698_v46 = vadd.f32 %v6697_v51, %v12802_v31  ;;  %v6766_v42 = vadd.f32 %v6765_v15, %v6634_v47  ;;  %v6570_v47 = vld [vmem:[%s13975_s5] sm:$0x1] }
 0xa64   :  { %v6699_v28 = vrot.slane %v6698_v46, 4  ;;  %v6767_v22 = vadd.f32 %v6766_v42, %v6635_v27 }
 0xa66   :  { %v6700_v60 = vadd.f32 %v6699_v28, %v6698_v46  ;;  %v6768_v32 = vrot.slane %v6767_v22, 4  ;;  %v12824_v46 = vld [vmem:[%s13976_s6] sm:$0x1] }
 0xa68   :  { %v6701_v53 = vrot.slane %v6700_v60, 2  ;;  %v6769_v37 = vadd.f32 %v6768_v32, %v6767_v22  ;;  %v14752_v22 = vld [vmem:[#allocation42_spill] sm:$0xff]  ;;  %v14754_v32 = vld [vmem:[#allocation57_spill] sm:$0xff] }
 0xa6a   :  { %v6702_v62 = vadd.f32 %v6701_v53, %v6700_v60  ;;  %v6770_v44 = vrot.slane %v6769_v37, 2  ;;  %v14753_v60 = vld [vmem:[#allocation45_spill] sm:$0xff] }
 0xa6b   :  { %v14755_v53 = vld [vmem:[#allocation5_spill] sm:$0xff] }
 0xa6c   :  { %v6703_v34 = vrot.slane %v6702_v62, 1  ;;  %v6771_v39 = vadd.f32 %v6770_v44, %v6769_v37  ;;  %v14757_v44 = vld [vmem:[#allocation12_spill] sm:$0xff] }
 0xa6e   :  { %v6704_v35 = vadd.f32 %v6703_v34, %v6702_v62  ;;  %v6772_v50 = vrot.slane %v6771_v39, 1  ;;  %v14756_v62 = vld [vmem:[#allocation9_spill] sm:$0xff] }
 0xa70   :  { %v6773_v23 = vadd.f32 %v6772_v50, %v6771_v39  ;;  %v6774_v26 = vmul.f32 0.001953125, %v6704_v35  ;;  %v14751_v50 = vld [vmem:[#allocation43_spill] sm:$0xff] }
 0xa72   :  { %v6775_v40 = vmul.f32 0.001953125, %v6773_v23  ;;  %v6776_v18 = vmul.f32 %v6774_v26, %v6774_v26 }
 0xa74   :  { %v6777_v57 = vsub.f32 %v6775_v40, %v6776_v18 }
 0xa76   :  { %v6778_v17 = vmax.f32 %v6777_v57, 0.0 }
 0xa78   :  { %v6779_v51 = vadd.f32 1e-05, %v6778_v17 }
 0xa7a   :  { %8435 = vrsqrt.f32 %v6779_v51  ;;  %v14759_v51 = vld [vmem:[#allocation37_spill] sm:$0xff] }
 0xa84   :  { %v8436_v15 = vpop.eup %8435 }
 0xa85   :  { %v6781_v27 = vmul.f32 %v8436_v15, %v6570_v47 }
 0xa87   :  { %v12826_v34 = vmul.f32 %v6781_v27, %v6774_v26  ;;  %v12829_v35 = vrot.slane %v6781_v27, %v14751_v50  ;;  %v14758_v26 = vld [vmem:[#allocation29_spill] sm:$0xff]  ;;  %v14760_v27 = vld [vmem:[#allocation52_spill] sm:$0xff] }
 0xa89   :  { %v6783_v18 = vsub.f32 %v12824_v46, %v12826_v34  ;;  %v12835_v39 = vmul.f32 %v12829_v35, %v12430_v45  ;;  %v12839_v57 = vmul.f32 %v12829_v35, %v12433_v56  ;;  %v12843_v17 = vmul.f32 %v12829_v35, %v12438_v8  ;;  %v14761_v34 = vld [vmem:[#allocation17_spill] sm:$0xff] }
 0xa8a   :  { %v12847_v42 = vmul.f32 %v12829_v35, %v12441_v4  ;;  %v12851_v28 = vmul.f32 %v12829_v35, %v12446_v7  ;;  %v12855_v45 = vmul.f32 %v12829_v35, %v12449_v25  ;;  %v12859_v56 = vmul.f32 %v12829_v35, %v12454_v55 }
 0xa8b   :  { %v12863_v8 = vmul.f32 %v12829_v35, %v12457_v14  ;;  %v12867_v4 = vmul.f32 %v12829_v35, %v12462_v52  ;;  %v12871_v7 = vmul.f32 %v12829_v35, %v12465_v43  ;;  %v12875_v25 = vmul.f32 %v12829_v35, %v12470_v49 }
 0xa8c   :  { %v12879_v55 = vmul.f32 %v12829_v35, %v12473_v41  ;;  %v12883_v14 = vmul.f32 %v12829_v35, %v12478_v54  ;;  %v12887_v52 = vmul.f32 %v12829_v35, %v12481_v38  ;;  %v12891_v43 = vmul.f32 %v12829_v35, %v12485_v61 }
 0xa8d   :  { %v12895_v49 = vmul.f32 %v12829_v35, %v12488_v59  ;;  %v12899_v41 = vmul.f32 %v12829_v35, %v12491_v19  ;;  %v12903_v54 = vmul.f32 %v12829_v35, %v12494_v0  ;;  %v12907_v38 = vmul.f32 %v12829_v35, %v12497_v6 }
 0xa8e   :  { %v12911_v61 = vmul.f32 %v12829_v35, %v12500_v21  ;;  %v12915_v59 = vmul.f32 %v12829_v35, %v12503_v63  ;;  %v12919_v19 = vmul.f32 %v12829_v35, %v12506_v2  ;;  %v12923_v0 = vmul.f32 %v12829_v35, %v12509_v36 }
 0xa8f   :  { %v12927_v6 = vmul.f32 %v12829_v35, %v12512_v33  ;;  %v12931_v21 = vmul.f32 %v12829_v35, %v12523_v9  ;;  %v12935_v63 = vmul.f32 %v12829_v35, %v12527_v5  ;;  %v12939_v2 = vmul.f32 %v12829_v35, %v12536_v11 }
 0xa90   :  { %v12943_v36 = vmul.f32 %v12829_v35, %v12541_v58  ;;  %v12947_v33 = vmul.f32 %v12829_v35, %v12550_v13  ;;  %v12951_v9 = vmul.f32 %v12829_v35, %v12556_v12  ;;  %v12955_v5 = vmul.f32 %v12829_v35, %v12565_v30 }
 0xa91   :  { %v12959_v11 = vmul.f32 %v12829_v35, %v14752_v22  ;;  %v12963_v58 = vmul.f32 %v12829_v35, %v12578_v10  ;;  %v12967_v13 = vmul.f32 %v12829_v35, %v14753_v60  ;;  %v12971_v12 = vmul.f32 %v12829_v35, %v12592_v3  ;;  %v14762_v60 = vld [vmem:[#allocation22_spill] sm:$0xff] }
 0xa92   :  { %v12975_v30 = vmul.f32 %v12829_v35, %v14754_v32  ;;  %v12979_v37 = vmul.f32 %v12829_v35, %v14755_v53  ;;  %v12983_v10 = vmul.f32 %v12829_v35, %v14756_v62  ;;  %v12987_v23 = vmul.f32 %v12829_v35, %v14757_v44  ;;  %v14763_v32 = vld [vmem:[#allocation26_spill] sm:$0xff]  ;;  %v14764_v62 = vld [vmem:[#allocation23_spill] sm:$0xff] }
 0xa93   :  { %v12991_v3 = vmul.f32 %v12829_v35, %v14758_v26  ;;  %v12995_v40 = vmul.f32 %v12829_v35, %v12634_v29  ;;  %v12999_v47 = vmul.f32 %v12829_v35, %v14759_v51  ;;  %v13003_v15 = vmul.f32 %v12829_v35, %v12649_v48  ;;  %v14767_v26 = vld [vmem:[#allocation32_spill] sm:$0xff] }
 0xa94   :  { %v13007_v46 = vmul.f32 %v12829_v35, %v14760_v27  ;;  %v13011_v22 = vmul.f32 %v12829_v35, %v14761_v34  ;;  %v13015_v29 = vmul.f32 %v12829_v35, %v14762_v60  ;;  %v13019_v53 = vmul.f32 %v12829_v35, %v14763_v32  ;;  %v14770_v34 = vld [vmem:[#allocation35_spill] sm:$0xff]  ;;  %v14772_v32 = vld [vmem:[#allocation16_spill] sm:$0xff] }
 0xa95   :  { %v13023_v48 = vmul.f32 %v12829_v35, %v14764_v62  ;;  %v13027_v44 = vmul.f32 %v12829_v35, %v12691_v20  ;;  %v13031_v51 = vmul.f32 %v12829_v35, %v14767_v26  ;;  %v13035_v27 = vmul.f32 %v12829_v35, %v12704_v24 }
 0xa96   :  { %v13039_v60 = vmul.f32 %v12829_v35, %v14770_v34  ;;  %v13043_v62 = vmul.f32 %v12829_v35, %v14772_v32  ;;  %v13047_v20 = vmul.f32 %v12829_v35, %v12782_v16  ;;  %v13051_v26 = vmul.f32 %v12829_v35, %v12799_v1 }
 0xa97   :  { %14765 = vst [vmem:[#allocation54_spill] sm:$0xff] %v13023_v48  ;;  %14766 = vst [vmem:[#allocation8_spill] sm:$0xff] %v13027_v44  ;;  %v13067_v16 = vmul.f32 %v12829_v35, %v12802_v31  ;;  %v13070_v1 = vrot.slane %v6783_v18, %v14751_v50 }
 0xa98   :  { %14768 = vst [vmem:[#allocation34_spill] sm:$0xff] %v13031_v51  ;;  %14769 = vst [vmem:[#allocation49_spill] sm:$0xff] %v13035_v27  ;;  %v14776_v51 = vld [vmem:[#allocation39_spill] sm:$0xff]  ;;  %v14778_v27 = vld [vmem:[#allocation60_spill] sm:$0xff] }
 0xa99   :  { %14771 = vst [vmem:[#allocation11_spill] sm:$0xff] %v13039_v60  ;;  %14773 = vst [vmem:[#allocation21_spill] sm:$0xff] %v13043_v62  ;;  %v13055_v24 = vmul.f32 %v12829_v35, %v14776_v51  ;;  %v13059_v34 = vmul.f32 %v12829_v35, %v14778_v27  ;;  %v14780_v60 = vld [vmem:[#allocation20_spill] sm:$0xff]  ;;  %v14781_v62 = vld [vmem:[#allocation2_spill] sm:$0xff]  ;;  %v13086_v31 = vadd.f32 %v13070_v1, %v12839_v57 }
 0xa9a   :  { %14774 = vst [vmem:[#allocation30_spill] sm:$0xff] %v13047_v20  ;;  %14775 = vst [vmem:[#allocation44_spill] sm:$0xff] %v13051_v26  ;;  %v6843_v32 = vmul.f32 %v12829_v35, %v14780_v60  ;;  %v6844_v44 = vmul.f32 %v12829_v35, %v14781_v62  ;;  %v14782_v26 = vld [vmem:[#allocation14_spill] sm:$0xff]  ;;  %v14785_v60 = vld [vmem:[#allocation63_spill] sm:$0xff]  ;;  %v13082_v62 = vadd.f32 %v13070_v1, %v12835_v39 }
 0xa9b   :  { %14777 = vst [vmem:[#allocation15_spill] sm:$0xff] %v13055_v24  ;;  %14779 = vst [vmem:[#allocation50_spill] sm:$0xff] %v13059_v34  ;;  %v6845_v51 = vmul.f32 %v12829_v35, %v14782_v26  ;;  %v14783_v24 = vld [vmem:[#allocation53_spill] sm:$0xff]  ;;  %v14784_v34 = vld [vmem:[#allocation56_spill] sm:$0xff]  ;;  %v6848_v48 = vmul.f32 %v12829_v35, %v14785_v60  ;;  %v13090_v50 = vadd.f32 %v13070_v1, %v12843_v17 }
 0xa9c   :  { %v6846_v27 = vmul.f32 %v12829_v35, %v14783_v24  ;;  %v6847_v20 = vmul.f32 %v12829_v35, %v14784_v34  ;;  %v13094_v18 = vadd.f32 %v13070_v1, %v12847_v42  ;;  %v13098_v26 = vadd.f32 %v13070_v1, %v12851_v28 }
 0xa9d   :  { %v13102_v35 = vadd.f32 %v13070_v1, %v12855_v45  ;;  %v13106_v39 = vadd.f32 %v13070_v1, %v12859_v56  ;;  %v13110_v57 = vadd.f32 %v13070_v1, %v12863_v8  ;;  %v13114_v17 = vadd.f32 %v13070_v1, %v12867_v4 }
 0xa9e   :  { %v13118_v42 = vadd.f32 %v13070_v1, %v12871_v7  ;;  %v13122_v28 = vadd.f32 %v13070_v1, %v12875_v25  ;;  %v13126_v45 = vadd.f32 %v13070_v1, %v12879_v55  ;;  %v13130_v56 = vadd.f32 %v13070_v1, %v12883_v14  ;;  %v14790_v24 = vld [vmem:[#allocation8_spill] sm:$0xff] }
 0xa9f   :  { %v13134_v8 = vadd.f32 %v13070_v1, %v12887_v52  ;;  %v13138_v4 = vadd.f32 %v13070_v1, %v12891_v43  ;;  %v13142_v7 = vadd.f32 %v13070_v1, %v12895_v49  ;;  %v13146_v25 = vadd.f32 %v13070_v1, %v12899_v41  ;;  %v14791_v34 = vld [vmem:[#allocation34_spill] sm:$0xff]  ;;  %v14792_v60 = vld [vmem:[#allocation49_spill] sm:$0xff] }
 0xaa0   :  { %v13150_v55 = vadd.f32 %v13070_v1, %v12903_v54  ;;  %v13154_v14 = vadd.f32 %v13070_v1, %v12907_v38  ;;  %v13158_v52 = vadd.f32 %v13070_v1, %v12911_v61  ;;  %v13162_v43 = vadd.f32 %v13070_v1, %v12915_v59 }
 0xaa1   :  { %v13166_v49 = vadd.f32 %v13070_v1, %v12919_v19  ;;  %v13170_v41 = vadd.f32 %v13070_v1, %v12923_v0  ;;  %v13174_v54 = vadd.f32 %v13070_v1, %v12927_v6  ;;  %v13178_v38 = vadd.f32 %v13070_v1, %v12931_v21 }
 0xaa2   :  { %v13182_v61 = vadd.f32 %v13070_v1, %v12935_v63  ;;  %v13186_v59 = vadd.f32 %v13070_v1, %v12939_v2  ;;  %v13190_v19 = vadd.f32 %v13070_v1, %v12943_v36  ;;  %v13194_v0 = vadd.f32 %v13070_v1, %v12947_v33 }
 0xaa3   :  { %v13198_v6 = vadd.f32 %v13070_v1, %v12951_v9  ;;  %v13202_v21 = vadd.f32 %v13070_v1, %v12955_v5  ;;  %v13206_v63 = vadd.f32 %v13070_v1, %v12959_v11  ;;  %v13210_v2 = vadd.f32 %v13070_v1, %v12963_v58 }
 0xaa4   :  { %v13214_v36 = vadd.f32 %v13070_v1, %v12967_v13  ;;  %v13218_v33 = vadd.f32 %v13070_v1, %v12971_v12  ;;  %v13222_v9 = vadd.f32 %v13070_v1, %v12975_v30  ;;  %v13226_v5 = vadd.f32 %v13070_v1, %v12979_v37 }
 0xaa5   :  { %v13230_v11 = vadd.f32 %v13070_v1, %v12983_v10  ;;  %v13234_v58 = vadd.f32 %v13070_v1, %v12987_v23  ;;  %v13238_v13 = vadd.f32 %v13070_v1, %v12991_v3  ;;  %v13242_v12 = vadd.f32 %v13070_v1, %v12995_v40 }
 0xaa6   :  { %v13246_v30 = vadd.f32 %v13070_v1, %v12999_v47  ;;  %v13250_v37 = vadd.f32 %v13070_v1, %v13003_v15  ;;  %v13254_v10 = vadd.f32 %v13070_v1, %v13007_v46  ;;  %v13258_v23 = vadd.f32 %v13070_v1, %v13011_v22  ;;  %v14788_v47 = vld [vmem:[#allocation54_spill] sm:$0xff] }
 0xaa7   :  { %v13262_v3 = vadd.f32 %v13070_v1, %v13015_v29  ;;  %v13266_v40 = vadd.f32 %v13070_v1, %v13019_v53  ;;  %v13270_v15 = vadd.f32 %v13070_v1, %v14788_v47  ;;  %v13274_v46 = vadd.f32 %v13070_v1, %v14790_v24 }
 0xaa8   :  { %v13278_v22 = vadd.f32 %v13070_v1, %v14791_v34  ;;  %v13282_v29 = vadd.f32 %v13070_v1, %v14792_v60  ;;  %v13296_v24 = vadd.f32 %v13070_v1, %v6844_v44  ;;  %v13299_v34 = vadd.f32 %v13070_v1, %v6845_v51 }
 0xaa9   :  { %14786 = vst [vmem:[#allocation64_spill] sm:$0xff] %v13262_v3  ;;  %14787 = vst [vmem:[#allocation40_spill] sm:$0xff] %v13266_v40  ;;  %v14794_v3 = vld [vmem:[#allocation11_spill] sm:$0xff]  ;;  %v14795_v40 = vld [vmem:[#allocation21_spill] sm:$0xff]  ;;  %v13302_v60 = vadd.f32 %v13070_v1, %v6846_v27 }
 0xaaa   :  { %14789 = vst [vmem:[#allocation31_spill] sm:$0xff] %v13270_v15  ;;  %14793 = vst [vmem:[#allocation65_spill] sm:$0xff] %v13282_v29  ;;  %v13286_v53 = vadd.f32 %v13070_v1, %v14794_v3  ;;  %v13290_v47 = vadd.f32 %v13070_v1, %v14795_v40  ;;  %v13293_v15 = vadd.f32 %v13070_v1, %v6843_v32  ;;  %v14799_v40 = vld [vmem:[#allocation30_spill] sm:$0xff]  ;;  %v14800_v32 = vld [vmem:[#allocation44_spill] sm:$0xff] }
 0xaab   :  { %14797 = vst [vmem:[#allocation33_spill] sm:$0xff] %v13296_v24  ;;  %14798 = vst [vmem:[#allocation36_spill] sm:$0xff] %v13302_v60  ;;  %v13305_v29 = vadd.f32 %v13070_v1, %v6847_v20  ;;  %v13308_v3 = vadd.f32 %v13070_v1, %v6848_v48  ;;  %v13316_v44 = vadd.f32 %v13070_v1, %v14800_v32  ;;  %v14801_v24 = vld [vmem:[#allocation15_spill] sm:$0xff]  ;;  %v14802_v27 = vld [vmem:[#allocation50_spill] sm:$0xff] }
 0xaac   :  { %14796 = vst [vmem:[#allocation68_spill] sm:$0xff] %v13290_v47  ;;  %v13312_v47 = vadd.f32 %v13070_v1, %v14799_v40  ;;  %v13320_v51 = vadd.f32 %v13070_v1, %v14801_v24  ;;  %v13324_v60 = vadd.f32 %v13070_v1, %v14802_v27  ;;  %v13328_v48 = vadd.f32 %v13070_v1, %v13067_v16  ;;  %v8445_v20 = vld [vmem:[%s13971_s0] sm:$0xff]  ;;  %v8446_v24 = vld [vmem:[%s13971_s0 + $0x8] sm:$0xff]  ;;  %v8447_v27 = vld [vmem:[%s13971_s0 + $0x10] sm:$0xff] }
 0xaad   :  { %v13334_v40 = vadd.f32 %v8445_v20, %v13082_v62  ;;  %v13340_v32 = vadd.f32 %v8446_v24, %v13086_v31  ;;  %v13346_v16 = vadd.f32 %v8447_v27, %v13090_v50  ;;  %v8448_v1 = vld [vmem:[%s13971_s0 + $0x18] sm:$0xff]  ;;  %v8449_v20 = vld [vmem:[%s13971_s0 + $0x20] sm:$0xff]  ;;  %v8450_v24 = vld [vmem:[%s13971_s0 + $0x28] sm:$0xff] }
 0xaae   :  { %v13352_v62 = vadd.f32 %v8448_v1, %v13094_v18  ;;  %v13358_v31 = vadd.f32 %v8449_v20, %v13098_v26  ;;  %v13364_v50 = vadd.f32 %v8450_v24, %v13102_v35  ;;  %v8451_v27 = vld [vmem:[%s13971_s0 + $0x30] sm:$0xff]  ;;  %v8452_v1 = vld [vmem:[%s13971_s0 + $0x38] sm:$0xff]  ;;  %v8453_v20 = vld [vmem:[%s13971_s0 + $0x40] sm:$0xff] }
 0xaaf   :  { %v13370_v18 = vadd.f32 %v8451_v27, %v13106_v39  ;;  %v13376_v26 = vadd.f32 %v8452_v1, %v13110_v57  ;;  %v13382_v35 = vadd.f32 %v8453_v20, %v13114_v17  ;;  %v8454_v24 = vld [vmem:[%s13971_s0 + $0x48] sm:$0xff]  ;;  %v8455_v27 = vld [vmem:[%s13971_s0 + $0x50] sm:$0xff]  ;;  %v8456_v1 = vld [vmem:[%s13971_s0 + $0x58] sm:$0xff] }
 0xab0   :  { %v13388_v39 = vadd.f32 %v8454_v24, %v13118_v42  ;;  %v13394_v57 = vadd.f32 %v8455_v27, %v13122_v28  ;;  %v13400_v17 = vadd.f32 %v8456_v1, %v13126_v45  ;;  %v8457_v20 = vld [vmem:[%s13971_s0 + $0x60] sm:$0xff]  ;;  %v8458_v24 = vld [vmem:[%s13971_s0 + $0x68] sm:$0xff]  ;;  %v8459_v27 = vld [vmem:[%s13971_s0 + $0x70] sm:$0xff] }
 0xab1   :  { %v13406_v42 = vadd.f32 %v8457_v20, %v13130_v56  ;;  %v13412_v28 = vadd.f32 %v8458_v24, %v13134_v8  ;;  %v13418_v45 = vadd.f32 %v8459_v27, %v13138_v4  ;;  %v8460_v1 = vld [vmem:[%s13971_s0 + $0x78] sm:$0xff]  ;;  %v8461_v20 = vld [vmem:[%s13971_s0 + $0x80] sm:$0xff]  ;;  %v8462_v24 = vld [vmem:[%s13971_s0 + $0x88] sm:$0xff] }
 0xab2   :  { %v13424_v56 = vadd.f32 %v8460_v1, %v13142_v7  ;;  %v13430_v8 = vadd.f32 %v8461_v20, %v13146_v25  ;;  %v13436_v4 = vadd.f32 %v8462_v24, %v13150_v55  ;;  %v8463_v27 = vld [vmem:[%s13971_s0 + $0x90] sm:$0xff]  ;;  %v8464_v1 = vld [vmem:[%s13971_s0 + $0x98] sm:$0xff]  ;;  %v8465_v20 = vld [vmem:[%s13971_s0 + $0xa0] sm:$0xff] }
 0xab3   :  { %v13442_v7 = vadd.f32 %v8463_v27, %v13154_v14  ;;  %v13448_v25 = vadd.f32 %v8464_v1, %v13158_v52  ;;  %v13454_v55 = vadd.f32 %v8465_v20, %v13162_v43  ;;  %v8466_v24 = vld [vmem:[%s13971_s0 + $0xa8] sm:$0xff]  ;;  %v8467_v27 = vld [vmem:[%s13971_s0 + $0xb0] sm:$0xff]  ;;  %v8468_v1 = vld [vmem:[%s13971_s0 + $0xb8] sm:$0xff] }
 0xab4   :  { %v13460_v14 = vadd.f32 %v8466_v24, %v13166_v49  ;;  %v13466_v52 = vadd.f32 %v8467_v27, %v13170_v41  ;;  %v13472_v43 = vadd.f32 %v8468_v1, %v13174_v54  ;;  %v8469_v20 = vld [vmem:[%s13971_s0 + $0xc0] sm:$0xff]  ;;  %v8470_v24 = vld [vmem:[%s13971_s0 + $0xc8] sm:$0xff]  ;;  %v8471_v27 = vld [vmem:[%s13971_s0 + $0xd0] sm:$0xff] }
 0xab5   :  { %v13478_v49 = vadd.f32 %v8469_v20, %v13178_v38  ;;  %v13484_v41 = vadd.f32 %v8470_v24, %v13182_v61  ;;  %v13490_v54 = vadd.f32 %v8471_v27, %v13186_v59  ;;  %v8472_v1 = vld [vmem:[%s13971_s0 + $0xd8] sm:$0xff]  ;;  %v8473_v20 = vld [vmem:[%s13971_s0 + $0xe0] sm:$0xff]  ;;  %v8474_v24 = vld [vmem:[%s13971_s0 + $0xe8] sm:$0xff] }
 0xab6   :  { %v13496_v38 = vadd.f32 %v8472_v1, %v13190_v19  ;;  %v13502_v61 = vadd.f32 %v8473_v20, %v13194_v0  ;;  %v13508_v59 = vadd.f32 %v8474_v24, %v13198_v6  ;;  %v8475_v27 = vld [vmem:[%s13971_s0 + $0xf0] sm:$0xff]  ;;  %v8476_v1 = vld [vmem:[%s13971_s0 + $0xf8] sm:$0xff]  ;;  %v8477_v20 = vld [vmem:[%s13971_s0 + $0x100] sm:$0xff] }
 0xab7   :  { %v13514_v19 = vadd.f32 %v8475_v27, %v13202_v21  ;;  %v13520_v0 = vadd.f32 %v8476_v1, %v13206_v63  ;;  %v13526_v6 = vadd.f32 %v8477_v20, %v13210_v2  ;;  %v8478_v24 = vld [vmem:[%s13971_s0 + $0x108] sm:$0xff]  ;;  %v8479_v27 = vld [vmem:[%s13971_s0 + $0x110] sm:$0xff]  ;;  %v8480_v1 = vld [vmem:[%s13971_s0 + $0x118] sm:$0xff] }
 0xab8   :  { %v13532_v21 = vadd.f32 %v8478_v24, %v13214_v36  ;;  %v13538_v63 = vadd.f32 %v8479_v27, %v13218_v33  ;;  %v13544_v2 = vadd.f32 %v8480_v1, %v13222_v9  ;;  %v8481_v20 = vld [vmem:[%s13971_s0 + $0x120] sm:$0xff]  ;;  %v8482_v24 = vld [vmem:[%s13971_s0 + $0x128] sm:$0xff]  ;;  %v8483_v27 = vld [vmem:[%s13971_s0 + $0x130] sm:$0xff] }
 0xab9   :  { %v13550_v36 = vadd.f32 %v8481_v20, %v13226_v5  ;;  %v13556_v33 = vadd.f32 %v8482_v24, %v13230_v11  ;;  %v13562_v9 = vadd.f32 %v8483_v27, %v13234_v58  ;;  %v8484_v1 = vld [vmem:[%s13971_s0 + $0x138] sm:$0xff]  ;;  %v8485_v20 = vld [vmem:[%s13971_s0 + $0x140] sm:$0xff]  ;;  %v8486_v24 = vld [vmem:[%s13971_s0 + $0x148] sm:$0xff] }
 0xaba   :  { %v13568_v5 = vadd.f32 %v8484_v1, %v13238_v13  ;;  %v13574_v11 = vadd.f32 %v8485_v20, %v13242_v12  ;;  %v13580_v58 = vadd.f32 %v8486_v24, %v13246_v30  ;;  %v8487_v27 = vld [vmem:[%s13971_s0 + $0x150] sm:$0xff]  ;;  %v8488_v1 = vld [vmem:[%s13971_s0 + $0x158] sm:$0xff]  ;;  %v8489_v20 = vld [vmem:[%s13971_s0 + $0x160] sm:$0xff] }
 0xabb   :  { %v13586_v13 = vadd.f32 %v8487_v27, %v13250_v37  ;;  %v13592_v12 = vadd.f32 %v8488_v1, %v13254_v10  ;;  %v13598_v30 = vadd.f32 %v8489_v20, %v13258_v23  ;;  %v8490_v24 = vld [vmem:[%s13971_s0 + $0x168] sm:$0xff]  ;;  %v14806_v37 = vld [vmem:[#allocation64_spill] sm:$0xff] }
 0xabc   :  { %v13604_v27 = vadd.f32 %v8490_v24, %v14806_v37  ;;  %v14807_v10 = vld [vmem:[#allocation40_spill] sm:$0xff]  ;;  %v14808_v23 = vld [vmem:[#allocation31_spill] sm:$0xff] }
 0xabd   :  { %14803 = vst [vmem:[#allocation48_spill] sm:$0xff] %v13586_v13  ;;  %14804 = vst [vmem:[#allocation51_spill] sm:$0xff] %v13592_v12  ;;  %v8491_v13 = vld [vmem:[%s13971_s0 + $0x170] sm:$0xff]  ;;  %v8492_v12 = vld [vmem:[%s13971_s0 + $0x178] sm:$0xff] }
 0xabe   :  { %14805 = vst [vmem:[#allocation6_spill] sm:$0xff] %v13598_v30  ;;  %v13610_v1 = vadd.f32 %v8491_v13, %v14807_v10  ;;  %v13616_v20 = vadd.f32 %v8492_v12, %v14808_v23  ;;  %v8493_v30 = vld [vmem:[%s13971_s0 + $0x180] sm:$0xff]  ;;  %v8494_v37 = vld [vmem:[%s13971_s0 + $0x188] sm:$0xff]  ;;  %v8495_v10 = vld [vmem:[%s13971_s0 + $0x190] sm:$0xff] }
 0xabf   :  { %v13622_v24 = vadd.f32 %v8493_v30, %v13274_v46  ;;  %v13628_v13 = vadd.f32 %v8494_v37, %v13278_v22  ;;  %v14811_v12 = vld [vmem:[#allocation65_spill] sm:$0xff]  ;;  %v8497_v30 = vld [vmem:[%s13971_s0 + $0x1a0] sm:$0xff]  ;;  %v14813_v22 = vld [vmem:[#allocation68_spill] sm:$0xff] }
 0xac0   :  { %14809 = vst [vmem:[#allocation7_spill] sm:$0xff] %v13616_v20  ;;  %v13634_v23 = vadd.f32 %v8495_v10, %v14811_v12  ;;  %v8496_v20 = vld [vmem:[%s13971_s0 + $0x198] sm:$0xff]  ;;  %v13646_v37 = vadd.f32 %v8497_v30, %v14813_v22  ;;  %v8499_v12 = vld [vmem:[%s13971_s0 + $0x1b0] sm:$0xff]  ;;  %v8501_v22 = vld [vmem:[%s13971_s0 + $0x1c0] sm:$0xff] }
 0xac1   :  { %14810 = vst [vmem:[#allocation27_spill] sm:$0xff] %v13628_v13  ;;  %v13640_v46 = vadd.f32 %v8496_v20, %v13286_v53  ;;  %v8498_v13 = vld [vmem:[%s13971_s0 + $0x1a8] sm:$0xff]  ;;  %v14815_v53 = vld [vmem:[#allocation33_spill] sm:$0xff] }
 0xac2   :  { %v13652_v10 = vadd.f32 %v8498_v13, %v13293_v15  ;;  %v13658_v20 = vadd.f32 %v8499_v12, %v14815_v53  ;;  %v14816_v15 = vld [vmem:[#allocation36_spill] sm:$0xff] }
 0xac3   :  { %14812 = vst [vmem:[#allocation4_spill] sm:$0xff] %v13640_v46  ;;  %v8500_v46 = vld [vmem:[%s13971_s0 + $0x1b8] sm:$0xff]  ;;  %v13670_v13 = vadd.f32 %v8501_v22, %v14816_v15  ;;  %v8503_v53 = vld [vmem:[%s13971_s0 + $0x1d0] sm:$0xff]  ;;  %v8505_v15 = vld [vmem:[%s13971_s0 + $0x1e0] sm:$0xff] }
 0xac4   :  { %14814 = vst [vmem:[#allocation3_spill] sm:$0xff] %v13652_v10  ;;  %v13664_v30 = vadd.f32 %v8500_v46, %v13299_v34  ;;  %v8502_v10 = vld [vmem:[%s13971_s0 + $0x1c8] sm:$0xff]  ;;  %v13682_v34 = vadd.f32 %v8503_v53, %v13308_v3  ;;  %v8504_v46 = vld [vmem:[%s13971_s0 + $0x1d8] sm:$0xff]  ;;  %v8507_v53 = vld [vmem:[%s13971_s0 + $0x1f0] sm:$0xff] }
 0xac5   :  { %v13676_v12 = vadd.f32 %v8502_v10, %v13305_v29  ;;  %v13688_v22 = vadd.f32 %v8504_v46, %v13312_v47  ;;  %v13694_v29 = vadd.f32 %v8505_v15, %v13316_v44  ;;  %v8506_v10 = vld [vmem:[%s13971_s0 + $0x1e8] sm:$0xff]  ;;  %v13706_v47 = vadd.f32 %v8507_v53, %v13324_v60  ;;  %v8508_v46 = vld [vmem:[%s13971_s0 + $0x1f8] sm:$0xff] }
 0xac6   :  { %v13700_v3 = vadd.f32 %v8506_v10, %v13320_v51  ;;  %v13712_v44 = vadd.f32 %v8508_v46, %v13328_v48  ;;  %v6988_v15 = vmax.f32 %v13334_v40, 0.0  ;;  %v6990_v51 = vmax.f32 %v13346_v16, 0.0 }
 0xac7   :  { %14817 = vst [vmem:[#allocation46_spill] sm:$0xff] %v13688_v22  ;;  %14818 = vst [vmem:[#allocation55_spill] sm:$0xff] %v13694_v29  ;;  %v6989_v29 = vmax.f32 %v13340_v32, 0.0  ;;  %v6991_v10 = vmax.f32 %v13352_v62, 0.0  ;;  %v6993_v60 = vmax.f32 %v13364_v50, 0.0  ;;  %v6994_v53 = vmax.f32 %v13370_v18, 0.0 }
 0xac8   :  { %14819 = vst [vmem:[#allocation59_spill] sm:$0xff] %v13700_v3  ;;  %14820 = vst [vmem:[#allocation19_spill] sm:$0xff] %v13706_v47  ;;  %v6992_v3 = vmax.f32 %v13358_v31, 0.0  ;;  %v6995_v47 = vmax.f32 %v13376_v26, 0.0  ;;  %v6996_v22 = vmax.f32 %v13382_v35, 0.0  ;;  %v6997_v48 = vmax.f32 %v13388_v39, 0.0 }
 0xac9   :  { %v6998_v40 = vmax.f32 %v13394_v57, 0.0  ;;  %v6999_v32 = vmax.f32 %v13400_v17, 0.0  ;;  %7052 = vst [vmem:[%s13977_s7] sm:$0xff] %v6988_v15  ;;  %7053 = vst [vmem:[%s13977_s7 + $0x8] sm:$0xff] %v6989_v29  ;;  %v7000_v16 = vmax.f32 %v13406_v42, 0.0  ;;  %v7001_v62 = vmax.f32 %v13412_v28, 0.0 }
 0xaca   :  { %7054 = vst [vmem:[%s13977_s7 + $0x10] sm:$0xff] %v6990_v51  ;;  %7055 = vst [vmem:[%s13977_s7 + $0x18] sm:$0xff] %v6991_v10  ;;  %v7002_v31 = vmax.f32 %v13418_v45, 0.0  ;;  %v7003_v50 = vmax.f32 %v13424_v56, 0.0  ;;  %v7004_v18 = vmax.f32 %v13430_v8, 0.0  ;;  %v7005_v26 = vmax.f32 %v13436_v4, 0.0 }
 0xacb   :  { %7056 = vst [vmem:[%s13977_s7 + $0x20] sm:$0xff] %v6992_v3  ;;  %7057 = vst [vmem:[%s13977_s7 + $0x28] sm:$0xff] %v6993_v60  ;;  %v7006_v35 = vmax.f32 %v13442_v7, 0.0  ;;  %v7007_v39 = vmax.f32 %v13448_v25, 0.0  ;;  %v7008_v57 = vmax.f32 %v13454_v55, 0.0  ;;  %v7009_v17 = vmax.f32 %v13460_v14, 0.0 }
 0xacc   :  { %7058 = vst [vmem:[%s13977_s7 + $0x30] sm:$0xff] %v6994_v53  ;;  %7059 = vst [vmem:[%s13977_s7 + $0x38] sm:$0xff] %v6995_v47  ;;  %v7010_v42 = vmax.f32 %v13466_v52, 0.0  ;;  %v7011_v28 = vmax.f32 %v13472_v43, 0.0  ;;  %v7012_v45 = vmax.f32 %v13478_v49, 0.0  ;;  %v7013_v56 = vmax.f32 %v13484_v41, 0.0 }
 0xacd   :  { %7060 = vst [vmem:[%s13977_s7 + $0x40] sm:$0xff] %v6996_v22  ;;  %7061 = vst [vmem:[%s13977_s7 + $0x48] sm:$0xff] %v6997_v48  ;;  %v7014_v8 = vmax.f32 %v13490_v54, 0.0  ;;  %v7015_v4 = vmax.f32 %v13496_v38, 0.0  ;;  %v7016_v7 = vmax.f32 %v13502_v61, 0.0  ;;  %v7017_v25 = vmax.f32 %v13508_v59, 0.0 }
 0xace   :  { %7062 = vst [vmem:[%s13977_s7 + $0x50] sm:$0xff] %v6998_v40  ;;  %7063 = vst [vmem:[%s13977_s7 + $0x58] sm:$0xff] %v6999_v32  ;;  %v7018_v55 = vmax.f32 %v13514_v19, 0.0  ;;  %v7019_v14 = vmax.f32 %v13520_v0, 0.0  ;;  %v7020_v52 = vmax.f32 %v13526_v6, 0.0  ;;  %v7021_v43 = vmax.f32 %v13532_v21, 0.0 }
 0xacf   :  { %7064 = vst [vmem:[%s13977_s7 + $0x60] sm:$0xff] %v7000_v16  ;;  %7065 = vst [vmem:[%s13977_s7 + $0x68] sm:$0xff] %v7001_v62  ;;  %v7022_v49 = vmax.f32 %v13538_v63, 0.0  ;;  %v7023_v41 = vmax.f32 %v13544_v2, 0.0  ;;  %v7024_v54 = vmax.f32 %v13550_v36, 0.0  ;;  %v7025_v38 = vmax.f32 %v13556_v33, 0.0 }
 0xad0   :  { %7066 = vst [vmem:[%s13977_s7 + $0x70] sm:$0xff] %v7002_v31  ;;  %7067 = vst [vmem:[%s13977_s7 + $0x78] sm:$0xff] %v7003_v50  ;;  %v7026_v61 = vmax.f32 %v13562_v9, 0.0  ;;  %v7027_v59 = vmax.f32 %v13568_v5, 0.0  ;;  %v7028_v19 = vmax.f32 %v13574_v11, 0.0  ;;  %v7029_v0 = vmax.f32 %v13580_v58, 0.0 }
 0xad1   :  { %7068 = vst [vmem:[%s13977_s7 + $0x80] sm:$0xff] %v7004_v18  ;;  %7069 = vst [vmem:[%s13977_s7 + $0x88] sm:$0xff] %v7005_v26  ;;  %v14821_v6 = vld [vmem:[#allocation48_spill] sm:$0xff]  ;;  %v14822_v63 = vld [vmem:[#allocation51_spill] sm:$0xff]  ;;  %v7033_v9 = vmax.f32 %v13604_v27, 0.0  ;;  %v7034_v5 = vmax.f32 %v13610_v1, 0.0 }
 0xad2   :  { %7070 = vst [vmem:[%s13977_s7 + $0x90] sm:$0xff] %v7006_v35  ;;  %7071 = vst [vmem:[%s13977_s7 + $0x98] sm:$0xff] %v7007_v39  ;;  %v7030_v21 = vmax.f32 %v14821_v6, 0.0  ;;  %v7031_v2 = vmax.f32 %v14822_v63, 0.0  ;;  %v14823_v36 = vld [vmem:[#allocation6_spill] sm:$0xff]  ;;  %v14824_v11 = vld [vmem:[#allocation7_spill] sm:$0xff] }
 0xad3   :  { %7072 = vst [vmem:[%s13977_s7 + $0xa0] sm:$0xff] %v7008_v57  ;;  %7073 = vst [vmem:[%s13977_s7 + $0xa8] sm:$0xff] %v7009_v17  ;;  %v7032_v33 = vmax.f32 %v14823_v36, 0.0  ;;  %v7035_v58 = vmax.f32 %v14824_v11, 0.0  ;;  %v7036_v27 = vmax.f32 %v13622_v24, 0.0  ;;  %v14825_v1 = vld [vmem:[#allocation27_spill] sm:$0xff] }
 0xad4   :  { %7074 = vst [vmem:[%s13977_s7 + $0xb0] sm:$0xff] %v7010_v42  ;;  %7075 = vst [vmem:[%s13977_s7 + $0xb8] sm:$0xff] %v7011_v28  ;;  %v7037_v22 = vmax.f32 %v14825_v1, 0.0  ;;  %v7038_v29 = vmax.f32 %v13634_v23, 0.0  ;;  %v14826_v3 = vld [vmem:[#allocation4_spill] sm:$0xff]  ;;  %v7040_v24 = vmax.f32 %v13646_v37, 0.0 }
 0xad5   :  { %7076 = vst [vmem:[%s13977_s7 + $0xc0] sm:$0xff] %v7012_v45  ;;  %7077 = vst [vmem:[%s13977_s7 + $0xc8] sm:$0xff] %v7013_v56  ;;  %v7039_v47 = vmax.f32 %v14826_v3, 0.0  ;;  %v14827_v23 = vld [vmem:[#allocation3_spill] sm:$0xff]  ;;  %v7042_v15 = vmax.f32 %v13658_v20, 0.0  ;;  %v7043_v51 = vmax.f32 %v13664_v30, 0.0 }
 0xad6   :  { %7078 = vst [vmem:[%s13977_s7 + $0xd0] sm:$0xff] %v7014_v8  ;;  %7079 = vst [vmem:[%s13977_s7 + $0xd8] sm:$0xff] %v7015_v4  ;;  %v7041_v46 = vmax.f32 %v14827_v23, 0.0  ;;  %v7044_v37 = vmax.f32 %v13670_v13, 0.0  ;;  %v7045_v20 = vmax.f32 %v13676_v12, 0.0  ;;  %v7046_v30 = vmax.f32 %v13682_v34, 0.0 }
 0xad7   :  { %7080 = vst [vmem:[%s13977_s7 + $0xe0] sm:$0xff] %v7016_v7  ;;  %7081 = vst [vmem:[%s13977_s7 + $0xe8] sm:$0xff] %v7017_v25  ;;  %v14828_v10 = vld [vmem:[#allocation46_spill] sm:$0xff]  ;;  %v14829_v13 = vld [vmem:[#allocation55_spill] sm:$0xff]  ;;  %v7051_v32 = vmax.f32 %v13712_v44, 0.0 }
 0xad8   :  { %7082 = vst [vmem:[%s13977_s7 + $0xf0] sm:$0xff] %v7018_v55  ;;  %7083 = vst [vmem:[%s13977_s7 + $0xf8] sm:$0xff] %v7019_v14  ;;  %v7047_v60 = vmax.f32 %v14828_v10, 0.0  ;;  %v7048_v12 = vmax.f32 %v14829_v13, 0.0  ;;  %v14830_v34 = vld [vmem:[#allocation59_spill] sm:$0xff] }
 0xad9   :  { %7084 = vst [vmem:[%s13977_s7 + $0x100] sm:$0xff] %v7020_v52  ;;  %7085 = vst [vmem:[%s13977_s7 + $0x108] sm:$0xff] %v7021_v43  ;;  %v7049_v53 = vmax.f32 %v14830_v34, 0.0  ;;  %v14831_v48 = vld [vmem:[#allocation19_spill] sm:$0xff] }
 0xada   :  { %7086 = vst [vmem:[%s13977_s7 + $0x110] sm:$0xff] %v7022_v49  ;;  %7087 = vst [vmem:[%s13977_s7 + $0x118] sm:$0xff] %v7023_v41  ;;  %v7050_v40 = vmax.f32 %v14831_v48, 0.0 }
 0xadb   :  { %7088 = vst [vmem:[%s13977_s7 + $0x120] sm:$0xff] %v7024_v54  ;;  %7089 = vst [vmem:[%s13977_s7 + $0x128] sm:$0xff] %v7025_v38 }
 0xadc   :  { %7090 = vst [vmem:[%s13977_s7 + $0x130] sm:$0xff] %v7026_v61  ;;  %7091 = vst [vmem:[%s13977_s7 + $0x138] sm:$0xff] %v7027_v59 }
 0xadd   :  { %7092 = vst [vmem:[%s13977_s7 + $0x140] sm:$0xff] %v7028_v19  ;;  %7093 = vst [vmem:[%s13977_s7 + $0x148] sm:$0xff] %v7029_v0 }
 0xade   :  { %7094 = vst [vmem:[%s13977_s7 + $0x150] sm:$0xff] %v7030_v21  ;;  %7095 = vst [vmem:[%s13977_s7 + $0x158] sm:$0xff] %v7031_v2 }
 0xadf   :  { %7096 = vst [vmem:[%s13977_s7 + $0x160] sm:$0xff] %v7032_v33  ;;  %7097 = vst [vmem:[%s13977_s7 + $0x168] sm:$0xff] %v7033_v9 }
 0xae0   :  { %7098 = vst [vmem:[%s13977_s7 + $0x170] sm:$0xff] %v7034_v5  ;;  %7099 = vst [vmem:[%s13977_s7 + $0x178] sm:$0xff] %v7035_v58 }
 0xae1   :  { %7100 = vst [vmem:[%s13977_s7 + $0x180] sm:$0xff] %v7036_v27  ;;  %7101 = vst [vmem:[%s13977_s7 + $0x188] sm:$0xff] %v7037_v22 }
 0xae2   :  { %7102 = vst [vmem:[%s13977_s7 + $0x190] sm:$0xff] %v7038_v29  ;;  %7103 = vst [vmem:[%s13977_s7 + $0x198] sm:$0xff] %v7039_v47 }
 0xae3   :  { %7104 = vst [vmem:[%s13977_s7 + $0x1a0] sm:$0xff] %v7040_v24  ;;  %7105 = vst [vmem:[%s13977_s7 + $0x1a8] sm:$0xff] %v7041_v46 }
 0xae4   :  { %7106 = vst [vmem:[%s13977_s7 + $0x1b0] sm:$0xff] %v7042_v15  ;;  %7107 = vst [vmem:[%s13977_s7 + $0x1b8] sm:$0xff] %v7043_v51 }
 0xae5   :  { %7108 = vst [vmem:[%s13977_s7 + $0x1c0] sm:$0xff] %v7044_v37  ;;  %7109 = vst [vmem:[%s13977_s7 + $0x1c8] sm:$0xff] %v7045_v20 }
 0xae6   :  { %7110 = vst [vmem:[%s13977_s7 + $0x1d0] sm:$0xff] %v7046_v30  ;;  %7111 = vst [vmem:[%s13977_s7 + $0x1d8] sm:$0xff] %v7047_v60 }
 0xae7   :  { %7112 = vst [vmem:[%s13977_s7 + $0x1e0] sm:$0xff] %v7048_v12  ;;  %7113 = vst [vmem:[%s13977_s7 + $0x1e8] sm:$0xff] %v7049_v53 }
 0xae8   :  { %7114 = vst [vmem:[%s13977_s7 + $0x1f0] sm:$0xff] %v7050_v40  ;;  %7115 = vst [vmem:[%s13977_s7 + $0x1f8] sm:$0xff] %v7051_v32 }

</bundles_post_ra>
